<compile_context>
chip_gen: v6e
topology: v6e:2x2x1
jax: 0.10.0
libtpu: 0.0.40
codegen_flags: <defaults>
</compile_context>

<pallas_src>
import math

import jax
import jax.numpy as jnp
from jax import lax
from jax.experimental import pallas as pl
from jax.experimental.pallas import tpu as pltpu


# ----------------------------------------------------------------------------
# Fused CNNEncoder forward
# ----------------------------------------------------------------------------
def cnn_encoder_forward(params, x, *, b_block=1):
    """x: (B, C, H, W) float32 -> (B, out_dim) float32."""
    B, C, H, W = x.shape
    HW = H * W
    # Halo (in flattened-pixel units) so every 5x5 tap is a constant-offset slice.
    # Rounded up to a multiple of 128 lanes so interior writebacks are tile-aligned.
    PADR = ((2 * W + 2 + 127) // 128) * 128
    HWp = HW + 2 * PADR
    C1, C2, C3 = 32, 64, 128
    out_dim = params["proj_w"].shape[1]

    assert B % b_block == 0, "b_block must divide the batch"
    nb = B // b_block

    # ---- wrapper-side layout glue (all cheap; no input round-trip through HBM) ------
    xr = x.reshape(nb, b_block, C, HW)                 # pure reshape of NCHW

    # Conv weights as channel-major matmul operands (Cout, 25*Cin), pre-cast to bf16.
    # Column order is (kh, kw, cin) and matches the in-kernel im2col row order.
    w1 = params["c1_w"].reshape(25 * C, C1).T.astype(jnp.bfloat16)
    w2 = params["c2_w"].reshape(25 * C1, C2).T.astype(jnp.bfloat16)
    w3 = params["c3_w"].reshape(25 * C2, C3).T.astype(jnp.bfloat16)
    b1 = params["c1_b"].reshape(C1, 1)
    b2 = params["c2_b"].reshape(C2, 1)
    b3 = params["c3_b"].reshape(C3, 1)
    wp = params["proj_w"]                              # (128, out_dim) f32
    bp = params["proj_b"].reshape(1, out_dim)

    def kernel(x_ref, w1_ref, b1_ref, w2_ref, b2_ref, w3_ref, b3_ref,
               wp_ref, bp_ref, o_ref, cols, buf0, buf1, buf2):
        # kw-shift validity masks (1, HW), generated in-kernel; hoisted out of all loops.
        # (bf16 elementwise: packed 2x on v6e/v7x; silently upcast on v5e — still exact
        #  since the mask is 0/1.)
        wpos = lax.broadcasted_iota(jnp.int32, (1, HW), 1) % W
        kwmask = {dw: ((wpos + dw >= 0) & (wpos + dw < W)).astype(jnp.bfloat16)
                  for dw in (-2, -1, 1, 2)}

        # Zero only the halo lanes (interior is fully overwritten below); per grid step
        # so it stays correct under megacore "parallel" sharding.
        for buf, cbuf in ((buf0, C), (buf1, C1), (buf2, C2)):
            buf[:, 0:PADR] = jnp.zeros((cbuf, PADR), jnp.bfloat16)
            buf[:, PADR + HW:HWp] = jnp.zeros((cbuf, PADR), jnp.bfloat16)

        def conv5x5_relu(src_buf, cin, w_ref, b_ref):
            # Channel-major im2col: every store is lane-dense (HW on lanes) and bf16.
            for k in range(25):
                dh, dw = k // 5 - 2, k % 5 - 2
                start = PADR + dh * W + dw
                slab = src_buf[:, start:start + HW]              # (cin, HW) bf16
                if dw != 0:
                    slab = slab * kwmask[dw]                     # mask row wrap-around
                cols[k * cin:(k + 1) * cin, :] = slab
            # One MXU matmul per conv: (cout, 25*cin) x (25*cin, HW), f32 accumulation.
            y = jnp.dot(w_ref[...], cols[0:25 * cin, :],
                        preferred_element_type=jnp.float32)      # (cout, HW) f32
            return jnp.maximum(y + b_ref[...], 0.0)              # bias + ReLU in f32

        feat_rows = []
        for i in range(b_block):
            # Stage the image into the zero-haloed bf16 buffer (padding done in-kernel).
            buf0[:, PADR:PADR + HW] = x_ref[0, i].astype(jnp.bfloat16)
            y1 = conv5x5_relu(buf0, C, w1_ref, b1_ref)           # (C1, HW)
            buf1[:, PADR:PADR + HW] = y1.astype(jnp.bfloat16)
            y2 = conv5x5_relu(buf1, C1, w2_ref, b2_ref)          # (C2, HW)
            buf2[:, PADR:PADR + HW] = y2.astype(jnp.bfloat16)
            y3 = conv5x5_relu(buf2, C2, w3_ref, b3_ref)          # (C3, HW) f32
            # AdaptiveAvgPool2d((1,1)): one small aligned transpose + sublane mean
            # -> lane-dense (1, C3) feature row.
            feat_rows.append(jnp.mean(y3.T, axis=0, keepdims=True))

        feats = feat_rows[0] if b_block == 1 else jnp.concatenate(feat_rows, axis=0)
        # Linear(128, out_dim) + ReLU, batched over the block; lane-dense output.
        proj = jnp.dot(feats, wp_ref[...], preferred_element_type=jnp.float32)
        o_ref[0] = jnp.maximum(proj + bp_ref[...], 0.0)          # (b_block, out_dim)

    out = pl.pallas_call(
        kernel,
        out_shape=jax.ShapeDtypeStruct((nb, b_block, out_dim), jnp.float32),
        grid=(nb,),
        in_specs=[
            pl.BlockSpec((1, b_block, C, HW), lambda n: (n, 0, 0, 0)),
            pl.BlockSpec((C1, 25 * C), lambda n: (0, 0)),
            pl.BlockSpec((C1, 1), lambda n: (0, 0)),
            pl.BlockSpec((C2, 25 * C1), lambda n: (0, 0)),
            pl.BlockSpec((C2, 1), lambda n: (0, 0)),
            pl.BlockSpec((C3, 25 * C2), lambda n: (0, 0)),
            pl.BlockSpec((C3, 1), lambda n: (0, 0)),
            pl.BlockSpec((C3, out_dim), lambda n: (0, 0)),
            pl.BlockSpec((1, out_dim), lambda n: (0, 0)),
        ],
        out_specs=pl.BlockSpec((1, b_block, out_dim), lambda n: (n, 0, 0)),
        scratch_shapes=[
            pltpu.VMEM((25 * C2, HW), jnp.bfloat16),   # shared channel-major im2col slab
            pltpu.VMEM((C, HWp), jnp.bfloat16),        # zero-haloed padded input
            pltpu.VMEM((C1, HWp), jnp.bfloat16),       # zero-haloed conv1 output
            pltpu.VMEM((C2, HWp), jnp.bfloat16),       # zero-haloed conv2 output
        ],
        compiler_params=pltpu.CompilerParams(
            dimension_semantics=("parallel",),
            vmem_limit_bytes=32 * 1024 * 1024),
    )(xr, w1, b1, w2, b2, w3, b3, wp, bp)
    return out.reshape(B, out_dim)


# ----------------------------------------------------------------------------
# Parameters (PyTorch-style uniform(-1/sqrt(fan_in), +1/sqrt(fan_in)))
# ----------------------------------------------------------------------------
def _uniform(key, shape, fan_in):
    bound = 1.0 / math.sqrt(fan_in)
    return jax.random.uniform(key, shape, jnp.float32, -bound, bound)


def init_params(key, in_channels, out_dim=128):
    """Conv weights stored as (5, 5, Cin, Cout); Linear stored as (in, out)."""
    ks = jax.random.split(key, 8)
    p = {}
    p["c1_w"] = _uniform(ks[0], (5, 5, in_channels, 32), in_channels * 25)
    p["c1_b"] = _uniform(ks[1], (32,), in_channels * 25)
    p["c2_w"] = _uniform(ks[2], (5, 5, 32, 64), 32 * 25)
    p["c2_b"] = _uniform(ks[3], (64,), 32 * 25)
    p["c3_w"] = _uniform(ks[4], (5, 5, 64, 128), 64 * 25)
    p["c3_b"] = _uniform(ks[5], (128,), 64 * 25)
    p["proj_w"] = _uniform(ks[6], (128, out_dim), 128)
    p["proj_b"] = _uniform(ks[7], (out_dim,), 128)
    return p


# ----------------------------------------------------------------------------
# Pure-JAX reference (for a numerical self-check only)
# ----------------------------------------------------------------------------
def reference_forward(params, x):
    def conv(h, w, b):
        w_oihw = jnp.transpose(w, (3, 2, 0, 1))
        y = jax.lax.conv_general_dilated(
            h, w_oihw, window_strides=(1, 1), padding=((2, 2), (2, 2)),
            dimension_numbers=("NCHW", "OIHW", "NCHW"))
        return jax.nn.relu(y + b[None, :, None, None])

    h = conv(x, params["c1_w"], params["c1_b"])
    h = conv(h, params["c2_w"], params["c2_b"])
    h = conv(h, params["c3_w"], params["c3_b"])
    feat = h.mean(axis=(2, 3))                                   # AdaptiveAvgPool2d((1,1))
    return jax.nn.relu(feat @ params["proj_w"] + params["proj_b"][None, :])


if __name__ == "__main__":
    B, C, H, W = 2, 4, 16, 16
    OUT_DIM = 128

    key = jax.random.PRNGKey(0)
    k_x, k_p = jax.random.split(key)
    x = jax.random.normal(k_x, (B, C, H, W), jnp.float32)
    params = init_params(k_p, C, OUT_DIM)

    out = jax.jit(cnn_encoder_forward)(params, x)
    out = jax.block_until_ready(out)
    assert out.shape == (B, OUT_DIM)
    assert bool(jnp.all(jnp.isfinite(out))), "non-finite output"

    ref = reference_forward(params, x)
    err = float(jnp.max(jnp.abs(out - ref)))
    assert err < 5e-2, f"mismatch vs reference: max abs err = {err}"
    print("KERNEL_OK")
</pallas_src>

<mosaic_0001>
module attributes {stable_mosaic.version = 11 : i64} {
  func.func @kernel(%arg0: i32, %arg1: memref<1x1x4x256xf32, #tpu.memory_space<vmem>>, %arg2: memref<32x100xbf16, #tpu.memory_space<vmem>>, %arg3: memref<32x1xf32, #tpu.memory_space<vmem>>, %arg4: memref<64x800xbf16, #tpu.memory_space<vmem>>, %arg5: memref<64x1xf32, #tpu.memory_space<vmem>>, %arg6: memref<128x1600xbf16, #tpu.memory_space<vmem>>, %arg7: memref<128x1xf32, #tpu.memory_space<vmem>>, %arg8: memref<128x128xf32, #tpu.memory_space<vmem>>, %arg9: memref<1x128xf32, #tpu.memory_space<vmem>>, %arg10: memref<1x1x128xf32, #tpu.memory_space<vmem>>, %arg11: memref<1600x256xbf16, #tpu.memory_space<vmem>>, %arg12: memref<4x512xbf16, #tpu.memory_space<vmem>>, %arg13: memref<32x512xbf16, #tpu.memory_space<vmem>>, %arg14: memref<64x512xbf16, #tpu.memory_space<vmem>>) attributes {dimension_semantics = [#tpu.dimension_semantics<parallel>], iteration_bounds = array<i64: 2>, scalar_prefetch = 0 : i64, scratch_operands = 4 : i64, tpu.core_type = #tpu.core_type<tc>, window_params = [{transform_indices = @transform_0, window_bounds = array<i64: 1, 1, 4, 256>}, {pipeline_mode = #tpu.pipeline_mode<synchronous>, transform_indices = @transform_1, window_bounds = array<i64: 32, 100>}, {pipeline_mode = #tpu.pipeline_mode<synchronous>, transform_indices = @transform_2, window_bounds = array<i64: 32, 1>}, {pipeline_mode = #tpu.pipeline_mode<synchronous>, transform_indices = @transform_3, window_bounds = array<i64: 64, 800>}, {pipeline_mode = #tpu.pipeline_mode<synchronous>, transform_indices = @transform_4, window_bounds = array<i64: 64, 1>}, {pipeline_mode = #tpu.pipeline_mode<synchronous>, transform_indices = @transform_5, window_bounds = array<i64: 128, 1600>}, {pipeline_mode = #tpu.pipeline_mode<synchronous>, transform_indices = @transform_6, window_bounds = array<i64: 128, 1>}, {pipeline_mode = #tpu.pipeline_mode<synchronous>, transform_indices = @transform_7, window_bounds = array<i64: 128, 128>}, {pipeline_mode = #tpu.pipeline_mode<synchronous>, transform_indices = @transform_8, window_bounds = array<i64: 1, 128>}, {transform_indices = @transform_9, window_bounds = array<i64: 1, 1, 128>}]} {
    %0 = tpu.iota {dimensions = array<i32: 1>} : vector<1x256xi32>
    %c16_i32 = arith.constant 16 : i32
    %c0_i32 = arith.constant 0 : i32
    %1 = arith.cmpi eq, %c16_i32, %c0_i32 : i32
    %c1_i32 = arith.constant 1 : i32
    %2 = arith.select %1, %c1_i32, %c16_i32 : i32
    %3 = vector.broadcast %2 : i32 to vector<1x256xi32>
    %4 = arith.remsi %0, %3 : vector<1x256xi32>
    %c0_i32_0 = arith.constant 0 : i32
    %5 = vector.broadcast %c0_i32_0 : i32 to vector<1x256xi32>
    %6 = arith.cmpi ne, %4, %5 : vector<1x256xi32>
    %c0_i32_1 = arith.constant 0 : i32
    %7 = vector.broadcast %c0_i32_1 : i32 to vector<1x256xi32>
    %8 = arith.cmpi slt, %4, %7 : vector<1x256xi32>
    %c0_i32_2 = arith.constant 0 : i32
    %9 = arith.cmpi slt, %2, %c0_i32_2 : i32
    %10 = vector.broadcast %9 : i1 to vector<1x256xi1>
    %11 = vector.broadcast %10 : vector<1x256xi1> to vector<1x256xi1>
    %12 = arith.xori %8, %11 : vector<1x256xi1>
    %13 = arith.andi %12, %6 : vector<1x256xi1>
    %14 = vector.broadcast %2 : i32 to vector<1x256xi32>
    %15 = arith.addi %4, %14 : vector<1x256xi32>
    %16 = arith.select %13, %15, %4 : vector<1x256xi1>, vector<1x256xi32>
    %c-2_i32 = arith.constant -2 : i32
    %17 = vector.broadcast %c-2_i32 : i32 to vector<1x256xi32>
    %18 = arith.addi %16, %17 : vector<1x256xi32>
    %c0_i32_3 = arith.constant 0 : i32
    %19 = vector.broadcast %c0_i32_3 : i32 to vector<1x256xi32>
    %20 = arith.cmpi sge, %18, %19 : vector<1x256xi32>
    %c-2_i32_4 = arith.constant -2 : i32
    %21 = vector.broadcast %c-2_i32_4 : i32 to vector<1x256xi32>
    %22 = arith.addi %16, %21 : vector<1x256xi32>
    %c16_i32_5 = arith.constant 16 : i32
    %23 = vector.broadcast %c16_i32_5 : i32 to vector<1x256xi32>
    %24 = arith.cmpi slt, %22, %23 : vector<1x256xi32>
    %25 = arith.andi %20, %24 : vector<1x256xi1>
    %26 = arith.extui %25 : vector<1x256xi1> to vector<1x256xi32>
    %27 = arith.sitofp %26 : vector<1x256xi32> to vector<1x256xf32>
    %28 = arith.truncf %27 : vector<1x256xf32> to vector<1x256xbf16>
    %c-1_i32 = arith.constant -1 : i32
    %29 = vector.broadcast %c-1_i32 : i32 to vector<1x256xi32>
    %30 = arith.addi %16, %29 : vector<1x256xi32>
    %c0_i32_6 = arith.constant 0 : i32
    %31 = vector.broadcast %c0_i32_6 : i32 to vector<1x256xi32>
    %32 = arith.cmpi sge, %30, %31 : vector<1x256xi32>
    %c-1_i32_7 = arith.constant -1 : i32
    %33 = vector.broadcast %c-1_i32_7 : i32 to vector<1x256xi32>
    %34 = arith.addi %16, %33 : vector<1x256xi32>
    %c16_i32_8 = arith.constant 16 : i32
    %35 = vector.broadcast %c16_i32_8 : i32 to vector<1x256xi32>
    %36 = arith.cmpi slt, %34, %35 : vector<1x256xi32>
    %37 = arith.andi %32, %36 : vector<1x256xi1>
    %38 = arith.extui %37 : vector<1x256xi1> to vector<1x256xi32>
    %39 = arith.sitofp %38 : vector<1x256xi32> to vector<1x256xf32>
    %40 = arith.truncf %39 : vector<1x256xf32> to vector<1x256xbf16>
    %c1_i32_9 = arith.constant 1 : i32
    %41 = vector.broadcast %c1_i32_9 : i32 to vector<1x256xi32>
    %42 = arith.addi %16, %41 : vector<1x256xi32>
    %c0_i32_10 = arith.constant 0 : i32
    %43 = vector.broadcast %c0_i32_10 : i32 to vector<1x256xi32>
    %44 = arith.cmpi sge, %42, %43 : vector<1x256xi32>
    %c1_i32_11 = arith.constant 1 : i32
    %45 = vector.broadcast %c1_i32_11 : i32 to vector<1x256xi32>
    %46 = arith.addi %16, %45 : vector<1x256xi32>
    %c16_i32_12 = arith.constant 16 : i32
    %47 = vector.broadcast %c16_i32_12 : i32 to vector<1x256xi32>
    %48 = arith.cmpi slt, %46, %47 : vector<1x256xi32>
    %49 = arith.andi %44, %48 : vector<1x256xi1>
    %50 = arith.extui %49 : vector<1x256xi1> to vector<1x256xi32>
    %51 = arith.sitofp %50 : vector<1x256xi32> to vector<1x256xf32>
    %52 = arith.truncf %51 : vector<1x256xf32> to vector<1x256xbf16>
    %c2_i32 = arith.constant 2 : i32
    %53 = vector.broadcast %c2_i32 : i32 to vector<1x256xi32>
    %54 = arith.addi %16, %53 : vector<1x256xi32>
    %c0_i32_13 = arith.constant 0 : i32
    %55 = vector.broadcast %c0_i32_13 : i32 to vector<1x256xi32>
    %56 = arith.cmpi sge, %54, %55 : vector<1x256xi32>
    %c2_i32_14 = arith.constant 2 : i32
    %57 = vector.broadcast %c2_i32_14 : i32 to vector<1x256xi32>
    %58 = arith.addi %16, %57 : vector<1x256xi32>
    %c16_i32_15 = arith.constant 16 : i32
    %59 = vector.broadcast %c16_i32_15 : i32 to vector<1x256xi32>
    %60 = arith.cmpi slt, %58, %59 : vector<1x256xi32>
    %61 = arith.andi %56, %60 : vector<1x256xi1>
    %62 = arith.extui %61 : vector<1x256xi1> to vector<1x256xi32>
    %63 = arith.sitofp %62 : vector<1x256xi32> to vector<1x256xf32>
    %64 = arith.truncf %63 : vector<1x256xf32> to vector<1x256xbf16>
    %cst = arith.constant 0.000000e+00 : bf16
    %65 = vector.broadcast %cst : bf16 to vector<4x128xbf16>
    %c0 = arith.constant 0 : index
    %c0_16 = arith.constant 0 : index
    %66 = vector.load %arg12[%c0, %c0_16] : memref<4x512xbf16, #tpu.memory_space<vmem>>, vector<4x128xbf16>
    tpu.vector_store %arg12[%c0, %c0_16], %65 {strides = array<i32>} : memref<4x512xbf16, #tpu.memory_space<vmem>>, vector<4x128xbf16>,
    %cst_17 = arith.constant 0.000000e+00 : bf16
    %67 = vector.broadcast %cst_17 : bf16 to vector<4x128xbf16>
    %c0_18 = arith.constant 0 : index
    %c384 = arith.constant 384 : index
    %68 = vector.load %arg12[%c0_18, %c384] : memref<4x512xbf16, #tpu.memory_space<vmem>>, vector<4x128xbf16>
    tpu.vector_store %arg12[%c0_18, %c384], %67 {strides = array<i32>} : memref<4x512xbf16, #tpu.memory_space<vmem>>, vector<4x128xbf16>,
    %cst_19 = arith.constant 0.000000e+00 : bf16
    %69 = vector.broadcast %cst_19 : bf16 to vector<32x128xbf16>
    %c0_20 = arith.constant 0 : index
    %c0_21 = arith.constant 0 : index
    %70 = vector.load %arg13[%c0_20, %c0_21] : memref<32x512xbf16, #tpu.memory_space<vmem>>, vector<32x128xbf16>
    tpu.vector_store %arg13[%c0_20, %c0_21], %69 {strides = array<i32>} : memref<32x512xbf16, #tpu.memory_space<vmem>>, vector<32x128xbf16>,
    %cst_22 = arith.constant 0.000000e+00 : bf16
    %71 = vector.broadcast %cst_22 : bf16 to vector<32x128xbf16>
    %c0_23 = arith.constant 0 : index
    %c384_24 = arith.constant 384 : index
    %72 = vector.load %arg13[%c0_23, %c384_24] : memref<32x512xbf16, #tpu.memory_space<vmem>>, vector<32x128xbf16>
    tpu.vector_store %arg13[%c0_23, %c384_24], %71 {strides = array<i32>} : memref<32x512xbf16, #tpu.memory_space<vmem>>, vector<32x128xbf16>,
    %cst_25 = arith.constant 0.000000e+00 : bf16
    %73 = vector.broadcast %cst_25 : bf16 to vector<64x128xbf16>
    %c0_26 = arith.constant 0 : index
    %c0_27 = arith.constant 0 : index
    %74 = vector.load %arg14[%c0_26, %c0_27] : memref<64x512xbf16, #tpu.memory_space<vmem>>, vector<64x128xbf16>
    tpu.vector_store %arg14[%c0_26, %c0_27], %73 {strides = array<i32>} : memref<64x512xbf16, #tpu.memory_space<vmem>>, vector<64x128xbf16>,
    %cst_28 = arith.constant 0.000000e+00 : bf16
    %75 = vector.broadcast %cst_28 : bf16 to vector<64x128xbf16>
    %c0_29 = arith.constant 0 : index
    %c384_30 = arith.constant 384 : index
    %76 = vector.load %arg14[%c0_29, %c384_30] : memref<64x512xbf16, #tpu.memory_space<vmem>>, vector<64x128xbf16>
    tpu.vector_store %arg14[%c0_29, %c384_30], %75 {strides = array<i32>} : memref<64x512xbf16, #tpu.memory_space<vmem>>, vector<64x128xbf16>,
    %c0_31 = arith.constant 0 : index
    %c0_32 = arith.constant 0 : index
    %c0_33 = arith.constant 0 : index
    %c0_34 = arith.constant 0 : index
    %77 = vector.load %arg1[%c0_31, %c0_32, %c0_33, %c0_34] : memref<1x1x4x256xf32, #tpu.memory_space<vmem>>, vector<1x1x4x256xf32>
    %78 = vector.shape_cast %77 : vector<1x1x4x256xf32> to vector<4x256xf32>
    %79 = arith.truncf %78 : vector<4x256xf32> to vector<4x256xbf16>
    %c0_35 = arith.constant 0 : index
    %c128 = arith.constant 128 : index
    %80 = vector.load %arg12[%c0_35, %c128] : memref<4x512xbf16, #tpu.memory_space<vmem>>, vector<4x256xbf16>
    tpu.vector_store %arg12[%c0_35, %c128], %79 {strides = array<i32>} : memref<4x512xbf16, #tpu.memory_space<vmem>>, vector<4x256xbf16>,
    %c0_36 = arith.constant 0 : index
    %c94 = arith.constant 94 : index
    %81 = vector.load %arg12[%c0_36, %c94] : memref<4x512xbf16, #tpu.memory_space<vmem>>, vector<4x256xbf16>
    %82 = vector.broadcast %28 : vector<1x256xbf16> to vector<4x256xbf16>
    %83 = arith.mulf %81, %82 : vector<4x256xbf16>
    %c0_37 = arith.constant 0 : index
    %c0_38 = arith.constant 0 : index
    %84 = vector.load %arg11[%c0_37, %c0_38] : memref<1600x256xbf16, #tpu.memory_space<vmem>>, vector<4x256xbf16>
    tpu.vector_store %arg11[%c0_37, %c0_38], %83 {strides = array<i32>} : memref<1600x256xbf16, #tpu.memory_space<vmem>>, vector<4x256xbf16>,
    %c0_39 = arith.constant 0 : index
    %c95 = arith.constant 95 : index
    %85 = vector.load %arg12[%c0_39, %c95] : memref<4x512xbf16, #tpu.memory_space<vmem>>, vector<4x256xbf16>
    %86 = vector.broadcast %40 : vector<1x256xbf16> to vector<4x256xbf16>
    %87 = arith.mulf %85, %86 : vector<4x256xbf16>
    %c4 = arith.constant 4 : index
    %c0_40 = arith.constant 0 : index
    %88 = vector.load %arg11[%c4, %c0_40] : memref<1600x256xbf16, #tpu.memory_space<vmem>>, vector<4x256xbf16>
    tpu.vector_store %arg11[%c4, %c0_40], %87 {strides = array<i32>} : memref<1600x256xbf16, #tpu.memory_space<vmem>>, vector<4x256xbf16>,
    %c0_41 = arith.constant 0 : index
    %c96 = arith.constant 96 : index
    %89 = vector.load %arg12[%c0_41, %c96] : memref<4x512xbf16, #tpu.memory_space<vmem>>, vector<4x256xbf16>
    %c8 = arith.constant 8 : index
    %c0_42 = arith.constant 0 : index
    %90 = vector.load %arg11[%c8, %c0_42] : memref<1600x256xbf16, #tpu.memory_space<vmem>>, vector<4x256xbf16>
    tpu.vector_store %arg11[%c8, %c0_42], %89 {strides = array<i32>} : memref<1600x256xbf16, #tpu.memory_space<vmem>>, vector<4x256xbf16>,
    %c0_43 = arith.constant 0 : index
    %c97 = arith.constant 97 : index
    %91 = vector.load %arg12[%c0_43, %c97] : memref<4x512xbf16, #tpu.memory_space<vmem>>, vector<4x256xbf16>
    %92 = vector.broadcast %52 : vector<1x256xbf16> to vector<4x256xbf16>
    %93 = arith.mulf %91, %92 : vector<4x256xbf16>
    %c12 = arith.constant 12 : index
    %c0_44 = arith.constant 0 : index
    %94 = vector.load %arg11[%c12, %c0_44] : memref<1600x256xbf16, #tpu.memory_space<vmem>>, vector<4x256xbf16>
    tpu.vector_store %arg11[%c12, %c0_44], %93 {strides = array<i32>} : memref<1600x256xbf16, #tpu.memory_space<vmem>>, vector<4x256xbf16>,
    %c0_45 = arith.constant 0 : index
    %c98 = arith.constant 98 : index
    %95 = vector.load %arg12[%c0_45, %c98] : memref<4x512xbf16, #tpu.memory_space<vmem>>, vector<4x256xbf16>
    %96 = vector.broadcast %64 : vector<1x256xbf16> to vector<4x256xbf16>
    %97 = arith.mulf %95, %96 : vector<4x256xbf16>
    %c16 = arith.constant 16 : index
    %c0_46 = arith.constant 0 : index
    %98 = vector.load %arg11[%c16, %c0_46] : memref<1600x256xbf16, #tpu.memory_space<vmem>>, vector<4x256xbf16>
    tpu.vector_store %arg11[%c16, %c0_46], %97 {strides = array<i32>} : memref<1600x256xbf16, #tpu.memory_space<vmem>>, vector<4x256xbf16>,
    %c0_47 = arith.constant 0 : index
    %c110 = arith.constant 110 : index
    %99 = vector.load %arg12[%c0_47, %c110] : memref<4x512xbf16, #tpu.memory_space<vmem>>, vector<4x256xbf16>
    %100 = vector.broadcast %28 : vector<1x256xbf16> to vector<4x256xbf16>
    %101 = arith.mulf %99, %100 : vector<4x256xbf16>
    %c20 = arith.constant 20 : index
    %c0_48 = arith.constant 0 : index
    %102 = vector.load %arg11[%c20, %c0_48] : memref<1600x256xbf16, #tpu.memory_space<vmem>>, vector<4x256xbf16>
    tpu.vector_store %arg11[%c20, %c0_48], %101 {strides = array<i32>} : memref<1600x256xbf16, #tpu.memory_space<vmem>>, vector<4x256xbf16>,
    %c0_49 = arith.constant 0 : index
    %c111 = arith.constant 111 : index
    %103 = vector.load %arg12[%c0_49, %c111] : memref<4x512xbf16, #tpu.memory_space<vmem>>, vector<4x256xbf16>
    %104 = vector.broadcast %40 : vector<1x256xbf16> to vector<4x256xbf16>
    %105 = arith.mulf %103, %104 : vector<4x256xbf16>
    %c24 = arith.constant 24 : index
    %c0_50 = arith.constant 0 : index
    %106 = vector.load %arg11[%c24, %c0_50] : memref<1600x256xbf16, #tpu.memory_space<vmem>>, vector<4x256xbf16>
    tpu.vector_store %arg11[%c24, %c0_50], %105 {strides = array<i32>} : memref<1600x256xbf16, #tpu.memory_space<vmem>>, vector<4x256xbf16>,
    %c0_51 = arith.constant 0 : index
    %c112 = arith.constant 112 : index
    %107 = vector.load %arg12[%c0_51, %c112] : memref<4x512xbf16, #tpu.memory_space<vmem>>, vector<4x256xbf16>
    %c28 = arith.constant 28 : index
    %c0_52 = arith.constant 0 : index
    %108 = vector.load %arg11[%c28, %c0_52] : memref<1600x256xbf16, #tpu.memory_space<vmem>>, vector<4x256xbf16>
    tpu.vector_store %arg11[%c28, %c0_52], %107 {strides = array<i32>} : memref<1600x256xbf16, #tpu.memory_space<vmem>>, vector<4x256xbf16>,
    %c0_53 = arith.constant 0 : index
    %c113 = arith.constant 113 : index
    %109 = vector.load %arg12[%c0_53, %c113] : memref<4x512xbf16, #tpu.memory_space<vmem>>, vector<4x256xbf16>
    %110 = vector.broadcast %52 : vector<1x256xbf16> to vector<4x256xbf16>
    %111 = arith.mulf %109, %110 : vector<4x256xbf16>
    %c32 = arith.constant 32 : index
    %c0_54 = arith.constant 0 : index
    %112 = vector.load %arg11[%c32, %c0_54] : memref<1600x256xbf16, #tpu.memory_space<vmem>>, vector<4x256xbf16>
    tpu.vector_store %arg11[%c32, %c0_54], %111 {strides = array<i32>} : memref<1600x256xbf16, #tpu.memory_space<vmem>>, vector<4x256xbf16>,
    %c0_55 = arith.constant 0 : index
    %c114 = arith.constant 114 : index
    %113 = vector.load %arg12[%c0_55, %c114] : memref<4x512xbf16, #tpu.memory_space<vmem>>, vector<4x256xbf16>
    %114 = vector.broadcast %64 : vector<1x256xbf16> to vector<4x256xbf16>
    %115 = arith.mulf %113, %114 : vector<4x256xbf16>
    %c36 = arith.constant 36 : index
    %c0_56 = arith.constant 0 : index
    %116 = vector.load %arg11[%c36, %c0_56] : memref<1600x256xbf16, #tpu.memory_space<vmem>>, vector<4x256xbf16>
    tpu.vector_store %arg11[%c36, %c0_56], %115 {strides = array<i32>} : memref<1600x256xbf16, #tpu.memory_space<vmem>>, vector<4x256xbf16>,
    %c0_57 = arith.constant 0 : index
    %c126 = arith.constant 126 : index
    %117 = vector.load %arg12[%c0_57, %c126] : memref<4x512xbf16, #tpu.memory_space<vmem>>, vector<4x256xbf16>
    %118 = vector.broadcast %28 : vector<1x256xbf16> to vector<4x256xbf16>
    %119 = arith.mulf %117, %118 : vector<4x256xbf16>
    %c40 = arith.constant 40 : index
    %c0_58 = arith.constant 0 : index
    %120 = vector.load %arg11[%c40, %c0_58] : memref<1600x256xbf16, #tpu.memory_space<vmem>>, vector<4x256xbf16>
    tpu.vector_store %arg11[%c40, %c0_58], %119 {strides = array<i32>} : memref<1600x256xbf16, #tpu.memory_space<vmem>>, vector<4x256xbf16>,
    %c0_59 = arith.constant 0 : index
    %c127 = arith.constant 127 : index
    %121 = vector.load %arg12[%c0_59, %c127] : memref<4x512xbf16, #tpu.memory_space<vmem>>, vector<4x256xbf16>
    %122 = vector.broadcast %40 : vector<1x256xbf16> to vector<4x256xbf16>
    %123 = arith.mulf %121, %122 : vector<4x256xbf16>
    %c44 = arith.constant 44 : index
    %c0_60 = arith.constant 0 : index
    %124 = vector.load %arg11[%c44, %c0_60] : memref<1600x256xbf16, #tpu.memory_space<vmem>>, vector<4x256xbf16>
    tpu.vector_store %arg11[%c44, %c0_60], %123 {strides = array<i32>} : memref<1600x256xbf16, #tpu.memory_space<vmem>>, vector<4x256xbf16>,
    %c0_61 = arith.constant 0 : index
    %c128_62 = arith.constant 128 : index
    %125 = vector.load %arg12[%c0_61, %c128_62] : memref<4x512xbf16, #tpu.memory_space<vmem>>, vector<4x256xbf16>
    %c48 = arith.constant 48 : index
    %c0_63 = arith.constant 0 : index
    %126 = vector.load %arg11[%c48, %c0_63] : memref<1600x256xbf16, #tpu.memory_space<vmem>>, vector<4x256xbf16>
    tpu.vector_store %arg11[%c48, %c0_63], %125 {strides = array<i32>} : memref<1600x256xbf16, #tpu.memory_space<vmem>>, vector<4x256xbf16>,
    %c0_64 = arith.constant 0 : index
    %c129 = arith.constant 129 : index
    %127 = vector.load %arg12[%c0_64, %c129] : memref<4x512xbf16, #tpu.memory_space<vmem>>, vector<4x256xbf16>
    %128 = vector.broadcast %52 : vector<1x256xbf16> to vector<4x256xbf16>
    %129 = arith.mulf %127, %128 : vector<4x256xbf16>
    %c52 = arith.constant 52 : index
    %c0_65 = arith.constant 0 : index
    %130 = vector.load %arg11[%c52, %c0_65] : memref<1600x256xbf16, #tpu.memory_space<vmem>>, vector<4x256xbf16>
    tpu.vector_store %arg11[%c52, %c0_65], %129 {strides = array<i32>} : memref<1600x256xbf16, #tpu.memory_space<vmem>>, vector<4x256xbf16>,
    %c0_66 = arith.constant 0 : index
    %c130 = arith.constant 130 : index
    %131 = vector.load %arg12[%c0_66, %c130] : memref<4x512xbf16, #tpu.memory_space<vmem>>, vector<4x256xbf16>
    %132 = vector.broadcast %64 : vector<1x256xbf16> to vector<4x256xbf16>
    %133 = arith.mulf %131, %132 : vector<4x256xbf16>
    %c56 = arith.constant 56 : index
    %c0_67 = arith.constant 0 : index
    %134 = vector.load %arg11[%c56, %c0_67] : memref<1600x256xbf16, #tpu.memory_space<vmem>>, vector<4x256xbf16>
    tpu.vector_store %arg11[%c56, %c0_67], %133 {strides = array<i32>} : memref<1600x256xbf16, #tpu.memory_space<vmem>>, vector<4x256xbf16>,
    %c0_68 = arith.constant 0 : index
    %c142 = arith.constant 142 : index
    %135 = vector.load %arg12[%c0_68, %c142] : memref<4x512xbf16, #tpu.memory_space<vmem>>, vector<4x256xbf16>
    %136 = vector.broadcast %28 : vector<1x256xbf16> to vector<4x256xbf16>
    %137 = arith.mulf %135, %136 : vector<4x256xbf16>
    %c60 = arith.constant 60 : index
    %c0_69 = arith.constant 0 : index
    %138 = vector.load %arg11[%c60, %c0_69] : memref<1600x256xbf16, #tpu.memory_space<vmem>>, vector<4x256xbf16>
    tpu.vector_store %arg11[%c60, %c0_69], %137 {strides = array<i32>} : memref<1600x256xbf16, #tpu.memory_space<vmem>>, vector<4x256xbf16>,
    %c0_70 = arith.constant 0 : index
    %c143 = arith.constant 143 : index
    %139 = vector.load %arg12[%c0_70, %c143] : memref<4x512xbf16, #tpu.memory_space<vmem>>, vector<4x256xbf16>
    %140 = vector.broadcast %40 : vector<1x256xbf16> to vector<4x256xbf16>
    %141 = arith.mulf %139, %140 : vector<4x256xbf16>
    %c64 = arith.constant 64 : index
    %c0_71 = arith.constant 0 : index
    %142 = vector.load %arg11[%c64, %c0_71] : memref<1600x256xbf16, #tpu.memory_space<vmem>>, vector<4x256xbf16>
    tpu.vector_store %arg11[%c64, %c0_71], %141 {strides = array<i32>} : memref<1600x256xbf16, #tpu.memory_space<vmem>>, vector<4x256xbf16>,
    %c0_72 = arith.constant 0 : index
    %c144 = arith.constant 144 : index
    %143 = vector.load %arg12[%c0_72, %c144] : memref<4x512xbf16, #tpu.memory_space<vmem>>, vector<4x256xbf16>
    %c68 = arith.constant 68 : index
    %c0_73 = arith.constant 0 : index
    %144 = vector.load %arg11[%c68, %c0_73] : memref<1600x256xbf16, #tpu.memory_space<vmem>>, vector<4x256xbf16>
    tpu.vector_store %arg11[%c68, %c0_73], %143 {strides = array<i32>} : memref<1600x256xbf16, #tpu.memory_space<vmem>>, vector<4x256xbf16>,
    %c0_74 = arith.constant 0 : index
    %c145 = arith.constant 145 : index
    %145 = vector.load %arg12[%c0_74, %c145] : memref<4x512xbf16, #tpu.memory_space<vmem>>, vector<4x256xbf16>
    %146 = vector.broadcast %52 : vector<1x256xbf16> to vector<4x256xbf16>
    %147 = arith.mulf %145, %146 : vector<4x256xbf16>
    %c72 = arith.constant 72 : index
    %c0_75 = arith.constant 0 : index
    %148 = vector.load %arg11[%c72, %c0_75] : memref<1600x256xbf16, #tpu.memory_space<vmem>>, vector<4x256xbf16>
    tpu.vector_store %arg11[%c72, %c0_75], %147 {strides = array<i32>} : memref<1600x256xbf16, #tpu.memory_space<vmem>>, vector<4x256xbf16>,
    %c0_76 = arith.constant 0 : index
    %c146 = arith.constant 146 : index
    %149 = vector.load %arg12[%c0_76, %c146] : memref<4x512xbf16, #tpu.memory_space<vmem>>, vector<4x256xbf16>
    %150 = vector.broadcast %64 : vector<1x256xbf16> to vector<4x256xbf16>
    %151 = arith.mulf %149, %150 : vector<4x256xbf16>
    %c76 = arith.constant 76 : index
    %c0_77 = arith.constant 0 : index
    %152 = vector.load %arg11[%c76, %c0_77] : memref<1600x256xbf16, #tpu.memory_space<vmem>>, vector<4x256xbf16>
    tpu.vector_store %arg11[%c76, %c0_77], %151 {strides = array<i32>} : memref<1600x256xbf16, #tpu.memory_space<vmem>>, vector<4x256xbf16>,
    %c0_78 = arith.constant 0 : index
    %c158 = arith.constant 158 : index
    %153 = vector.load %arg12[%c0_78, %c158] : memref<4x512xbf16, #tpu.memory_space<vmem>>, vector<4x256xbf16>
    %154 = vector.broadcast %28 : vector<1x256xbf16> to vector<4x256xbf16>
    %155 = arith.mulf %153, %154 : vector<4x256xbf16>
    %c80 = arith.constant 80 : index
    %c0_79 = arith.constant 0 : index
    %156 = vector.load %arg11[%c80, %c0_79] : memref<1600x256xbf16, #tpu.memory_space<vmem>>, vector<4x256xbf16>
    tpu.vector_store %arg11[%c80, %c0_79], %155 {strides = array<i32>} : memref<1600x256xbf16, #tpu.memory_space<vmem>>, vector<4x256xbf16>,
    %c0_80 = arith.constant 0 : index
    %c159 = arith.constant 159 : index
    %157 = vector.load %arg12[%c0_80, %c159] : memref<4x512xbf16, #tpu.memory_space<vmem>>, vector<4x256xbf16>
    %158 = vector.broadcast %40 : vector<1x256xbf16> to vector<4x256xbf16>
    %159 = arith.mulf %157, %158 : vector<4x256xbf16>
    %c84 = arith.constant 84 : index
    %c0_81 = arith.constant 0 : index
    %160 = vector.load %arg11[%c84, %c0_81] : memref<1600x256xbf16, #tpu.memory_space<vmem>>, vector<4x256xbf16>
    tpu.vector_store %arg11[%c84, %c0_81], %159 {strides = array<i32>} : memref<1600x256xbf16, #tpu.memory_space<vmem>>, vector<4x256xbf16>,
    %c0_82 = arith.constant 0 : index
    %c160 = arith.constant 160 : index
    %161 = vector.load %arg12[%c0_82, %c160] : memref<4x512xbf16, #tpu.memory_space<vmem>>, vector<4x256xbf16>
    %c88 = arith.constant 88 : index
    %c0_83 = arith.constant 0 : index
    %162 = vector.load %arg11[%c88, %c0_83] : memref<1600x256xbf16, #tpu.memory_space<vmem>>, vector<4x256xbf16>
    tpu.vector_store %arg11[%c88, %c0_83], %161 {strides = array<i32>} : memref<1600x256xbf16, #tpu.memory_space<vmem>>, vector<4x256xbf16>,
    %c0_84 = arith.constant 0 : index
    %c161 = arith.constant 161 : index
    %163 = vector.load %arg12[%c0_84, %c161] : memref<4x512xbf16, #tpu.memory_space<vmem>>, vector<4x256xbf16>
    %164 = vector.broadcast %52 : vector<1x256xbf16> to vector<4x256xbf16>
    %165 = arith.mulf %163, %164 : vector<4x256xbf16>
    %c92 = arith.constant 92 : index
    %c0_85 = arith.constant 0 : index
    %166 = vector.load %arg11[%c92, %c0_85] : memref<1600x256xbf16, #tpu.memory_space<vmem>>, vector<4x256xbf16>
    tpu.vector_store %arg11[%c92, %c0_85], %165 {strides = array<i32>} : memref<1600x256xbf16, #tpu.memory_space<vmem>>, vector<4x256xbf16>,
    %c0_86 = arith.constant 0 : index
    %c162 = arith.constant 162 : index
    %167 = vector.load %arg12[%c0_86, %c162] : memref<4x512xbf16, #tpu.memory_space<vmem>>, vector<4x256xbf16>
    %168 = vector.broadcast %64 : vector<1x256xbf16> to vector<4x256xbf16>
    %169 = arith.mulf %167, %168 : vector<4x256xbf16>
    %c96_87 = arith.constant 96 : index
    %c0_88 = arith.constant 0 : index
    %170 = vector.load %arg11[%c96_87, %c0_88] : memref<1600x256xbf16, #tpu.memory_space<vmem>>, vector<4x256xbf16>
    tpu.vector_store %arg11[%c96_87, %c0_88], %169 {strides = array<i32>} : memref<1600x256xbf16, #tpu.memory_space<vmem>>, vector<4x256xbf16>,
    %c0_89 = arith.constant 0 : index
    %c0_90 = arith.constant 0 : index
    %171 = vector.load %arg2[%c0_89, %c0_90] : memref<32x100xbf16, #tpu.memory_space<vmem>>, vector<32x100xbf16>
    %c0_91 = arith.constant 0 : index
    %c0_92 = arith.constant 0 : index
    %172 = vector.load %arg11[%c0_91, %c0_92] : memref<1600x256xbf16, #tpu.memory_space<vmem>>, vector<100x256xbf16>
    %cst_93 = arith.constant dense<0.000000e+00> : vector<32x256xf32>
    %173 = tpu.matmul %171, %172, %cst_93 {dimension_numbers = #tpu.dot_dimension_numbers<[1], [0], [0], [1], [0, 0, 1, 1], [], []>} : vector<32x100xbf16>, vector<100x256xbf16>, vector<32x256xf32> -> vector<32x256xf32>
    %c0_94 = arith.constant 0 : index
    %c0_95 = arith.constant 0 : index
    %174 = vector.load %arg3[%c0_94, %c0_95] : memref<32x1xf32, #tpu.memory_space<vmem>>, vector<32x1xf32>
    %175 = vector.broadcast %174 : vector<32x1xf32> to vector<32x256xf32>
    %176 = arith.addf %173, %175 : vector<32x256xf32>
    %cst_96 = arith.constant 0.000000e+00 : f32
    %177 = vector.broadcast %cst_96 : f32 to vector<32x256xf32>
    %178 = arith.maximumf %176, %177 : vector<32x256xf32>
    %179 = arith.truncf %178 : vector<32x256xf32> to vector<32x256xbf16>
    %c0_97 = arith.constant 0 : index
    %c128_98 = arith.constant 128 : index
    %180 = vector.load %arg13[%c0_97, %c128_98] : memref<32x512xbf16, #tpu.memory_space<vmem>>, vector<32x256xbf16>
    tpu.vector_store %arg13[%c0_97, %c128_98], %179 {strides = array<i32>} : memref<32x512xbf16, #tpu.memory_space<vmem>>, vector<32x256xbf16>,
    %c0_99 = arith.constant 0 : index
    %c94_100 = arith.constant 94 : index
    %181 = vector.load %arg13[%c0_99, %c94_100] : memref<32x512xbf16, #tpu.memory_space<vmem>>, vector<32x256xbf16>
    %182 = vector.broadcast %28 : vector<1x256xbf16> to vector<32x256xbf16>
    %183 = arith.mulf %181, %182 : vector<32x256xbf16>
    %c0_101 = arith.constant 0 : index
    %c0_102 = arith.constant 0 : index
    %184 = vector.load %arg11[%c0_101, %c0_102] : memref<1600x256xbf16, #tpu.memory_space<vmem>>, vector<32x256xbf16>
    tpu.vector_store %arg11[%c0_101, %c0_102], %183 {strides = array<i32>} : memref<1600x256xbf16, #tpu.memory_space<vmem>>, vector<32x256xbf16>,
    %c0_103 = arith.constant 0 : index
    %c95_104 = arith.constant 95 : index
    %185 = vector.load %arg13[%c0_103, %c95_104] : memref<32x512xbf16, #tpu.memory_space<vmem>>, vector<32x256xbf16>
    %186 = vector.broadcast %40 : vector<1x256xbf16> to vector<32x256xbf16>
    %187 = arith.mulf %185, %186 : vector<32x256xbf16>
    %c32_105 = arith.constant 32 : index
    %c0_106 = arith.constant 0 : index
    %188 = vector.load %arg11[%c32_105, %c0_106] : memref<1600x256xbf16, #tpu.memory_space<vmem>>, vector<32x256xbf16>
    tpu.vector_store %arg11[%c32_105, %c0_106], %187 {strides = array<i32>} : memref<1600x256xbf16, #tpu.memory_space<vmem>>, vector<32x256xbf16>,
    %c0_107 = arith.constant 0 : index
    %c96_108 = arith.constant 96 : index
    %189 = vector.load %arg13[%c0_107, %c96_108] : memref<32x512xbf16, #tpu.memory_space<vmem>>, vector<32x256xbf16>
    %c64_109 = arith.constant 64 : index
    %c0_110 = arith.constant 0 : index
    %190 = vector.load %arg11[%c64_109, %c0_110] : memref<1600x256xbf16, #tpu.memory_space<vmem>>, vector<32x256xbf16>
    tpu.vector_store %arg11[%c64_109, %c0_110], %189 {strides = array<i32>} : memref<1600x256xbf16, #tpu.memory_space<vmem>>, vector<32x256xbf16>,
    %c0_111 = arith.constant 0 : index
    %c97_112 = arith.constant 97 : index
    %191 = vector.load %arg13[%c0_111, %c97_112] : memref<32x512xbf16, #tpu.memory_space<vmem>>, vector<32x256xbf16>
    %192 = vector.broadcast %52 : vector<1x256xbf16> to vector<32x256xbf16>
    %193 = arith.mulf %191, %192 : vector<32x256xbf16>
    %c96_113 = arith.constant 96 : index
    %c0_114 = arith.constant 0 : index
    %194 = vector.load %arg11[%c96_113, %c0_114] : memref<1600x256xbf16, #tpu.memory_space<vmem>>, vector<32x256xbf16>
    tpu.vector_store %arg11[%c96_113, %c0_114], %193 {strides = array<i32>} : memref<1600x256xbf16, #tpu.memory_space<vmem>>, vector<32x256xbf16>,
    %c0_115 = arith.constant 0 : index
    %c98_116 = arith.constant 98 : index
    %195 = vector.load %arg13[%c0_115, %c98_116] : memref<32x512xbf16, #tpu.memory_space<vmem>>, vector<32x256xbf16>
    %196 = vector.broadcast %64 : vector<1x256xbf16> to vector<32x256xbf16>
    %197 = arith.mulf %195, %196 : vector<32x256xbf16>
    %c128_117 = arith.constant 128 : index
    %c0_118 = arith.constant 0 : index
    %198 = vector.load %arg11[%c128_117, %c0_118] : memref<1600x256xbf16, #tpu.memory_space<vmem>>, vector<32x256xbf16>
    tpu.vector_store %arg11[%c128_117, %c0_118], %197 {strides = array<i32>} : memref<1600x256xbf16, #tpu.memory_space<vmem>>, vector<32x256xbf16>,
    %c0_119 = arith.constant 0 : index
    %c110_120 = arith.constant 110 : index
    %199 = vector.load %arg13[%c0_119, %c110_120] : memref<32x512xbf16, #tpu.memory_space<vmem>>, vector<32x256xbf16>
    %200 = vector.broadcast %28 : vector<1x256xbf16> to vector<32x256xbf16>
    %201 = arith.mulf %199, %200 : vector<32x256xbf16>
    %c160_121 = arith.constant 160 : index
    %c0_122 = arith.constant 0 : index
    %202 = vector.load %arg11[%c160_121, %c0_122] : memref<1600x256xbf16, #tpu.memory_space<vmem>>, vector<32x256xbf16>
    tpu.vector_store %arg11[%c160_121, %c0_122], %201 {strides = array<i32>} : memref<1600x256xbf16, #tpu.memory_space<vmem>>, vector<32x256xbf16>,
    %c0_123 = arith.constant 0 : index
    %c111_124 = arith.constant 111 : index
    %203 = vector.load %arg13[%c0_123, %c111_124] : memref<32x512xbf16, #tpu.memory_space<vmem>>, vector<32x256xbf16>
    %204 = vector.broadcast %40 : vector<1x256xbf16> to vector<32x256xbf16>
    %205 = arith.mulf %203, %204 : vector<32x256xbf16>
    %c192 = arith.constant 192 : index
    %c0_125 = arith.constant 0 : index
    %206 = vector.load %arg11[%c192, %c0_125] : memref<1600x256xbf16, #tpu.memory_space<vmem>>, vector<32x256xbf16>
    tpu.vector_store %arg11[%c192, %c0_125], %205 {strides = array<i32>} : memref<1600x256xbf16, #tpu.memory_space<vmem>>, vector<32x256xbf16>,
    %c0_126 = arith.constant 0 : index
    %c112_127 = arith.constant 112 : index
    %207 = vector.load %arg13[%c0_126, %c112_127] : memref<32x512xbf16, #tpu.memory_space<vmem>>, vector<32x256xbf16>
    %c224 = arith.constant 224 : index
    %c0_128 = arith.constant 0 : index
    %208 = vector.load %arg11[%c224, %c0_128] : memref<1600x256xbf16, #tpu.memory_space<vmem>>, vector<32x256xbf16>
    tpu.vector_store %arg11[%c224, %c0_128], %207 {strides = array<i32>} : memref<1600x256xbf16, #tpu.memory_space<vmem>>, vector<32x256xbf16>,
    %c0_129 = arith.constant 0 : index
    %c113_130 = arith.constant 113 : index
    %209 = vector.load %arg13[%c0_129, %c113_130] : memref<32x512xbf16, #tpu.memory_space<vmem>>, vector<32x256xbf16>
    %210 = vector.broadcast %52 : vector<1x256xbf16> to vector<32x256xbf16>
    %211 = arith.mulf %209, %210 : vector<32x256xbf16>
    %c256 = arith.constant 256 : index
    %c0_131 = arith.constant 0 : index
    %212 = vector.load %arg11[%c256, %c0_131] : memref<1600x256xbf16, #tpu.memory_space<vmem>>, vector<32x256xbf16>
    tpu.vector_store %arg11[%c256, %c0_131], %211 {strides = array<i32>} : memref<1600x256xbf16, #tpu.memory_space<vmem>>, vector<32x256xbf16>,
    %c0_132 = arith.constant 0 : index
    %c114_133 = arith.constant 114 : index
    %213 = vector.load %arg13[%c0_132, %c114_133] : memref<32x512xbf16, #tpu.memory_space<vmem>>, vector<32x256xbf16>
    %214 = vector.broadcast %64 : vector<1x256xbf16> to vector<32x256xbf16>
    %215 = arith.mulf %213, %214 : vector<32x256xbf16>
    %c288 = arith.constant 288 : index
    %c0_134 = arith.constant 0 : index
    %216 = vector.load %arg11[%c288, %c0_134] : memref<1600x256xbf16, #tpu.memory_space<vmem>>, vector<32x256xbf16>
    tpu.vector_store %arg11[%c288, %c0_134], %215 {strides = array<i32>} : memref<1600x256xbf16, #tpu.memory_space<vmem>>, vector<32x256xbf16>,
    %c0_135 = arith.constant 0 : index
    %c126_136 = arith.constant 126 : index
    %217 = vector.load %arg13[%c0_135, %c126_136] : memref<32x512xbf16, #tpu.memory_space<vmem>>, vector<32x256xbf16>
    %218 = vector.broadcast %28 : vector<1x256xbf16> to vector<32x256xbf16>
    %219 = arith.mulf %217, %218 : vector<32x256xbf16>
    %c320 = arith.constant 320 : index
    %c0_137 = arith.constant 0 : index
    %220 = vector.load %arg11[%c320, %c0_137] : memref<1600x256xbf16, #tpu.memory_space<vmem>>, vector<32x256xbf16>
    tpu.vector_store %arg11[%c320, %c0_137], %219 {strides = array<i32>} : memref<1600x256xbf16, #tpu.memory_space<vmem>>, vector<32x256xbf16>,
    %c0_138 = arith.constant 0 : index
    %c127_139 = arith.constant 127 : index
    %221 = vector.load %arg13[%c0_138, %c127_139] : memref<32x512xbf16, #tpu.memory_space<vmem>>, vector<32x256xbf16>
    %222 = vector.broadcast %40 : vector<1x256xbf16> to vector<32x256xbf16>
    %223 = arith.mulf %221, %222 : vector<32x256xbf16>
    %c352 = arith.constant 352 : index
    %c0_140 = arith.constant 0 : index
    %224 = vector.load %arg11[%c352, %c0_140] : memref<1600x256xbf16, #tpu.memory_space<vmem>>, vector<32x256xbf16>
    tpu.vector_store %arg11[%c352, %c0_140], %223 {strides = array<i32>} : memref<1600x256xbf16, #tpu.memory_space<vmem>>, vector<32x256xbf16>,
    %c0_141 = arith.constant 0 : index
    %c128_142 = arith.constant 128 : index
    %225 = vector.load %arg13[%c0_141, %c128_142] : memref<32x512xbf16, #tpu.memory_space<vmem>>, vector<32x256xbf16>
    %c384_143 = arith.constant 384 : index
    %c0_144 = arith.constant 0 : index
    %226 = vector.load %arg11[%c384_143, %c0_144] : memref<1600x256xbf16, #tpu.memory_space<vmem>>, vector<32x256xbf16>
    tpu.vector_store %arg11[%c384_143, %c0_144], %225 {strides = array<i32>} : memref<1600x256xbf16, #tpu.memory_space<vmem>>, vector<32x256xbf16>,
    %c0_145 = arith.constant 0 : index
    %c129_146 = arith.constant 129 : index
    %227 = vector.load %arg13[%c0_145, %c129_146] : memref<32x512xbf16, #tpu.memory_space<vmem>>, vector<32x256xbf16>
    %228 = vector.broadcast %52 : vector<1x256xbf16> to vector<32x256xbf16>
    %229 = arith.mulf %227, %228 : vector<32x256xbf16>
    %c416 = arith.constant 416 : index
    %c0_147 = arith.constant 0 : index
    %230 = vector.load %arg11[%c416, %c0_147] : memref<1600x256xbf16, #tpu.memory_space<vmem>>, vector<32x256xbf16>
    tpu.vector_store %arg11[%c416, %c0_147], %229 {strides = array<i32>} : memref<1600x256xbf16, #tpu.memory_space<vmem>>, vector<32x256xbf16>,
    %c0_148 = arith.constant 0 : index
    %c130_149 = arith.constant 130 : index
    %231 = vector.load %arg13[%c0_148, %c130_149] : memref<32x512xbf16, #tpu.memory_space<vmem>>, vector<32x256xbf16>
    %232 = vector.broadcast %64 : vector<1x256xbf16> to vector<32x256xbf16>
    %233 = arith.mulf %231, %232 : vector<32x256xbf16>
    %c448 = arith.constant 448 : index
    %c0_150 = arith.constant 0 : index
    %234 = vector.load %arg11[%c448, %c0_150] : memref<1600x256xbf16, #tpu.memory_space<vmem>>, vector<32x256xbf16>
    tpu.vector_store %arg11[%c448, %c0_150], %233 {strides = array<i32>} : memref<1600x256xbf16, #tpu.memory_space<vmem>>, vector<32x256xbf16>,
    %c0_151 = arith.constant 0 : index
    %c142_152 = arith.constant 142 : index
    %235 = vector.load %arg13[%c0_151, %c142_152] : memref<32x512xbf16, #tpu.memory_space<vmem>>, vector<32x256xbf16>
    %236 = vector.broadcast %28 : vector<1x256xbf16> to vector<32x256xbf16>
    %237 = arith.mulf %235, %236 : vector<32x256xbf16>
    %c480 = arith.constant 480 : index
    %c0_153 = arith.constant 0 : index
    %238 = vector.load %arg11[%c480, %c0_153] : memref<1600x256xbf16, #tpu.memory_space<vmem>>, vector<32x256xbf16>
    tpu.vector_store %arg11[%c480, %c0_153], %237 {strides = array<i32>} : memref<1600x256xbf16, #tpu.memory_space<vmem>>, vector<32x256xbf16>,
    %c0_154 = arith.constant 0 : index
    %c143_155 = arith.constant 143 : index
    %239 = vector.load %arg13[%c0_154, %c143_155] : memref<32x512xbf16, #tpu.memory_space<vmem>>, vector<32x256xbf16>
    %240 = vector.broadcast %40 : vector<1x256xbf16> to vector<32x256xbf16>
    %241 = arith.mulf %239, %240 : vector<32x256xbf16>
    %c512 = arith.constant 512 : index
    %c0_156 = arith.constant 0 : index
    %242 = vector.load %arg11[%c512, %c0_156] : memref<1600x256xbf16, #tpu.memory_space<vmem>>, vector<32x256xbf16>
    tpu.vector_store %arg11[%c512, %c0_156], %241 {strides = array<i32>} : memref<1600x256xbf16, #tpu.memory_space<vmem>>, vector<32x256xbf16>,
    %c0_157 = arith.constant 0 : index
    %c144_158 = arith.constant 144 : index
    %243 = vector.load %arg13[%c0_157, %c144_158] : memref<32x512xbf16, #tpu.memory_space<vmem>>, vector<32x256xbf16>
    %c544 = arith.constant 544 : index
    %c0_159 = arith.constant 0 : index
    %244 = vector.load %arg11[%c544, %c0_159] : memref<1600x256xbf16, #tpu.memory_space<vmem>>, vector<32x256xbf16>
    tpu.vector_store %arg11[%c544, %c0_159], %243 {strides = array<i32>} : memref<1600x256xbf16, #tpu.memory_space<vmem>>, vector<32x256xbf16>,
    %c0_160 = arith.constant 0 : index
    %c145_161 = arith.constant 145 : index
    %245 = vector.load %arg13[%c0_160, %c145_161] : memref<32x512xbf16, #tpu.memory_space<vmem>>, vector<32x256xbf16>
    %246 = vector.broadcast %52 : vector<1x256xbf16> to vector<32x256xbf16>
    %247 = arith.mulf %245, %246 : vector<32x256xbf16>
    %c576 = arith.constant 576 : index
    %c0_162 = arith.constant 0 : index
    %248 = vector.load %arg11[%c576, %c0_162] : memref<1600x256xbf16, #tpu.memory_space<vmem>>, vector<32x256xbf16>
    tpu.vector_store %arg11[%c576, %c0_162], %247 {strides = array<i32>} : memref<1600x256xbf16, #tpu.memory_space<vmem>>, vector<32x256xbf16>,
    %c0_163 = arith.constant 0 : index
    %c146_164 = arith.constant 146 : index
    %249 = vector.load %arg13[%c0_163, %c146_164] : memref<32x512xbf16, #tpu.memory_space<vmem>>, vector<32x256xbf16>
    %250 = vector.broadcast %64 : vector<1x256xbf16> to vector<32x256xbf16>
    %251 = arith.mulf %249, %250 : vector<32x256xbf16>
    %c608 = arith.constant 608 : index
    %c0_165 = arith.constant 0 : index
    %252 = vector.load %arg11[%c608, %c0_165] : memref<1600x256xbf16, #tpu.memory_space<vmem>>, vector<32x256xbf16>
    tpu.vector_store %arg11[%c608, %c0_165], %251 {strides = array<i32>} : memref<1600x256xbf16, #tpu.memory_space<vmem>>, vector<32x256xbf16>,
    %c0_166 = arith.constant 0 : index
    %c158_167 = arith.constant 158 : index
    %253 = vector.load %arg13[%c0_166, %c158_167] : memref<32x512xbf16, #tpu.memory_space<vmem>>, vector<32x256xbf16>
    %254 = vector.broadcast %28 : vector<1x256xbf16> to vector<32x256xbf16>
    %255 = arith.mulf %253, %254 : vector<32x256xbf16>
    %c640 = arith.constant 640 : index
    %c0_168 = arith.constant 0 : index
    %256 = vector.load %arg11[%c640, %c0_168] : memref<1600x256xbf16, #tpu.memory_space<vmem>>, vector<32x256xbf16>
    tpu.vector_store %arg11[%c640, %c0_168], %255 {strides = array<i32>} : memref<1600x256xbf16, #tpu.memory_space<vmem>>, vector<32x256xbf16>,
    %c0_169 = arith.constant 0 : index
    %c159_170 = arith.constant 159 : index
    %257 = vector.load %arg13[%c0_169, %c159_170] : memref<32x512xbf16, #tpu.memory_space<vmem>>, vector<32x256xbf16>
    %258 = vector.broadcast %40 : vector<1x256xbf16> to vector<32x256xbf16>
    %259 = arith.mulf %257, %258 : vector<32x256xbf16>
    %c672 = arith.constant 672 : index
    %c0_171 = arith.constant 0 : index
    %260 = vector.load %arg11[%c672, %c0_171] : memref<1600x256xbf16, #tpu.memory_space<vmem>>, vector<32x256xbf16>
    tpu.vector_store %arg11[%c672, %c0_171], %259 {strides = array<i32>} : memref<1600x256xbf16, #tpu.memory_space<vmem>>, vector<32x256xbf16>,
    %c0_172 = arith.constant 0 : index
    %c160_173 = arith.constant 160 : index
    %261 = vector.load %arg13[%c0_172, %c160_173] : memref<32x512xbf16, #tpu.memory_space<vmem>>, vector<32x256xbf16>
    %c704 = arith.constant 704 : index
    %c0_174 = arith.constant 0 : index
    %262 = vector.load %arg11[%c704, %c0_174] : memref<1600x256xbf16, #tpu.memory_space<vmem>>, vector<32x256xbf16>
    tpu.vector_store %arg11[%c704, %c0_174], %261 {strides = array<i32>} : memref<1600x256xbf16, #tpu.memory_space<vmem>>, vector<32x256xbf16>,
    %c0_175 = arith.constant 0 : index
    %c161_176 = arith.constant 161 : index
    %263 = vector.load %arg13[%c0_175, %c161_176] : memref<32x512xbf16, #tpu.memory_space<vmem>>, vector<32x256xbf16>
    %264 = vector.broadcast %52 : vector<1x256xbf16> to vector<32x256xbf16>
    %265 = arith.mulf %263, %264 : vector<32x256xbf16>
    %c736 = arith.constant 736 : index
    %c0_177 = arith.constant 0 : index
    %266 = vector.load %arg11[%c736, %c0_177] : memref<1600x256xbf16, #tpu.memory_space<vmem>>, vector<32x256xbf16>
    tpu.vector_store %arg11[%c736, %c0_177], %265 {strides = array<i32>} : memref<1600x256xbf16, #tpu.memory_space<vmem>>, vector<32x256xbf16>,
    %c0_178 = arith.constant 0 : index
    %c162_179 = arith.constant 162 : index
    %267 = vector.load %arg13[%c0_178, %c162_179] : memref<32x512xbf16, #tpu.memory_space<vmem>>, vector<32x256xbf16>
    %268 = vector.broadcast %64 : vector<1x256xbf16> to vector<32x256xbf16>
    %269 = arith.mulf %267, %268 : vector<32x256xbf16>
    %c768 = arith.constant 768 : index
    %c0_180 = arith.constant 0 : index
    %270 = vector.load %arg11[%c768, %c0_180] : memref<1600x256xbf16, #tpu.memory_space<vmem>>, vector<32x256xbf16>
    tpu.vector_store %arg11[%c768, %c0_180], %269 {strides = array<i32>} : memref<1600x256xbf16, #tpu.memory_space<vmem>>, vector<32x256xbf16>,
    %c0_181 = arith.constant 0 : index
    %c0_182 = arith.constant 0 : index
    %271 = vector.load %arg4[%c0_181, %c0_182] : memref<64x800xbf16, #tpu.memory_space<vmem>>, vector<64x800xbf16>
    %c0_183 = arith.constant 0 : index
    %c0_184 = arith.constant 0 : index
    %272 = vector.load %arg11[%c0_183, %c0_184] : memref<1600x256xbf16, #tpu.memory_space<vmem>>, vector<800x256xbf16>
    %cst_185 = arith.constant dense<0.000000e+00> : vector<64x256xf32>
    %273 = tpu.matmul %271, %272, %cst_185 {dimension_numbers = #tpu.dot_dimension_numbers<[1], [0], [0], [1], [0, 0, 1, 1], [], []>} : vector<64x800xbf16>, vector<800x256xbf16>, vector<64x256xf32> -> vector<64x256xf32>
    %c0_186 = arith.constant 0 : index
    %c0_187 = arith.constant 0 : index
    %274 = vector.load %arg5[%c0_186, %c0_187] : memref<64x1xf32, #tpu.memory_space<vmem>>, vector<64x1xf32>
    %275 = vector.broadcast %274 : vector<64x1xf32> to vector<64x256xf32>
    %276 = arith.addf %273, %275 : vector<64x256xf32>
    %cst_188 = arith.constant 0.000000e+00 : f32
    %277 = vector.broadcast %cst_188 : f32 to vector<64x256xf32>
    %278 = arith.maximumf %276, %277 : vector<64x256xf32>
    %279 = arith.truncf %278 : vector<64x256xf32> to vector<64x256xbf16>
    %c0_189 = arith.constant 0 : index
    %c128_190 = arith.constant 128 : index
    %280 = vector.load %arg14[%c0_189, %c128_190] : memref<64x512xbf16, #tpu.memory_space<vmem>>, vector<64x256xbf16>
    tpu.vector_store %arg14[%c0_189, %c128_190], %279 {strides = array<i32>} : memref<64x512xbf16, #tpu.memory_space<vmem>>, vector<64x256xbf16>,
    %c0_191 = arith.constant 0 : index
    %c94_192 = arith.constant 94 : index
    %281 = vector.load %arg14[%c0_191, %c94_192] : memref<64x512xbf16, #tpu.memory_space<vmem>>, vector<64x256xbf16>
    %282 = vector.broadcast %28 : vector<1x256xbf16> to vector<64x256xbf16>
    %283 = arith.mulf %281, %282 : vector<64x256xbf16>
    %c0_193 = arith.constant 0 : index
    %c0_194 = arith.constant 0 : index
    %284 = vector.load %arg11[%c0_193, %c0_194] : memref<1600x256xbf16, #tpu.memory_space<vmem>>, vector<64x256xbf16>
    tpu.vector_store %arg11[%c0_193, %c0_194], %283 {strides = array<i32>} : memref<1600x256xbf16, #tpu.memory_space<vmem>>, vector<64x256xbf16>,
    %c0_195 = arith.constant 0 : index
    %c95_196 = arith.constant 95 : index
    %285 = vector.load %arg14[%c0_195, %c95_196] : memref<64x512xbf16, #tpu.memory_space<vmem>>, vector<64x256xbf16>
    %286 = vector.broadcast %40 : vector<1x256xbf16> to vector<64x256xbf16>
    %287 = arith.mulf %285, %286 : vector<64x256xbf16>
    %c64_197 = arith.constant 64 : index
    %c0_198 = arith.constant 0 : index
    %288 = vector.load %arg11[%c64_197, %c0_198] : memref<1600x256xbf16, #tpu.memory_space<vmem>>, vector<64x256xbf16>
    tpu.vector_store %arg11[%c64_197, %c0_198], %287 {strides = array<i32>} : memref<1600x256xbf16, #tpu.memory_space<vmem>>, vector<64x256xbf16>,
    %c0_199 = arith.constant 0 : index
    %c96_200 = arith.constant 96 : index
    %289 = vector.load %arg14[%c0_199, %c96_200] : memref<64x512xbf16, #tpu.memory_space<vmem>>, vector<64x256xbf16>
    %c128_201 = arith.constant 128 : index
    %c0_202 = arith.constant 0 : index
    %290 = vector.load %arg11[%c128_201, %c0_202] : memref<1600x256xbf16, #tpu.memory_space<vmem>>, vector<64x256xbf16>
    tpu.vector_store %arg11[%c128_201, %c0_202], %289 {strides = array<i32>} : memref<1600x256xbf16, #tpu.memory_space<vmem>>, vector<64x256xbf16>,
    %c0_203 = arith.constant 0 : index
    %c97_204 = arith.constant 97 : index
    %291 = vector.load %arg14[%c0_203, %c97_204] : memref<64x512xbf16, #tpu.memory_space<vmem>>, vector<64x256xbf16>
    %292 = vector.broadcast %52 : vector<1x256xbf16> to vector<64x256xbf16>
    %293 = arith.mulf %291, %292 : vector<64x256xbf16>
    %c192_205 = arith.constant 192 : index
    %c0_206 = arith.constant 0 : index
    %294 = vector.load %arg11[%c192_205, %c0_206] : memref<1600x256xbf16, #tpu.memory_space<vmem>>, vector<64x256xbf16>
    tpu.vector_store %arg11[%c192_205, %c0_206], %293 {strides = array<i32>} : memref<1600x256xbf16, #tpu.memory_space<vmem>>, vector<64x256xbf16>,
    %c0_207 = arith.constant 0 : index
    %c98_208 = arith.constant 98 : index
    %295 = vector.load %arg14[%c0_207, %c98_208] : memref<64x512xbf16, #tpu.memory_space<vmem>>, vector<64x256xbf16>
    %296 = vector.broadcast %64 : vector<1x256xbf16> to vector<64x256xbf16>
    %297 = arith.mulf %295, %296 : vector<64x256xbf16>
    %c256_209 = arith.constant 256 : index
    %c0_210 = arith.constant 0 : index
    %298 = vector.load %arg11[%c256_209, %c0_210] : memref<1600x256xbf16, #tpu.memory_space<vmem>>, vector<64x256xbf16>
    tpu.vector_store %arg11[%c256_209, %c0_210], %297 {strides = array<i32>} : memref<1600x256xbf16, #tpu.memory_space<vmem>>, vector<64x256xbf16>,
    %c0_211 = arith.constant 0 : index
    %c110_212 = arith.constant 110 : index
    %299 = vector.load %arg14[%c0_211, %c110_212] : memref<64x512xbf16, #tpu.memory_space<vmem>>, vector<64x256xbf16>
    %300 = vector.broadcast %28 : vector<1x256xbf16> to vector<64x256xbf16>
    %301 = arith.mulf %299, %300 : vector<64x256xbf16>
    %c320_213 = arith.constant 320 : index
    %c0_214 = arith.constant 0 : index
    %302 = vector.load %arg11[%c320_213, %c0_214] : memref<1600x256xbf16, #tpu.memory_space<vmem>>, vector<64x256xbf16>
    tpu.vector_store %arg11[%c320_213, %c0_214], %301 {strides = array<i32>} : memref<1600x256xbf16, #tpu.memory_space<vmem>>, vector<64x256xbf16>,
    %c0_215 = arith.constant 0 : index
    %c111_216 = arith.constant 111 : index
    %303 = vector.load %arg14[%c0_215, %c111_216] : memref<64x512xbf16, #tpu.memory_space<vmem>>, vector<64x256xbf16>
    %304 = vector.broadcast %40 : vector<1x256xbf16> to vector<64x256xbf16>
    %305 = arith.mulf %303, %304 : vector<64x256xbf16>
    %c384_217 = arith.constant 384 : index
    %c0_218 = arith.constant 0 : index
    %306 = vector.load %arg11[%c384_217, %c0_218] : memref<1600x256xbf16, #tpu.memory_space<vmem>>, vector<64x256xbf16>
    tpu.vector_store %arg11[%c384_217, %c0_218], %305 {strides = array<i32>} : memref<1600x256xbf16, #tpu.memory_space<vmem>>, vector<64x256xbf16>,
    %c0_219 = arith.constant 0 : index
    %c112_220 = arith.constant 112 : index
    %307 = vector.load %arg14[%c0_219, %c112_220] : memref<64x512xbf16, #tpu.memory_space<vmem>>, vector<64x256xbf16>
    %c448_221 = arith.constant 448 : index
    %c0_222 = arith.constant 0 : index
    %308 = vector.load %arg11[%c448_221, %c0_222] : memref<1600x256xbf16, #tpu.memory_space<vmem>>, vector<64x256xbf16>
    tpu.vector_store %arg11[%c448_221, %c0_222], %307 {strides = array<i32>} : memref<1600x256xbf16, #tpu.memory_space<vmem>>, vector<64x256xbf16>,
    %c0_223 = arith.constant 0 : index
    %c113_224 = arith.constant 113 : index
    %309 = vector.load %arg14[%c0_223, %c113_224] : memref<64x512xbf16, #tpu.memory_space<vmem>>, vector<64x256xbf16>
    %310 = vector.broadcast %52 : vector<1x256xbf16> to vector<64x256xbf16>
    %311 = arith.mulf %309, %310 : vector<64x256xbf16>
    %c512_225 = arith.constant 512 : index
    %c0_226 = arith.constant 0 : index
    %312 = vector.load %arg11[%c512_225, %c0_226] : memref<1600x256xbf16, #tpu.memory_space<vmem>>, vector<64x256xbf16>
    tpu.vector_store %arg11[%c512_225, %c0_226], %311 {strides = array<i32>} : memref<1600x256xbf16, #tpu.memory_space<vmem>>, vector<64x256xbf16>,
    %c0_227 = arith.constant 0 : index
    %c114_228 = arith.constant 114 : index
    %313 = vector.load %arg14[%c0_227, %c114_228] : memref<64x512xbf16, #tpu.memory_space<vmem>>, vector<64x256xbf16>
    %314 = vector.broadcast %64 : vector<1x256xbf16> to vector<64x256xbf16>
    %315 = arith.mulf %313, %314 : vector<64x256xbf16>
    %c576_229 = arith.constant 576 : index
    %c0_230 = arith.constant 0 : index
    %316 = vector.load %arg11[%c576_229, %c0_230] : memref<1600x256xbf16, #tpu.memory_space<vmem>>, vector<64x256xbf16>
    tpu.vector_store %arg11[%c576_229, %c0_230], %315 {strides = array<i32>} : memref<1600x256xbf16, #tpu.memory_space<vmem>>, vector<64x256xbf16>,
    %c0_231 = arith.constant 0 : index
    %c126_232 = arith.constant 126 : index
    %317 = vector.load %arg14[%c0_231, %c126_232] : memref<64x512xbf16, #tpu.memory_space<vmem>>, vector<64x256xbf16>
    %318 = vector.broadcast %28 : vector<1x256xbf16> to vector<64x256xbf16>
    %319 = arith.mulf %317, %318 : vector<64x256xbf16>
    %c640_233 = arith.constant 640 : index
    %c0_234 = arith.constant 0 : index
    %320 = vector.load %arg11[%c640_233, %c0_234] : memref<1600x256xbf16, #tpu.memory_space<vmem>>, vector<64x256xbf16>
    tpu.vector_store %arg11[%c640_233, %c0_234], %319 {strides = array<i32>} : memref<1600x256xbf16, #tpu.memory_space<vmem>>, vector<64x256xbf16>,
    %c0_235 = arith.constant 0 : index
    %c127_236 = arith.constant 127 : index
    %321 = vector.load %arg14[%c0_235, %c127_236] : memref<64x512xbf16, #tpu.memory_space<vmem>>, vector<64x256xbf16>
    %322 = vector.broadcast %40 : vector<1x256xbf16> to vector<64x256xbf16>
    %323 = arith.mulf %321, %322 : vector<64x256xbf16>
    %c704_237 = arith.constant 704 : index
    %c0_238 = arith.constant 0 : index
    %324 = vector.load %arg11[%c704_237, %c0_238] : memref<1600x256xbf16, #tpu.memory_space<vmem>>, vector<64x256xbf16>
    tpu.vector_store %arg11[%c704_237, %c0_238], %323 {strides = array<i32>} : memref<1600x256xbf16, #tpu.memory_space<vmem>>, vector<64x256xbf16>,
    %c0_239 = arith.constant 0 : index
    %c128_240 = arith.constant 128 : index
    %325 = vector.load %arg14[%c0_239, %c128_240] : memref<64x512xbf16, #tpu.memory_space<vmem>>, vector<64x256xbf16>
    %c768_241 = arith.constant 768 : index
    %c0_242 = arith.constant 0 : index
    %326 = vector.load %arg11[%c768_241, %c0_242] : memref<1600x256xbf16, #tpu.memory_space<vmem>>, vector<64x256xbf16>
    tpu.vector_store %arg11[%c768_241, %c0_242], %325 {strides = array<i32>} : memref<1600x256xbf16, #tpu.memory_space<vmem>>, vector<64x256xbf16>,
    %c0_243 = arith.constant 0 : index
    %c129_244 = arith.constant 129 : index
    %327 = vector.load %arg14[%c0_243, %c129_244] : memref<64x512xbf16, #tpu.memory_space<vmem>>, vector<64x256xbf16>
    %328 = vector.broadcast %52 : vector<1x256xbf16> to vector<64x256xbf16>
    %329 = arith.mulf %327, %328 : vector<64x256xbf16>
    %c832 = arith.constant 832 : index
    %c0_245 = arith.constant 0 : index
    %330 = vector.load %arg11[%c832, %c0_245] : memref<1600x256xbf16, #tpu.memory_space<vmem>>, vector<64x256xbf16>
    tpu.vector_store %arg11[%c832, %c0_245], %329 {strides = array<i32>} : memref<1600x256xbf16, #tpu.memory_space<vmem>>, vector<64x256xbf16>,
    %c0_246 = arith.constant 0 : index
    %c130_247 = arith.constant 130 : index
    %331 = vector.load %arg14[%c0_246, %c130_247] : memref<64x512xbf16, #tpu.memory_space<vmem>>, vector<64x256xbf16>
    %332 = vector.broadcast %64 : vector<1x256xbf16> to vector<64x256xbf16>
    %333 = arith.mulf %331, %332 : vector<64x256xbf16>
    %c896 = arith.constant 896 : index
    %c0_248 = arith.constant 0 : index
    %334 = vector.load %arg11[%c896, %c0_248] : memref<1600x256xbf16, #tpu.memory_space<vmem>>, vector<64x256xbf16>
    tpu.vector_store %arg11[%c896, %c0_248], %333 {strides = array<i32>} : memref<1600x256xbf16, #tpu.memory_space<vmem>>, vector<64x256xbf16>,
    %c0_249 = arith.constant 0 : index
    %c142_250 = arith.constant 142 : index
    %335 = vector.load %arg14[%c0_249, %c142_250] : memref<64x512xbf16, #tpu.memory_space<vmem>>, vector<64x256xbf16>
    %336 = vector.broadcast %28 : vector<1x256xbf16> to vector<64x256xbf16>
    %337 = arith.mulf %335, %336 : vector<64x256xbf16>
    %c960 = arith.constant 960 : index
    %c0_251 = arith.constant 0 : index
    %338 = vector.load %arg11[%c960, %c0_251] : memref<1600x256xbf16, #tpu.memory_space<vmem>>, vector<64x256xbf16>
    tpu.vector_store %arg11[%c960, %c0_251], %337 {strides = array<i32>} : memref<1600x256xbf16, #tpu.memory_space<vmem>>, vector<64x256xbf16>,
    %c0_252 = arith.constant 0 : index
    %c143_253 = arith.constant 143 : index
    %339 = vector.load %arg14[%c0_252, %c143_253] : memref<64x512xbf16, #tpu.memory_space<vmem>>, vector<64x256xbf16>
    %340 = vector.broadcast %40 : vector<1x256xbf16> to vector<64x256xbf16>
    %341 = arith.mulf %339, %340 : vector<64x256xbf16>
    %c1024 = arith.constant 1024 : index
    %c0_254 = arith.constant 0 : index
    %342 = vector.load %arg11[%c1024, %c0_254] : memref<1600x256xbf16, #tpu.memory_space<vmem>>, vector<64x256xbf16>
    tpu.vector_store %arg11[%c1024, %c0_254], %341 {strides = array<i32>} : memref<1600x256xbf16, #tpu.memory_space<vmem>>, vector<64x256xbf16>,
    %c0_255 = arith.constant 0 : index
    %c144_256 = arith.constant 144 : index
    %343 = vector.load %arg14[%c0_255, %c144_256] : memref<64x512xbf16, #tpu.memory_space<vmem>>, vector<64x256xbf16>
    %c1088 = arith.constant 1088 : index
    %c0_257 = arith.constant 0 : index
    %344 = vector.load %arg11[%c1088, %c0_257] : memref<1600x256xbf16, #tpu.memory_space<vmem>>, vector<64x256xbf16>
    tpu.vector_store %arg11[%c1088, %c0_257], %343 {strides = array<i32>} : memref<1600x256xbf16, #tpu.memory_space<vmem>>, vector<64x256xbf16>,
    %c0_258 = arith.constant 0 : index
    %c145_259 = arith.constant 145 : index
    %345 = vector.load %arg14[%c0_258, %c145_259] : memref<64x512xbf16, #tpu.memory_space<vmem>>, vector<64x256xbf16>
    %346 = vector.broadcast %52 : vector<1x256xbf16> to vector<64x256xbf16>
    %347 = arith.mulf %345, %346 : vector<64x256xbf16>
    %c1152 = arith.constant 1152 : index
    %c0_260 = arith.constant 0 : index
    %348 = vector.load %arg11[%c1152, %c0_260] : memref<1600x256xbf16, #tpu.memory_space<vmem>>, vector<64x256xbf16>
    tpu.vector_store %arg11[%c1152, %c0_260], %347 {strides = array<i32>} : memref<1600x256xbf16, #tpu.memory_space<vmem>>, vector<64x256xbf16>,
    %c0_261 = arith.constant 0 : index
    %c146_262 = arith.constant 146 : index
    %349 = vector.load %arg14[%c0_261, %c146_262] : memref<64x512xbf16, #tpu.memory_space<vmem>>, vector<64x256xbf16>
    %350 = vector.broadcast %64 : vector<1x256xbf16> to vector<64x256xbf16>
    %351 = arith.mulf %349, %350 : vector<64x256xbf16>
    %c1216 = arith.constant 1216 : index
    %c0_263 = arith.constant 0 : index
    %352 = vector.load %arg11[%c1216, %c0_263] : memref<1600x256xbf16, #tpu.memory_space<vmem>>, vector<64x256xbf16>
    tpu.vector_store %arg11[%c1216, %c0_263], %351 {strides = array<i32>} : memref<1600x256xbf16, #tpu.memory_space<vmem>>, vector<64x256xbf16>,
    %c0_264 = arith.constant 0 : index
    %c158_265 = arith.constant 158 : index
    %353 = vector.load %arg14[%c0_264, %c158_265] : memref<64x512xbf16, #tpu.memory_space<vmem>>, vector<64x256xbf16>
    %354 = vector.broadcast %28 : vector<1x256xbf16> to vector<64x256xbf16>
    %355 = arith.mulf %353, %354 : vector<64x256xbf16>
    %c1280 = arith.constant 1280 : index
    %c0_266 = arith.constant 0 : index
    %356 = vector.load %arg11[%c1280, %c0_266] : memref<1600x256xbf16, #tpu.memory_space<vmem>>, vector<64x256xbf16>
    tpu.vector_store %arg11[%c1280, %c0_266], %355 {strides = array<i32>} : memref<1600x256xbf16, #tpu.memory_space<vmem>>, vector<64x256xbf16>,
    %c0_267 = arith.constant 0 : index
    %c159_268 = arith.constant 159 : index
    %357 = vector.load %arg14[%c0_267, %c159_268] : memref<64x512xbf16, #tpu.memory_space<vmem>>, vector<64x256xbf16>
    %358 = vector.broadcast %40 : vector<1x256xbf16> to vector<64x256xbf16>
    %359 = arith.mulf %357, %358 : vector<64x256xbf16>
    %c1344 = arith.constant 1344 : index
    %c0_269 = arith.constant 0 : index
    %360 = vector.load %arg11[%c1344, %c0_269] : memref<1600x256xbf16, #tpu.memory_space<vmem>>, vector<64x256xbf16>
    tpu.vector_store %arg11[%c1344, %c0_269], %359 {strides = array<i32>} : memref<1600x256xbf16, #tpu.memory_space<vmem>>, vector<64x256xbf16>,
    %c0_270 = arith.constant 0 : index
    %c160_271 = arith.constant 160 : index
    %361 = vector.load %arg14[%c0_270, %c160_271] : memref<64x512xbf16, #tpu.memory_space<vmem>>, vector<64x256xbf16>
    %c1408 = arith.constant 1408 : index
    %c0_272 = arith.constant 0 : index
    %362 = vector.load %arg11[%c1408, %c0_272] : memref<1600x256xbf16, #tpu.memory_space<vmem>>, vector<64x256xbf16>
    tpu.vector_store %arg11[%c1408, %c0_272], %361 {strides = array<i32>} : memref<1600x256xbf16, #tpu.memory_space<vmem>>, vector<64x256xbf16>,
    %c0_273 = arith.constant 0 : index
    %c161_274 = arith.constant 161 : index
    %363 = vector.load %arg14[%c0_273, %c161_274] : memref<64x512xbf16, #tpu.memory_space<vmem>>, vector<64x256xbf16>
    %364 = vector.broadcast %52 : vector<1x256xbf16> to vector<64x256xbf16>
    %365 = arith.mulf %363, %364 : vector<64x256xbf16>
    %c1472 = arith.constant 1472 : index
    %c0_275 = arith.constant 0 : index
    %366 = vector.load %arg11[%c1472, %c0_275] : memref<1600x256xbf16, #tpu.memory_space<vmem>>, vector<64x256xbf16>
    tpu.vector_store %arg11[%c1472, %c0_275], %365 {strides = array<i32>} : memref<1600x256xbf16, #tpu.memory_space<vmem>>, vector<64x256xbf16>,
    %c0_276 = arith.constant 0 : index
    %c162_277 = arith.constant 162 : index
    %367 = vector.load %arg14[%c0_276, %c162_277] : memref<64x512xbf16, #tpu.memory_space<vmem>>, vector<64x256xbf16>
    %368 = vector.broadcast %64 : vector<1x256xbf16> to vector<64x256xbf16>
    %369 = arith.mulf %367, %368 : vector<64x256xbf16>
    %c1536 = arith.constant 1536 : index
    %c0_278 = arith.constant 0 : index
    %370 = vector.load %arg11[%c1536, %c0_278] : memref<1600x256xbf16, #tpu.memory_space<vmem>>, vector<64x256xbf16>
    tpu.vector_store %arg11[%c1536, %c0_278], %369 {strides = array<i32>} : memref<1600x256xbf16, #tpu.memory_space<vmem>>, vector<64x256xbf16>,
    %c0_279 = arith.constant 0 : index
    %c0_280 = arith.constant 0 : index
    %371 = vector.load %arg6[%c0_279, %c0_280] : memref<128x1600xbf16, #tpu.memory_space<vmem>>, vector<128x1600xbf16>
    %c0_281 = arith.constant 0 : index
    %c0_282 = arith.constant 0 : index
    %372 = vector.load %arg11[%c0_281, %c0_282] : memref<1600x256xbf16, #tpu.memory_space<vmem>>, vector<1600x256xbf16>
    %cst_283 = arith.constant dense<0.000000e+00> : vector<128x256xf32>
    %373 = tpu.matmul %371, %372, %cst_283 {dimension_numbers = #tpu.dot_dimension_numbers<[1], [0], [0], [1], [0, 0, 1, 1], [], []>} : vector<128x1600xbf16>, vector<1600x256xbf16>, vector<128x256xf32> -> vector<128x256xf32>
    %c0_284 = arith.constant 0 : index
    %c0_285 = arith.constant 0 : index
    %374 = vector.load %arg7[%c0_284, %c0_285] : memref<128x1xf32, #tpu.memory_space<vmem>>, vector<128x1xf32>
    %375 = vector.broadcast %374 : vector<128x1xf32> to vector<128x256xf32>
    %376 = arith.addf %373, %375 : vector<128x256xf32>
    %cst_286 = arith.constant 0.000000e+00 : f32
    %377 = vector.broadcast %cst_286 : f32 to vector<128x256xf32>
    %378 = arith.maximumf %376, %377 : vector<128x256xf32>
    %379 = tpu.transpose %378, [1, 0] : vector<128x256xf32> -> vector<256x128xf32>
    %cst_287 = arith.constant dense<0.000000e+00> : vector<128xf32>
    %380 = vector.multi_reduction <add>, %379, %cst_287 [0] : vector<256x128xf32> to vector<128xf32>
    %381 = vector.shape_cast %380 : vector<128xf32> to vector<1x128xf32>
    %cst_288 = arith.constant 2.560000e+02 : f32
    %382 = vector.broadcast %cst_288 : f32 to vector<1x128xf32>
    %383 = arith.divf %381, %382 : vector<1x128xf32>
    %c0_289 = arith.constant 0 : index
    %c0_290 = arith.constant 0 : index
    %384 = vector.load %arg8[%c0_289, %c0_290] : memref<128x128xf32, #tpu.memory_space<vmem>>, vector<128x128xf32>
    %cst_291 = arith.constant dense<0.000000e+00> : vector<1x128xf32>
    %385 = tpu.matmul %383, %384, %cst_291 {dimension_numbers = #tpu.dot_dimension_numbers<[1], [0], [0], [1], [0, 0, 1, 1], [], []>} : vector<1x128xf32>, vector<128x128xf32>, vector<1x128xf32> -> vector<1x128xf32>
    %c0_292 = arith.constant 0 : index
    %c0_293 = arith.constant 0 : index
    %386 = vector.load %arg9[%c0_292, %c0_293] : memref<1x128xf32, #tpu.memory_space<vmem>>, vector<1x128xf32>
    %387 = arith.addf %385, %386 : vector<1x128xf32>
    %cst_294 = arith.constant 0.000000e+00 : f32
    %388 = vector.broadcast %cst_294 : f32 to vector<1x128xf32>
    %389 = arith.maximumf %387, %388 : vector<1x128xf32>
    %c0_295 = arith.constant 0 : index
    %c0_296 = arith.constant 0 : index
    %c0_297 = arith.constant 0 : index
    %390 = vector.load %arg10[%c0_295, %c0_296, %c0_297] : memref<1x1x128xf32, #tpu.memory_space<vmem>>, vector<1x1x128xf32>
    %391 = vector.shape_cast %390 : vector<1x1x128xf32> to vector<1x128xf32>
    %392 = vector.shape_cast %389 : vector<1x128xf32> to vector<1x1x128xf32>
    tpu.vector_store %arg10[%c0_295, %c0_296, %c0_297], %392 {strides = array<i32>} : memref<1x1x128xf32, #tpu.memory_space<vmem>>, vector<1x1x128xf32>,
    return
  }
  func.func @transform_0(%arg0: i32) -> (i32, i32, i32, i32) {
    %c0_i32 = arith.constant 0 : i32
    %c0_i32_0 = arith.constant 0 : i32
    %c0_i32_1 = arith.constant 0 : i32
    %c0_i32_2 = arith.constant 0 : i32
    return %arg0, %c0_i32, %c0_i32_0, %c0_i32_1 : i32, i32, i32, i32
  }
  func.func @transform_1(%arg0: i32) -> (i32, i32) {
    %c0_i32 = arith.constant 0 : i32
    %c0_i32_0 = arith.constant 0 : i32
    %c0_i32_1 = arith.constant 0 : i32
    return %c0_i32, %c0_i32_0 : i32, i32
  }
  func.func @transform_2(%arg0: i32) -> (i32, i32) {
    %c0_i32 = arith.constant 0 : i32
    %c0_i32_0 = arith.constant 0 : i32
    %c0_i32_1 = arith.constant 0 : i32
    return %c0_i32, %c0_i32_0 : i32, i32
  }
  func.func @transform_3(%arg0: i32) -> (i32, i32) {
    %c0_i32 = arith.constant 0 : i32
    %c0_i32_0 = arith.constant 0 : i32
    %c0_i32_1 = arith.constant 0 : i32
    return %c0_i32, %c0_i32_0 : i32, i32
  }
  func.func @transform_4(%arg0: i32) -> (i32, i32) {
    %c0_i32 = arith.constant 0 : i32
    %c0_i32_0 = arith.constant 0 : i32
    %c0_i32_1 = arith.constant 0 : i32
    return %c0_i32, %c0_i32_0 : i32, i32
  }
  func.func @transform_5(%arg0: i32) -> (i32, i32) {
    %c0_i32 = arith.constant 0 : i32
    %c0_i32_0 = arith.constant 0 : i32
    %c0_i32_1 = arith.constant 0 : i32
    return %c0_i32, %c0_i32_0 : i32, i32
  }
  func.func @transform_6(%arg0: i32) -> (i32, i32) {
    %c0_i32 = arith.constant 0 : i32
    %c0_i32_0 = arith.constant 0 : i32
    %c0_i32_1 = arith.constant 0 : i32
    return %c0_i32, %c0_i32_0 : i32, i32
  }
  func.func @transform_7(%arg0: i32) -> (i32, i32) {
    %c0_i32 = arith.constant 0 : i32
    %c0_i32_0 = arith.constant 0 : i32
    %c0_i32_1 = arith.constant 0 : i32
    return %c0_i32, %c0_i32_0 : i32, i32
  }
  func.func @transform_8(%arg0: i32) -> (i32, i32) {
    %c0_i32 = arith.constant 0 : i32
    %c0_i32_0 = arith.constant 0 : i32
    %c0_i32_1 = arith.constant 0 : i32
    return %c0_i32, %c0_i32_0 : i32, i32
  }
  func.func @transform_9(%arg0: i32) -> (i32, i32, i32) {
    %c0_i32 = arith.constant 0 : i32
    %c0_i32_0 = arith.constant 0 : i32
    %c0_i32_1 = arith.constant 0 : i32
    return %arg0, %c0_i32, %c0_i32_0 : i32, i32, i32
  }
}

</mosaic_0001>

<bundles_post_ra>
// kernel: cnn_encoder_forward.1
= control target key start
LH: loop header
LB: loop body
LE: loop exit
PB: predicated region body
PF: predicated region fallthrough
CT: control target
= control target key end

     0   :  { %s16144_s0 = inlined_call_operand.vmem [shape: f32[2,1,4,256], index: 0, kind: input, shape index: {}]   ;;  %s16145_s1 = inlined_call_operand.vmem [shape: bf16[32,100], index: 1, kind: input, shape index: {}]   ;;  %s16146_s2 = inlined_call_operand.vmem [shape: f32[32,1], index: 2, kind: input, shape index: {}]   ;;  %s16147_s3 = inlined_call_operand.vmem [shape: bf16[64,800], index: 3, kind: input, shape index: {}]   ;;  %s16148_s4 = inlined_call_operand.vmem [shape: f32[64,1], index: 4, kind: input, shape index: {}]   ;;  %s16149_s5 = inlined_call_operand.vmem [shape: bf16[128,1600], index: 5, kind: input, shape index: {}]   ;;  %s16150_s6 = inlined_call_operand.vmem [shape: f32[128,1], index: 6, kind: input, shape index: {}]   ;;  %s16151_s7 = inlined_call_operand.vmem [shape: f32[128,128], index: 7, kind: input, shape index: {}]   ;;  %s16152_s8 = inlined_call_operand.vmem [shape: f32[1,128], index: 8, kind: input, shape index: {}]   ;;  %s16153_s9 = inlined_call_operand.hbm [shape: f32[2,1,128], index: 9, kind: output, shape index: {}]  }
   0x1   :  { %16330 = sst [smem:[#allocation110_spill]] %s16144_s0 }
   0x2   :  { %16331 = sst [smem:[#allocation111_spill]] %s16145_s1 }
   0x3   :  { %16332 = sst [smem:[#allocation112_spill]] %s16146_s2 }
   0x4   :  { %16333 = sst [smem:[#allocation113_spill]] %s16148_s4 }
   0x5   :  { %16334 = sst [smem:[#allocation114_spill]] %s16150_s6 }
   0x6   :  { %16335 = sst [smem:[#allocation115_spill]] %s16151_s7 }
   0x7   :  { %16336 = sst [smem:[#allocation116_spill]] %s16152_s8 }
   0x8   :  { %16337 = sst [smem:[#allocation117_spill]] %s16153_s9 }
   0x9   :  { %14 = vsyncpa [#allocation7], 0 }
   0xa   :  { %16 = vsyncpa [#allocation7 + $0x1], 0  ;;  %s11660_s30 = smov 0   ;;  %s11662_s10 = smov 0  }
   0xb   :  { %s11664_s11 = smov 0   ;;  %s11666_s12 = smov 0  }
   0xc LB: > { %16338 = sst [smem:[#allocation9_spill]] %s11567_s30  ;;  %s11681_s13 = sadd.s32 4294967295, %s11579_s12   ;;  %s11579_s12 = sphi %s11666_s12, %s16885_s12   ;;  %s11575_s11 = sphi %s11664_s11, %s16888_s11   ;;  %s11571_s10 = sphi %s11662_s10, %s16887_s10   ;;  %s11567_s30 = sphi %s11660_s30, %s16886_s30  }
   0xd   : > { %16339 = sst [smem:[#allocation10_spill]] %s11571_s10  ;;  %s10422_s14 = sadd.s32 4294967294, %s11579_s12  }
   0xe   : > { %16340 = sst [smem:[#allocation11_spill]] %s11575_s11  ;;  %s11685_s15 = sadd.s32 1, %s11579_s12  }
   0xf   : > { %16341 = sst [smem:[#allocation12_spill]] %s11579_s12  ;;  %s223_s16 = sadd.s32 1, %s11575_s11 }
  0x10   : > { %16342 = sst [smem:[#allocation13_spill]] %s11681_s13  ;;  %s220_s17 = ssub.s32 %s11579_s12, %s11685_s15 }
  0x11   : > { %16343 = sst [smem:[#allocation14_spill]] %s11685_s15  ;;  %p233_p0 = scmp.ne.s32.totalorder %s11575_s11, %s11571_s10 }
  0x12   : > { %p221_p1 = scmp.eq.s32.totalorder %s220_s17, 0  ;;  %p234_p2 = scmp.eq.s32.totalorder %s11681_s13, 1 }
  0x13   : > { %p239_p3 = scmp.ne.s32.totalorder %s11571_s10, %s11567_s30  ;;  %p240_p4 = scmp.eq.s32.totalorder %s10422_s14, 1 }
  0x14   : > { %s11696_s18 = scalar_select %p221_p1, %s11575_s11, %s223_s16  }
  0x15   : > { %p11698_p5 = por %p234_p2, %p233_p0  ;;  %p11702_p6 = por %p240_p4, %p239_p3 }
  0x16   : > { %16344 = sst [smem:[#allocation15_spill]] %s11696_s18  ;;  %p10425_p7 = scmp.ge.s32.totalorder %s11579_s12, 1 }
  0x17   : > { %s16345_s19 = scalar_select %p11698_p5, 1, 0 }
  0x18   : > { %s16347_s20 = scalar_select %p11702_p6, 1, 0 }
  0x19   : > { %16346 = sst [smem:[#allocation16_spill]] %s16345_s19  ;;  %p290_p8 = scmp.lt.s32.totalorder %s11579_s12, 3 }
  0x1a   : > { %16348 = sst [smem:[#allocation17_spill]] %s16347_s20 }
  0x1b   : > { %p291_p9 = pnand %p10425_p7, %p290_p8 }
  0x1d   : > { %294 = sbr.rel (%p291_p9) target bundleno = 2806 (0xaf6), region = 56 }
  0x22   : > { %v331_v0 = vlaneseq  ;;  %v11581_v1 = vmov 1983009808   ;;  %v16226_v3 = vmov 0   ;;  %v16224_v17 = vmov 0.0   ;;  %p325_p10 = scmp.lt.s32.totalorder %s11681_s13, 1  ;;  %s16349_s0 = sld [smem:[#allocation110_spill]] }
  0x23   : > { %v463_v2 = vunpack.c.l.s4 %v11581_v1  ;;  %415 = vst [vmem:[#allocation3 + $0x6] sm:$0x3] %v16226_v3  ;;  %414 = vst [vmem:[#allocation3] sm:$0x3] %v16226_v3  ;;  %11062 = vset.pattern.permute.xlu1 %v16226_v3  ;;  %11061 = vset.pattern.permute.xlu0 %v16226_v3  ;;  %s16156_s26 = smov 34   ;;  %s16154_s27 = smov 31  }
  0x24   : > { %416 = vst [vmem:[#allocation4] sm:$0xf] %v16226_v3  ;;  %417 = vst [vmem:[#allocation4 + $0x10] sm:$0xf] %v16226_v3  ;;  %v332_v4 = vand.u32 127, %v331_v0  ;;  %1464 = vmatprep.mubr.bf16.mxu1 %v16226_v3  ;;  %v466_v6 = vshrl.u32 %v331_v0, 7 }
  0x25   : > { %418 = vst [vmem:[#allocation4 + $0x20] sm:$0xf] %v16226_v3  ;;  %419 = vst [vmem:[#allocation4 + $0x30] sm:$0xf] %v16226_v3  ;;  %v464_v5 = vunpack.c.0.s8 %v463_v2  ;;  %s326_s21 = scalar_select %p325_p10, %s11681_s13, 1  ;;  %vm16190_vm8 = vcmask 277504  }
  0x26   : > { %420 = vst [vmem:[#allocation4 + $0xc] sm:$0xf] %v16226_v3  ;;  %421 = vst [vmem:[#allocation4 + $0x1c] sm:$0xf] %v16226_v3  ;;  %v333_v7 = vadd.s32 128, %v332_v4  ;;  %v338_v8 = vand.u32 15, %v332_v4 }
  0x27   : > { %422 = vst [vmem:[#allocation4 + $0x2c] sm:$0xf] %v16226_v3  ;;  %423 = vst [vmem:[#allocation4 + $0x3c] sm:$0xf] %v16226_v3  ;;  %v11737_v13 = vsub.s32 %v464_v5, %v466_v6  ;;  %s10925_s22 = sshll.u32 %s326_s21, 3  ;;  %s16166_s28 = smov 30  }
  0x28   : > { %424 = vst [vmem:[#allocation5] sm:$0xf] %v16226_v3  ;;  %425 = vst [vmem:[#allocation5 + $0x10] sm:$0xf] %v16226_v3  ;;  %v345_v9 = vand.u32 15, %v333_v7  ;;  %v400_v10 = vadd.s32 2, %v338_v8  ;;  %s329_s25 = scalar_lea.vmem %s16349_s0, %s10925_s22 }
  0x29   : > { %426 = vst [vmem:[#allocation5 + $0x20] sm:$0xf] %v16226_v3  ;;  %427 = vst [vmem:[#allocation5 + $0x30] sm:$0xf] %v16226_v3  ;;  %v372_v11 = vadd.s32 4294967295, %v338_v8  ;;  %v358_v12 = vadd.s32 4294967294, %v338_v8 }
  0x2a   : > { %428 = vst [vmem:[#allocation5 + $0x40] sm:$0xf] %v16226_v3  ;;  %429 = vst [vmem:[#allocation5 + $0x50] sm:$0xf] %v16226_v3  ;;  %v386_v14 = vadd.s32 1, %v338_v8  ;;  %v401_v15 = vadd.s32 2, %v345_v9 }
  0x2b   : > { %430 = vst [vmem:[#allocation5 + $0x60] sm:$0xf] %v16226_v3  ;;  %431 = vst [vmem:[#allocation5 + $0x70] sm:$0xf] %v16226_v3  ;;  %vm404_vm0 = vcmp.lt.s32.totalorder %v400_v10, 16  ;;  %v373_v16 = vadd.s32 4294967295, %v345_v9 }
  0x2c   : > { %432 = vst [vmem:[#allocation5 + $0xc] sm:$0xf] %v16226_v3  ;;  %433 = vst [vmem:[#allocation5 + $0x1c] sm:$0xf] %v16226_v3  ;;  %vm374_vm1 = vcmp.ge.s32.totalorder %v372_v11, 0  ;;  %v10434_v18 = vsel %vm404_vm0, 1.0, %v16224_v17 }
  0x2d   : > { %434 = vst [vmem:[#allocation5 + $0x2c] sm:$0xf] %v16226_v3  ;;  %435 = vst [vmem:[#allocation5 + $0x3c] sm:$0xf] %v16226_v3  ;;  %v10430_v19 = vsel %vm374_vm1, 1.0, %v16224_v17  ;;  %v359_v20 = vadd.s32 4294967294, %v345_v9 }
  0x2e   : > { %436 = vst [vmem:[#allocation5 + $0x4c] sm:$0xf] %v16226_v3  ;;  %437 = vst [vmem:[#allocation5 + $0x5c] sm:$0xf] %v16226_v3  ;;  %vm360_vm2 = vcmp.ge.s32.totalorder %v358_v12, 0  ;;  %vm405_vm3 = vcmp.lt.s32.totalorder %v401_v15, 16 }
  0x2f   : > { %438 = vst [vmem:[#allocation5 + $0x6c] sm:$0xf] %v16226_v3  ;;  %439 = vst [vmem:[#allocation5 + $0x7c] sm:$0xf] %v16226_v3  ;;  %vm375_vm4 = vcmp.ge.s32.totalorder %v373_v16, 0  ;;  %v10428_v21 = vsel %vm360_vm2, 1.0, %v16224_v17 }
  0x30   : > { %v387_v22 = vadd.s32 1, %v345_v9  ;;  %v10435_v23 = vsel %vm405_vm3, 1.0, %v16224_v17  ;;  %v10431_v24 = vsel %vm375_vm4, 1.0, %v16224_v17  ;;  %vm361_vm5 = vcmp.ge.s32.totalorder %v359_v20, 0  ;;  %v440_v36 = vld [vmem:[%s329_s25] sm:$0xff]  ;;  %s16158_s29 = smov 33  }
  0x31   : > { %vm390_vm6 = vcmp.lt.s32.totalorder %v386_v14, 16  ;;  %v11745_v25 = vpack.c.bf16 %v10435_v23, %v10434_v18  ;;  %v11747_v26 = vpack.c.bf16 %v10431_v24, %v10430_v19  ;;  %v10429_v27 = vsel %vm361_vm5, 1.0, %v16224_v17  ;;  %s16174_s14 = smov 15   ;;  %s16162_s16 = smov 17  }
  0x32   : > { %vm391_vm7 = vcmp.lt.s32.totalorder %v387_v22, 16  ;;  %v11751_v28 = vpack.c.bf16 %v10429_v27, %v10428_v21  ;;  %v10432_v29 = vsel %vm390_vm6, 1.0, %v16224_v17  ;;  %v442_v37 = vcombine.high %v440_v36, %v440_v36  ;;  %s16160_s17 = smov 18   ;;  %s16164_s21 = smov 1  }
  0x33   : > { %v10433_v30 = vsel %vm391_vm7, 1.0, %v16224_v17  ;;  %v632_v31 = vrot.slane %v11745_v25, %v11737_v13  ;;  %v514_v32 = vrot.slane %v11747_v26, %v11737_v13  ;;  %s16170_s22 = smov 2   ;;  %s16168_s23 = smov 14   ;;  %vm16195_vm9 = vcmask 252928  }
  0x34   : > { %v11759_v33 = vpack.c.bf16 %v10433_v30, %v10432_v29  ;;  %v468_v34 = vrot.slane %v11751_v28, %v11737_v13  ;;  %v10436_v38 = vpack.c.bf16 %v442_v37, %v440_v36  ;;  %s16193_s24 = smov 113   ;;  %s16172_s25 = smov 114   ;;  %vm16206_vm10 = vcmask 244736  }
  0x35   : > { %1270 = vrot.lane.b32.xlu0 %v632_v31, %s16156_s26  ;;  %1176 = vrot.lane.b32.xlu1 %v514_v32, %s16154_s27  ;;  %s16180_s27 = smov 126   ;;  %s16178_s26 = smov 127   ;;  %vm16201_vm11 = vcmask 269312   ;;  %vm16222_vm12 = vcmask 121856   ;;  %vm16196_vm13 = vcmask 138240   ;;  %vm16207_vm14 = vcmask 146432  }
  0x36   : > { %v587_v35 = vrot.slane %v11759_v33, %v11737_v13  ;;  %10437 = vst.sshfl [vmem:[#allocation3 + $0x2] sm:$0x33 pattern:$0x76325410] %v10436_v38  ;;  %s16350_s2 = sld [smem:[#allocation112_spill]]  ;;  %vm16320_vm15 = vcmask 7168  }
  0x37   : > { %vm16208_vm0 = vcmask 15360   ;;  %vm831_vm1 = vcmask 113664   ;;  %vm769_vm2 = vcmask 924672   ;;  %vm804_vm3 = vcmask 932864   ;;  %s16363_s0 = smov 33   ;;  %s16364_s18 = smov 34  }
  0x38   : > { %vm839_vm4 = vcmask 1031168   ;;  %vm874_vm5 = vcmask 1039360   ;;  %vm636_vm6 = vcmask 801792   ;;  %vm671_vm7 = vcmask 900096   ;;  %s16365_s11 = smov 31   ;;  %s16366_s15 = smov 97  }
  0x39   : > { %1143 = vrot.lane.b32.xlu0 %v468_v34, %s16166_s28  ;;  %1237 = vrot.lane.b32.xlu1 %v587_v35, %s16158_s29  ;;  %s16197_s29 = smov 98   ;;  %s16199_s28 = smov 95  }
  0x3a   : > { %s16367_s20 = smov 94   ;;  %s16368_s30 = smov 95  }
  0x3b   : > { %s16369_s12 = smov 98   ;;  %s16370_s9 = smov 113  }
  0x3c   : > { %v1322_v55 = vld [vmem:[%s16350_s2 + $0x18] sm:$0xff]  ;;  %v1321_v56 = vld [vmem:[%s16350_s2 + $0x10] sm:$0xff]  ;;  %v1319_v57 = vld [vmem:[%s16350_s2] sm:$0xff]  ;;  %s16378_s1 = sld [smem:[#allocation111_spill]]  ;;  %s16385_s13 = smov 96  }
  0x3d   : > { %1016 = vrot.lane.b32.xlu0 %v514_v32, %s16174_s14  ;;  %1077 = vrot.lane.b32.xlu1 %v587_v35, %s16162_s16  ;;  %v1208_v39 = vld [vmem:[#allocation3 + $0x2] sm:$0x3f]  ;;  %s16188_s16 = smov 111   ;;  %s16186_s14 = smov 16  }
  0x3e   : > { %v1210_v40 = vcombine.high %v1208_v39, %v1208_v39  ;;  %v1048_v41 = vld [vmem:[#allocation3 + $0x2] sm:$0x3f]  ;;  %v1217_v43 = vrot.slane %v1208_v39, %v11737_v13  ;;  %s16396_s8 = smov 32   ;;  %s16399_s19 = smov 16  }
  0x3f   : > { %v1050_v44 = vcombine.low %v1048_v41, %v1048_v41  ;;  %v737_v45 = vld [vmem:[#allocation3] sm:$0x3f]  ;;  %v1064_v46 = vrot.slane %v1048_v41, %v11737_v13  ;;  %s16474_s4 = sld [smem:[#allocation113_spill]]  ;;  %s16674_s6 = smov 95  }
  0x40   : > { %v1224_v42 = vrot.slane %v1210_v40, %v11737_v13  ;;  %v739_v48 = vcombine.low %v737_v45, %v737_v45  ;;  %v549_v49 = vld [vmem:[#allocation3] sm:$0x3f]  ;;  %v753_v50 = vrot.slane %v737_v45, %v11737_v13  ;;  %s16877_s7 = sld [smem:[#allocation10_spill]] }
  0x41   : > { %1110 = vrot.lane.b32.xlu0 %v632_v31, %s16160_s17  ;;  %917 = vrot.lane.b32.xlu1 %v587_v35, %s16164_s21  ;;  %s16184_s17 = smov 110   ;;  %s16202_s21 = smov 94   ;;  %v1057_v47 = vrot.slane %v1050_v44, %v11737_v13  ;;  %v551_v52 = vcombine.high %v549_v49, %v549_v49  ;;  %v558_v54 = vrot.slane %v549_v49, %v11737_v13  ;;  %v1269_v60 = vld [vmem:[#allocation3 + $0x2] sm:$0x3f] }
  0x42   : > { %v746_v51 = vrot.slane %v739_v48, %v11737_v13  ;;  %v1175_v62 = vld [vmem:[#allocation3 + $0x2] sm:$0x3f] }
  0x43   : > { %v565_v53 = vrot.slane %v551_v52, %v11737_v13  ;;  %v1142_v7 = vld [vmem:[#allocation3 + $0x2] sm:$0x3f] }
  0x44   : > { %v1236_v9 = vld [vmem:[#allocation3 + $0x2] sm:$0x3f] }
  0x45   : > { %950 = vrot.lane.b32.xlu0 %v632_v31, %s16170_s22  ;;  %983 = vrot.lane.b32.xlu1 %v468_v34, %s16168_s23  ;;  %s16204_s23 = smov 97   ;;  %s16176_s22 = smov 96   ;;  %v1015_v21 = vld [vmem:[#allocation3 + $0x2] sm:$0x3f] }
  0x46   : > { %v1076_v30 = vld [vmem:[#allocation3 + $0x2] sm:$0x3f] }
  0x47   : > { %v1109_v36 = vld [vmem:[#allocation3 + $0x2] sm:$0x3f] }
  0x49   : > { %766 = vrot.lane.b32.xlu0 %v587_v35, %s16193_s24  ;;  %801 = vrot.lane.b32.xlu1 %v632_v31, %s16172_s25  ;;  %s16182_s25 = smov 112  }
  0x4d   : > { %836 = vrot.lane.b32.xlu0 %v468_v34, %s16180_s27  ;;  %871 = vrot.lane.b32.xlu1 %v514_v32, %s16178_s26  ;;  %s16351_s26 = smov 111   ;;  %s16352_s27 = smov 110  }
  0x51   : > { %633 = vrot.lane.b32.xlu0 %v632_v31, %s16197_s29  ;;  %668 = vrot.lane.b32.xlu1 %v468_v34, %s16184_s17  ;;  %s16191_s17 = smov 32  }
  0x55   : > { %703 = vrot.lane.b32.xlu0 %v514_v32, %s16188_s16  ;;  %469 = vrot.lane.b32.xlu1 %v468_v34, %s16202_s21  ;;  %s16354_s16 = smov 127  }
  0x59   : > { %515 = vrot.lane.b32.xlu0 %v514_v32, %s16199_s28  ;;  %588 = vrot.lane.b32.xlu1 %v587_v35, %s16204_s23 }
  0x5d   : > { %1227 = vrot.lane.b32.xlu1 %v1224_v42, %s16176_s22  ;;  %1225 = vrot.lane.b32.xlu0 %v1217_v43, %s16176_s22  ;;  %v916_v42 = vld [vmem:[#allocation3 + $0x2] sm:$0x3f]  ;;  %s16355_s22 = smov 15  }
  0x61   : > { %1067 = vrot.lane.b32.xlu1 %v1064_v46, %s16182_s25  ;;  %1065 = vrot.lane.b32.xlu0 %v1057_v47, %s16182_s25  ;;  %v949_v47 = vld [vmem:[#allocation3 + $0x2] sm:$0x3f]  ;;  %s16356_s25 = smov 114  }
  0x65   : > { %756 = vrot.lane.b32.xlu1 %v753_v50, %s16186_s14  ;;  %754 = vrot.lane.b32.xlu0 %v746_v51, %s16186_s14  ;;  %s16353_s14 = smov 126  }
  0x69   : > { %568 = vrot.lane.b32.xlu1 %v565_v53, %s16191_s17  ;;  %566 = vrot.lane.b32.xlu0 %v558_v54, %s16191_s17  ;;  %v982_v54 = vld [vmem:[#allocation3 + $0x2] sm:$0x3f]  ;;  %s16357_s17 = smov 2  }
  0x6d   : > { %1340 = vperm.xlu1 %11062, %v1322_v55   ;;  %1335 = vperm.xlu0 %11061, %v1321_v56  }
  0x71   : > { %1325 = vperm.xlu1 %11062, %v1319_v57  }
  0xa7   : > { %v1271_v58 = vpop.permute.xlu0 %1270  ;;  %v1177_v59 = vpop.permute.xlu1 %1176 }
  0xa8   : > { %v1272_v61 = vrot.slane %v1271_v58, 6  ;;  %v1178_v63 = vrot.slane %v1177_v59, 6 }
  0xaa   : > { %v1273_v0 = vsel %vm16190_vm8, %v1272_v61, %v1271_v58  ;;  %v1179_v1 = vsel %vm16195_vm9, %v1178_v63, %v1177_v59  ;;  %v765_v59 = vld [vmem:[#allocation3] sm:$0x3f]  ;;  %vm706_vm8 = vcmask 908288   ;;  %vm472_vm9 = vcmask 769024  }
  0xab   : > { %v11815_v2 = vmul.bf16 %v1273_v0, %v1269_v60  ;;  %v11817_v4 = vmul.bf16 %v1179_v1, %v1175_v62  ;;  %v1144_v5 = vpop.permute.xlu0 %1143  ;;  %v1238_v6 = vpop.permute.xlu1 %1237 }
  0xac   : > { %v1145_v8 = vrot.slane %v1144_v5, 6  ;;  %v1239_v10 = vrot.slane %v1238_v6, 6 }
  0xad   : > { %v1284_v11 = vrot.slane %v11815_v2, %v11737_v13  ;;  %v1197_v12 = vrot.slane %v11817_v4, %v11737_v13 }
  0xae   : > { %v1146_v14 = vsel %vm16206_vm10, %v1145_v8, %v1144_v5  ;;  %v1240_v15 = vsel %vm16201_vm11, %v1239_v10, %v1238_v6  ;;  %v800_v5 = vld [vmem:[#allocation3] sm:$0x3f]  ;;  %vm591_vm11 = vcmask 793600   ;;  %vm498_vm10 = vcmask 1043456  }
  0xaf   : > { %v11825_v16 = vmul.bf16 %v1146_v14, %v1142_v7  ;;  %v11827_v18 = vmul.bf16 %v1240_v15, %v1236_v9  ;;  %v1017_v19 = vpop.permute.xlu0 %1016  ;;  %1292 = vrot.lane.b32.xlu0 %v1284_v11, %s16202_s21  ;;  %v1078_v20 = vpop.permute.xlu1 %1077  ;;  %1200 = vrot.lane.b32.xlu1 %v1197_v12, %s16204_s23  ;;  %v835_v10 = vld [vmem:[#allocation3] sm:$0x3f]  ;;  %s16361_s21 = smov 17   ;;  %s16362_s23 = smov 18  }
  0xb0   : > { %v1018_v22 = vrot.slane %v1017_v19, 6  ;;  %v1079_v23 = vrot.slane %v1078_v20, 6 }
  0xb1   : > { %v1157_v24 = vrot.slane %v11825_v16, %v11737_v13  ;;  %v1258_v27 = vrot.slane %v11827_v18, %v11737_v13 }
  0xb2   : > { %v1019_v29 = vsel %vm16222_vm12, %v1018_v22, %v1017_v19  ;;  %v1080_v31 = vsel %vm16196_vm13, %v1079_v23, %v1078_v20  ;;  %vm518_vm13 = vcmask 777216  }
  0xb3   : > { %v11837_v32 = vmul.bf16 %v1019_v29, %v1015_v21  ;;  %v1111_v34 = vpop.permute.xlu0 %1110  ;;  %1165 = vrot.lane.b32.xlu0 %v1157_v24, %s16197_s29  ;;  %v918_v35 = vpop.permute.xlu1 %917  ;;  %1261 = vrot.lane.b32.xlu1 %v1258_v27, %s16199_s28  ;;  %v11841_v39 = vmul.bf16 %v1080_v31, %v1076_v30  ;;  %v870_v21 = vld [vmem:[#allocation3] sm:$0x3f]  ;;  %s16359_s29 = smov 30   ;;  %s16360_s28 = smov 1  }
  0xb4   : > { %v1112_v37 = vrot.slane %v1111_v34, 6  ;;  %v919_v38 = vrot.slane %v918_v35, 6  ;;  %v622_v29 = vld [vmem:[#allocation3] sm:$0x3f] }
  0xb5   : > { %v1030_v40 = vrot.slane %v11837_v32, %v11737_v13  ;;  %v1091_v51 = vrot.slane %v11841_v39, %v11737_v13 }
  0xb6   : > { %v1113_v41 = vsel %vm16207_vm14, %v1112_v37, %v1111_v34  ;;  %v920_v43 = vsel %vm16320_vm15, %v919_v38, %v918_v35  ;;  %v667_v38 = vld [vmem:[#allocation3] sm:$0x3f]  ;;  %vm16212_vm14 = vcmask 785408  }
  0xb7   : > { %v11847_v44 = vmul.bf16 %v1113_v41, %v1109_v36  ;;  %v951_v45 = vpop.permute.xlu0 %950  ;;  %1038 = vrot.lane.b32.xlu0 %v1030_v40, %s16193_s24  ;;  %v984_v46 = vpop.permute.xlu1 %983  ;;  %v11850_v50 = vmul.bf16 %v920_v43, %v916_v42  ;;  %s16358_s24 = smov 14  }
  0xb8   : > { %v952_v48 = vrot.slane %v951_v45, 6  ;;  %v985_v49 = vrot.slane %v984_v46, 6 }
  0xb9   : > { %v1131_v52 = vrot.slane %v11847_v44, %v11737_v13  ;;  %v938_v0 = vrot.slane %v11850_v50, %v11737_v13 }
  0xba   : > { %v953_v53 = vsel %vm16208_vm0, %v952_v48, %v951_v45  ;;  %v986_v55 = vsel %vm831_vm1, %v985_v49, %v984_v46  ;;  %v702_v45 = vld [vmem:[#allocation3] sm:$0x3f]  ;;  %vm16215_vm0 = vcmask 916480  }
  0xbb   : > { %v11858_v56 = vmul.bf16 %v953_v53, %v949_v47  ;;  %v767_v57 = vpop.permute.xlu0 %766  ;;  %1099 = vrot.lane.b32.xlu0 %v1091_v51, %s16351_s26  ;;  %1134 = vrot.lane.b32.xlu1 %v1131_v52, %s16352_s27  ;;  %v802_v58 = vpop.permute.xlu1 %801  ;;  %v11862_v62 = vmul.bf16 %v986_v55, %v982_v54  ;;  %v458_v53 = vld [vmem:[#allocation3] sm:$0x3f] }
  0xbc   : > { %v768_v60 = vrot.slane %v767_v57, 6  ;;  %v803_v61 = vrot.slane %v802_v58, 6 }
  0xbd   : > { %v964_v63 = vrot.slane %v11858_v56, %v11737_v13  ;;  %v1004_v19 = vrot.slane %v11862_v62, %v11737_v13 }
  0xbe   : > { %v770_v1 = vsel %vm769_vm2, %v768_v60, %v767_v57  ;;  %v805_v6 = vsel %vm804_vm3, %v803_v61, %v802_v58 }
  0xbf   : > { %v11870_v7 = vmul.bf16 %v770_v1, %v765_v59  ;;  %v837_v8 = vpop.permute.xlu0 %836  ;;  %972 = vrot.lane.b32.xlu0 %v964_v63, %s16353_s14  ;;  %941 = vrot.lane.b32.xlu1 %v938_v0, %s16354_s16  ;;  %v872_v9 = vpop.permute.xlu1 %871  ;;  %v11874_v14 = vmul.bf16 %v805_v6, %v800_v5  ;;  %v504_v59 = vld [vmem:[#allocation3] sm:$0x3f] }
  0xc0   : > { %v838_v11 = vrot.slane %v837_v8, 6  ;;  %v873_v12 = vrot.slane %v872_v9, 6  ;;  %v577_v6 = vld [vmem:[#allocation3] sm:$0x3f] }
  0xc1   : > { %v781_v15 = vrot.slane %v11870_v7, %v11737_v13  ;;  %v823_v36 = vrot.slane %v11874_v14, %v11737_v13 }
  0xc2   : > { %v840_v20 = vsel %vm839_vm4, %v838_v11, %v837_v8  ;;  %v875_v22 = vsel %vm874_vm5, %v873_v12, %v872_v9 }
  0xc3   : > { %v11882_v23 = vmul.bf16 %v840_v20, %v835_v10  ;;  %v634_v24 = vpop.permute.xlu0 %633  ;;  %789 = vrot.lane.b32.xlu0 %v781_v15, %s16355_s22  ;;  %1007 = vrot.lane.b32.xlu1 %v1004_v19, %s16356_s25  ;;  %v669_v27 = vpop.permute.xlu1 %668  ;;  %v11886_v34 = vmul.bf16 %v875_v22, %v870_v21  ;;  %v1183_v22 = vcombine.low %v11817_v4, %v11817_v4 }
  0xc4   : > { %v635_v30 = vrot.slane %v634_v24, 6  ;;  %v670_v31 = vrot.slane %v669_v27, 6  ;;  %v1277_v4 = vcombine.high %v11815_v2, %v11815_v2 }
  0xc5   : > { %v851_v35 = vrot.slane %v11882_v23, %v11737_v13  ;;  %v893_v51 = vrot.slane %v11886_v34, %v11737_v13 }
  0xc6   : > { %v637_v37 = vsel %vm636_vm6, %v635_v30, %v634_v24  ;;  %v672_v40 = vsel %vm671_vm7, %v670_v31, %v669_v27 }
  0xc7   : > { %v11894_v41 = vmul.bf16 %v637_v37, %v622_v29  ;;  %v704_v42 = vpop.permute.xlu0 %703  ;;  %859 = vrot.lane.b32.xlu0 %v851_v35, %s16357_s17  ;;  %826 = vrot.lane.b32.xlu1 %v823_v36, %s16358_s24  ;;  %v470_v43 = vpop.permute.xlu1 %469  ;;  %v11898_v48 = vmul.bf16 %v672_v40, %v667_v38  ;;  %v1190_v37 = vrot.slane %v1183_v22, %v11737_v13 }
  0xc8   : > { %v705_v46 = vrot.slane %v704_v42, 6  ;;  %v471_v47 = vrot.slane %v470_v43, 6  ;;  %v1244_v38 = vcombine.low %v11827_v18, %v11827_v18  ;;  %v1150_v18 = vcombine.high %v11825_v16, %v11825_v16 }
  0xc9   : > { %v648_v49 = vrot.slane %v11894_v41, %v11737_v13  ;;  %v690_v1 = vrot.slane %v11898_v48, %v11737_v13  ;;  %v844_v22 = vcombine.high %v11882_v23, %v11882_v23 }
  0xca   : > { %v707_v52 = vsel %vm706_vm8, %v705_v46, %v704_v42  ;;  %v473_v54 = vsel %vm472_vm9, %v471_v47, %v470_v43  ;;  %v1251_v2 = vrot.slane %v1244_v38, %v11737_v13  ;;  %v1164_v16 = vrot.slane %v1150_v18, %v11737_v13 }
  0xcb   : > { %v11906_v55 = vmul.bf16 %v707_v52, %v702_v45  ;;  %v516_v57 = vpop.permute.xlu0 %515  ;;  %656 = vrot.lane.b32.xlu0 %v648_v49, %s16359_s29  ;;  %896 = vrot.lane.b32.xlu1 %v893_v51, %s16360_s28  ;;  %v589_v58 = vpop.permute.xlu1 %588  ;;  %v11910_v63 = vmul.bf16 %v473_v54, %v458_v53  ;;  %v1291_v49 = vrot.slane %v1277_v4, %v11737_v13  ;;  %v10442_v53 = vld.sshfl [vmem:[#allocation3 + $0x2] sm:$0x33 pattern:$0x76325410] }
  0xcc   : > { %v517_v60 = vrot.slane %v516_v57, 6  ;;  %v590_v61 = vrot.slane %v589_v58, 6  ;;  %v1117_v51 = vcombine.low %v11847_v44, %v11847_v44  ;;  %915 = vst [vmem:[#allocation2 + $0x440] sm:$0x33] %v10442_v53 }
  0xcd   : > { %v718_v0 = vrot.slane %v11906_v55, %v11737_v13  ;;  %v484_v21 = vrot.slane %v11910_v63, %v11737_v13 }
  0xce   : > { %v519_v5 = vsel %vm518_vm13, %v517_v60, %v516_v57  ;;  %v592_v8 = vsel %vm591_vm11, %v590_v61, %v589_v58  ;;  %v1124_v44 = vrot.slane %v1117_v51, %v11737_v13  ;;  %v1023_v61 = vcombine.high %v11837_v32, %v11837_v32 }
  0xcf   : > { %v11918_v9 = vmul.bf16 %v519_v5, %v504_v59  ;;  %726 = vrot.lane.b32.xlu0 %v718_v0, %s16361_s21  ;;  %693 = vrot.lane.b32.xlu1 %v690_v1, %s16362_s23  ;;  %v1226_v10 = vpop.permute.xlu0 %1225  ;;  %v1228_v11 = vpop.permute.xlu1 %1227  ;;  %v11922_v19 = vmul.bf16 %v592_v8, %v577_v6  ;;  %v924_v0 = vcombine.low %v11850_v50, %v11850_v50 }
  0xd0   : > { %v1229_v12 = vrot.slane %v1226_v10, 4  ;;  %v1230_v15 = vrot.slane %v1228_v11, 4  ;;  %v1037_v6 = vrot.slane %v1023_v61, %v11737_v13  ;;  %v990_v32 = vcombine.low %v11862_v62, %v11862_v62 }
  0xd1   : > { %v537_v20 = vrot.slane %v11918_v9, %v11737_v13  ;;  %v610_v36 = vrot.slane %v11922_v19, %v11737_v13  ;;  %v931_v8 = vrot.slane %v924_v0, %v11737_v13 }
  0xd2   : > { %v1231_v24 = vsel %vm498_vm10, %v1229_v12, %v1230_v15  ;;  %v997_v11 = vrot.slane %v990_v32, %v11737_v13  ;;  %v957_v12 = vcombine.high %v11858_v56, %v11858_v56  ;;  %v809_v15 = vcombine.low %v11874_v14, %v11874_v14 }
  0xd3   : > { %540 = vrot.lane.b32.xlu1 %v537_v20, %s16363_s0  ;;  %492 = vrot.lane.b32.xlu0 %v484_v21, %s16364_s18  ;;  %v1233_v27 = vsel %vm16212_vm14, %v1226_v10, %v1231_v24  ;;  %v1068_v29 = vpop.permute.xlu1 %1067  ;;  %v1066_v30 = vpop.permute.xlu0 %1065  ;;  %vm16220_vm14 = vcmask 130048   ;;  %v1084_v10 = vcombine.high %v11841_v39, %v11841_v39  ;;  %v774_v20 = vcombine.high %v11870_v7, %v11870_v7 }
  0xd4   : > { %1235 = vst [vmem:[#allocation2 + $0x318] sm:$0x33] %v1233_v27  ;;  %v1070_v31 = vrot.slane %v1068_v29, 4  ;;  %v1069_v35 = vrot.slane %v1066_v30, 4  ;;  %v971_v39 = vrot.slane %v957_v12, %v11737_v13  ;;  %v816_v62 = vrot.slane %v809_v15, %v11737_v13 }
  0xd5   : > { %v1098_v50 = vrot.slane %v1084_v10, %v11737_v13  ;;  %v879_v21 = vcombine.low %v11886_v34, %v11886_v34  ;;  %v788_v56 = vrot.slane %v774_v20, %v11737_v13  ;;  %v676_v24 = vcombine.low %v11898_v48, %v11898_v48 }
  0xd6   : > { %v1071_v40 = vsel %vm498_vm10, %v1069_v35, %v1070_v31  ;;  %v858_v7 = vrot.slane %v844_v22, %v11737_v13  ;;  %v641_v27 = vcombine.high %v11894_v41, %v11894_v41  ;;  %v523_v29 = vcombine.low %v11918_v9, %v11918_v9 }
  0xd7   : > { %613 = vrot.lane.b32.xlu1 %v610_v36, %s16365_s11  ;;  %1198 = vrot.lane.b32.xlu0 %v1190_v37, %s16366_s15  ;;  %v1073_v42 = vsel %vm16215_vm0, %v1066_v30, %v1071_v40  ;;  %v757_v43 = vpop.permute.xlu1 %756  ;;  %v755_v45 = vpop.permute.xlu0 %754  ;;  %vm16221_vm0 = vcmask 261120   ;;  %v886_v14 = vrot.slane %v879_v21, %v11737_v13  ;;  %v683_v34 = vrot.slane %v676_v24, %v11737_v13 }
  0xd8   : > { %1075 = vst [vmem:[#allocation2 + $0x108] sm:$0xcc] %v1073_v42  ;;  %v759_v46 = vrot.slane %v757_v43, 4  ;;  %v758_v47 = vrot.slane %v755_v45, 4  ;;  %v655_v23 = vrot.slane %v641_v27, %v11737_v13  ;;  %v530_v48 = vrot.slane %v523_v29, %v11737_v13 }
  0xd9   : > { %v711_v30 = vcombine.high %v11906_v55, %v11906_v55  ;;  %v596_v31 = vcombine.low %v11922_v19, %v11922_v19  ;;  %v477_v35 = vcombine.high %v11910_v63, %v11910_v63  ;;  %v1320_v55 = vld [vmem:[%s16350_s2 + $0x8] sm:$0xff]  ;;  %s16384_s2 = smov 112  }
  0xda   : > { %v760_v52 = vsel %vm498_vm10, %v758_v47, %v759_v46 }
  0xdb   : > { %1294 = vrot.lane.b32.xlu1 %v1291_v49, %s16367_s20  ;;  %1259 = vrot.lane.b32.xlu0 %v1251_v2, %s16368_s30  ;;  %v762_v54 = vsel %vm16220_vm14, %v755_v45, %v760_v52  ;;  %v567_v57 = vpop.permute.xlu0 %566  ;;  %v569_v58 = vpop.permute.xlu1 %568  ;;  %v725_v41 = vrot.slane %v711_v30, %v11737_v13  ;;  %v603_v9 = vrot.slane %v596_v31, %v11737_v13  ;;  %vm1425_vm14 = vcmask 1041408  }
  0xdc   : > { %764 = vst [vmem:[#allocation2 + $0x18] sm:$0xcc] %v762_v54  ;;  %v570_v59 = vrot.slane %v567_v57, 4  ;;  %v571_v60 = vrot.slane %v569_v58, 4  ;;  %v491_v19 = vrot.slane %v477_v35, %v11737_v13 }
  0xde   : > { %v572_v1 = vsel %vm498_vm10, %v570_v59, %v571_v60 }
  0xdf   : > { %1167 = vrot.lane.b32.xlu1 %v1164_v16, %s16369_s12  ;;  %1132 = vrot.lane.b32.xlu0 %v1124_v44, %s16352_s27  ;;  %v574_v5 = vsel %vm16221_vm0, %v567_v57, %v572_v1  ;;  %vm16372_vm0 = vcmask 146432  }
  0xe0   : > { %576 = vst [vmem:[#allocation2 + $0x3b0] sm:$0x33] %v574_v5 }
  0xe3   : > { %1040 = vrot.lane.b32.xlu1 %v1037_v6, %s16370_s9  ;;  %939 = vrot.lane.b32.xlu0 %v931_v8, %s16354_s16 }
  0xe7   : > { %1101 = vrot.lane.b32.xlu1 %v1098_v50, %s16351_s26  ;;  %1005 = vrot.lane.b32.xlu0 %v997_v11, %s16356_s25 }
  0xe8   : > { %v12048_v13 = vpop.permute.xlu1 %1340  ;;  %v12050_v63 = vpop.permute.xlu0 %1335 }
  0xeb   : > { %974 = vrot.lane.b32.xlu1 %v971_v39, %s16353_s14  ;;  %824 = vrot.lane.b32.xlu0 %v816_v62, %s16358_s24 }
  0xec   : > { %v12056_v36 = vpop.permute.xlu1 %1325 }
  0xef   : > { %791 = vrot.lane.b32.xlu1 %v788_v56, %s16355_s22  ;;  %894 = vrot.lane.b32.xlu0 %v886_v14, %s16360_s28 }
  0xf3   : > { %861 = vrot.lane.b32.xlu1 %v858_v7, %s16357_s17  ;;  %691 = vrot.lane.b32.xlu0 %v683_v34, %s16362_s23 }
  0xf7   : > { %658 = vrot.lane.b32.xlu1 %v655_v23, %s16359_s29  ;;  %538 = vrot.lane.b32.xlu0 %v530_v48, %s16363_s0 }
  0xfb   : > { %728 = vrot.lane.b32.xlu1 %v725_v41, %s16361_s21  ;;  %611 = vrot.lane.b32.xlu0 %v603_v9, %s16365_s11 }
  0xff   : > { %1330 = vperm.xlu0 %11061, %v1320_v55   ;;  %494 = vrot.lane.b32.xlu1 %v491_v19, %s16364_s18 }
 0x103   : > { %1605 = vrot.lane.b32.xlu0 %v11747_v26, %s16368_s30  ;;  %1734 = vrot.lane.b32.xlu1 %v11759_v33, %s16366_s15 }
 0x107   : > { %2283 = vrot.lane.b32.xlu0 %v11747_v26, %s16354_s16  ;;  %1532 = vrot.lane.b32.xlu1 %v11751_v28, %s16367_s20 }
 0x10b   : > { %2213 = vrot.lane.b32.xlu0 %v11751_v28, %s16353_s14  ;;  %1947 = vrot.lane.b32.xlu1 %v11747_v26, %s16351_s26 }
 0x10f   : > { %2143 = vrot.lane.b32.xlu0 %v11745_v25, %s16356_s25  ;;  %1877 = vrot.lane.b32.xlu1 %v11751_v28, %s16352_s27 }
 0x113   : > { %2073 = vrot.lane.b32.xlu0 %v11759_v33, %s16370_s9  ;;  %1807 = vrot.lane.b32.xlu1 %v11745_v25, %s16369_s12 }
 0x117   : > { %2767 = vrot.lane.b32.xlu0 %v11745_v25, %s16362_s23  ;;  %2501 = vrot.lane.b32.xlu1 %v11751_v28, %s16358_s24 }
 0x11b   : > { %2697 = vrot.lane.b32.xlu0 %v11759_v33, %s16361_s21  ;;  %2431 = vrot.lane.b32.xlu1 %v11745_v25, %s16357_s17 }
 0x11f   : > { %2361 = vrot.lane.b32.xlu0 %v11759_v33, %s16360_s28  ;;  %3033 = vrot.lane.b32.xlu1 %v11759_v33, %s16363_s0 }
 0x121   : > { %v1293_v37 = vpop.permute.xlu0 %1292  ;;  %v1201_v4 = vpop.permute.xlu1 %1200 }
 0x122   : > { %v1203_v58 = vrot.slane %v1201_v4, 4  ;;  %v1296_v0 = vrot.slane %v1293_v37, 4 }
 0x123   : > { %2571 = vrot.lane.b32.xlu0 %v11747_v26, %s16355_s22  ;;  %2837 = vrot.lane.b32.xlu1 %v11751_v28, %s16359_s29 }
 0x125   : > { %v1166_v38 = vpop.permute.xlu0 %1165  ;;  %v1262_v40 = vpop.permute.xlu1 %1261 }
 0x126   : > { %v1264_v1 = vrot.slane %v1262_v40, 4  ;;  %v1169_v15 = vrot.slane %v1166_v38, 4 }
 0x127   : > { %2907 = vrot.lane.b32.xlu0 %v11747_v26, %s16365_s11 }
 0x129   : > { %v1039_v42 = vpop.permute.xlu0 %1038 }
 0x12a   : > { %v1042_v34 = vrot.slane %v1039_v42, 4 }
 0x12b   : > { %3103 = vrot.lane.b32.xlu0 %v11745_v25, %s16364_s18 }
 0x12d   : > { %v12070_v43 = vpop.permute.xlu0 %1099  ;;  %v1135_v33 = vpop.permute.xlu1 %1134 }
 0x12e   : > { %v1137_v39 = vrot.slane %v1135_v33, 4  ;;  %v1103_v31 = vrot.slane %v12070_v43, 4 }
 0x131   : > { %v12072_v45 = vpop.permute.xlu0 %972  ;;  %v942_v46 = vpop.permute.xlu1 %941 }
 0x132   : > { %v944_v27 = vrot.slane %v942_v46, 4 }
 0x135   : > { %v12074_v47 = vpop.permute.xlu0 %789  ;;  %v12076_v49 = vpop.permute.xlu1 %1007 }
 0x136   : > { %v1010_v41 = vrot.slane %v12076_v49, 4 }
 0x139   : > { %v12078_v28 = vpop.permute.xlu0 %859  ;;  %v12080_v2 = vpop.permute.xlu1 %826 }
 0x13d   : > { %v12082_v26 = vpop.permute.xlu0 %656  ;;  %v12084_v18 = vpop.permute.xlu1 %896 }
 0x141   : > { %v12086_v51 = vpop.permute.xlu0 %726  ;;  %v12088_v25 = vpop.permute.xlu1 %693 }
 0x145   : > { %v12090_v52 = vpop.permute.xlu1 %540  ;;  %v12092_v53 = vpop.permute.xlu0 %492 }
 0x149   : > { %v12094_v54 = vpop.permute.xlu1 %613  ;;  %v1199_v57 = vpop.permute.xlu0 %1198 }
 0x14a   : > { %v1202_v59 = vrot.slane %v1199_v57, 4 }
 0x14c   : > { %v1204_v60 = vsel %vm498_vm10, %v1202_v59, %v1203_v58 }
 0x14d   : > { %v1205_v16 = vsel %vm591_vm11, %v1199_v57, %v1204_v60  ;;  %v1295_v44 = vpop.permute.xlu1 %1294  ;;  %v1260_v61 = vpop.permute.xlu0 %1259 }
 0x14e   : > { %1207 = vst [vmem:[#allocation2 + $0x490] sm:$0xcc] %v1205_v16  ;;  %v1297_v5 = vrot.slane %v1295_v44, 4  ;;  %v1263_v6 = vrot.slane %v1260_v61, 4  ;;  %v976_v44 = vrot.slane %v12072_v45, 4 }
 0x150   : > { %v1298_v8 = vsel %vm498_vm10, %v1296_v0, %v1297_v5  ;;  %v1265_v10 = vsel %vm498_vm10, %v1263_v6, %v1264_v1 }
 0x151   : > { %v1299_v32 = vsel %vm472_vm9, %v1293_v37, %v1298_v8  ;;  %v1266_v50 = vsel %vm518_vm13, %v1260_v61, %v1265_v10  ;;  %v1168_v11 = vpop.permute.xlu1 %1167  ;;  %v1133_v12 = vpop.permute.xlu0 %1132  ;;  %v829_v61 = vrot.slane %v12080_v2, 4  ;;  %v793_v2 = vrot.slane %v12074_v47, 4 }
 0x152   : > { %1301 = vst [vmem:[#allocation2 + $0x548] sm:$0x33] %v1299_v32  ;;  %1268 = vst [vmem:[#allocation2 + $0x318] sm:$0xcc] %v1266_v50  ;;  %v1170_v62 = vrot.slane %v1168_v11, 4  ;;  %v1136_v20 = vrot.slane %v1133_v12, 4 }
 0x153   : > { %v899_v11 = vrot.slane %v12084_v18, 4  ;;  %v696_v18 = vrot.slane %v12088_v25, 4  ;;  %v660_v25 = vrot.slane %v12082_v26, 4 }
 0x154   : > { %v1171_v21 = vsel %vm498_vm10, %v1169_v15, %v1170_v62  ;;  %v1138_v56 = vsel %vm498_vm10, %v1136_v20, %v1137_v39 }
 0x155   : > { %v1172_v14 = vsel %vm636_vm6, %v1166_v38, %v1171_v21  ;;  %v1139_v22 = vsel %vm671_vm7, %v1133_v12, %v1138_v56  ;;  %v1041_v24 = vpop.permute.xlu1 %1040  ;;  %v940_v7 = vpop.permute.xlu0 %939 }
 0x156   : > { %1174 = vst [vmem:[#allocation2 + $0x490] sm:$0x33] %v1172_v14  ;;  %1141 = vst [vmem:[#allocation2 + $0x510] sm:$0xcc] %v1139_v22  ;;  %v1043_v29 = vrot.slane %v1041_v24, 4  ;;  %v943_v23 = vrot.slane %v940_v7, 4 }
 0x157   : > { %v863_v24 = vrot.slane %v12078_v28, 4 }
 0x158   : > { %v1044_v48 = vsel %vm498_vm10, %v1042_v34, %v1043_v29  ;;  %v945_v30 = vsel %vm498_vm10, %v943_v23, %v944_v27 }
 0x159   : > { %v1045_v9 = vsel %vm769_vm2, %v1039_v42, %v1044_v48  ;;  %v946_v35 = vsel %vm874_vm5, %v940_v7, %v945_v30  ;;  %v1102_v55 = vpop.permute.xlu1 %1101  ;;  %v1006_v19 = vpop.permute.xlu0 %1005  ;;  %v1318_v37 = vld [vmem:[#allocation2 + $0x548] sm:$0x33] }
 0x15a   : > { %1047 = vst [vmem:[#allocation2 + $0x108] sm:$0x33] %v1045_v9  ;;  %948 = vst [vmem:[#allocation2 + $0x440] sm:$0xcc] %v946_v35  ;;  %v1104_v4 = vrot.slane %v1102_v55, 4  ;;  %v1009_v38 = vrot.slane %v1006_v19, 4  ;;  %v10458_v40 = vcombine.high %v1318_v37, %v1318_v37  ;;  %v10457_v33 = vcombine.low %v1318_v37, %v1318_v37 }
 0x15b   : > { %v543_v9 = vrot.slane %v12090_v52, 4  ;;  %v616_v52 = vrot.slane %v12094_v54, 4 }
 0x15c   : > { %v1105_v46 = vsel %vm498_vm10, %v1103_v31, %v1104_v4  ;;  %v1011_v57 = vsel %vm498_vm10, %v1009_v38, %v1010_v41  ;;  %10459 = vmatprep.subr.msk.bf16.mxu1 %vm1425_vm14, %v10458_v40  ;;  %v1427_v49 = vsel %vm1425_vm14, %v10457_v33, 0  ;;  %vm16371_vm14 = vcmask 15360  }
 0x15d   : > { %v1106_v42 = vsel %vm706_vm8, %v12070_v43, %v1105_v46  ;;  %v1012_v58 = vsel %vm804_vm3, %v1006_v19, %v1011_v57  ;;  %1435 = vmatpush1.bf16.msra.mxu1 %v1427_v49  ;;  %v975_v59 = vpop.permute.xlu1 %974  ;;  %v825_v60 = vpop.permute.xlu0 %824  ;;  %v11130_v16 = vld [vmem:[#allocation2 + $0x494] ss:$-376 sps:$4 sm:$0xff]   ;;  %v11132_v5 = vld [vmem:[#allocation2 + $0x490] ss:$-376 sps:$4 sm:$0xff]   ;;  %v730_v33 = vrot.slane %v12086_v51, 4 }
 0x15e   : > { %1108 = vst [vmem:[#allocation2 + $0x510] sm:$0x33] %v1106_v42  ;;  %1014 = vst [vmem:[#allocation2 + $0x378] sm:$0xcc] %v1012_v58  ;;  %v977_v0 = vrot.slane %v975_v59, 4  ;;  %v828_v1 = vrot.slane %v825_v60, 4  ;;  %1436 = vmatprep.subr.bf16.mxu1 %v11130_v16 }
 0x160   : > { %v978_v6 = vsel %vm498_vm10, %v976_v44, %v977_v0  ;;  %v830_v43 = vsel %vm498_vm10, %v828_v1, %v829_v61  ;;  %v496_v44 = vrot.slane %v12092_v53, 4 }
 0x161   : > { %v979_v8 = vsel %vm839_vm4, %v12072_v45, %v978_v6  ;;  %v832_v10 = vsel %vm831_vm1, %v825_v60, %v830_v43  ;;  %v792_v32 = vpop.permute.xlu1 %791  ;;  %1437 = vmatpush1.bf16.msra.mxu1 %v11132_v5  ;;  %v895_v50 = vpop.permute.xlu0 %894 }
 0x162   : > { %981 = vst [vmem:[#allocation2 + $0x378] sm:$0x33] %v979_v8  ;;  %834 = vst [vmem:[#allocation2 + $0x450] sm:$0xcc] %v832_v10  ;;  %v794_v12 = vrot.slane %v792_v32, 4  ;;  %v898_v15 = vrot.slane %v895_v50, 4 }
 0x164   : > { %v795_v39 = vsel %vm498_vm10, %v793_v2, %v794_v12  ;;  %v900_v62 = vsel %vm498_vm10, %v898_v15, %v899_v11 }
 0x165   : > { %v797_v45 = vsel %vm16222_vm12, %v12074_v47, %v795_v39  ;;  %v902_v20 = vsel %vm16320_vm15, %v895_v50, %v900_v62  ;;  %v862_v21 = vpop.permute.xlu1 %861  ;;  %v692_v56 = vpop.permute.xlu0 %691  ;;  %v11133_v14 = vld [vmem:[#allocation2 + $0x10c] ss:$1032 sps:$4 sm:$0xff]   ;;  %v11135_v22 = vld [vmem:[#allocation2 + $0x108] ss:$1032 sps:$4 sm:$0xff]   ;;  %vm16375_vm12 = vcmask 138240  }
 0x166   : > { %799 = vst [vmem:[#allocation2 + $0x450] sm:$0x33] %v797_v45  ;;  %904 = vst [vmem:[#allocation2 + $0x328] sm:$0xcc] %v902_v20  ;;  %v864_v7 = vrot.slane %v862_v21, 4  ;;  %v695_v34 = vrot.slane %v692_v56, 4  ;;  %1438 = vmatprep.subr.bf16.mxu1 %v11133_v14 }
 0x167   : > { %1439 = vmatpush1.bf16.msra.mxu1 %v11135_v22  ;;  %v11143_v45 = vld [vmem:[%s16378_s1 + $0x8] sm:$0xff]  }
 0x168   : > { %v865_v27 = vsel %vm498_vm10, %v863_v24, %v864_v7  ;;  %v697_v29 = vsel %vm498_vm10, %v695_v34, %v696_v18  ;;  %v2764_v24 = vld [vmem:[#allocation4 + $0x2c] sm:$0xf]  ;;  %v2766_v34 = vld [vmem:[#allocation4 + $0x3c] sm:$0xf] }
 0x169   : > { %v867_v47 = vsel %vm16371_vm14, %v12078_v28, %v865_v27  ;;  %v699_v23 = vsel %vm16372_vm0, %v692_v56, %v697_v29  ;;  %v659_v48 = vpop.permute.xlu1 %658  ;;  %v539_v30 = vpop.permute.xlu0 %538  ;;  %v11136_v31 = vld [vmem:[#allocation2 + $0x444] ss:$-200 sps:$4 sm:$0xff]   ;;  %v11138_v41 = vld [vmem:[#allocation2 + $0x440] ss:$-200 sps:$4 sm:$0xff]   ;;  %vm16373_vm0 = vcmask 244736   ;;  %vm16374_vm14 = vcmask 269312  }
 0x16a   : > { %869 = vst [vmem:[#allocation2 + $0x328] sm:$0x33] %v867_v47  ;;  %701 = vst [vmem:[#allocation2 + $0x4d8] sm:$0xcc] %v699_v23  ;;  %v661_v35 = vrot.slane %v659_v48, 4  ;;  %v542_v55 = vrot.slane %v539_v30, 4  ;;  %1440 = vmatprep.subr.bf16.mxu1 %v11136_v31 }
 0x16b   : > { %1441 = vmatpush1.bf16.msra.mxu1 %v11138_v41  ;;  %v2498_v48 = vld [vmem:[#allocation4 + $0x2c] sm:$0xf] }
 0x16c   : > { %v662_v19 = vsel %vm498_vm10, %v660_v25, %v661_v35  ;;  %v544_v37 = vsel %vm498_vm10, %v542_v55, %v543_v9  ;;  %v2358_v31 = vld [vmem:[#allocation4 + $0x2c] sm:$0xf]  ;;  %v2500_v9 = vld [vmem:[#allocation4 + $0x3c] sm:$0xf] }
 0x16d   : > { %v664_v28 = vsel %vm16373_vm0, %v12082_v26, %v662_v19  ;;  %v546_v4 = vsel %vm16374_vm14, %v539_v30, %v544_v37  ;;  %v729_v38 = vpop.permute.xlu1 %728  ;;  %v612_v40 = vpop.permute.xlu0 %611  ;;  %vm16376_vm0 = vcmask 252928   ;;  %vm16377_vm14 = vcmask 277504   ;;  %v2760_v19 = vld [vmem:[#allocation4 + $0xc] sm:$0xf] }
 0x16e   : > { %666 = vst [vmem:[#allocation2 + $0x4d8] sm:$0x33] %v664_v28  ;;  %548 = vst [vmem:[#allocation2 + $0x2b0] sm:$0xcc] %v546_v4  ;;  %v731_v46 = vrot.slane %v729_v38, 4  ;;  %v615_v57 = vrot.slane %v612_v40, 4 }
 0x16f   : > { %v2762_v28 = vld [vmem:[#allocation4 + $0x1c] sm:$0xf]  ;;  %v2494_v38 = vld [vmem:[#allocation4 + $0xc] sm:$0xf] }
 0x170   : > { %v732_v49 = vsel %vm498_vm10, %v730_v33, %v731_v46  ;;  %v617_v42 = vsel %vm498_vm10, %v615_v57, %v616_v52  ;;  %v2496_v33 = vld [vmem:[#allocation4 + $0x1c] sm:$0xf]  ;;  %v2694_v57 = vld [vmem:[#allocation4 + $0x2c] sm:$0xf] }
 0x171   : > { %v734_v58 = vsel %vm16375_vm12, %v12086_v51, %v732_v49  ;;  %v619_v26 = vsel %vm16376_vm0, %v612_v40, %v617_v42  ;;  %v495_v59 = vpop.permute.xlu1 %494  ;;  %v11139_v60 = vld [vmem:[#allocation2 + $0x454] ss:$-296 sps:$4 sm:$0xff]   ;;  %v11141_v16 = vld [vmem:[#allocation2 + $0x450] ss:$-296 sps:$4 sm:$0xff]   ;;  %vm1418_vm12 = vcmask 818176   ;;  %vm16423_vm0 = vcmask 146432  }
 0x172   : > { %736 = vst [vmem:[#allocation2 + $0x18] sm:$0x33] %v734_v58  ;;  %621 = vst [vmem:[#allocation2 + $0x3b0] sm:$0xcc] %v619_v26  ;;  %v497_v54 = vrot.slane %v495_v59, 4  ;;  %1442 = vmatprep.subr.bf16.mxu1 %v11139_v60 }
 0x173   : > { %1443 = vmatpush1.bf16.msra.mxu1 %v11141_v16  ;;  %v2696_v58 = vld [vmem:[#allocation4 + $0x3c] sm:$0xf]  ;;  %v2428_v60 = vld [vmem:[#allocation4 + $0x2c] sm:$0xf] }
 0x174   : > { %v499_v61 = vsel %vm498_vm10, %v496_v44, %v497_v54  ;;  %v2430_v44 = vld [vmem:[#allocation4 + $0x3c] sm:$0xf] }
 0x175   : > { %v501_v0 = vsel %vm16377_vm14, %v12092_v53, %v499_v61  ;;  %v12158_v1 = vpop.permute.xlu1 %1734  ;;  %v1308_v51 = vld [vmem:[#allocation2 + $0x4d8] sm:$0xff]  ;;  %v11142_v53 = vld [vmem:[%s16378_s1] sm:$0xff]   ;;  %v2690_v61 = vld [vmem:[#allocation4 + $0xc] sm:$0xf]  ;;  %vm16427_vm14 = vcmask 138240   ;;  %s16679_s1 = sld [smem:[#allocation114_spill]] }
 0x176   : > { %503 = vst [vmem:[#allocation2 + $0x2b0] sm:$0x33] %v501_v0 }
 0x179   : > { %v1309_v5 = vld [vmem:[#allocation2 + $0x18] sm:$0xff]  ;;  %v12162_v10 = vpop.permute.xlu1 %1532  ;;  %v1307_v50 = vld [vmem:[#allocation2 + $0x3b0] sm:$0xff] }
 0x17a   : > { %v12160_v6 = vpop.permute.xlu0 %1330  ;;  %v10448_v43 = vcombine.high %v1308_v51, %v1309_v5  ;;  %v10447_v8 = vcombine.low %v1308_v51, %v1309_v5  ;;  %v2360_v51 = vld [vmem:[#allocation4 + $0x3c] sm:$0xf] }
 0x17b   : > { %v2692_v5 = vld [vmem:[#allocation4 + $0x1c] sm:$0xf] }
 0x17c   : > { %1444 = vmatprep.subr.bf16.mxu1 %v10448_v43 }
 0x17d   : > { %1445 = vmatpush1.bf16.msra.mxu1 %v10447_v8  ;;  %v1306_v32 = vld [vmem:[#allocation2 + $0x2b0] sm:$0xff]  ;;  %v12171_v39 = vpop.permute.xlu1 %1947 }
 0x17e   : > { %v10446_v2 = vcombine.high %v1306_v32, %v1307_v50  ;;  %v10445_v11 = vcombine.low %v1306_v32, %v1307_v50  ;;  %v12164_v12 = vpop.permute.xlu0 %1605  ;;  %v2424_v32 = vld [vmem:[#allocation4 + $0xc] sm:$0xf] }
 0x180   : > { %1446 = vmatprep.subr.bf16.mxu1 %v10446_v2  ;;  %v2634_v2 = vld [vmem:[#allocation4 + $0xc] sm:$0xf] }
 0x181   : > { %1447 = vmatpush1.bf16.msra.mxu1 %v10445_v11  ;;  %v12179_v20 = vpop.permute.xlu1 %1877  ;;  %v2636_v11 = vld [vmem:[#allocation4 + $0x1c] sm:$0xf] }
 0x182   : > { %v12169_v15 = vpop.permute.xlu0 %2283 }
 0x184   : > { %10460 = vmatmul.mubr.msk.bf16.vlgmr.msra.gmra.mxu1 %vm1418_vm12, %v11142_v53  ;;  %v2426_v53 = vld [vmem:[#allocation4 + $0x1c] sm:$0xf] }
 0x185   : > { %1474 = vmatprep.mubr.bf16.mxu1 %v16226_v3  ;;  %v12185_v14 = vpop.permute.xlu1 %1807 }
 0x186   : > { %v12174_v62 = vpop.permute.xlu0 %2213 }
 0x189   : > { %v12192_v7 = vpop.permute.xlu1 %2501 }
 0x18a   : > { %v12181_v21 = vpop.permute.xlu0 %2143  ;;  %v12199_v47 = vrot.slane %v12192_v7, 4 }
 0x18c   : > { %10461 = vmatmul.mubr.msk.bf16.gmra.mxu1 %vm1418_vm12, %v11143_v45  ;;  %16380 = vst [vmem:[#allocation19_spill] sm:$0xff] %v12199_v47  ;;  %v2512_v41 = vmul.bf16 %v12199_v47, %v2498_v48  ;;  %v2514_v55 = vmul.bf16 %v12199_v47, %v2500_v9  ;;  %v2508_v40 = vmul.bf16 %v12199_v47, %v2494_v38  ;;  %v2640_v48 = vld [vmem:[#allocation4 + $0x3c] sm:$0xf]  ;;  %v2354_v9 = vld [vmem:[#allocation4 + $0xc] sm:$0xf]  ;;  %vm16430_vm12 = vcmask 15360  }
 0x18d   : > { %v2510_v46 = vmul.bf16 %v12199_v47, %v2496_v33  ;;  %v12226_v42 = vpop.permute.xlu1 %2431  ;;  %v11068_v45 = vpack.i.bf16 %v2636_v11, %v2634_v2 }
 0x18e   : > { %v12183_v56 = vpop.permute.xlu0 %2073  ;;  %v12230_v26 = vrot.slane %v12226_v42, 4 }
 0x18f   : > { %v12470_v17 = vrot.slane %v12183_v56, 4 }
 0x190   : > { %16383 = vst [vmem:[#allocation22_spill] sm:$0xff] %v12230_v26  ;;  %v2442_v16 = vmul.bf16 %v12230_v26, %v2428_v60  ;;  %v2444_v54 = vmul.bf16 %v12230_v26, %v2430_v44  ;;  %v2438_v50 = vmul.bf16 %v12230_v26, %v2424_v32  ;;  %v2974_v32 = vld [vmem:[#allocation4 + $0x2c] sm:$0xf] }
 0x191   : > { %16419 = vst [vmem:[#allocation54_spill] sm:$0xff] %v12470_v17 }
 0x192   : > { %v12187_v22 = vpop.permute.xlu0 %2767 }
 0x193   : > { %v12190_v18 = vrot.slane %v12187_v22, 4 }
 0x195   : > { %16379 = vst [vmem:[#allocation18_spill] sm:$0xff] %v12190_v18  ;;  %v2778_v27 = vmul.bf16 %v12190_v18, %v2764_v24  ;;  %v2780_v23 = vmul.bf16 %v12190_v18, %v2766_v34  ;;  %v2774_v37 = vmul.bf16 %v12190_v18, %v2760_v19  ;;  %v2776_v4 = vmul.bf16 %v12190_v18, %v2762_v28  ;;  %v2970_v34 = vld [vmem:[#allocation4 + $0xc] sm:$0xf]  ;;  %v2356_v19 = vld [vmem:[#allocation4 + $0x1c] sm:$0xf] }
 0x196   : > { %v12195_v29 = vpop.permute.xlu0 %2697  ;;  %v2440_v24 = vmul.bf16 %v12230_v26, %v2426_v53  ;;  %v2904_v53 = vld [vmem:[#allocation4 + $0x2c] sm:$0xf] }
 0x197   : > { %2799 = vrot.lane.b32.xlu0 %v2778_v27, %s16352_s27  ;;  %v12221_v52 = vrot.slane %v12195_v29, 4  ;;  %v2972_v27 = vld [vmem:[#allocation4 + $0x1c] sm:$0xf] }
 0x199   : > { %16382 = vst [vmem:[#allocation21_spill] sm:$0xff] %v12221_v52  ;;  %v2708_v49 = vmul.bf16 %v12221_v52, %v2694_v57  ;;  %v2710_v59 = vmul.bf16 %v12221_v52, %v2696_v58  ;;  %v2704_v0 = vmul.bf16 %v12221_v52, %v2690_v61  ;;  %v2706_v8 = vmul.bf16 %v12221_v52, %v2692_v5  ;;  %v2566_v58 = vld [vmem:[#allocation4 + $0x1c] sm:$0xf] }
 0x19a   : > { %v12202_v30 = vpop.permute.xlu0 %2361  ;;  %v3028_v5 = vld [vmem:[#allocation4 + $0x1c] sm:$0xf] }
 0x19b   : > { %2803 = vrot.lane.b32.xlu0 %v2780_v23, %s16352_s27  ;;  %v12207_v25 = vrot.slane %v12202_v30, 4  ;;  %v2638_v23 = vld [vmem:[#allocation4 + $0x2c] sm:$0xf] }
 0x19d   : > { %16381 = vst [vmem:[#allocation20_spill] sm:$0xff] %v12207_v25  ;;  %v2372_v35 = vmul.bf16 %v12207_v25, %v2358_v31  ;;  %v2374_v43 = vmul.bf16 %v12207_v25, %v2360_v51  ;;  %v11078_v31 = vpack.i.bf16 %v2972_v27, %v2970_v34  ;;  %v2370_v28 = vmul.bf16 %v12207_v25, %v2356_v19 }
 0x19f   : > { %2533 = vrot.lane.b32.xlu0 %v2512_v41, %s16356_s25  ;;  %2393 = vrot.lane.b32.xlu1 %v2372_v35, %s16354_s16  ;;  %v11063_v41 = vpack.i.bf16 %v2640_v48, %v2638_v23  ;;  %v2368_v35 = vmul.bf16 %v12207_v25, %v2354_v9 }
 0x1a3   : > { %2537 = vrot.lane.b32.xlu0 %v2514_v55, %s16356_s25  ;;  %2397 = vrot.lane.b32.xlu1 %v2374_v43, %s16354_s16  ;;  %v12252_v55 = vpop.permute.xlu0 %2571 }
 0x1a7   : > { %2791 = vrot.lane.b32.xlu0 %v2774_v37, %s16352_s27  ;;  %11069 = vrot.lane.b32.xlu1 %v11068_v45, %s16384_s2  ;;  %v12256_v37 = vrot.slane %v12252_v55, 4 }
 0x1a9   : > { %16386 = vst [vmem:[#allocation23_spill] sm:$0xff] %v12256_v37  ;;  %v2580_v60 = vmul.bf16 %v12256_v37, %v2566_v58 }
 0x1ab   : > { %2795 = vrot.lane.b32.xlu0 %v2776_v4, %s16352_s27  ;;  %11079 = vrot.lane.b32.xlu1 %v11078_v31, %s16385_s13  ;;  %v2568_v4 = vld [vmem:[#allocation4 + $0x2c] sm:$0xf] }
 0x1ac   : > { %v2582_v38 = vmul.bf16 %v12256_v37, %v2568_v4 }
 0x1af   : > { %2525 = vrot.lane.b32.xlu0 %v2508_v40, %s16356_s25  ;;  %v2570_v40 = vld [vmem:[#allocation4 + $0x3c] sm:$0xf] }
 0x1b0   : > { %v2584_v33 = vmul.bf16 %v12256_v37, %v2570_v40 }
 0x1b3   : > { %2529 = vrot.lane.b32.xlu0 %v2510_v46, %s16356_s25  ;;  %v2564_v46 = vld [vmem:[#allocation4 + $0xc] sm:$0xf] }
 0x1b4   : > { %v2578_v57 = vmul.bf16 %v12256_v37, %v2564_v46 }
 0x1b7   : > { %2729 = vrot.lane.b32.xlu0 %v2708_v49, %s16351_s26  ;;  %v12265_v49 = vpop.permute.xlu1 %3033 }
 0x1bb   : > { %2733 = vrot.lane.b32.xlu0 %v2710_v59, %s16351_s26  ;;  %v12269_v59 = vrot.slane %v12265_v49, 4 }
 0x1bd   : > { %16387 = vst [vmem:[#allocation24_spill] sm:$0xff] %v12269_v59  ;;  %v3042_v43 = vmul.bf16 %v12269_v59, %v3028_v5 }
 0x1bf   : > { %2463 = vrot.lane.b32.xlu0 %v2442_v16, %s16353_s14  ;;  %v3030_v16 = vld [vmem:[#allocation4 + $0x2c] sm:$0xf] }
 0x1c0   : > { %v3044_v44 = vmul.bf16 %v12269_v59, %v3030_v16 }
 0x1c3   : > { %2467 = vrot.lane.b32.xlu0 %v2444_v54, %s16353_s14  ;;  %v3032_v54 = vld [vmem:[#allocation4 + $0x3c] sm:$0xf] }
 0x1c4   : > { %v3046_v61 = vmul.bf16 %v12269_v59, %v3032_v54 }
 0x1c7   : > { %2721 = vrot.lane.b32.xlu0 %v2704_v0, %s16351_s26  ;;  %v3026_v0 = vld [vmem:[#allocation4 + $0xc] sm:$0xf] }
 0x1c8   : > { %v3040_v51 = vmul.bf16 %v12269_v59, %v3026_v0 }
 0x1cb   : > { %2725 = vrot.lane.b32.xlu0 %v2706_v8, %s16351_s26  ;;  %v12280_v8 = vpop.permute.xlu0 %2907 }
 0x1cc   : > { %v12284_v2 = vrot.slane %v12280_v8, 4 }
 0x1ce   : > { %16388 = vst [vmem:[#allocation25_spill] sm:$0xff] %v12284_v2  ;;  %v2918_v45 = vmul.bf16 %v12284_v2, %v2904_v53 }
 0x1cf   : > { %2455 = vrot.lane.b32.xlu0 %v2438_v50, %s16353_s14  ;;  %v2976_v50 = vld [vmem:[#allocation4 + $0x3c] sm:$0xf]  ;;  %v12291_v27 = vpop.permute.xlu0 %3103 }
 0x1d0   : > { %v11073_v11 = vpack.i.bf16 %v2976_v50, %v2974_v32 }
 0x1d3   : > { %2459 = vrot.lane.b32.xlu0 %v2440_v24, %s16353_s14  ;;  %v2906_v24 = vld [vmem:[#allocation4 + $0x3c] sm:$0xf] }
 0x1d4   : > { %v2920_v34 = vmul.bf16 %v12284_v2, %v2906_v24 }
 0x1d7   : > { %11064 = vrot.lane.b32.xlu0 %v11063_v41, %s16384_s2 }
 0x1db   : > { %2385 = vrot.lane.b32.xlu0 %v2368_v35, %s16354_s16 }
 0x1df   : > { %2389 = vrot.lane.b32.xlu0 %v2370_v28, %s16354_s16 }
 0x1e3   : > { %2603 = vrot.lane.b32.xlu0 %v2582_v38, %s16370_s9 }
 0x1e7   : > { %2607 = vrot.lane.b32.xlu0 %v2584_v33, %s16370_s9 }
 0x1eb   : > { %2595 = vrot.lane.b32.xlu0 %v2578_v57, %s16370_s9 }
 0x1ef   : > { %2599 = vrot.lane.b32.xlu0 %v2580_v60, %s16370_s9 }
 0x1f3   : > { %3065 = vrot.lane.b32.xlu0 %v3044_v44, %s16368_s30 }
 0x1f7   : > { %3069 = vrot.lane.b32.xlu0 %v3046_v61, %s16368_s30 }
 0x1fb   : > { %3057 = vrot.lane.b32.xlu0 %v3040_v51, %s16368_s30 }
 0x1ff   : > { %3061 = vrot.lane.b32.xlu0 %v3042_v43, %s16368_s30 }
 0x203   : > { %11074 = vrot.lane.b32.xlu0 %v11073_v11, %s16385_s13 }
 0x207   : > { %2939 = vrot.lane.b32.xlu0 %v2918_v45, %s16366_s15 }
 0x209   : > { %v12293_v23 = vpop.permute.xlu0 %2799 }
 0x20a   : > { %16389 = vst [vmem:[#allocation26_spill] sm:$0xff] %v12293_v23 }
 0x20b   : > { %2943 = vrot.lane.b32.xlu0 %v2920_v34, %s16366_s15 }
 0x20d   : > { %v12295_v48 = vpop.permute.xlu0 %2803 }
 0x20e   : > { %16390 = vst [vmem:[#allocation27_spill] sm:$0xff] %v12295_v48 }
 0x211   : > { %v12297_v31 = vpop.permute.xlu0 %2533 }
 0x212   : > { %16391 = vst [vmem:[#allocation28_spill] sm:$0xff] %v12297_v31 }
 0x215   : > { %v12299_v41 = vpop.permute.xlu0 %2537 }
 0x216   : > { %16392 = vst [vmem:[#allocation29_spill] sm:$0xff] %v12299_v41 }
 0x219   : > { %v12301_v9 = vpop.permute.xlu0 %2791 }
 0x21d   : > { %v12303_v35 = vpop.permute.xlu0 %2795 }
 0x221   : > { %v12305_v19 = vpop.permute.xlu0 %2525 }
 0x225   : > { %v12307_v28 = vpop.permute.xlu0 %2529 }
 0x229   : > { %v12309_v4 = vpop.permute.xlu0 %2729 }
 0x22a   : > { %16393 = vst [vmem:[#allocation30_spill] sm:$0xff] %v12309_v4  ;;  %v12459_v4 = vrot.slane %v12185_v14, 4 }
 0x22c   : > { %16418 = vst [vmem:[#allocation53_spill] sm:$0xff] %v12459_v4 }
 0x22d   : > { %v12314_v44 = vpop.permute.xlu0 %2733 }
 0x22e   : > { %16394 = vst [vmem:[#allocation31_spill] sm:$0xff] %v12314_v44 }
 0x231   : > { %v12324_v53 = vpop.permute.xlu0 %2463 }
 0x232   : > { %16395 = vst [vmem:[#allocation32_spill] sm:$0xff] %v12324_v53 }
 0x244   : > { %v1466_v38 = vpop.f32.mrf.mxu1 }
 0x245   : > { %v1467_v40 = vadd.f32 %v1466_v38, %v12056_v36 }
 0x246   : > { %v1468_v33 = vpop.f32.mrf.mxu1 }
 0x247   : > { %v1469_v46 = vadd.f32 %v1468_v33, %v12056_v36  ;;  %v1485_v58 = vmax.f32 %v1467_v40, 0.0 }
 0x248   : > { %v1470_v57 = vpop.f32.mrf.mxu1 }
 0x249   : > { %v1486_v60 = vmax.f32 %v1469_v46, 0.0  ;;  %v1471_v16 = vadd.f32 %v1470_v57, %v12160_v6 }
 0x24a   : > { %v1472_v54 = vpop.f32.mrf.mxu1 }
 0x24b   : > { %v12316_v61 = vpack.c.bf16 %v1486_v60, %v1485_v58  ;;  %v1473_v0 = vadd.f32 %v1472_v54, %v12160_v6  ;;  %v1487_v5 = vmax.f32 %v1471_v16, 0.0  ;;  %v12337_v60 = vpop.permute.xlu0 %2467  ;;  %v12340_v16 = vrot.slane %v12162_v10, 4 }
 0x24c   : > { %v1476_v51 = vpop.f32.mrf.mxu1  ;;  %16397 = vst [vmem:[#allocation33_spill] sm:$0xff] %v12337_v60 }
 0x24d   : > { %1517 = vst [vmem:[#allocation4 + $0x4] sm:$0xff] %v12316_v61  ;;  %v1488_v43 = vmax.f32 %v1473_v0, 0.0  ;;  %v1477_v32 = vadd.f32 %v1476_v51, %v12050_v63  ;;  %16398 = vst [vmem:[#allocation34_spill] sm:$0xff] %v12340_v16 }
 0x24e   : > { %v1478_v36 = vpop.f32.mrf.mxu1 }
 0x24f   : > { %v12321_v50 = vpack.c.bf16 %v1488_v43, %v1487_v5  ;;  %v1479_v11 = vadd.f32 %v1478_v36, %v12050_v63  ;;  %v1489_v24 = vmax.f32 %v1477_v32, 0.0  ;;  %v12352_v5 = vpop.permute.xlu0 %2721  ;;  %v12355_v32 = vrot.slane %v12158_v1, 4 }
 0x250   : > { %v1480_v45 = vpop.f32.mrf.mxu1  ;;  %v12361_v36 = vrot.slane %v12164_v12, 4 }
 0x251   : > { %1518 = vst [vmem:[#allocation4 + $0x14] sm:$0xff] %v12321_v50  ;;  %v1490_v34 = vmax.f32 %v1479_v11, 0.0  ;;  %v1481_v6 = vadd.f32 %v1480_v45, %v12048_v13  ;;  %16401 = vst [vmem:[#allocation36_spill] sm:$0xff] %v12355_v32 }
 0x252   : > { %v1482_v38 = vpop.f32.mrf.mxu1  ;;  %16402 = vst [vmem:[#allocation37_spill] sm:$0xff] %v12361_v36 }
 0x253   : > { %v12328_v40 = vpack.c.bf16 %v1490_v34, %v1489_v24  ;;  %v1483_v33 = vadd.f32 %v1482_v38, %v12048_v13  ;;  %v1491_v63 = vmax.f32 %v1481_v6, 0.0  ;;  %v12348_v13 = vsel %vm472_vm9, %v12340_v16, %v12162_v10  ;;  %v12367_v45 = vpop.permute.xlu0 %2725 }
 0x254   : > { %v1668_v46 = vld [vmem:[#allocation4 + $0x8] sm:$0xf]  ;;  %v12331_v57 = vld [vmem:[#allocation4] sm:$0xff]  ;;  %16400 = vst [vmem:[#allocation35_spill] sm:$0xff] %v12348_v13  ;;  %v12372_v24 = vsel %vm518_vm13, %v12361_v36, %v12164_v12 }
 0x255   : > { %1519 = vst [vmem:[#allocation4 + $0x24] sm:$0xff] %v12328_v40  ;;  %v1492_v58 = vmax.f32 %v1483_v33, 0.0  ;;  %1685 = vrot.lane.b32.xlu1 %v1668_v46, %s16396_s8  ;;  %1683 = vrot.lane.b32.xlu0 %v12331_v57, %s16396_s8  ;;  %v2010_v0 = vld [vmem:[#allocation4 + $0x8] sm:$0xf]  ;;  %v1538_v51 = vmul.bf16 %v12331_v57, %v12348_v13  ;;  %16403 = vst [vmem:[#allocation38_spill] sm:$0xff] %v12372_v24  ;;  %v1611_v34 = vmul.bf16 %v12331_v57, %v12372_v24 }
 0x256   : > { %v1724_v43 = vld [vmem:[#allocation4 + $0x8] sm:$0xf]  ;;  %v12378_v33 = vrot.slane %v12169_v15, 4  ;;  %v12385_v46 = vsel %vm591_vm11, %v12355_v32, %v12158_v1 }
 0x257   : > { %v10929_v54 = vpack.c.bf16 %v1492_v58, %v1491_v63  ;;  %v1741_v10 = vmul.bf16 %v12355_v32, %v1724_v43  ;;  %v1522_v11 = vld [vmem:[#allocation4 + $0x8] sm:$0xf]  ;;  %16405 = vst [vmem:[#allocation40_spill] sm:$0xff] %v12385_v46  ;;  %v1740_v63 = vmul.bf16 %v12385_v46, %v12331_v57  ;;  %v12390_v58 = vpop.permute.xlu0 %2455 }
 0x258   : > { %v1539_v6 = vmul.bf16 %v12340_v16, %v1522_v11  ;;  %v2276_v38 = vld [vmem:[#allocation4 + $0x8] sm:$0xf]  ;;  %16404 = vst [vmem:[#allocation39_spill] sm:$0xff] %v12378_v33  ;;  %v12400_v11 = vrot.slane %v12174_v62, 4  ;;  %v1799_v60 = vld [vmem:[#allocation4 + $0x18] sm:$0xf] }
 0x259   : > { %1520 = vst [vmem:[#allocation4 + $0x34] sm:$0xff] %v10929_v54  ;;  %2027 = vrot.lane.b32.xlu1 %v2010_v0, %s16399_s19  ;;  %2025 = vrot.lane.b32.xlu0 %v12331_v57, %s16399_s19  ;;  %v2290_v12 = vmul.bf16 %v12378_v33, %v2276_v38  ;;  %v1940_v54 = vld [vmem:[#allocation4 + $0x8] sm:$0xf]  ;;  %v12412_v38 = vrot.slane %v12179_v20, 4  ;;  %v1942_v53 = vld [vmem:[#allocation4 + $0x18] sm:$0xf] }
 0x25a   : > { %v1595_v0 = vld [vmem:[#allocation4 + $0x8] sm:$0xf]  ;;  %16407 = vst [vmem:[#allocation42_spill] sm:$0xff] %v12400_v11  ;;  %v2068_v31 = vld [vmem:[#allocation4 + $0x18] sm:$0xf] }
 0x25b   : > { %v1612_v1 = vmul.bf16 %v12361_v36, %v1595_v0  ;;  %16409 = vst [vmem:[#allocation44_spill] sm:$0xff] %v12412_v38  ;;  %v12422_v0 = vrot.slane %v12181_v21, 4  ;;  %v2136_v44 = vld [vmem:[#allocation4 + $0x8] sm:$0xf] }
 0x25c   : > { %v1797_v48 = vld [vmem:[#allocation4 + $0x8] sm:$0xf] }
 0x25d   : > { %1554 = vrot.lane.b32.xlu1 %v1538_v51, %s16364_s18  ;;  %2649 = vrot.lane.b32.xlu0 %v12316_v61, %s16384_s2  ;;  %v12393_v51 = vrot.slane %v12171_v39, 4  ;;  %16411 = vst [vmem:[#allocation46_spill] sm:$0xff] %v12422_v0  ;;  %v12456_v3 = vsel %vm804_vm3, %v12422_v0, %v12181_v21  ;;  %v12475_v21 = vsel %vm636_vm6, %v12459_v4, %v12185_v14 }
 0x25e   : > { %16417 = vst [vmem:[#allocation52_spill] sm:$0xff] %v12456_v3  ;;  %16420 = vst [vmem:[#allocation55_spill] sm:$0xff] %v12475_v21  ;;  %v2150_v14 = vmul.bf16 %v12422_v0, %v2136_v44 }
 0x25f   : > { %16406 = vst [vmem:[#allocation41_spill] sm:$0xff] %v12393_v51  ;;  %v1954_v43 = vmul.bf16 %v12393_v51, %v1940_v54  ;;  %v12417_v54 = vld [vmem:[#allocation4 + $0x14] sm:$0xff] }
 0x260   : > { %16410 = vst [vmem:[#allocation45_spill] sm:$0xff] %v12417_v54  ;;  %v1813_v54 = vmul.bf16 %v12475_v21, %v12331_v57 }
 0x261   : > { %1758 = vrot.lane.b32.xlu1 %v1741_v10, %s16365_s11  ;;  %2985 = vrot.lane.b32.xlu0 %v12316_v61, %s16385_s13  ;;  %v2206_v10 = vld [vmem:[#allocation4 + $0x8] sm:$0xf] }
 0x265   : > { %1627 = vrot.lane.b32.xlu1 %v1611_v34, %s16363_s0  ;;  %1556 = vrot.lane.b32.xlu0 %v1539_v6, %s16364_s18  ;;  %v12404_v34 = vpop.permute.xlu0 %2459  ;;  %v12409_v6 = vsel %vm874_vm5, %v12378_v33, %v12169_v15  ;;  %v12427_v15 = vsel %vm706_vm8, %v12393_v51, %v12171_v39  ;;  %v2149_v39 = vmul.bf16 %v12456_v3, %v12331_v57 }
 0x266   : > { %16408 = vst [vmem:[#allocation43_spill] sm:$0xff] %v12409_v6  ;;  %16412 = vst [vmem:[#allocation47_spill] sm:$0xff] %v12427_v15 }
 0x269   : > { %2307 = vrot.lane.b32.xlu1 %v2290_v12, %s16360_s28  ;;  %1756 = vrot.lane.b32.xlu0 %v1740_v63, %s16365_s11  ;;  %v2220_v12 = vmul.bf16 %v12400_v11, %v2206_v10  ;;  %v2289_v63 = vmul.bf16 %v12409_v6, %v12331_v57 }
 0x26d   : > { %1971 = vrot.lane.b32.xlu1 %v1954_v43, %s16361_s21  ;;  %1629 = vrot.lane.b32.xlu0 %v1612_v1, %s16363_s0  ;;  %v12432_v43 = vsel %vm671_vm7, %v12412_v38, %v12179_v20  ;;  %v12434_v1 = vld [vmem:[#allocation4 + $0x4] sm:$0xff]  ;;  %v12451_v20 = vsel %vm839_vm4, %v12400_v11, %v12174_v62 }
 0x26e   : > { %16413 = vst [vmem:[#allocation48_spill] sm:$0xff] %v12432_v43  ;;  %16414 = vst [vmem:[#allocation49_spill] sm:$0xff] %v12434_v1  ;;  %v1883_v10 = vmul.bf16 %v12432_v43, %v12331_v57 }
 0x26f   : > { %16416 = vst [vmem:[#allocation51_spill] sm:$0xff] %v12451_v20 }
 0x271   : > { %2237 = vrot.lane.b32.xlu1 %v2220_v12, %s16357_s17  ;;  %2305 = vrot.lane.b32.xlu0 %v2289_v63, %s16360_s28  ;;  %v1953_v12 = vmul.bf16 %v12427_v15, %v12331_v57  ;;  %v12440_v63 = vpop.permute.xlu0 %11064 }
 0x272   : > { %16415 = vst [vmem:[#allocation50_spill] sm:$0xff] %v12440_v63 }
 0x275   : > { %1899 = vrot.lane.b32.xlu1 %v1883_v10, %s16362_s23  ;;  %1969 = vrot.lane.b32.xlu0 %v1953_v12, %s16361_s21  ;;  %v2219_v10 = vmul.bf16 %v12451_v20, %v12331_v57  ;;  %v1870_v12 = vld [vmem:[#allocation4 + $0x8] sm:$0xf]  ;;  %v12467_v62 = vpop.permute.xlu0 %2385 }
 0x276   : > { %v1884_v1 = vmul.bf16 %v12412_v38, %v1870_v12  ;;  %v12509_v12 = vsel %vm831_vm1, %v12199_v47, %v12192_v7  ;;  %v12528_v7 = vsel %vm16430_vm12, %v12230_v26, %v12226_v42  ;;  %v12545_v42 = vsel %vm16320_vm15, %v12207_v25, %v12202_v30  ;;  %v2012_v47 = vld [vmem:[#allocation4 + $0x18] sm:$0xf] }
 0x277   : > { %16426 = vst [vmem:[#allocation60_spill] sm:$0xff] %v12509_v12  ;;  %16431 = vst [vmem:[#allocation63_spill] sm:$0xff] %v12528_v7  ;;  %vm16438_vm12 = vcmask 252928  }
 0x278   : > { %16432 = vst [vmem:[#allocation64_spill] sm:$0xff] %v12545_v42  ;;  %v12575_v26 = vsel %vm16438_vm12, %v12284_v2, %v12280_v8  ;;  %vm16450_vm12 = vcmask 916480  }
 0x279   : > { %2165 = vrot.lane.b32.xlu1 %v2149_v39, %s16358_s24  ;;  %2235 = vrot.lane.b32.xlu0 %v2219_v10, %s16357_s17  ;;  %v12485_v39 = vsel %vm769_vm2, %v12470_v17, %v12183_v56  ;;  %v12490_v23 = vpop.permute.xlu0 %2389  ;;  %16439 = vst [vmem:[#allocation68_spill] sm:$0xff] %v12575_v26 }
 0x27a   : > { %16421 = vst [vmem:[#allocation56_spill] sm:$0xff] %v12485_v39  ;;  %v2079_v10 = vmul.bf16 %v12485_v39, %v12331_v57  ;;  %16422 = vst [vmem:[#allocation57_spill] sm:$0xff] %v12490_v23  ;;  %v2066_v57 = vld [vmem:[#allocation4 + $0x8] sm:$0xf] }
 0x27d   : > { %1829 = vrot.lane.b32.xlu1 %v1813_v54, %s16359_s29  ;;  %1901 = vrot.lane.b32.xlu0 %v1884_v1, %s16362_s23  ;;  %v12497_v54 = vsel %vm16423_vm0, %v12190_v18, %v12187_v22  ;;  %v1814_v1 = vmul.bf16 %v12459_v4, %v1797_v48  ;;  %v12504_v44 = vpop.permute.xlu0 %2603  ;;  %v2507_v22 = vmul.bf16 %v12316_v61, %v12509_v12  ;;  %vm16433_vm0 = vcmask 121856  }
 0x27e   : > { %16424 = vst [vmem:[#allocation58_spill] sm:$0xff] %v12497_v54  ;;  %v2773_v56 = vmul.bf16 %v12316_v61, %v12497_v54  ;;  %16425 = vst [vmem:[#allocation59_spill] sm:$0xff] %v12504_v44  ;;  %v12519_v48 = vsel %vm16427_vm14, %v12221_v52, %v12195_v29  ;;  %v2437_v29 = vmul.bf16 %v12316_v61, %v12528_v7  ;;  %vm16436_vm14 = vcmask 269312   ;;  %v1524_v52 = vld [vmem:[#allocation4 + $0x18] sm:$0xf] }
 0x27f   : > { %16428 = vst [vmem:[#allocation61_spill] sm:$0xff] %v12519_v48  ;;  %v12564_v30 = vsel %vm16436_vm14, %v12269_v59, %v12265_v49  ;;  %v1597_v59 = vld [vmem:[#allocation4 + $0x18] sm:$0xf]  ;;  %vm16449_vm14 = vcmask 130048  }
 0x280   : > { %16437 = vst [vmem:[#allocation67_spill] sm:$0xff] %v12564_v30  ;;  %v1614_v8 = vmul.bf16 %v12361_v36, %v1597_v59  ;;  %v2278_v44 = vld [vmem:[#allocation4 + $0x18] sm:$0xf] }
 0x281   : > { %2095 = vrot.lane.b32.xlu1 %v2079_v10, %s16355_s22  ;;  %2167 = vrot.lane.b32.xlu0 %v2150_v14, %s16358_s24  ;;  %v2080_v10 = vmul.bf16 %v12470_v17, %v2066_v57  ;;  %v2703_v14 = vmul.bf16 %v12316_v61, %v12519_v48 }
 0x285   : > { %2789 = vrot.lane.b32.xlu1 %v2773_v56, %s16352_s27  ;;  %1831 = vrot.lane.b32.xlu0 %v1814_v1, %s16359_s29  ;;  %v12523_v56 = vpop.permute.xlu0 %2607  ;;  %v12530_v1 = vld [vmem:[#allocation4 + $0x10] sm:$0xff] }
 0x286   : > { %16429 = vst [vmem:[#allocation62_spill] sm:$0xff] %v12523_v56  ;;  %v1955_v59 = vmul.bf16 %v12427_v15, %v12530_v1 }
 0x289   : > { %2523 = vrot.lane.b32.xlu1 %v2507_v22, %s16356_s25  ;;  %2097 = vrot.lane.b32.xlu0 %v2080_v10, %s16355_s22  ;;  %v12540_v57 = vpop.permute.xlu0 %2595  ;;  %v2367_v22 = vmul.bf16 %v12316_v61, %v12545_v42  ;;  %v12552_v10 = vsel %vm16433_vm0, %v12256_v37, %v12252_v55  ;;  %v1541_v55 = vmul.bf16 %v12340_v16, %v1524_v52  ;;  %v1872_v37 = vld [vmem:[#allocation4 + $0x18] sm:$0xf]  ;;  %vm16448_vm0 = vcmask 261120  }
 0x28a   : > { %16434 = vst [vmem:[#allocation65_spill] sm:$0xff] %v12552_v10  ;;  %v2913_v52 = vmul.bf16 %v12316_v61, %v12575_v26 }
 0x28d   : > { %2719 = vrot.lane.b32.xlu1 %v2703_v14, %s16351_s26  ;;  %1687 = vrot.lane.b32.xlu0 %v12530_v1, %s16396_s8  ;;  %v2577_v14 = vmul.bf16 %v12316_v61, %v12552_v10 }
 0x291   : > { %2453 = vrot.lane.b32.xlu1 %v2437_v29, %s16353_s14  ;;  %2029 = vrot.lane.b32.xlu0 %v12530_v1, %s16399_s19  ;;  %v12559_v29 = vpop.permute.xlu0 %2599 }
 0x292   : > { %16435 = vst [vmem:[#allocation66_spill] sm:$0xff] %v12559_v29 }
 0x295   : > { %2383 = vrot.lane.b32.xlu1 %v2367_v22, %s16354_s16  ;;  %2653 = vrot.lane.b32.xlu0 %v12321_v50, %s16384_s2  ;;  %v3039_v22 = vmul.bf16 %v12316_v61, %v12564_v30  ;;  %v12579_v49 = vpop.permute.xlu0 %3065 }
 0x296   : > { %16440 = vst [vmem:[#allocation69_spill] sm:$0xff] %v12579_v49 }
 0x299   : > { %2593 = vrot.lane.b32.xlu1 %v2577_v14, %s16370_s9  ;;  %2989 = vrot.lane.b32.xlu0 %v12321_v50, %s16385_s13  ;;  %v1742_v14 = vmul.bf16 %v12385_v46, %v12530_v1  ;;  %v12588_v18 = vpop.permute.xlu0 %3069 }
 0x29a   : > { %16441 = vst [vmem:[#allocation70_spill] sm:$0xff] %v12588_v18  ;;  %v1886_v18 = vmul.bf16 %v12412_v38, %v1872_v37  ;;  %v1816_v37 = vmul.bf16 %v12459_v4, %v1799_v60 }
 0x29d   : > { %1560 = vrot.lane.b32.xlu0 %v1541_v55, %s16364_s18  ;;  %3055 = vrot.lane.b32.xlu1 %v3039_v22, %s16368_s30  ;;  %v1670_v55 = vld [vmem:[#allocation4 + $0x18] sm:$0xf]  ;;  %v2291_v22 = vmul.bf16 %v12409_v6, %v12530_v1  ;;  %v12596_v61 = vpop.permute.xlu0 %3057 }
 0x2a1   : > { %1760 = vrot.lane.b32.xlu0 %v1742_v14, %s16365_s11  ;;  %2929 = vrot.lane.b32.xlu1 %v2913_v52, %s16366_s15  ;;  %v1540_v14 = vmul.bf16 %v12530_v1, %v12348_v13  ;;  %v1726_v52 = vld [vmem:[#allocation4 + $0x18] sm:$0xf] }
 0x2a5   : > { %1633 = vrot.lane.b32.xlu0 %v1614_v8, %s16363_s0  ;;  %1689 = vrot.lane.b32.xlu1 %v1670_v55, %s16396_s8  ;;  %v12602_v8 = vpop.permute.xlu1 %2837  ;;  %v2221_v55 = vmul.bf16 %v12451_v20, %v12530_v1 }
 0x2a9   : > { %2309 = vrot.lane.b32.xlu0 %v2291_v22, %s16360_s28  ;;  %2031 = vrot.lane.b32.xlu1 %v2012_v47, %s16399_s19  ;;  %v1743_v47 = vmul.bf16 %v12355_v32, %v1726_v52  ;;  %v12609_v22 = vpop.permute.xlu0 %3061  ;;  %v12613_v49 = vpop.permute.xlu1 %2393 }
 0x2aa   : > { %16442 = vst [vmem:[#allocation71_spill] sm:$0xff] %v12609_v22  ;;  %16443 = vst [vmem:[#allocation72_spill] sm:$0xff] %v12613_v49  ;;  %v1815_v49 = vmul.bf16 %v12475_v21, %v12530_v1 }
 0x2ad   : > { %1973 = vrot.lane.b32.xlu0 %v1955_v59, %s16361_s21  ;;  %1558 = vrot.lane.b32.xlu1 %v1540_v14, %s16364_s18  ;;  %v1613_v59 = vmul.bf16 %v12530_v1, %v12372_v24  ;;  %v2138_v14 = vld [vmem:[#allocation4 + $0x18] sm:$0xf]  ;;  %v12620_v52 = vpop.permute.xlu0 %11074  ;;  %v12622_v56 = vpop.permute.xlu1 %2397 }
 0x2ae   : > { %16444 = vst [vmem:[#allocation73_spill] sm:$0xff] %v12620_v52  ;;  %16445 = vst [vmem:[#allocation74_spill] sm:$0xff] %v12622_v56  ;;  %v2208_v56 = vld [vmem:[#allocation4 + $0x18] sm:$0xf] }
 0x2b1   : > { %2239 = vrot.lane.b32.xlu0 %v2221_v55, %s16357_s17  ;;  %1762 = vrot.lane.b32.xlu1 %v1743_v47, %s16365_s11  ;;  %v2152_v55 = vmul.bf16 %v12422_v0, %v2138_v14  ;;  %v2292_v47 = vmul.bf16 %v12378_v33, %v2278_v44  ;;  %v12630_v41 = vpop.permute.xlu0 %2939  ;;  %v2082_v44 = vmul.bf16 %v12470_v17, %v2068_v31 }
 0x2b2   : > { %16446 = vst [vmem:[#allocation75_spill] sm:$0xff] %v12630_v41  ;;  %v2222_v14 = vmul.bf16 %v12400_v11, %v2208_v56 }
 0x2b5   : > { %1905 = vrot.lane.b32.xlu0 %v1886_v18, %s16362_s23  ;;  %1631 = vrot.lane.b32.xlu1 %v1613_v59, %s16363_s0  ;;  %v1956_v18 = vmul.bf16 %v12393_v51, %v1942_v53  ;;  %v12632_v59 = vpop.permute.xlu1 %11069  ;;  %v12640_v60 = vpop.permute.xlu0 %2943 }
 0x2b6   : > { %16447 = vst [vmem:[#allocation76_spill] sm:$0xff] %v12640_v60  ;;  %v11071_v22 = vunpack.i.l.bf16 %v12632_v59 }
 0x2b8   : > { %v2666_v29 = vrot.slane %v11071_v22, 4 }
 0x2b9   : > { %2171 = vrot.lane.b32.xlu0 %v2152_v55, %s16358_s24  ;;  %2311 = vrot.lane.b32.xlu1 %v2292_v47, %s16360_s28  ;;  %v12642_v53 = vpop.permute.xlu1 %11079  ;;  %v1885_v55 = vmul.bf16 %v12432_v43, %v12530_v1  ;;  %v12646_v47 = vld [vmem:[#allocation4 + $0x20] sm:$0xff] }
 0x2bd   : > { %1835 = vrot.lane.b32.xlu0 %v1816_v37, %s16359_s29  ;;  %1975 = vrot.lane.b32.xlu1 %v1956_v18, %s16361_s21  ;;  %v2151_v37 = vmul.bf16 %v12456_v3, %v12530_v1 }
 0x2c1   : > { %2101 = vrot.lane.b32.xlu0 %v2082_v44, %s16355_s22  ;;  %2241 = vrot.lane.b32.xlu1 %v2222_v14, %s16357_s17  ;;  %v2014_v14 = vld [vmem:[#allocation4 + $0x28] sm:$0xf] }
 0x2c5   : > { %1691 = vrot.lane.b32.xlu0 %v12646_v47, %s16396_s8  ;;  %1903 = vrot.lane.b32.xlu1 %v1885_v55, %s16362_s23  ;;  %v1744_v55 = vmul.bf16 %v12385_v46, %v12646_v47 }
 0x2c7   : > { %v1684_v31 = vpop.permute.xlu0 %1683  ;;  %v1686_v56 = vpop.permute.xlu1 %1685 }
 0x2c8   : > { %v1699_v18 = vrot.slane %v1684_v31, 4  ;;  %v1700_v44 = vrot.slane %v1686_v56, 4 }
 0x2c9   : > { %2035 = vrot.lane.b32.xlu0 %v2014_v14, %s16399_s19  ;;  %2169 = vrot.lane.b32.xlu1 %v2151_v37, %s16358_s24  ;;  %v2081_v14 = vmul.bf16 %v12485_v39, %v12530_v1  ;;  %v2775_v1 = vmul.bf16 %v12321_v50, %v12497_v54 }
 0x2ca   : > { %v1707_v60 = vsel %vm498_vm10, %v1699_v18, %v1700_v44  ;;  %v1615_v44 = vmul.bf16 %v12646_v47, %v12372_v24 }
 0x2cb   : > { %v1708_v41 = vsel %vm16448_vm0, %v1684_v31, %v1707_v60  ;;  %v2026_v52 = vpop.permute.xlu0 %2025  ;;  %v2028_v63 = vpop.permute.xlu1 %2027  ;;  %vm16451_vm0 = vcmask 785408  }
 0x2cc   : > { %1719 = vst [vmem:[#allocation2 + $0x108] sm:$0xff] %v1708_v41  ;;  %v2041_v56 = vrot.slane %v2026_v52, 4  ;;  %v2042_v25 = vrot.slane %v2028_v63, 4  ;;  %v11081_v41 = vunpack.i.l.bf16 %v12642_v53 }
 0x2cd   : > { %1764 = vrot.lane.b32.xlu0 %v1744_v55, %s16365_s11  ;;  %1833 = vrot.lane.b32.xlu1 %v1815_v49, %s16359_s29 }
 0x2ce   : > { %v2049_v37 = vsel %vm498_vm10, %v2041_v56, %v2042_v25  ;;  %v2293_v56 = vmul.bf16 %v12409_v6, %v12646_v47  ;;  %v3002_v22 = vrot.slane %v11081_v41, 4 }
 0x2cf   : > { %v2050_v60 = vsel %vm16449_vm14, %v2026_v52, %v2049_v37  ;;  %v2650_v31 = vpop.permute.xlu0 %2649  ;;  %v1555_v18 = vpop.permute.xlu1 %1554  ;;  %vm16452_vm14 = vcmask 277504  }
 0x2d0   : > { %2061 = vst [vmem:[#allocation2 + $0x3a8] sm:$0xff] %v2050_v60  ;;  %v2665_v63 = vrot.slane %v2650_v31, 4 }
 0x2d1   : > { %1635 = vrot.lane.b32.xlu0 %v1615_v44, %s16363_s0  ;;  %2099 = vrot.lane.b32.xlu1 %v2081_v14, %s16355_s22  ;;  %v1957_v14 = vmul.bf16 %v12427_v15, %v12646_v47 }
 0x2d2   : > { %v2673_v25 = vsel %vm498_vm10, %v2665_v63, %v2666_v29  ;;  %v2509_v63 = vmul.bf16 %v12321_v50, %v12509_v12 }
 0x2d3   : > { %v2674_v49 = vsel %vm16450_vm12, %v2650_v31, %v2673_v25  ;;  %v2986_v52 = vpop.permute.xlu0 %2985  ;;  %v1759_v55 = vpop.permute.xlu1 %1758  ;;  %v1570_v25 = vrot.slane %v1555_v18, 4  ;;  %vm16453_vm12 = vcmask 252928  }
 0x2d4   : > { %2685 = vst [vmem:[#allocation2 + $0x588] sm:$0xff] %v2674_v49  ;;  %v3001_v37 = vrot.slane %v2986_v52, 4 }
 0x2d5   : > { %2313 = vrot.lane.b32.xlu0 %v2293_v56, %s16360_s28  ;;  %2793 = vrot.lane.b32.xlu1 %v2775_v1, %s16352_s27 }
 0x2d6   : > { %v3009_v60 = vsel %vm498_vm10, %v3001_v37, %v3002_v22  ;;  %v2223_v22 = vmul.bf16 %v12451_v20, %v12646_v47  ;;  %v2705_v37 = vmul.bf16 %v12321_v50, %v12519_v48 }
 0x2d7   : > { %v3010_v29 = vsel %vm16451_vm0, %v2986_v52, %v3009_v60  ;;  %v1557_v31 = vpop.permute.xlu0 %1556  ;;  %v1628_v44 = vpop.permute.xlu1 %1627  ;;  %v1773_v60 = vrot.slane %v1759_v55, 4  ;;  %vm16454_vm0 = vcmask 269312  }
 0x2d8   : > { %3021 = vst [vmem:[#allocation2 + $0x2d8] sm:$0xff] %v3010_v29  ;;  %v1571_v41 = vrot.slane %v1557_v31, 4 }
 0x2d9   : > { %1977 = vrot.lane.b32.xlu0 %v1957_v14, %s16361_s21  ;;  %2527 = vrot.lane.b32.xlu1 %v2509_v63, %s16356_s25 }
 0x2da   : > { %v1578_v49 = vsel %vm498_vm10, %v1570_v25, %v1571_v41  ;;  %v1887_v25 = vmul.bf16 %v12432_v43, %v12646_v47  ;;  %v2439_v41 = vmul.bf16 %v12321_v50, %v12528_v7 }
 0x2db   : > { %v1579_v56 = vsel %vm16452_vm14, %v1555_v18, %v1578_v49  ;;  %v1757_v52 = vpop.permute.xlu0 %1756  ;;  %v2308_v1 = vpop.permute.xlu1 %2307  ;;  %v1643_v49 = vrot.slane %v1628_v44, 4  ;;  %vm16455_vm14 = vcmask 138240  }
 0x2dc   : > { %1590 = vst [vmem:[#allocation2 + $0x2b0] sm:$0xff] %v1579_v56  ;;  %v1772_v29 = vrot.slane %v1757_v52, 4  ;;  %v2140_v56 = vld [vmem:[#allocation4 + $0x28] sm:$0xf]  ;;  %v2322_v23 = vrot.slane %v2308_v1, 4 }
 0x2dd   : > { %2243 = vrot.lane.b32.xlu0 %v2223_v22, %s16357_s17  ;;  %2723 = vrot.lane.b32.xlu1 %v2705_v37, %s16351_s26 }
 0x2de   : > { %v1780_v31 = vsel %vm498_vm10, %v1772_v29, %v1773_v60  ;;  %v2154_v29 = vmul.bf16 %v12422_v0, %v2140_v56  ;;  %v2579_v56 = vmul.bf16 %v12321_v50, %v12552_v10 }
 0x2df   : > { %v1781_v14 = vsel %vm16453_vm12, %v1757_v52, %v1780_v31  ;;  %v1630_v18 = vpop.permute.xlu0 %1629  ;;  %v1972_v63 = vpop.permute.xlu1 %1971  ;;  %v2369_v31 = vmul.bf16 %v12321_v50, %v12545_v42  ;;  %vm16456_vm12 = vcmask 15360  }
 0x2e0   : > { %1792 = vst [vmem:[#allocation2 + $0x548] sm:$0xff] %v1781_v14  ;;  %v1644_v55 = vrot.slane %v1630_v18, 4  ;;  %v1801_v18 = vld [vmem:[#allocation4 + $0x28] sm:$0xf] }
 0x2e1   : > { %1907 = vrot.lane.b32.xlu0 %v1887_v25, %s16362_s23  ;;  %2457 = vrot.lane.b32.xlu1 %v2439_v41, %s16353_s14 }
 0x2e2   : > { %v1651_v22 = vsel %vm498_vm10, %v1643_v49, %v1644_v55  ;;  %v1818_v55 = vmul.bf16 %v12459_v4, %v1801_v18 }
 0x2e3   : > { %v1652_v52 = vsel %vm16454_vm0, %v1628_v44, %v1651_v22  ;;  %v2306_v37 = vpop.permute.xlu0 %2305  ;;  %v2238_v60 = vpop.permute.xlu1 %2237  ;;  %v1986_v22 = vrot.slane %v1972_v63, 4  ;;  %vm16457_vm0 = vcmask 146432  }
 0x2e4   : > { %1663 = vst [vmem:[#allocation2 + $0x450] sm:$0xff] %v1652_v52  ;;  %v2321_v14 = vrot.slane %v2306_v37, 4  ;;  %v2252_v18 = vrot.slane %v2238_v60, 4 }
 0x2e5   : > { %2175 = vrot.lane.b32.xlu0 %v2154_v29, %s16358_s24  ;;  %2387 = vrot.lane.b32.xlu1 %v2369_v31, %s16354_s16  ;;  %v2083_v31 = vmul.bf16 %v12485_v39, %v12646_v47 }
 0x2e6   : > { %v2329_v25 = vsel %vm498_vm10, %v2321_v14, %v2322_v23  ;;  %v3041_v14 = vmul.bf16 %v12321_v50, %v12564_v30  ;;  %v1672_v50 = vld [vmem:[#allocation4 + $0x28] sm:$0xf] }
 0x2e7   : > { %v2330_v41 = vsel %vm16320_vm15, %v2306_v37, %v2329_v25  ;;  %v1970_v44 = vpop.permute.xlu0 %1969  ;;  %v1900_v49 = vpop.permute.xlu1 %1899 }
 0x2e8   : > { %2341 = vst [vmem:[#allocation2 + $0x338] sm:$0xff] %v2330_v41  ;;  %v1985_v1 = vrot.slane %v1970_v44, 4 }
 0x2e9   : > { %1839 = vrot.lane.b32.xlu0 %v1818_v55, %s16359_s29  ;;  %2597 = vrot.lane.b32.xlu1 %v2579_v56, %s16370_s9  ;;  %v2371_v56 = vmul.bf16 %v12328_v40, %v12545_v42 }
 0x2ea   : > { %v1993_v52 = vsel %vm498_vm10, %v1985_v1, %v1986_v22  ;;  %v1915_v22 = vrot.slane %v1900_v49, 4 }
 0x2eb   : > { %v1994_v23 = vsel %vm16455_vm14, %v1970_v44, %v1993_v52  ;;  %v2236_v29 = vpop.permute.xlu0 %2235  ;;  %v2166_v37 = vpop.permute.xlu1 %2165  ;;  %vm16458_vm14 = vcmask 244736  }
 0x2ec   : > { %2005 = vst [vmem:[#allocation2 + $0x248] sm:$0xff] %v1994_v23  ;;  %v2251_v63 = vrot.slane %v2236_v29, 4 }
 0x2ed   : > { %2103 = vrot.lane.b32.xlu0 %v2083_v31, %s16355_s22  ;;  %3059 = vrot.lane.b32.xlu1 %v3041_v14, %s16368_s30 }
 0x2ee   : > { %v2259_v25 = vsel %vm498_vm10, %v2251_v63, %v2252_v18  ;;  %v12735_v18 = vld [vmem:[#allocation4 + $0x30] sm:$0xff] }
 0x2ef   : > { %v2260_v41 = vsel %vm16456_vm12, %v2236_v29, %v2259_v25  ;;  %v1902_v44 = vpop.permute.xlu0 %1901  ;;  %v1830_v55 = vpop.permute.xlu1 %1829  ;;  %v2181_v29 = vrot.slane %v2166_v37, 4  ;;  %vm16459_vm12 = vcmask 121856  }
 0x2f0   : > { %2271 = vst [vmem:[#allocation2 + $0x1f8] sm:$0xff] %v2260_v41  ;;  %v1916_v1 = vrot.slane %v1902_v44, 4 }
 0x2f1   : > { %2391 = vrot.lane.b32.xlu0 %v2371_v56, %s16354_s16  ;;  %1693 = vrot.lane.b32.xlu1 %v1672_v50, %s16396_s8  ;;  %v1845_v56 = vrot.slane %v1830_v55, 4  ;;  %v2016_v50 = vld [vmem:[#allocation4 + $0x38] sm:$0xf] }
 0x2f2   : > { %v1923_v60 = vsel %vm498_vm10, %v1915_v22, %v1916_v1 }
 0x2f3   : > { %v1924_v52 = vsel %vm16457_vm0, %v1900_v49, %v1923_v60  ;;  %v2168_v23 = vpop.permute.xlu0 %2167  ;;  %v2096_v31 = vpop.permute.xlu1 %2095  ;;  %v2806_v49 = vrot.slane %v12301_v9, 4  ;;  %vm16460_vm0 = vcmask 916480  }
 0x2f4   : > { %1935 = vst [vmem:[#allocation2 + $0x330] sm:$0xff] %v1924_v52  ;;  %v2182_v14 = vrot.slane %v2168_v23, 4 }
 0x2f5   : > { %1695 = vrot.lane.b32.xlu0 %v12735_v18, %s16396_s8  ;;  %2033 = vrot.lane.b32.xlu1 %v12646_v47, %s16399_s19 }
 0x2f6   : > { %v2189_v63 = vsel %vm498_vm10, %v2181_v29, %v2182_v14  ;;  %v1746_v14 = vmul.bf16 %v12385_v46, %v12735_v18 }
 0x2f7   : > { %v2190_v25 = vsel %vm831_vm1, %v2166_v37, %v2189_v63  ;;  %v1832_v41 = vpop.permute.xlu0 %1831  ;;  %v2790_v44 = vpop.permute.xlu1 %2789  ;;  %v2540_v63 = vrot.slane %v12305_v19, 4 }
 0x2f8   : > { %2201 = vst [vmem:[#allocation2 + $0x598] sm:$0xff] %v2190_v25  ;;  %v1846_v22 = vrot.slane %v1832_v41, 4  ;;  %v2805_v1 = vrot.slane %v2790_v44, 4  ;;  %v2111_v25 = vrot.slane %v2096_v31, 4 }
 0x2f9   : > { %2039 = vrot.lane.b32.xlu0 %v2016_v50, %s16399_s19  ;;  %2657 = vrot.lane.b32.xlu1 %v12328_v40, %s16384_s2 }
 0x2fa   : > { %v1853_v60 = vsel %vm498_vm10, %v1845_v56, %v1846_v22  ;;  %v2813_v52 = vsel %vm498_vm10, %v2805_v1, %v2806_v49  ;;  %v1617_v1 = vmul.bf16 %v12735_v18, %v12372_v24 }
 0x2fb   : > { %v1854_v37 = vsel %vm16458_vm14, %v1830_v55, %v1853_v60  ;;  %v2814_v23 = vsel %vm671_vm7, %v2790_v44, %v2813_v52  ;;  %v2098_v29 = vpop.permute.xlu0 %2097  ;;  %v2524_v9 = vpop.permute.xlu1 %2523  ;;  %v1542_v60 = vmul.bf16 %v12646_v47, %v12348_v13  ;;  %v2736_v52 = vrot.slane %v12352_v5, 4 }
 0x2fc   : > { %1865 = vst [vmem:[#allocation2 + $0x580] sm:$0xff] %v1854_v37  ;;  %2825 = vst [vmem:[#allocation2 + $0x3f8] sm:$0xff] %v2814_v23  ;;  %v2112_v41 = vrot.slane %v2098_v29, 4  ;;  %v2539_v50 = vrot.slane %v2524_v9, 4  ;;  %v1728_v37 = vld [vmem:[#allocation4 + $0x28] sm:$0xf]  ;;  %v11072_v23 = vunpack.i.h.bf16 %v12632_v59  ;;  %v1544_v5 = vmul.bf16 %v12735_v18, %v12348_v13 }
 0x2fd   : > { %1768 = vrot.lane.b32.xlu0 %v1746_v14, %s16365_s11  ;;  %2993 = vrot.lane.b32.xlu1 %v12328_v40, %s16385_s13  ;;  %vm16461_vm14 = vcmask 785408  }
 0x2fe   : > { %v2119_v55 = vsel %vm498_vm10, %v2111_v25, %v2112_v41  ;;  %v2547_v44 = vsel %vm498_vm10, %v2539_v50, %v2540_v63  ;;  %v1745_v63 = vmul.bf16 %v12355_v32, %v1728_v37  ;;  %v2470_v25 = vrot.slane %v12390_v58, 4  ;;  %v1599_v50 = vld [vmem:[#allocation4 + $0x28] sm:$0xf] }
 0x2ff   : > { %v2120_v49 = vsel %vm16459_vm12, %v2096_v31, %v2119_v55  ;;  %v2548_v56 = vsel %vm804_vm3, %v2524_v9, %v2547_v44  ;;  %v12761_v22 = vpop.permute.xlu0 %1687  ;;  %v2720_v19 = vpop.permute.xlu1 %2719  ;;  %v2668_v55 = vrot.slane %v11072_v23, 4  ;;  %v2400_v58 = vrot.slane %v12467_v62, 4  ;;  %v1526_v37 = vld [vmem:[#allocation4 + $0x28] sm:$0xf] }
 0x300   : > { %2131 = vst [vmem:[#allocation2 + $0x98] sm:$0xff] %v2120_v49  ;;  %2559 = vst [vmem:[#allocation2 + $0x2f8] sm:$0xff] %v2548_v56  ;;  %v2735_v40 = vrot.slane %v2720_v19, 4  ;;  %vm16462_vm12 = vcmask 261120  }
 0x301   : > { %1639 = vrot.lane.b32.xlu0 %v1617_v1, %s16363_s0  ;;  %1562 = vrot.lane.b32.xlu1 %v1542_v60, %s16364_s18  ;;  %v1616_v1 = vmul.bf16 %v12361_v36, %v1599_v50  ;;  %v11082_v60 = vunpack.i.h.bf16 %v12642_v53  ;;  %v1959_v53 = vmul.bf16 %v12427_v15, %v12735_v18  ;;  %v2212_v15 = vld [vmem:[#allocation4 + $0x38] sm:$0xf] }
 0x302   : > { %v2743_v31 = vsel %vm498_vm10, %v2735_v40, %v2736_v52 }
 0x303   : > { %v2744_v29 = vsel %vm706_vm8, %v2720_v19, %v2743_v31  ;;  %v12773_v9 = vpop.permute.xlu0 %2029  ;;  %v2454_v14 = vpop.permute.xlu1 %2453  ;;  %v2295_v19 = vmul.bf16 %v12409_v6, %v12735_v18 }
 0x304   : > { %2755 = vst [vmem:[#allocation2 + $0x390] sm:$0xff] %v2744_v29  ;;  %v2469_v41 = vrot.slane %v2454_v14, 4 }
 0x305   : > { %1566 = vrot.lane.b32.xlu0 %v1544_v5, %s16364_s18  ;;  %1766 = vrot.lane.b32.xlu1 %v1745_v63, %s16365_s11  ;;  %v1543_v63 = vmul.bf16 %v12340_v16, %v1526_v37  ;;  %v1944_v37 = vld [vmem:[#allocation4 + $0x28] sm:$0xf] }
 0x306   : > { %v2477_v59 = vsel %vm498_vm10, %v2469_v41, %v2470_v25  ;;  %v2610_v25 = vrot.slane %v12540_v57, 4  ;;  %v3004_v41 = vrot.slane %v11082_v60, 4 }
 0x307   : > { %v2478_v44 = vsel %vm839_vm4, %v2454_v14, %v2477_v59  ;;  %v2654_v49 = vpop.permute.xlu0 %2653  ;;  %v2384_v56 = vpop.permute.xlu1 %2383 }
 0x308   : > { %2489 = vst [vmem:[#allocation2 + $0x308] sm:$0xff] %v2478_v44  ;;  %v2667_v52 = vrot.slane %v2654_v49, 4  ;;  %v2399_v40 = vrot.slane %v2384_v56, 4 }
 0x309   : > { %2317 = vrot.lane.b32.xlu0 %v2295_v19, %s16360_s28  ;;  %1637 = vrot.lane.b32.xlu1 %v1616_v1, %s16363_s0 }
 0x30a   : > { %v2675_v31 = vsel %vm498_vm10, %v2667_v52, %v2668_v55  ;;  %v2407_v23 = vsel %vm498_vm10, %v2399_v40, %v2400_v58  ;;  %v2280_v55 = vld [vmem:[#allocation4 + $0x28] sm:$0xf]  ;;  %v2225_v58 = vmul.bf16 %v12451_v20, %v12735_v18  ;;  %v3072_v52 = vrot.slane %v12596_v61, 4 }
 0x30b   : > { %v2676_v29 = vsel %vm16460_vm0, %v2654_v49, %v2675_v31  ;;  %v2408_v14 = vsel %vm874_vm5, %v2384_v56, %v2407_v23  ;;  %v2990_v5 = vpop.permute.xlu0 %2989  ;;  %v2594_v62 = vpop.permute.xlu1 %2593  ;;  %v2294_v60 = vmul.bf16 %v12378_v33, %v2280_v55  ;;  %v1958_v61 = vmul.bf16 %v12393_v51, %v1944_v37 }
 0x30c   : > { %2686 = vst [vmem:[#allocation2 + $0x148] sm:$0xff] %v2676_v29  ;;  %2419 = vst [vmem:[#allocation2 + $0x608] sm:$0xff] %v2408_v14  ;;  %v3003_v50 = vrot.slane %v2990_v5, 4  ;;  %v2609_v59 = vrot.slane %v2594_v62, 4  ;;  %vm16463_vm0 = vcmask 130048  }
 0x30d   : > { %1981 = vrot.lane.b32.xlu0 %v1959_v53, %s16361_s21  ;;  %1564 = vrot.lane.b32.xlu1 %v1543_v63, %s16364_s18  ;;  %v2210_v53 = vld [vmem:[#allocation4 + $0x28] sm:$0xf] }
 0x30e   : > { %v3011_v44 = vsel %vm498_vm10, %v3003_v50, %v3004_v41  ;;  %v2617_v49 = vsel %vm498_vm10, %v2609_v59, %v2610_v25  ;;  %v2224_v50 = vmul.bf16 %v12400_v11, %v2210_v53  ;;  %v1701_v59 = vrot.slane %v12761_v22, 4 }
 0x30f   : > { %v3012_v56 = vsel %vm16461_vm14, %v2990_v5, %v3011_v44  ;;  %v2618_v19 = vsel %vm769_vm2, %v2594_v62, %v2617_v49  ;;  %v1561_v1 = vpop.permute.xlu0 %1560  ;;  %v3056_v57 = vpop.permute.xlu1 %3055  ;;  %v1889_v5 = vmul.bf16 %v12432_v43, %v12735_v18  ;;  %v2142_v62 = vld [vmem:[#allocation4 + $0x38] sm:$0xf]  ;;  %v1874_v49 = vld [vmem:[#allocation4 + $0x28] sm:$0xf]  ;;  %vm16464_vm14 = vcmask 277504  }
 0x310   : > { %3022 = vst [vmem:[#allocation2 + $0x4e0] sm:$0xff] %v3012_v56  ;;  %2629 = vst [vmem:[#allocation2 + $0x538] sm:$0xff] %v2618_v19  ;;  %v3071_v40 = vrot.slane %v3056_v57, 4  ;;  %v2156_v41 = vmul.bf16 %v12422_v0, %v2142_v62  ;;  %v1803_v44 = vld [vmem:[#allocation4 + $0x38] sm:$0xf]  ;;  %v2153_v62 = vmul.bf16 %v12456_v3, %v12646_v47  ;;  %v1573_v53 = vrot.slane %v1561_v1, 4 }
 0x311   : > { %2247 = vrot.lane.b32.xlu0 %v2225_v58, %s16357_s17  ;;  %2315 = vrot.lane.b32.xlu1 %v2294_v60, %s16360_s28  ;;  %v1820_v60 = vmul.bf16 %v12459_v4, %v1803_v44  ;;  %v1817_v1 = vmul.bf16 %v12475_v21, %v12646_v47  ;;  %v11513_v4 = vld [vmem:[#allocation4 + $0x14] sm:$0xff] }
 0x312   : > { %v3079_v31 = vsel %vm498_vm10, %v3071_v40, %v3072_v52  ;;  %v1888_v52 = vmul.bf16 %v12412_v38, %v1874_v49  ;;  %v2043_v40 = vrot.slane %v12773_v9, 4 }
 0x313   : > { %v3080_v23 = vsel %vm518_vm13, %v3056_v57, %v3079_v31  ;;  %v1761_v29 = vpop.permute.xlu0 %1760  ;;  %v12812_v14 = vpop.permute.xlu1 %2929 }
 0x314   : > { %3091 = vst [vmem:[#allocation2 + $0x610] sm:$0xff] %v3080_v23  ;;  %v1774_v49 = vrot.slane %v1761_v29, 4 }
 0x315   : > { %1911 = vrot.lane.b32.xlu0 %v1889_v5, %s16362_s23  ;;  %1979 = vrot.lane.b32.xlu1 %v1958_v61, %s16361_s21  ;;  %v2085_v61 = vmul.bf16 %v12485_v39, %v12735_v18 }
 0x317   : > { %v1634_v63 = vpop.permute.xlu0 %1633  ;;  %v1690_v25 = vpop.permute.xlu1 %1689 }
 0x318   : > { %v1702_v55 = vrot.slane %v1690_v25, 4 }
 0x319   : > { %2179 = vrot.lane.b32.xlu0 %v2156_v41, %s16358_s24  ;;  %2245 = vrot.lane.b32.xlu1 %v2224_v50, %s16357_s17  ;;  %v12841_v41 = vld [vmem:[#allocation4 + $0x34] sm:$0xff] }
 0x31a   : > { %v1709_v56 = vsel %vm498_vm10, %v1701_v59, %v1702_v55  ;;  %v2373_v44 = vmul.bf16 %v12545_v42, %v12841_v41  ;;  %v2282_v42 = vld [vmem:[#allocation4 + $0x38] sm:$0xf]  ;;  %v2583_v6 = vmul.bf16 %v12552_v10, %v12841_v41  ;;  %v2919_v39 = vmul.bf16 %v12575_v26, %v12841_v41 }
 0x31b   : > { %v1710_v19 = vsel %vm16462_vm12, %v12761_v22, %v1709_v56  ;;  %v2310_v57 = vpop.permute.xlu0 %2309  ;;  %v2032_v58 = vpop.permute.xlu1 %2031  ;;  %vm16465_vm12 = vcmask 252928  }
 0x31c   : > { %1720 = vst [vmem:[#allocation2 + $0x510] sm:$0xff] %v1710_v19  ;;  %v2044_v37 = vrot.slane %v2032_v58, 4  ;;  %v2900_v19 = vld [vmem:[#allocation4 + $0xc] sm:$0xf]  ;;  %v2070_v58 = vld [vmem:[#allocation4 + $0x28] sm:$0xf] }
 0x31d   : > { %1843 = vrot.lane.b32.xlu0 %v1820_v60, %s16359_s29  ;;  %1909 = vrot.lane.b32.xlu1 %v1888_v52, %s16362_s23  ;;  %v2084_v47 = vmul.bf16 %v12470_v17, %v2070_v58 }
 0x31e   : > { %v2051_v31 = vsel %vm498_vm10, %v2043_v40, %v2044_v37 }
 0x31f   : > { %v2052_v23 = vsel %vm16463_vm0, %v12773_v9, %v2051_v31  ;;  %v12835_v22 = vpop.permute.xlu0 %1973  ;;  %v1559_v5 = vpop.permute.xlu1 %1558  ;;  %v2914_v31 = vmul.bf16 %v12284_v2, %v2900_v19  ;;  %vm16466_vm0 = vcmask 269312  }
 0x320   : > { %2062 = vst [vmem:[#allocation2 + $0x5e0] sm:$0xff] %v2052_v23  ;;  %v1572_v25 = vrot.slane %v1559_v5, 4  ;;  %v1646_v23 = vrot.slane %v1634_v63, 4 }
 0x321   : > { %2107 = vrot.lane.b32.xlu0 %v2085_v61, %s16355_s22  ;;  %2173 = vrot.lane.b32.xlu1 %v2153_v62, %s16358_s24  ;;  %v2902_v61 = vld [vmem:[#allocation4 + $0x1c] sm:$0xf]  ;;  %v12861_v62 = vld [vmem:[#allocation4 + $0x24] sm:$0xff] }
 0x322   : > { %v1580_v9 = vsel %vm498_vm10, %v1572_v25, %v1573_v53  ;;  %v2777_v63 = vmul.bf16 %v12497_v54, %v12861_v62 }
 0x323   : > { %v1581_v50 = vsel %vm16464_vm14, %v1559_v5, %v1580_v9  ;;  %v12847_v59 = vpop.permute.xlu0 %2239  ;;  %v1763_v55 = vpop.permute.xlu1 %1762  ;;  %vm16468_vm14 = vcmask 138240  }
 0x324   : > { %1591 = vst [vmem:[#allocation2 + $0x3b0] sm:$0xff] %v1581_v50  ;;  %v1775_v56 = vrot.slane %v1763_v55, 4  ;;  %v2916_v50 = vmul.bf16 %v12284_v2, %v2902_v61  ;;  %v2323_v55 = vrot.slane %v2310_v57, 4  ;;  %v5897_v2 = vld [vmem:[#allocation5 + $0x7c] sm:$0xf] }
 0x325   : > { %2395 = vrot.lane.b32.xlu0 %v2373_v44, %s16354_s16  ;;  %1837 = vrot.lane.b32.xlu1 %v1817_v1, %s16359_s29  ;;  %v2834_v1 = vld [vmem:[#allocation4 + $0x2c] sm:$0xf] }
 0x326   : > { %v1782_v60 = vsel %vm498_vm10, %v1774_v49, %v1775_v56  ;;  %v12871_v49 = vrot.slane %v12602_v8, 4 }
 0x327   : > { %v1783_v52 = vsel %vm16465_vm12, %v1761_v29, %v1782_v60  ;;  %v12857_v40 = vpop.permute.xlu0 %1905  ;;  %v1632_v37 = vpop.permute.xlu1 %1631  ;;  %vm16470_vm12 = vcmask 15360  }
 0x328   : > { %1793 = vst [vmem:[#allocation2 + $0x500] sm:$0xff] %v1783_v52  ;;  %v1645_v5 = vrot.slane %v1632_v37, 4  ;;  %16467 = vst [vmem:[#allocation77_spill] sm:$0xff] %v12871_v49  ;;  %v2848_v52 = vmul.bf16 %v12871_v49, %v2834_v1 }
 0x329   : > { %2931 = vrot.lane.b32.xlu0 %v2914_v31, %s16366_s15  ;;  %2105 = vrot.lane.b32.xlu1 %v2084_v47, %s16355_s22  ;;  %v1987_v31 = vrot.slane %v12835_v22, 4 }
 0x32a   : > { %v1653_v53 = vsel %vm498_vm10, %v1645_v5, %v1646_v23  ;;  %v2836_v23 = vld [vmem:[#allocation4 + $0x3c] sm:$0xf] }
 0x32b   : > { %v1654_v29 = vsel %vm16466_vm0, %v1632_v37, %v1653_v53  ;;  %v2172_v25 = vpop.permute.xlu0 %2171  ;;  %v2312_v9 = vpop.permute.xlu1 %2311  ;;  %v2511_v37 = vmul.bf16 %v12861_v62, %v12509_v12  ;;  %vm16471_vm0 = vcmask 146432  }
 0x32c   : > { %1664 = vst [vmem:[#allocation2 + $0x328] sm:$0xff] %v1654_v29  ;;  %v2324_v44 = vrot.slane %v2312_v9, 4  ;;  %v2850_v29 = vmul.bf16 %v12871_v49, %v2836_v23  ;;  %v2707_v9 = vmul.bf16 %v12861_v62, %v12519_v48 }
 0x32d   : > { %2935 = vrot.lane.b32.xlu0 %v2916_v50, %s16366_s15  ;;  %2797 = vrot.lane.b32.xlu1 %v2777_v63, %s16352_s27  ;;  %v2253_v50 = vrot.slane %v12847_v59, 4 }
 0x32e   : > { %v2331_v56 = vsel %vm498_vm10, %v2323_v55, %v2324_v44  ;;  %v3100_v55 = vld [vmem:[#allocation4 + $0x2c] sm:$0xf]  ;;  %v12891_v44 = vrot.slane %v12291_v27, 4 }
 0x32f   : > { %v2332_v19 = vsel %vm16320_vm15, %v2310_v57, %v2331_v56  ;;  %v1836_v58 = vpop.permute.xlu0 %1835  ;;  %v1976_v60 = vpop.permute.xlu1 %1975 }
 0x330   : > { %2342 = vst [vmem:[#allocation2 + $0x480] sm:$0xff] %v2332_v19  ;;  %v1988_v47 = vrot.slane %v1976_v60, 4  ;;  %16469 = vst [vmem:[#allocation78_spill] sm:$0xff] %v12891_v44  ;;  %v3114_v60 = vmul.bf16 %v12891_v44, %v3100_v55 }
 0x331   : > { %2869 = vrot.lane.b32.xlu0 %v2848_v52, %s16369_s12  ;;  %2531 = vrot.lane.b32.xlu1 %v2511_v37, %s16356_s25  ;;  %v2441_v52 = vmul.bf16 %v12861_v62, %v12528_v7  ;;  %v1918_v37 = vrot.slane %v12857_v40, 4  ;;  %v2184_v40 = vrot.slane %v2172_v25, 4  ;;  %v1848_v25 = vrot.slane %v1836_v58, 4 }
 0x332   : > { %v1995_v5 = vsel %vm498_vm10, %v1987_v31, %v1988_v47  ;;  %v3102_v47 = vld [vmem:[#allocation4 + $0x3c] sm:$0xf] }
 0x333   : > { %v1996_v57 = vsel %vm16468_vm14, %v12835_v22, %v1995_v5  ;;  %v2102_v61 = vpop.permute.xlu0 %2101  ;;  %v2242_v53 = vpop.permute.xlu1 %2241  ;;  %vm16472_vm14 = vcmask 244736  }
 0x334   : > { %2006 = vst [vmem:[#allocation2 + $0xc8] sm:$0xff] %v1996_v57  ;;  %v2254_v63 = vrot.slane %v2242_v53, 4  ;;  %v3116_v53 = vmul.bf16 %v12891_v44, %v3102_v47  ;;  %v2114_v58 = vrot.slane %v2102_v61, 4 }
 0x335   : > { %2873 = vrot.lane.b32.xlu0 %v2850_v29, %s16369_s12  ;;  %2727 = vrot.lane.b32.xlu1 %v2707_v9, %s16351_s26  ;;  %v2581_v29 = vmul.bf16 %v12861_v62, %v12552_v10 }
 0x336   : > { %v2261_v22 = vsel %vm498_vm10, %v2253_v50, %v2254_v63  ;;  %v2830_v50 = vld [vmem:[#allocation4 + $0xc] sm:$0xf] }
 0x337   : > { %v2262_v1 = vsel %vm16470_vm12, %v12847_v59, %v2261_v22  ;;  %v12898_v56 = vpop.permute.xlu0 %1691  ;;  %v1904_v19 = vpop.permute.xlu1 %1903  ;;  %vm16473_vm12 = vcmask 121856  }
 0x338   : > { %2272 = vst [vmem:[#allocation2 + $0x2f0] sm:$0xff] %v2262_v1  ;;  %v1917_v31 = vrot.slane %v1904_v19, 4 }
 0x339   : > { %3135 = vrot.lane.b32.xlu0 %v3114_v60, %s16367_s20  ;;  %2461 = vrot.lane.b32.xlu1 %v2441_v52, %s16353_s14  ;;  %v3043_v60 = vmul.bf16 %v12564_v30, %v12861_v62 }
 0x33a   : > { %v1925_v23 = vsel %vm498_vm10, %v1917_v31, %v1918_v37  ;;  %v2832_v37 = vld [vmem:[#allocation4 + $0x1c] sm:$0xf] }
 0x33b   : > { %v1926_v59 = vsel %vm16471_vm0, %v1904_v19, %v1925_v23  ;;  %v12908_v5 = vpop.permute.xlu0 %2035  ;;  %v2170_v57 = vpop.permute.xlu1 %2169  ;;  %v2844_v19 = vmul.bf16 %v12871_v49, %v2830_v50  ;;  %vm16482_vm0 = vcmask 916480  }
 0x33c   : > { %1936 = vst [vmem:[#allocation2 + $0x100] sm:$0xff] %v1926_v59  ;;  %v2183_v9 = vrot.slane %v2170_v57, 4 }
 0x33d   : > { %3139 = vrot.lane.b32.xlu0 %v3116_v53, %s16367_s20  ;;  %2601 = vrot.lane.b32.xlu1 %v2581_v29, %s16370_s9  ;;  %v2917_v53 = vmul.bf16 %v12575_v26, %v12861_v62 }
 0x33e   : > { %v2191_v63 = vsel %vm498_vm10, %v2183_v9, %v2184_v40  ;;  %v3096_v40 = vld [vmem:[#allocation4 + $0xc] sm:$0xf] }
 0x33f   : > { %v2192_v55 = vsel %vm831_vm1, %v2170_v57, %v2191_v63  ;;  %v12917_v22 = vpop.permute.xlu0 %1764  ;;  %v1834_v1 = vpop.permute.xlu1 %1833  ;;  %v2846_v57 = vmul.bf16 %v12871_v49, %v2832_v37 }
 0x340   : > { %2202 = vst [vmem:[#allocation2 + $0x5a8] sm:$0xff] %v2192_v55  ;;  %v1847_v52 = vrot.slane %v1834_v1, 4 }
 0x341   : > { %2861 = vrot.lane.b32.xlu0 %v2844_v19, %s16369_s12  ;;  %3063 = vrot.lane.b32.xlu1 %v3043_v60, %s16368_s30  ;;  %v2808_v19 = vrot.slane %v12303_v35, 4  ;;  %v1674_v60 = vld [vmem:[#allocation4 + $0x38] sm:$0xf] }
 0x342   : > { %v1855_v31 = vsel %vm498_vm10, %v1847_v52, %v1848_v25  ;;  %v3098_v25 = vld [vmem:[#allocation4 + $0x1c] sm:$0xf] }
 0x343   : > { %v1856_v47 = vsel %vm16472_vm14, %v1834_v1, %v1855_v31  ;;  %v12926_v23 = vpop.permute.xlu0 %1635  ;;  %v2100_v59 = vpop.permute.xlu1 %2099  ;;  %v3110_v1 = vmul.bf16 %v12891_v44, %v3096_v40  ;;  %vm16483_vm14 = vcmask 785408  }
 0x344   : > { %1866 = vst [vmem:[#allocation2 + $0x590] sm:$0xff] %v1856_v47  ;;  %v2113_v29 = vrot.slane %v2100_v59, 4 }
 0x345   : > { %2865 = vrot.lane.b32.xlu0 %v2846_v57, %s16369_s12  ;;  %2937 = vrot.lane.b32.xlu1 %v2917_v53, %s16366_s15  ;;  %v2542_v57 = vrot.slane %v12307_v28, 4  ;;  %v2738_v28 = vrot.slane %v12367_v45, 4 }
 0x346   : > { %v2121_v9 = vsel %vm498_vm10, %v2113_v29, %v2114_v58  ;;  %v3304_v58 = vld [vmem:[%s16474_s4 + $0x38] sm:$0xff] }
 0x347   : > { %v2122_v50 = vsel %vm16473_vm12, %v2100_v59, %v2121_v9  ;;  %v12935_v63 = vpop.permute.xlu0 %2313  ;;  %v2794_v55 = vpop.permute.xlu1 %2793  ;;  %v3112_v59 = vmul.bf16 %v12891_v44, %v3098_v25  ;;  %v2472_v25 = vrot.slane %v12404_v34, 4  ;;  %vm16484_vm12 = vcmask 244736  }
 0x348   : > { %2132 = vst [vmem:[#allocation2 + $0xb0] sm:$0xff] %v2122_v50  ;;  %v2807_v61 = vrot.slane %v2794_v55, 4 }
 0x349   : > { %3127 = vrot.lane.b32.xlu0 %v3110_v1, %s16367_s20  ;;  %1697 = vrot.lane.b32.xlu1 %v1674_v60, %s16396_s8  ;;  %v3302_v1 = vld [vmem:[%s16474_s4 + $0x28] sm:$0xff] }
 0x34a   : > { %v2815_v52 = vsel %vm498_vm10, %v2807_v61, %v2808_v19 }
 0x34b   : > { %v2816_v37 = vsel %vm671_vm7, %v2794_v55, %v2815_v52  ;;  %v12943_v31 = vpop.permute.xlu0 %1977  ;;  %v2528_v47 = vpop.permute.xlu1 %2527  ;;  %v1730_v52 = vld [vmem:[#allocation4 + $0x38] sm:$0xf] }
 0x34c   : > { %2826 = vst [vmem:[#allocation2 + $0x128] sm:$0xff] %v2816_v37  ;;  %v2541_v35 = vrot.slane %v2528_v47, 4  ;;  %v1747_v34 = vmul.bf16 %v12355_v32, %v1730_v52 }
 0x34d   : > { %3131 = vrot.lane.b32.xlu0 %v3112_v59, %s16367_s20  ;;  %2037 = vrot.lane.b32.xlu1 %v12735_v18, %s16399_s19 }
 0x34e   : > { %v2549_v53 = vsel %vm498_vm10, %v2541_v35, %v2542_v57 }
 0x34f   : > { %v2550_v29 = vsel %vm804_vm3, %v2528_v47, %v2549_v53  ;;  %v12955_v40 = vpop.permute.xlu0 %2243  ;;  %v2724_v9 = vpop.permute.xlu1 %2723  ;;  %v3300_v47 = vld [vmem:[%s16474_s4 + $0x18] sm:$0xff]  ;;  %v16475_v53 = vld [vmem:[#allocation57_spill] sm:$0xff] }
 0x350   : > { %2560 = vst [vmem:[#allocation2 + $0x380] sm:$0xff] %v2550_v29  ;;  %v2737_v50 = vrot.slane %v2724_v9, 4 }
 0x351   : > { %3342 = vperm.xlu0 %11061, %v3304_v58   ;;  %2661 = vrot.lane.b32.xlu1 %v12841_v41, %s16384_s2  ;;  %v2402_v58 = vrot.slane %v16475_v53, 4 }
 0x352   : > { %v2745_v55 = vsel %vm498_vm10, %v2737_v50, %v2738_v28  ;;  %v3298_v50 = vld [vmem:[%s16474_s4 + $0x8] sm:$0xff] }
 0x353   : > { %v2746_v19 = vsel %vm706_vm8, %v2724_v9, %v2745_v55  ;;  %v12965_v61 = vpop.permute.xlu0 %1907  ;;  %v2458_v60 = vpop.permute.xlu1 %2457  ;;  %v1601_v9 = vld [vmem:[#allocation4 + $0x38] sm:$0xf] }
 0x354   : > { %2756 = vst [vmem:[#allocation2 + $0x4c0] sm:$0xff] %v2746_v19  ;;  %v2471_v45 = vrot.slane %v2458_v60, 4 }
 0x355   : > { %3332 = vperm.xlu0 %11061, %v3302_v1   ;;  %2997 = vrot.lane.b32.xlu1 %v12841_v41, %s16385_s13 }
 0x356   : > { %v2479_v37 = vsel %vm498_vm10, %v2471_v45, %v2472_v25  ;;  %v16476_v25 = vld [vmem:[#allocation66_spill] sm:$0xff] }
 0x357   : > { %v2480_v59 = vsel %vm839_vm4, %v2458_v60, %v2479_v37  ;;  %v12975_v57 = vpop.permute.xlu0 %2175  ;;  %v2388_v35 = vpop.permute.xlu1 %2387  ;;  %v1618_v60 = vmul.bf16 %v12361_v36, %v1601_v9  ;;  %v2612_v45 = vrot.slane %v16476_v25, 4  ;;  %v5895_v37 = vld [vmem:[#allocation5 + $0x6c] sm:$0xf] }
 0x358   : > { %2490 = vst [vmem:[#allocation2 + $0x278] sm:$0xff] %v2480_v59  ;;  %v2401_v29 = vrot.slane %v2388_v35, 4 }
 0x359   : > { %3322 = vperm.xlu0 %11061, %v3300_v47   ;;  %1770 = vrot.lane.b32.xlu1 %v1747_v34, %s16365_s11  ;;  %v1528_v47 = vld [vmem:[#allocation4 + $0x38] sm:$0xf] }
 0x35a   : > { %v2409_v28 = vsel %vm498_vm10, %v2401_v29, %v2402_v58  ;;  %v16477_v58 = vld [vmem:[#allocation20_spill] sm:$0xff]  ;;  %v1545_v9 = vmul.bf16 %v12340_v16, %v1528_v47 }
 0x35b   : > { %v2410_v55 = vsel %vm874_vm5, %v2388_v35, %v2409_v28  ;;  %v12985_v1 = vpop.permute.xlu0 %1839  ;;  %v2598_v19 = vpop.permute.xlu1 %2597  ;;  %v5911_v29 = vmul.bf16 %v5895_v37, %v16477_v58  ;;  %v16478_v28 = vld [vmem:[#allocation71_spill] sm:$0xff]  ;;  %v5913_v47 = vmul.bf16 %v5897_v2, %v16477_v58 }
 0x35c   : > { %2420 = vst [vmem:[#allocation2 + $0x4f0] sm:$0xff] %v2410_v55  ;;  %v2611_v52 = vrot.slane %v2598_v19, 4  ;;  %v3074_v25 = vrot.slane %v16478_v28, 4 }
 0x35d   : > { %3312 = vperm.xlu0 %11061, %v3298_v50   ;;  %1641 = vrot.lane.b32.xlu1 %v1618_v60, %s16363_s0  ;;  %v6409_v60 = vld [vmem:[#allocation5 + $0x7c] sm:$0xf] }
 0x35e   : > { %v2619_v59 = vsel %vm498_vm10, %v2611_v52, %v2612_v45 }
 0x35f   : > { %v2620_v34 = vsel %vm769_vm2, %v2598_v19, %v2619_v59  ;;  %v12992_v53 = vpop.permute.xlu0 %2103  ;;  %v3060_v35 = vpop.permute.xlu1 %3059  ;;  %v6407_v19 = vld [vmem:[#allocation5 + $0x6c] sm:$0xf]  ;;  %v2296_v59 = vmul.bf16 %v12378_v33, %v2282_v42  ;;  %v16480_v42 = vld [vmem:[#allocation50_spill] sm:$0xff] }
 0x360   : > { %2630 = vst [vmem:[#allocation2 + $0x1d0] sm:$0xff] %v2620_v34  ;;  %v3073_v55 = vrot.slane %v3060_v35, 4  ;;  %v16479_v34 = vld [vmem:[#allocation72_spill] sm:$0xff] }
 0x361   : > { %5956 = vrot.lane.b32.xlu0 %v5911_v29, %s16354_s16  ;;  %1568 = vrot.lane.b32.xlu1 %v1545_v9, %s16364_s18  ;;  %v2404_v28 = vrot.slane %v16479_v34, 4  ;;  %v1946_v29 = vld [vmem:[#allocation4 + $0x38] sm:$0xf]  ;;  %v11083_v9 = vpack.i.bf16 %v6409_v60, %v6407_v19  ;;  %v11066_v34 = vunpack.i.l.bf16 %v16480_v42 }
 0x362   : > { %v3081_v50 = vsel %vm498_vm10, %v3073_v55, %v3074_v25  ;;  %v1960_v2 = vmul.bf16 %v12393_v51, %v1946_v29  ;;  %v1876_v51 = vld [vmem:[#allocation4 + $0x38] sm:$0xf] }
 0x363   : > { %v3082_v45 = vsel %vm518_vm13, %v3060_v35, %v3081_v50  ;;  %v2392_v52 = vpop.permute.xlu0 %2391  ;;  %v13001_v37 = vpop.permute.xlu1 %1693 }
 0x364   : > { %3092 = vst [vmem:[#allocation2 + $0x460] sm:$0xff] %v3082_v45  ;;  %v2403_v20 = vrot.slane %v2392_v52, 4  ;;  %v5887_v45 = vld [vmem:[#allocation5 + $0x2c] sm:$0xf]  ;;  %v1704_v36 = vrot.slane %v13001_v37, 4 }
 0x365   : > { %5960 = vrot.lane.b32.xlu0 %v5913_v47, %s16354_s16  ;;  %2319 = vrot.lane.b32.xlu1 %v2296_v59, %s16360_s28  ;;  %v5903_v60 = vmul.bf16 %v5887_v45, %v16477_v58  ;;  %v2670_v47 = vrot.slane %v11066_v34, 4  ;;  %v16481_v59 = vld [vmem:[#allocation73_spill] sm:$0xff] }
 0x366   : > { %v2411_v25 = vsel %vm498_vm10, %v2403_v20, %v2404_v28  ;;  %v11076_v28 = vunpack.i.l.bf16 %v16481_v59 }
 0x367   : > { %v2412_v35 = vsel %vm874_vm5, %v2392_v52, %v2411_v25  ;;  %v13010_v55 = vpop.permute.xlu0 %1695  ;;  %v13012_v50 = vpop.permute.xlu1 %2033  ;;  %v2226_v52 = vmul.bf16 %v12400_v11, %v2212_v15  ;;  %v5889_v25 = vld [vmem:[#allocation5 + $0x3c] sm:$0xf]  ;;  %v1890_v15 = vmul.bf16 %v12412_v38, %v1876_v51 }
 0x368   : > { %2421 = vst [vmem:[#allocation2 + $0x5a0] sm:$0xff] %v2412_v35  ;;  %v5905_v45 = vmul.bf16 %v5889_v25, %v16477_v58  ;;  %v3006_v34 = vrot.slane %v11076_v28, 4  ;;  %v1819_v25 = vmul.bf16 %v12475_v21, %v12735_v18  ;;  %v2915_v21 = vmul.bf16 %v11513_v4, %v12575_v26 }
 0x369   : > { %11084 = vrot.lane.b32.xlu0 %v11083_v9, %s16384_s2  ;;  %1983 = vrot.lane.b32.xlu1 %v1960_v2, %s16361_s21 }
 0x36b   : > { %v13018_v19 = vpop.permute.xlu0 %2039  ;;  %v2658_v20 = vpop.permute.xlu1 %2657 }
 0x36c   : > { %v2669_v29 = vrot.slane %v2658_v20, 4 }
 0x36d   : > { %5940 = vrot.lane.b32.xlu0 %v5903_v60, %s16354_s16  ;;  %2249 = vrot.lane.b32.xlu1 %v2226_v52, %s16357_s17 }
 0x36e   : > { %v2677_v9 = vsel %vm498_vm10, %v2669_v29, %v2670_v47  ;;  %v2155_v29 = vmul.bf16 %v12456_v3, %v12735_v18 }
 0x36f   : > { %v2678_v35 = vsel %vm16482_vm0, %v2658_v20, %v2677_v9  ;;  %v13027_v2 = vpop.permute.xlu0 %1768  ;;  %v2994_v33 = vpop.permute.xlu1 %2993  ;;  %vm16486_vm0 = vcmask 277504  }
 0x370   : > { %2687 = vst [vmem:[#allocation2 + $0x2e8] sm:$0xff] %v2678_v35  ;;  %v3005_v11 = vrot.slane %v2994_v33, 4 }
 0x371   : > { %5944 = vrot.lane.b32.xlu0 %v5905_v45, %s16354_s16  ;;  %1913 = vrot.lane.b32.xlu1 %v1890_v15, %s16362_s23 }
 0x372   : > { %v3013_v60 = vsel %vm498_vm10, %v3005_v11, %v3006_v34  ;;  %v2072_v11 = vld [vmem:[#allocation4 + $0x38] sm:$0xf]  ;;  %v2779_v34 = vmul.bf16 %v12497_v54, %v12841_v41  ;;  %v2443_v54 = vmul.bf16 %v12528_v7, %v12841_v41 }
 0x373   : > { %v3014_v52 = vsel %vm16483_vm14, %v2994_v33, %v3013_v60  ;;  %v13035_v47 = vpop.permute.xlu0 %1639  ;;  %v13037_v20 = vpop.permute.xlu1 %1562  ;;  %v2086_v35 = vmul.bf16 %v12470_v17, %v2072_v11  ;;  %v2709_v11 = vmul.bf16 %v12519_v48, %v12841_v41  ;;  %v3045_v17 = vmul.bf16 %v12564_v30, %v12841_v41  ;;  %v11184_v30 = vld [vmem:[%s16147_s3 + $0x4] ss:$28 sps:$4 sm:$0xff]  }
 0x374   : > { %3023 = vst [vmem:[#allocation2 + $0x168] sm:$0xff] %v3014_v52  ;;  %v2513_v52 = vmul.bf16 %v12509_v12, %v12841_v41  ;;  %4030 = vmatprep.mubr.bf16.mxu1 %v11184_v30  ;;  %vm16490_vm14 = vcmask 252928  }
 0x375   : > { %2177 = vrot.lane.b32.xlu1 %v2155_v29, %s16358_s24 }
 0x377   : > { %v13042_v51 = vpop.permute.xlu0 %1566  ;;  %v13044_v28 = vpop.permute.xlu1 %1766 }
 0x379   : > { %1841 = vrot.lane.b32.xlu1 %v1819_v25, %s16359_s29 }
 0x37b   : > { %v13049_v33 = vpop.permute.xlu0 %2317  ;;  %v13051_v9 = vpop.permute.xlu1 %1637 }
 0x37d   : > { %2109 = vrot.lane.b32.xlu1 %v2086_v35, %s16355_s22 }
 0x37f   : > { %v13055_v45 = vpop.permute.xlu0 %1981  ;;  %v13057_v15 = vpop.permute.xlu1 %1564 }
 0x381   : > { %2801 = vrot.lane.b32.xlu1 %v2779_v34, %s16352_s27 }
 0x383   : > { %v13062_v18 = vpop.permute.xlu0 %2247  ;;  %v13064_v60 = vpop.permute.xlu1 %2315 }
 0x385   : > { %2535 = vrot.lane.b32.xlu1 %v2513_v52, %s16356_s25 }
 0x387   : > { %v13069_v29 = vpop.permute.xlu0 %1911  ;;  %v13071_v25 = vpop.permute.xlu1 %1979 }
 0x389   : > { %2731 = vrot.lane.b32.xlu1 %v2709_v11, %s16351_s26 }
 0x38b   : > { %v13076_v35 = vpop.permute.xlu0 %2179  ;;  %v13078_v34 = vpop.permute.xlu1 %2245 }
 0x38d   : > { %2465 = vrot.lane.b32.xlu1 %v2443_v54, %s16353_s14 }
 0x38f   : > { %v13083_v12 = vpop.permute.xlu0 %1843  ;;  %v13085_v52 = vpop.permute.xlu1 %1909 }
 0x391   : > { %2605 = vrot.lane.b32.xlu1 %v2583_v6, %s16370_s9 }
 0x393   : > { %v13090_v48 = vpop.permute.xlu0 %2107  ;;  %v13092_v11 = vpop.permute.xlu1 %2173 }
 0x395   : > { %3067 = vrot.lane.b32.xlu1 %v3045_v17, %s16368_s30  ;;  %v2945_v17 = vrot.slane %v12812_v14, 4  ;;  %s16874_s30 = sld [smem:[#allocation115_spill]] }
 0x397   : > { %v13097_v7 = vpop.permute.xlu0 %2395  ;;  %v13099_v54 = vpop.permute.xlu1 %1837 }
 0x399   : > { %2941 = vrot.lane.b32.xlu1 %v2919_v39, %s16366_s15  ;;  %v13115_v39 = vsel %vm16484_vm12, %v12871_v49, %v12602_v8  ;;  %vm16491_vm12 = vmmov %vm16490_vm14 }
 0x39a   : > { %16485 = vst [vmem:[#allocation57_spill] sm:$0xff] %v13115_v39  ;;  %v2847_v43 = vmul.bf16 %v13115_v39, %v12861_v62 }
 0x39b   : > { %v2932_v10 = vpop.permute.xlu0 %2931  ;;  %v13104_v6 = vpop.permute.xlu1 %2105 }
 0x39c   : > { %v2946_v0 = vrot.slane %v2932_v10, 4  ;;  %v2849_v10 = vmul.bf16 %v13115_v39, %v12841_v41 }
 0x39d   : > { %2933 = vrot.lane.b32.xlu1 %v2915_v21, %s16366_s15 }
 0x39e   : > { %v2953_v3 = vsel %vm498_vm10, %v2945_v17, %v2946_v0  ;;  %v13133_v0 = vsel %vm16486_vm0, %v12891_v44, %v12291_v27  ;;  %v16488_v44 = vld [vmem:[#allocation75_spill] sm:$0xff]  ;;  %vm16492_vm0 = vcmask 261120  }
 0x39f   : > { %v2954_v26 = vsel %vm591_vm11, %v12812_v14, %v2953_v3  ;;  %v13120_v38 = vpop.permute.xlu1 %2797  ;;  %16487 = vst [vmem:[#allocation66_spill] sm:$0xff] %v13133_v0  ;;  %v3113_v30 = vmul.bf16 %v13133_v0, %v12861_v62  ;;  %v3115_v8 = vmul.bf16 %v13133_v0, %v12841_v41  ;;  %v11514_v14 = vld [vmem:[#allocation4 + $0x4] sm:$0xff]  ;;  %v2950_v41 = vrot.slane %v16488_v44, 4  ;;  %v3301_v44 = vld [vmem:[%s16474_s4 + $0x20] sm:$0xff] }
 0x3a0   : > { %2965 = vst [vmem:[#allocation2 + $0xd0] sm:$0xff] %v2954_v26  ;;  %v11201_v26 = vld [vmem:[%s16147_s3 + $0xc] ss:$28 sps:$4 sm:$0xff]   ;;  %v2843_v17 = vmul.bf16 %v11514_v14, %v13115_v39 }
 0x3a1   : > { %2867 = vrot.lane.b32.xlu1 %v2847_v43, %s16369_s12  ;;  %4103 = vmatprep.mubr.bf16.mxu0 %v11201_v26  ;;  %v3109_v26 = vmul.bf16 %v11514_v14, %v13133_v0 }
 0x3a3   : > { %v13125_v21 = vpop.permute.xlu1 %2531 }
 0x3a5   : > { %2871 = vrot.lane.b32.xlu1 %v2849_v10, %s16369_s12  ;;  %v2845_v10 = vmul.bf16 %v11513_v4, %v13115_v39  ;;  %v5891_v39 = vld [vmem:[#allocation5 + $0x4c] sm:$0xf] }
 0x3a7   : > { %v13135_v3 = vpop.permute.xlu1 %2727 }
 0x3a9   : > { %3133 = vrot.lane.b32.xlu1 %v3113_v30, %s16367_s20 }
 0x3ab   : > { %v13143_v43 = vpop.permute.xlu1 %2461 }
 0x3ad   : > { %3137 = vrot.lane.b32.xlu1 %v3115_v8, %s16367_s20 }
 0x3af   : > { %v13148_v27 = vpop.permute.xlu1 %2601 }
 0x3b1   : > { %2859 = vrot.lane.b32.xlu1 %v2843_v17, %s16369_s12  ;;  %v3111_v17 = vmul.bf16 %v11513_v4, %v13133_v0  ;;  %v3299_v4 = vld [vmem:[%s16474_s4 + $0x10] sm:$0xff] }
 0x3b3   : > { %v13152_v62 = vpop.permute.xlu1 %3063 }
 0x3b5   : > { %2863 = vrot.lane.b32.xlu1 %v2845_v10, %s16369_s12  ;;  %v3303_v10 = vld [vmem:[%s16474_s4 + $0x30] sm:$0xff]  ;;  %s16880_s12 = sld [smem:[#allocation116_spill]] }
 0x3b7   : > { %v2938_v30 = vpop.permute.xlu1 %2937 }
 0x3b8   : > { %v2949_v49 = vrot.slane %v2938_v30, 4 }
 0x3b9   : > { %3125 = vrot.lane.b32.xlu1 %v3109_v26, %s16367_s20  ;;  %v1776_v26 = vrot.slane %v12917_v22, 4 }
 0x3ba   : > { %v2957_v8 = vsel %vm498_vm10, %v2949_v49, %v2950_v41  ;;  %v3297_v41 = vld [vmem:[%s16474_s4] sm:$0xff]  ;;  %s16878_s4 = sld [smem:[#allocation13_spill]] }
 0x3bb   : > { %v2958_v32 = vsel %vm591_vm11, %v2938_v30, %v2957_v8  ;;  %v1698_v46 = vpop.permute.xlu1 %1697  ;;  %v1777_v30 = vrot.slane %v13044_v28, 4  ;;  %v1705_v28 = vrot.slane %v13010_v55, 4 }
 0x3bc   : > { %2967 = vst [vmem:[#allocation2 + $0x20] sm:$0xff] %v2958_v32 }
 0x3bd   : > { %3129 = vrot.lane.b32.xlu1 %v3111_v17, %s16367_s20  ;;  %v1778_v17 = vrot.slane %v13027_v2, 4 }
 0x3bf   : > { %v13166_v14 = vpop.permute.xlu1 %2037 }
 0x3c1   : > { %3337 = vperm.xlu1 %11062, %v3303_v10   ;;  %v1784_v10 = vsel %vm498_vm10, %v1776_v26, %v1777_v30  ;;  %v5893_v26 = vld [vmem:[#allocation5 + $0x5c] sm:$0xf] }
 0x3c2   : > { %v1785_v24 = vsel %vm16490_vm14, %v12917_v22, %v1784_v10  ;;  %v11144_v22 = vld [vmem:[#allocation2 + $0x54c] ss:$-72 sps:$4 sm:$0xff]   ;;  %vm16493_vm14 = vmmov %vm16492_vm0 }
 0x3c3   : > { %v13171_v49 = vpop.permute.xlu1 %2661 }
 0x3c5   : > { %3327 = vperm.xlu1 %11062, %v3301_v44   ;;  %v1706_v44 = vrot.slane %v1698_v46, 4  ;;  %v1703_v46 = vrot.slane %v12898_v56, 4 }
 0x3c7   : > { %v13176_v32 = vpop.permute.xlu1 %2997  ;;  %v1713_v30 = vsel %vm498_vm10, %v1705_v28, %v1706_v44  ;;  %v2326_v44 = vrot.slane %v13064_v60, 4 }
 0x3c8   : > { %16489 = vst [vmem:[#allocation20_spill] sm:$0xff] %v13176_v32  ;;  %v5907_v32 = vmul.bf16 %v5891_v39, %v16477_v58  ;;  %v5909_v39 = vmul.bf16 %v5893_v26, %v16477_v58 }
 0x3c9   : > { %3317 = vperm.xlu1 %11062, %v3299_v4  }
 0x3cb   : > { %v1771_v8 = vpop.permute.xlu1 %1770 }
 0x3cc   : > { %v1779_v0 = vrot.slane %v1771_v8, 4  ;;  %v6403_v8 = vld [vmem:[#allocation5 + $0x4c] sm:$0xf] }
 0x3cd   : > { %3307 = vperm.xlu1 %11062, %v3297_v41  }
 0x3ce   : > { %v1786_v4 = vsel %vm498_vm10, %v1778_v17, %v1779_v0  ;;  %v1711_v0 = vsel %vm498_vm10, %v1703_v46, %v1704_v36  ;;  %v6405_v17 = vld [vmem:[#allocation5 + $0x5c] sm:$0xf] }
 0x3cf   : > { %v1787_v16 = vsel %vm16491_vm12, %v13027_v2, %v1786_v4  ;;  %v1642_v13 = vpop.permute.xlu1 %1641  ;;  %v1714_v2 = vsel %vm16492_vm0, %v13010_v55, %v1713_v30  ;;  %v11088_v36 = vpack.i.bf16 %v6405_v17, %v6403_v8  ;;  %v1649_v4 = vrot.slane %v13035_v47, 4  ;;  %v11147_v17 = vld [vmem:[#allocation2 + $0x10c] ss:$1032 sps:$4 sm:$0xff]  }
 0x3d0   : > { %v10513_v41 = vcombine.high %v1785_v24, %v1787_v16  ;;  %v10512_v37 = vcombine.low %v1785_v24, %v1787_v16  ;;  %v1650_v28 = vrot.slane %v1642_v13, 4  ;;  %v1712_v16 = vsel %vm16493_vm14, %v12898_v56, %v1711_v0  ;;  %v11146_v24 = vld [vmem:[#allocation2 + $0x548] ss:$-72 sps:$4 sm:$0xff]  }
 0x3d1   : > { %5948 = vrot.lane.b32.xlu1 %v5907_v32, %s16354_s16  ;;  %v2325_v32 = vrot.slane %v12935_v63, 4  ;;  %v1648_v55 = vrot.slane %v13051_v9, 4  ;;  %v10509_v46 = vcombine.high %v1712_v16, %v1714_v2  ;;  %v1647_v30 = vrot.slane %v12926_v23, 4 }
 0x3d2   : > { %3998 = vmatprep.subr.bf16.mxu1 %v10513_v41  ;;  %v2327_v13 = vrot.slane %v13049_v33, 4  ;;  %v1657_v56 = vsel %vm498_vm10, %v1649_v4, %v1650_v28  ;;  %v10508_v0 = vcombine.low %v1712_v16, %v1714_v2  ;;  %vm16494_vm12 = vcmask 269312  }
 0x3d3   : > { %v1569_v10 = vpop.permute.xlu1 %1568  ;;  %3999 = vmatpush1.bf16.msra.mxu1 %v10512_v37  ;;  %v2333_v60 = vsel %vm498_vm10, %v2325_v32, %v2326_v44  ;;  %v5883_v37 = vld [vmem:[#allocation5 + $0xc] sm:$0xf]  ;;  %v1655_v8 = vsel %vm498_vm10, %v1647_v30, %v1648_v55  ;;  %v2256_v2 = vrot.slane %v13078_v34, 4  ;;  %vm16495_vm0 = vmmov %vm16494_vm12  ;;  %v1576_v55 = vrot.slane %v13042_v51, 4  ;;  %v11150_v34 = vld [vmem:[#allocation2 + $0x33c] ss:$328 sps:$4 sm:$0xff]  }
 0x3d4   : > { %4000 = vmatprep.subr.bf16.mxu1 %v11144_v22  ;;  %v2334_v22 = vsel %vm16320_vm15, %v12935_v63, %v2333_v60  ;;  %v1577_v16 = vrot.slane %v1569_v10, 4  ;;  %v1656_v63 = vsel %vm16495_vm0, %v12926_v23, %v1655_v8  ;;  %v1574_v10 = vrot.slane %v13037_v20, 4 }
 0x3d5   : > { %5952 = vrot.lane.b32.xlu1 %v5909_v39, %s16354_s16  ;;  %v1658_v39 = vsel %vm16494_vm12, %v13035_v47, %v1657_v56  ;;  %v11149_v47 = vld [vmem:[#allocation2 + $0x108] ss:$1032 sps:$4 sm:$0xff]   ;;  %v2257_v23 = vrot.slane %v13062_v18, 4  ;;  %vm16496_vm14 = vcmask 15360   ;;  %vm16497_vm12 = vcmask 277504  }
 0x3d6   : > { %v10505_v30 = vcombine.high %v1656_v63, %v1658_v39  ;;  %v1584_v56 = vsel %vm498_vm10, %v1576_v55, %v1577_v16  ;;  %vm16498_vm0 = vmmov %vm16496_vm14  ;;  %v3198_v55 = vld [vmem:[#allocation2 + $0x3b0] sm:$0xff] }
 0x3d7   : > { %v2320_v26 = vpop.permute.xlu1 %2319  ;;  %4001 = vmatpush1.bf16.msra.mxu1 %v11146_v24  ;;  %v5899_v24 = vmul.bf16 %v5883_v37, %v16477_v58  ;;  %v11152_v37 = vld [vmem:[#allocation2 + $0x338] ss:$328 sps:$4 sm:$0xff]  }
 0x3d8   : > { %v2328_v41 = vrot.slane %v2320_v26, 4  ;;  %4002 = vmatprep.subr.bf16.mxu1 %v10509_v46  ;;  %v1575_v46 = vrot.slane %v13057_v15, 4  ;;  %v10504_v15 = vcombine.low %v1656_v63, %v1658_v39  ;;  %v2185_v39 = vrot.slane %v13092_v11, 4  ;;  %v11156_v63 = vld [vmem:[#allocation2 + $0x1fc] ss:$248 sps:$4 sm:$0xff]  }
 0x3d9   : > { %11089 = vrot.lane.b32.xlu1 %v11088_v36, %s16384_s2  ;;  %v5885_v36 = vld [vmem:[#allocation5 + $0x1c] sm:$0xf] }
 0x3da   : > { %v2335_v9 = vsel %vm498_vm10, %v2327_v13, %v2328_v41  ;;  %v5901_v13 = vmul.bf16 %v5885_v36, %v16477_v58  ;;  %v11153_v58 = vld [vmem:[#allocation2 + $0x454] ss:$-296 sps:$4 sm:$0xff]   ;;  %v11155_v36 = vld [vmem:[#allocation2 + $0x450] ss:$-296 sps:$4 sm:$0xff]  }
 0x3db   : > { %v2336_v44 = vsel %vm16320_vm15, %v13049_v33, %v2335_v9  ;;  %v13220_v28 = vpop.permute.xlu1 %1983  ;;  %4003 = vmatpush1.bf16.msra.mxu1 %v10508_v0  ;;  %v2255_v33 = vrot.slane %v12955_v40, 4  ;;  %v1582_v0 = vsel %vm498_vm10, %v1574_v10, %v1575_v46  ;;  %vm16499_vm15 = vmmov %vm16497_vm12  ;;  %v2188_v46 = vrot.slane %v13076_v35, 4  ;;  %v3197_v10 = vld [vmem:[#allocation2 + $0x2b0] sm:$0xff] }
 0x3dc   : > { %4004 = vmatprep.subr.bf16.mxu1 %v11147_v17  ;;  %v10545_v32 = vcombine.high %v2334_v22, %v2336_v44  ;;  %v10544_v4 = vcombine.low %v2334_v22, %v2336_v44  ;;  %v1585_v17 = vsel %vm16497_vm12, %v13042_v51, %v1584_v56  ;;  %v2186_v51 = vrot.slane %v12975_v57, 4 }
 0x3dd   : > { %5932 = vrot.lane.b32.xlu1 %v5899_v24, %s16354_s16  ;;  %v2263_v60 = vsel %vm498_vm10, %v2255_v33, %v2256_v2  ;;  %v2047_v24 = vrot.slane %v13166_v14, 4  ;;  %vm16502_vm12 = vcmask 121856  }
 0x3de   : > { %4071 = vmatprep.subr.bf16.mxu0 %v10545_v32  ;;  %v2264_v9 = vsel %vm16496_vm14, %v12955_v40, %v2263_v60  ;;  %v1583_v40 = vsel %vm16499_vm15, %v13037_v20, %v1582_v0  ;;  %v2045_v32 = vrot.slane %v13012_v50, 4  ;;  %v2193_v20 = vsel %vm498_vm10, %v2185_v39, %v2186_v51  ;;  %v11162_v51 = vld [vmem:[#allocation2 + $0x3ac] ss:$568 sps:$4 sm:$0xff]  }
 0x3df   : > { %v2250_v26 = vpop.permute.xlu1 %2249  ;;  %4005 = vmatpush1.bf16.msra.mxu1 %v11149_v47  ;;  %4072 = vmatpush1.bf16.msra.mxu0 %v10544_v4  ;;  %v10501_v4 = vcombine.high %v1583_v40, %v1585_v17  ;;  %v2046_v47 = vrot.slane %v12908_v5, 4  ;;  %vm16500_vm15 = vcmask 130048  }
 0x3e0   : > { %v2258_v41 = vrot.slane %v2250_v26, 4  ;;  %4006 = vmatprep.subr.bf16.mxu1 %v10505_v30  ;;  %4073 = vmatprep.subr.bf16.mxu0 %v11150_v34  ;;  %v10500_v34 = vcombine.low %v1583_v40, %v1585_v17  ;;  %vm16501_vm14 = vmmov %vm16500_vm15  ;;  %v11161_v40 = vld [vmem:[#allocation2 + $0x598] ss:$16 sps:$4 sm:$0xff]  }
 0x3e1   : > { %5936 = vrot.lane.b32.xlu1 %v5901_v13, %s16354_s16  ;;  %v2053_v26 = vsel %vm498_vm10, %v2045_v32, %v2046_v47  ;;  %v10499_v13 = vcombine.high %v3197_v10, %v3198_v55  ;;  %v2543_v47 = vrot.slane %v13125_v21, 4 }
 0x3e2   : > { %v2265_v8 = vsel %vm498_vm10, %v2257_v23, %v2258_v41  ;;  %v2194_v23 = vsel %vm831_vm1, %v13092_v11, %v2193_v20  ;;  %v2116_v41 = vrot.slane %v13104_v6, 4  ;;  %v10498_v11 = vcombine.low %v3197_v10, %v3198_v55  ;;  %v11164_v20 = vld [vmem:[#allocation2 + $0x3a8] ss:$568 sps:$4 sm:$0xff]  }
 0x3e3   : > { %v2266_v22 = vsel %vm16498_vm0, %v13062_v18, %v2265_v8  ;;  %v13244_v44 = vpop.permute.xlu1 %1913  ;;  %4007 = vmatpush1.bf16.msra.mxu1 %v10504_v15  ;;  %4074 = vmatpush1.bf16.msra.mxu0 %v11152_v37  ;;  %v2048_v18 = vrot.slane %v13018_v19, 4  ;;  %v11158_v19 = vld [vmem:[#allocation2 + $0x1f8] ss:$248 sps:$4 sm:$0xff]   ;;  %v1992_v15 = vrot.slane %v13220_v28, 4  ;;  %v2054_v8 = vsel %vm16501_vm14, %v13012_v50, %v2053_v26  ;;  %v16507_v10 = vld [vmem:[#allocation29_spill] sm:$0xff] }
 0x3e4   : > { %4008 = vmatprep.subr.bf16.mxu1 %v11153_v58  ;;  %v10541_v2 = vcombine.high %v2264_v9, %v2266_v22  ;;  %v10540_v16 = vcombine.low %v2264_v9, %v2266_v22  ;;  %v2115_v58 = vrot.slane %v12992_v53, 4  ;;  %v1990_v9 = vrot.slane %v13071_v25, 4  ;;  %v11159_v22 = vld [vmem:[#allocation2 + $0x59c] ss:$16 sps:$4 sm:$0xff]  }
 0x3e5   : > { %v2055_v30 = vsel %vm498_vm10, %v2047_v24, %v2048_v18  ;;  %v1989_v6 = vrot.slane %v12943_v31, 4  ;;  %v2117_v28 = vrot.slane %v13090_v48, 4  ;;  %vm16503_vm0 = vcmask 138240  }
 0x3e6   : > { %4075 = vmatprep.subr.bf16.mxu0 %v10541_v2  ;;  %v2056_v35 = vsel %vm16500_vm15, %v13166_v14, %v2055_v30  ;;  %v1991_v14 = vrot.slane %v13055_v45, 4  ;;  %v2123_v24 = vsel %vm498_vm10, %v2115_v58, %v2116_v41  ;;  %vm16504_vm15 = vmmov %vm16502_vm12  ;;  %v16506_v30 = vld [vmem:[#allocation28_spill] sm:$0xff]  ;;  %v2546_v26 = vrot.slane %v16507_v10, 4  ;;  %v3221_v41 = vld [vmem:[#allocation2 + $0x248] sm:$0xff] }
 0x3e7   : > { %v2178_v33 = vpop.permute.xlu1 %2177  ;;  %4009 = vmatpush1.bf16.msra.mxu1 %v11155_v36  ;;  %4076 = vmatpush1.bf16.msra.mxu0 %v10540_v16  ;;  %v10529_v17 = vcombine.high %v2054_v8, %v2056_v35  ;;  %v10528_v16 = vcombine.low %v2054_v8, %v2056_v35  ;;  %v1997_v25 = vsel %vm498_vm10, %v1989_v6, %v1990_v9  ;;  %vm16505_vm14 = vmmov %vm16503_vm0  ;;  %v2473_v9 = vrot.slane %v13143_v43, 4 }
 0x3e8   : > { %v2187_v57 = vrot.slane %v2178_v33, 4  ;;  %4010 = vmatprep.subr.bf16.mxu1 %v10501_v4  ;;  %4077 = vmatprep.subr.bf16.mxu0 %v11156_v63  ;;  %v1999_v50 = vsel %vm498_vm10, %v1991_v14, %v1992_v15  ;;  %v2124_v32 = vsel %vm16502_vm12, %v12992_v53, %v2123_v24  ;;  %v1998_v53 = vsel %vm16505_vm14, %v12943_v31, %v1997_v25  ;;  %v16511_v25 = vld [vmem:[#allocation33_spill] sm:$0xff] }
 0x3e9   : > { %v2000_v18 = vsel %vm16503_vm0, %v13055_v45, %v1999_v50  ;;  %v2544_v45 = vrot.slane %v16506_v30, 4  ;;  %vm16508_vm12 = vcmask 146432   ;;  %v1852_v50 = vrot.slane %v13083_v12, 4 }
 0x3ea   : > { %v2195_v5 = vsel %vm498_vm10, %v2187_v57, %v2188_v46  ;;  %v1921_v57 = vrot.slane %v13069_v29, 4  ;;  %vm16509_vm0 = vmmov %vm16508_vm12 }
 0x3eb   : > { %v2196_v60 = vsel %vm831_vm1, %v2178_v33, %v2195_v5  ;;  %v13264_v56 = vpop.permute.xlu1 %1841  ;;  %4011 = vmatpush1.bf16.msra.mxu1 %v10500_v34  ;;  %4078 = vmatpush1.bf16.msra.mxu0 %v11158_v19  ;;  %v1922_v33 = vrot.slane %v13244_v44, 4  ;;  %v10525_v34 = vcombine.high %v1998_v53, %v2000_v18  ;;  %v11165_v19 = vld [vmem:[#allocation2 + $0x9c] ss:$24 sps:$4 sm:$0xff]   ;;  %v3222_v44 = vld [vmem:[#allocation2 + $0xc8] sm:$0xff]  ;;  %v2551_v31 = vsel %vm498_vm10, %v2543_v47, %v2544_v45 }
 0x3ec   : > { %4012 = vmatprep.subr.bf16.mxu1 %v10499_v13  ;;  %v10537_v37 = vcombine.high %v2194_v23, %v2196_v60  ;;  %v10536_v0 = vcombine.low %v2194_v23, %v2196_v60  ;;  %v1919_v13 = vrot.slane %v12965_v61, 4  ;;  %v10524_v60 = vcombine.low %v1998_v53, %v2000_v18 }
 0x3ed   : > { %v1929_v23 = vsel %vm498_vm10, %v1921_v57, %v1922_v33  ;;  %v2552_v8 = vsel %vm804_vm3, %v13125_v21, %v2551_v31  ;;  %v13311_v21 = vpop.permute.xlu0 %2935  ;;  %v11170_v33 = vld [vmem:[#allocation2 + $0x2f8] ss:$136 sps:$4 sm:$0xff]  }
 0x3ee   : > { %4079 = vmatprep.subr.bf16.mxu0 %v10537_v37 }
 0x3ef   : > { %v2110_v39 = vpop.permute.xlu1 %2109  ;;  %4013 = vmatpush1.bf16.msra.mxu1 %v10498_v11  ;;  %4080 = vmatpush1.bf16.msra.mxu0 %v10536_v0  ;;  %v10523_v0 = vcombine.high %v3221_v41, %v3222_v44  ;;  %v1930_v11 = vsel %vm16508_vm12, %v13069_v29, %v1929_v23  ;;  %v16510_v29 = vld [vmem:[#allocation32_spill] sm:$0xff]  ;;  %vm16522_vm12 = vcmask 916480  }
 0x3f0   : > { %v2118_v2 = vrot.slane %v2110_v39, 4  ;;  %4014 = vmatprep.subr.bf16.mxu1 %v10529_v17  ;;  %4081 = vmatprep.subr.bf16.mxu0 %v11159_v22  ;;  %v1851_v17 = vrot.slane %v13264_v56, 4  ;;  %v2474_v24 = vrot.slane %v16510_v29, 4 }
 0x3f1   : > { %v13324_v30 = vpop.permute.xlu0 %2869 }
 0x3f2   : > { %v2125_v36 = vsel %vm498_vm10, %v2117_v28, %v2118_v2  ;;  %v10522_v28 = vcombine.low %v3221_v41, %v3222_v44  ;;  %v1849_v2 = vrot.slane %v13099_v54, 4  ;;  %v2481_v18 = vsel %vm498_vm10, %v2473_v9, %v2474_v24  ;;  %v16516_v41 = vld [vmem:[#allocation26_spill] sm:$0xff]  ;;  %v11177_v9 = vld [vmem:[#allocation2 + $0x584] ss:$16 sps:$4 sm:$0xff]  }
 0x3f3   : > { %v2126_v4 = vsel %vm16504_vm15, %v13090_v48, %v2125_v36  ;;  %v13285_v63 = vpop.permute.xlu1 %2801  ;;  %4015 = vmatpush2.bf16.msra.mxu1 %v10528_v16  ;;  %4082 = vmatpush1.bf16.msra.mxu0 %v11161_v40  ;;  %v1920_v48 = vrot.slane %v13085_v52, 4  ;;  %v11167_v52 = vld [vmem:[#allocation2 + $0x98] ss:$24 sps:$4 sm:$0xff]   ;;  %v11168_v40 = vld [vmem:[#allocation2 + $0x2fc] ss:$136 sps:$4 sm:$0xff]   ;;  %v2476_v36 = vrot.slane %v16511_v25, 4  ;;  %v2482_v45 = vsel %vm839_vm4, %v13143_v43, %v2481_v18 }
 0x3f4   : > { %4016 = vmatprep.subr.bf16.mxu1 %v11162_v51  ;;  %v10533_v55 = vcombine.high %v2124_v32, %v2126_v4  ;;  %v10532_v46 = vcombine.low %v2124_v32, %v2126_v4  ;;  %v1850_v51 = vrot.slane %v12985_v1, 4  ;;  %v1859_v4 = vsel %vm498_vm10, %v1851_v17, %v1852_v50  ;;  %v11173_v43 = vld [vmem:[#allocation2 + $0x330] ss:$-560 sps:$4 sm:$0xff]  }
 0x3f5   : > { %v1927_v15 = vsel %vm498_vm10, %v1919_v13, %v1920_v48  ;;  %vm16513_vm15 = vcmask 244736   ;;  %v2811_v10 = vrot.slane %v13285_v63, 4  ;;  %v16515_v13 = vld [vmem:[#allocation27_spill] sm:$0xff] }
 0x3f6   : > { %4083 = vmatprep.subr.bf16.mxu0 %v10533_v55  ;;  %v1928_v39 = vsel %vm16509_vm0, %v12965_v61, %v1927_v15  ;;  %v2405_v61 = vrot.slane %v13097_v7, 4  ;;  %v16512_v55 = vld [vmem:[#allocation74_spill] sm:$0xff]  ;;  %v1857_v53 = vsel %vm498_vm10, %v1849_v2, %v1850_v51  ;;  %v1860_v57 = vsel %vm16513_vm15, %v13264_v56, %v1859_v4  ;;  %vm16514_vm14 = vmmov %vm16513_vm15  ;;  %v16517_v24 = vld [vmem:[#allocation31_spill] sm:$0xff] }
 0x3f7   : > { %v2536_v5 = vpop.permute.xlu1 %2535  ;;  %4017 = vmatpush2.bf16.msra.mxu1 %v11164_v20  ;;  %4084 = vmatpush1.bf16.msra.mxu0 %v10532_v46  ;;  %v10521_v16 = vcombine.high %v1928_v39, %v1930_v11  ;;  %v10520_v12 = vcombine.low %v1928_v39, %v1930_v11  ;;  %v2406_v46 = vrot.slane %v16512_v55, 4  ;;  %v11171_v20 = vld [vmem:[#allocation2 + $0x334] ss:$-560 sps:$4 sm:$0xff]   ;;  %v1858_v44 = vsel %vm16514_vm14, %v13099_v54, %v1857_v53  ;;  %v13345_v54 = vpop.permute.xlu0 %2873  ;;  %v16518_v51 = vld [vmem:[#allocation30_spill] sm:$0xff]  ;;  %v11193_v4 = vld [vmem:[%s16147_s3 + $0x3c] ss:$28 sps:$4 sm:$0xff]  }
 0x3f8   : > { %v2545_v35 = vrot.slane %v2536_v5, 4  ;;  %4018 = vmatprep.subr.bf16.mxu1 %v10525_v34  ;;  %4085 = vmatprep.subr.bf16.mxu0 %v11165_v19  ;;  %v2812_v31 = vrot.slane %v16515_v13, 4  ;;  %v2809_v56 = vrot.slane %v13120_v38, 4  ;;  %v10517_v23 = vcombine.high %v1858_v44, %v1860_v57  ;;  %v3251_v11 = vld [vmem:[#allocation2 + $0x5a0] sm:$0xff]  ;;  %v11188_v55 = vld [vmem:[#allocation2 + $0x3fc] ss:$-720 sps:$4 sm:$0xff]  }
 0x3f9   : > { %v2413_v19 = vsel %vm498_vm10, %v2405_v61, %v2406_v46  ;;  %v2810_v15 = vrot.slane %v16516_v41, 4  ;;  %v2742_v50 = vrot.slane %v16517_v24, 4  ;;  %v2739_v2 = vrot.slane %v13135_v3, 4  ;;  %v11185_v61 = vld [vmem:[#allocation2 + $0x608] ss:$-280 sps:$4 sm:$0xff]  }
 0x3fa   : > { %v2553_v37 = vsel %vm498_vm10, %v2545_v35, %v2546_v26  ;;  %v11174_v35 = vld [vmem:[#allocation2 + $0x30c] ss:$-144 sps:$4 sm:$0xff]   ;;  %vm16529_vm0 = vcmask 785408   ;;  %vm16532_vm15 = vcmask 261120  }
 0x3fb   : > { %v2554_v58 = vsel %vm804_vm3, %v2536_v5, %v2553_v37  ;;  %v13305_v14 = vpop.permute.xlu1 %2731  ;;  %4019 = vmatpush2.bf16.msra.mxu1 %v10524_v60  ;;  %4086 = vmatpush1.bf16.msra.mxu0 %v11167_v52  ;;  %v2414_v60 = vsel %vm874_vm5, %v13097_v7, %v2413_v19  ;;  %v2819_v37 = vsel %vm498_vm10, %v2811_v10, %v2812_v31  ;;  %v13360_v25 = vpop.permute.xlu0 %3135  ;;  %v11197_v31 = vld [vmem:[#allocation2 + $0x394] ss:$304 sps:$4 sm:$0xff]   ;;  %v3266_v24 = vld [vmem:[#allocation2 + $0x148] sm:$0xff]  ;;  %vm16533_vm14 = vmmov %vm16532_vm15 }
 0x3fc   : > { %4020 = vmatprep.subr.bf16.mxu1 %v10523_v0  ;;  %v10561_v22 = vcombine.high %v2552_v8, %v2554_v58  ;;  %v10560_v6 = vcombine.low %v2552_v8, %v2554_v58  ;;  %v10516_v0 = vcombine.low %v1858_v44, %v1860_v57  ;;  %v11176_v8 = vld [vmem:[#allocation2 + $0x308] ss:$-144 sps:$4 sm:$0xff]   ;;  %v2817_v58 = vsel %vm498_vm10, %v2809_v56, %v2810_v15  ;;  %v11206_v15 = vld [vmem:[%s16147_s3 + $0x44] ss:$28 sps:$4 sm:$0xff]  }
 0x3fd   : > { %v10553_v17 = vcombine.high %v3251_v11, %v2414_v60  ;;  %v2820_v7 = vsel %vm671_vm7, %v13285_v63, %v2819_v37  ;;  %v2818_v39 = vsel %vm671_vm7, %v13120_v38, %v2817_v58  ;;  %v10552_v29 = vcombine.low %v3251_v11, %v2414_v60  ;;  %v11182_v63 = vld [vmem:[%s16147_s3] ss:$28 sps:$4 sm:$0xff]   ;;  %v11191_v57 = vld [vmem:[#allocation2 + $0x3f8] ss:$-720 sps:$4 sm:$0xff]  }
 0x3fe   : > { %4087 = vmatprep.subr.bf16.mxu0 %v10561_v22  ;;  %v2740_v38 = vrot.slane %v16518_v51, 4  ;;  %v10576_v18 = vcombine.low %v2818_v39, %v2820_v7  ;;  %v16520_v44 = vld [vmem:[#allocation45_spill] sm:$0xff]  ;;  %v16524_v58 = vld [vmem:[#allocation62_spill] sm:$0xff] }
 0x3ff   : > { %v2466_v32 = vpop.permute.xlu1 %2465  ;;  %4021 = vmatpush2.bf16.msra.mxu1 %v10522_v28  ;;  %4088 = vmatpush2.bf16.msra.mxu0 %v10560_v6  ;;  %v2741_v6 = vrot.slane %v13305_v14, 4  ;;  %v11179_v28 = vld [vmem:[#allocation2 + $0x580] ss:$16 sps:$4 sm:$0xff]   ;;  %v11199_v56 = vld [vmem:[%s16147_s3 + $0x8] ss:$28 sps:$4 sm:$0xff]  }
 0x400   : > { %v2475_v47 = vrot.slane %v2466_v32, 4  ;;  %4022 = vmatprep.subr.bf16.mxu1 %v10521_v16  ;;  %4089 = vmatprep.subr.bf16.mxu0 %v11168_v40  ;;  %v11180_v16 = vld [vmem:[#allocation2 + $0x60c] ss:$-280 sps:$4 sm:$0xff]   ;;  %v10577_v40 = vcombine.high %v2818_v39, %v2820_v7 }
 0x401   : > { %v3267_v11 = vld [vmem:[#allocation2 + $0x2e8] sm:$0xff]  ;;  %v16525_v39 = vld [vmem:[#allocation59_spill] sm:$0xff] }
 0x402   : > { %v2483_v1 = vsel %vm498_vm10, %v2475_v47, %v2476_v36  ;;  %v11067_v47 = vunpack.i.h.bf16 %v16480_v42  ;;  %v3140_v42 = vpop.permute.xlu0 %3139 }
 0x403   : > { %v2484_v48 = vsel %vm839_vm4, %v2466_v32, %v2483_v1  ;;  %v13331_v34 = vpop.permute.xlu1 %2605  ;;  %4023 = vmatpush2.bf16.msra.mxu1 %v10520_v12  ;;  %4090 = vmatpush2.bf16.msra.mxu0 %v11170_v33  ;;  %v2749_v32 = vsel %vm498_vm10, %v2741_v6, %v2742_v50  ;;  %v2747_v12 = vsel %vm498_vm10, %v2739_v2, %v2740_v38  ;;  %v11186_v33 = vld [vmem:[#allocation4 + $0x28] ss:$16 sps:$4 sm:$0xff]   ;;  %v2671_v1 = vrot.slane %v13171_v49, 4  ;;  %v11209_v50 = vld [vmem:[%s16147_s3 + $0xac] ss:$28 sps:$4 sm:$0xff]  }
 0x404   : > { %4024 = vmatprep.subr.bf16.mxu1 %v11171_v20  ;;  %v10557_v26 = vcombine.high %v2482_v45, %v2484_v48  ;;  %v10556_v5 = vcombine.low %v2482_v45, %v2484_v48  ;;  %v2750_v46 = vsel %vm706_vm8, %v13305_v14, %v2749_v32  ;;  %v2748_v20 = vsel %vm706_vm8, %v13135_v3, %v2747_v12  ;;  %v11190_v45 = vld [vmem:[#allocation4 + $0x24] ss:$16 sps:$4 sm:$0xff]   ;;  %v11195_v14 = vld [vmem:[%s16147_s3 + $0x38] ss:$28 sps:$4 sm:$0xff]  }
 0x405   : > { %v2672_v48 = vrot.slane %v11067_v47, 4  ;;  %v10573_v19 = vcombine.high %v2748_v20, %v2750_v46  ;;  %v11203_v3 = vld [vmem:[%s16147_s3 + $0x74] ss:$28 sps:$4 sm:$0xff]   ;;  %v10572_v13 = vcombine.low %v2748_v20, %v2750_v46  ;;  %v2615_v37 = vrot.slane %v13331_v34, 4  ;;  %v3265_v38 = vld [vmem:[#allocation2 + $0x588] sm:$0xff] }
 0x406   : > { %4091 = vmatprep.subr.bf16.mxu0 %v10557_v26  ;;  %v11205_v6 = vld [vmem:[%s16147_s3 + $0x70] ss:$28 sps:$4 sm:$0xff]   ;;  %v3148_v2 = vrot.slane %v3140_v42, 4  ;;  %v11214_v42 = vld [vmem:[%s16147_s3 + $0x7c] ss:$28 sps:$4 sm:$0xff]  }
 0x407   : > { %v13341_v52 = vpop.permute.xlu1 %3067  ;;  %4025 = vmatpush2.bf16.msra.mxu1 %v11173_v43  ;;  %4092 = vmatpush2.bf16.msra.mxu0 %v10556_v5  ;;  %v2679_v26 = vsel %vm498_vm10, %v2671_v1, %v2672_v48  ;;  %v16519_v5 = vld [vmem:[#allocation49_spill] sm:$0xff] }
 0x408   : > { %4026 = vmatprep.subr.bf16.mxu1 %v10517_v23  ;;  %4093 = vmatprep.subr.bf16.mxu0 %v11174_v35  ;;  %v16521_v43 = vcombine.high %v16519_v5, %v16520_v44  ;;  %v13393_v23 = vpop.permute.xlu0 %2861  ;;  %v2680_v35 = vsel %vm16522_vm12, %v13171_v49, %v2679_v26  ;;  %v16523_v41 = vcombine.low %v16519_v5, %v16520_v44  ;;  %v3146_v49 = vrot.slane %v13360_v25, 4  ;;  %v11211_v26 = vld [vmem:[%s16147_s3 + $0xa8] ss:$28 sps:$4 sm:$0xff]   ;;  %vm16534_vm12 = vmmov %vm16533_vm14 }
 0x409   : > { %v10569_v7 = vcombine.high %v3267_v11, %v2680_v35  ;;  %v10568_v51 = vcombine.low %v3267_v11, %v2680_v35  ;;  %v3077_v46 = vrot.slane %v13341_v52, 4 }
 0x40b   : > { %v13350_v22 = vpop.permute.xlu1 %2941  ;;  %4027 = vmatpush2.bf16.msra.mxu1 %v10516_v0  ;;  %4094 = vmatpush2.bf16.msra.mxu0 %v11176_v8  ;;  %v11202_v8 = vld [vmem:[#allocation2 + $0x390] ss:$304 sps:$4 sm:$0xff]  }
 0x40c   : > { %4028 = vmatprep.subr.bf16.mxu1 %v11177_v9  ;;  %4095 = vmatprep.subr.bf16.mxu0 %v10553_v17  ;;  %v2616_v9 = vrot.slane %v16524_v58, 4  ;;  %v2613_v17 = vrot.slane %v13148_v27, 4  ;;  %v13416_v25 = vpop.permute.xlu0 %2865 }
 0x40f   : > { %v13362_v36 = vpop.permute.xlu1 %2933  ;;  %4029 = vmatpush2.bf16.msra.mxu1 %v11179_v28  ;;  %4096 = vmatpush2.bf16.msra.mxu0 %v10552_v29  ;;  %v2614_v28 = vrot.slane %v16525_v39, 4 }
 0x410   : > { %4097 = vmatprep.subr.bf16.mxu0 %v11180_v16  ;;  %4144 = vmatprep.subr.bf16.mxu1 %v10577_v40  ;;  %v2623_v16 = vsel %vm498_vm10, %v2615_v37, %v2616_v9  ;;  %v3128_v5 = vpop.permute.xlu0 %3127 }
 0x411   : > { %v2621_v32 = vsel %vm498_vm10, %v2613_v17, %v2614_v28  ;;  %v2624_v47 = vsel %vm769_vm2, %v13331_v34, %v2623_v16  ;;  %v11222_v16 = vld [vmem:[%s16147_s3 + $0xb0] ss:$28 sps:$4 sm:$0xff]  }
 0x412   : > { %4031 = vmatmul.mubr.bf16.vlgmr.msra.gmra.mxu1 %v11182_v63  ;;  %v2622_v34 = vsel %vm769_vm2, %v13148_v27, %v2621_v32  ;;  %v11230_v27 = vld [vmem:[%s16147_s3 + $0x14] ss:$28 sps:$4 sm:$0xff]  }
 0x413   : > { %v13373_v53 = vpop.permute.xlu1 %2867  ;;  %4098 = vmatpush2.bf16.msra.mxu0 %v11185_v61  ;;  %4145 = vmatpush1.bf16.msra.mxu1 %v10576_v18  ;;  %v10567_v18 = vcombine.high %v3265_v38, %v3266_v24 }
 0x414   : > { %4099 = vmatprep.subr.bf16.mxu0 %v11186_v33  ;;  %4146 = vmatprep.subr.bf16.mxu1 %v11188_v55  ;;  %v3132_v9 = vpop.permute.xlu0 %3131 }
 0x415   : > { %4040 = vmatprep.mubr.bf16.mxu1 %v11193_v4  ;;  %v11208_v4 = vld [vmem:[%s16147_s3 + $0x40] ss:$28 sps:$4 sm:$0xff]   ;;  %v3144_v39 = vrot.slane %v3132_v9, 4 }
 0x417   : > { %v13381_v10 = vpop.permute.xlu1 %2871  ;;  %4100 = vmatpush2.bf16.msra.mxu0 %v11190_v45  ;;  %4147 = vmatpush1.bf16.msra.mxu1 %v11191_v57  ;;  %v10566_v45 = vcombine.low %v3265_v38, %v3266_v24  ;;  %v16526_v57 = vld [vmem:[#allocation70_spill] sm:$0xff]  ;;  %v2951_v38 = vrot.slane %v13350_v22, 4 }
 0x418   : > { %4101 = vmatprep.subr.bf16.mxu0 %v16521_v43  ;;  %4148 = vmatprep.subr.bf16.mxu1 %v10573_v19  ;;  %v3078_v48 = vrot.slane %v16526_v57, 4  ;;  %v3075_v19 = vrot.slane %v13152_v62, 4  ;;  %v16527_v43 = vld [vmem:[#allocation69_spill] sm:$0xff]  ;;  %v11227_v57 = vld [vmem:[%s16147_s3 + $0x18] ss:$28 sps:$4 sm:$0xff]  }
 0x41a   : > { %4041 = vmatmul.mubr.bf16.gmra.mxu1 %v11195_v14  ;;  %v10565_v14 = vcombine.high %v2622_v34, %v2624_v47 }
 0x41b   : > { %v3134_v60 = vpop.permute.xlu1 %3133  ;;  %4102 = vmatpush2.bf16.msra.mxu0 %v16523_v41  ;;  %4149 = vmatpush1.bf16.msra.mxu1 %v10572_v13  ;;  %v3085_v13 = vsel %vm498_vm10, %v3077_v46, %v3078_v48  ;;  %v11216_v41 = vld [vmem:[%s16147_s3 + $0x78] ss:$28 sps:$4 sm:$0xff]  }
 0x41c   : > { %v3145_v0 = vrot.slane %v3134_v60, 4  ;;  %4150 = vmatprep.subr.bf16.mxu1 %v11197_v31  ;;  %4050 = vmatprep.mubr.bf16.mxu1 %v11203_v3  ;;  %v3076_v3 = vrot.slane %v16527_v43, 4  ;;  %v10564_v31 = vcombine.low %v2622_v34, %v2624_v47  ;;  %v16530_v47 = vld [vmem:[#allocation76_spill] sm:$0xff]  ;;  %v2948_v34 = vrot.slane %v13311_v21, 4 }
 0x41d   : > { %v2879_v21 = vrot.slane %v13373_v53, 4 }
 0x41e   : > { %4104 = vmatmul.mubr.bf16.vlgmr.msra.gmra.mxu0 %v11199_v56  ;;  %v3153_v40 = vsel %vm498_vm10, %v3145_v0, %v3146_v49  ;;  %v11077_v56 = vunpack.i.h.bf16 %v16481_v59  ;;  %v3083_v35 = vsel %vm498_vm10, %v3075_v19, %v3076_v3  ;;  %v11220_v0 = vld [vmem:[%s16147_s3 + $0xb4] ss:$28 sps:$4 sm:$0xff]  }
 0x41f   : > { %v3138_v29 = vpop.permute.xlu1 %3137  ;;  %4151 = vmatpush1.bf16.msra.mxu1 %v11202_v8  ;;  %4113 = vmatprep.mubr.bf16.mxu0 %v11206_v15  ;;  %v3154_v12 = vsel %vm472_vm9, %v3134_v60, %v3153_v40  ;;  %v11212_v60 = vld [vmem:[#allocation2 + $0x53c] ss:$-872 sps:$4 sm:$0xff]   ;;  %v3086_v15 = vsel %vm518_vm13, %v13341_v52, %v3085_v13  ;;  %v3084_v58 = vsel %vm518_vm13, %v13152_v62, %v3083_v35  ;;  %v11217_v49 = vld [vmem:[#allocation2 + $0x538] ss:$-872 sps:$4 sm:$0xff]   ;;  %v2878_v35 = vrot.slane %v13416_v25, 4 }
 0x420   : > { %v3147_v63 = vrot.slane %v3138_v29, 4  ;;  %4152 = vmatprep.subr.bf16.mxu1 %v10569_v7  ;;  %v16528_v8 = vld [vmem:[#allocation20_spill] sm:$0xff]  ;;  %v3008_v17 = vrot.slane %v11077_v56, 4  ;;  %v3142_v7 = vrot.slane %v3128_v5, 4  ;;  %v10593_v52 = vcombine.high %v3084_v58, %v3086_v15  ;;  %v11218_v62 = vld [vmem:[#allocation2 + $0x614] ss:$-432 sps:$4 sm:$0xff]  }
 0x421   : > { %v3007_v59 = vrot.slane %v16528_v8, 4  ;;  %v3283_v5 = vld [vmem:[#allocation2 + $0x20] sm:$0xff] }
 0x422   : > { %v3155_v61 = vsel %vm498_vm10, %v3147_v63, %v3148_v2  ;;  %4051 = vmatmul.mubr.bf16.gmra.mxu1 %v11205_v6 }
 0x423   : > { %v3156_v33 = vsel %vm472_vm9, %v3138_v29, %v3155_v61  ;;  %v13427_v55 = vpop.permute.xlu1 %2859  ;;  %4153 = vmatpush1.bf16.msra.mxu1 %v10568_v51  ;;  %4060 = vmatprep.mubr.bf16.mxu1 %v11209_v50  ;;  %v3015_v28 = vsel %vm498_vm10, %v3007_v59, %v3008_v17  ;;  %v10592_v50 = vcombine.low %v3084_v58, %v3086_v15  ;;  %v11242_v17 = vld [vmem:[%s16147_s3 + $0xc0] ss:$28 sps:$4 sm:$0xff]  }
 0x424   : > { %4154 = vmatprep.subr.bf16.mxu1 %v10567_v18  ;;  %v10597_v1 = vcombine.high %v3154_v12, %v3156_v33  ;;  %v10596_v20 = vcombine.low %v3154_v12, %v3156_v33  ;;  %v3016_v40 = vsel %vm16529_vm0, %v16528_v8, %v3015_v28  ;;  %v11223_v18 = vld [vmem:[#allocation2 + $0x610] ss:$-432 sps:$4 sm:$0xff]   ;;  %v2952_v12 = vrot.slane %v16530_v47, 4  ;;  %vm16535_vm0 = vmmov %vm16534_vm12  ;;  %v11241_v28 = vld [vmem:[%s16147_s3 + $0xb8] ss:$28 sps:$4 sm:$0xff]  }
 0x426   : > { %4114 = vmatmul.mubr.bf16.gmra.mxu0 %v11208_v4  ;;  %4229 = vmatprep.subr.bf16.mxu0 %v10597_v1  ;;  %v3287_v4 = vld [vmem:[#allocation2 + $0x168] sm:$0xff]  ;;  %v2959_v46 = vsel %vm498_vm10, %v2951_v38, %v2952_v12  ;;  %v2947_v1 = vrot.slane %v13362_v36, 4 }
 0x427   : > { %v13440_v44 = vpop.permute.xlu1 %2863  ;;  %4230 = vmatpush1.bf16.msra.mxu0 %v10596_v20  ;;  %4155 = vmatpush1.bf16.msra.mxu1 %v10566_v45  ;;  %v10589_v33 = vcombine.high %v3287_v4, %v3016_v40  ;;  %v16531_v20 = vmov 0   ;;  %v11224_v45 = vld [vmem:[#allocation2 + $0x2dc] ss:$520 sps:$4 sm:$0xff]   ;;  %v2960_v48 = vsel %vm591_vm11, %v13350_v22, %v2959_v46  ;;  %v2880_v22 = vrot.slane %v13324_v30, 4 }
 0x428   : > { %4156 = vmatprep.subr.bf16.mxu1 %v10565_v14  ;;  %4123 = vmatprep.mubr.bf16.mxu0 %v11214_v42  ;;  %v10588_v42 = vcombine.low %v3287_v4, %v3016_v40  ;;  %v2955_v19 = vsel %vm498_vm10, %v2947_v1, %v2948_v34  ;;  %v2881_v14 = vrot.slane %v13381_v10, 4  ;;  %v10585_v43 = vcombine.high %v3283_v5, %v2960_v48 }
 0x429   : > { %v2956_v3 = vsel %vm591_vm11, %v13362_v36, %v2955_v19  ;;  %v10584_v56 = vcombine.low %v3283_v5, %v2960_v48  ;;  %v11234_v36 = vld [vmem:[%s16147_s3 + $0x50] ss:$28 sps:$4 sm:$0xff]  }
 0x42a   : > { %4061 = vmatmul.mubr.bf16.gmra.mxu1 %v11211_v26  ;;  %v11226_v26 = vld [vmem:[#allocation2 + $0x2d8] ss:$520 sps:$4 sm:$0xff]  }
 0x42b   : > { %v3126_v37 = vpop.permute.xlu1 %3125  ;;  %4157 = vmatpush1.bf16.msra.mxu1 %v10564_v31  ;;  %4176 = vmatprep.mubr.bf16.mxu1 %v11230_v27  ;;  %v2882_v27 = vrot.slane %v13345_v54, 4  ;;  %v2877_v31 = vrot.slane %v13440_v44, 4  ;;  %v3281_v54 = vld [vmem:[#allocation2 + $0xd0] sm:$0xff] }
 0x42c   : > { %v3141_v11 = vrot.slane %v3126_v37, 4  ;;  %4158 = vmatprep.subr.bf16.mxu1 %v11212_v60  ;;  %v2887_v60 = vsel %vm498_vm10, %v2879_v21, %v2880_v22  ;;  %v10583_v15 = vcombine.high %v3281_v54, %v2956_v3  ;;  %v10582_v8 = vcombine.low %v3281_v54, %v2956_v3 }
 0x42d   : > { %v2889_v13 = vsel %vm498_vm10, %v2881_v14, %v2882_v27  ;;  %v2888_v25 = vsel %vm636_vm6, %v13373_v53, %v2887_v60  ;;  %v11238_v53 = vld [vmem:[%s16147_s3 + $0x88] ss:$28 sps:$4 sm:$0xff]  }
 0x42e   : > { %4124 = vmatmul.mubr.bf16.gmra.mxu0 %v11216_v41  ;;  %v3149_v29 = vsel %vm498_vm10, %v3141_v11, %v3142_v7  ;;  %v2875_v41 = vrot.slane %v13427_v55, 4  ;;  %v2890_v30 = vsel %vm636_vm6, %v13381_v10, %v2889_v13  ;;  %v11233_v7 = vld [vmem:[%s16147_s3 + $0x48] ss:$28 sps:$4 sm:$0xff]  }
 0x42f   : > { %v3130_v6 = vpop.permute.xlu1 %3129  ;;  %4159 = vmatpush1.bf16.msra.mxu1 %v11217_v49  ;;  %4133 = vmatprep.mubr.bf16.mxu0 %v11220_v0  ;;  %v3150_v63 = vsel %vm472_vm9, %v3126_v37, %v3149_v29  ;;  %v2876_v37 = vrot.slane %v13393_v23, 4  ;;  %v2885_v0 = vsel %vm498_vm10, %v2877_v31, %v2878_v35  ;;  %v10581_v11 = vcombine.high %v2888_v25, %v2890_v30  ;;  %v6399_v29 = vld [vmem:[#allocation5 + $0x2c] sm:$0xf] }
 0x430   : > { %v3143_v24 = vrot.slane %v3130_v6, 4  ;;  %4160 = vmatprep.subr.bf16.mxu1 %v10593_v52  ;;  %v2886_v58 = vsel %vm636_vm6, %v13440_v44, %v2885_v0  ;;  %v10580_v23 = vcombine.low %v2888_v25, %v2890_v30  ;;  %v11228_v44 = vld [vmem:[%s16147_s3 + $0x10] ss:$28 sps:$4 sm:$0xff]   ;;  %v11235_v52 = vld [vmem:[%s16147_s3 + $0x84] ss:$28 sps:$4 sm:$0xff]  }
 0x431   : > { %v2883_v59 = vsel %vm498_vm10, %v2875_v41, %v2876_v37 }
 0x432   : > { %v3151_v2 = vsel %vm498_vm10, %v3143_v24, %v3144_v39  ;;  %v2884_v10 = vsel %vm636_vm6, %v13427_v55, %v2883_v59  ;;  %v11231_v55 = vld [vmem:[%s16147_s3 + $0x4c] ss:$28 sps:$4 sm:$0xff]   ;;  %v11239_v39 = vld [vmem:[%s16147_s3 + $0xbc] ss:$28 sps:$4 sm:$0xff]   ;;  %v6401_v24 = vld [vmem:[#allocation5 + $0x3c] sm:$0xf] }
 0x433   : > { %v3152_v51 = vsel %vm472_vm9, %v3130_v6, %v3151_v2  ;;  %4161 = vmatpush2.bf16.msra.mxu1 %v10592_v50  ;;  %v10579_v9 = vcombine.high %v2884_v10, %v2886_v58  ;;  %v10578_v49 = vcombine.low %v2884_v10, %v2886_v58  ;;  %v11237_v6 = vld [vmem:[%s16147_s3 + $0x80] ss:$28 sps:$4 sm:$0xff]   ;;  %v6395_v50 = vld [vmem:[#allocation5 + $0xc] sm:$0xf]  ;;  %v11093_v2 = vpack.i.bf16 %v6401_v24, %v6399_v29 }
 0x434   : > { %4162 = vmatprep.subr.bf16.mxu1 %v11218_v62  ;;  %v10595_v32 = vcombine.high %v3150_v63, %v3152_v51  ;;  %v10594_v61 = vcombine.low %v3150_v63, %v3152_v51  ;;  %v6397_v62 = vld [vmem:[#allocation5 + $0x1c] sm:$0xf] }
 0x435   : > { %11094 = vrot.lane.b32.xlu0 %v11093_v2, %s16384_s2 }
 0x436   : > { %4134 = vmatmul.mubr.bf16.gmra.mxu0 %v11222_v16  ;;  %4231 = vmatprep.subr.bf16.mxu0 %v10595_v32  ;;  %v11098_v16 = vpack.i.bf16 %v6397_v62, %v6395_v50 }
 0x437   : > { %4163 = vmatpush2.bf16.msra.mxu1 %v11223_v18  ;;  %4232 = vmatpush1.bf16.msra.mxu0 %v10594_v61 }
 0x438   : > { %4164 = vmatprep.subr.bf16.mxu1 %v10589_v33  ;;  %4249 = vmatprep.mubr.bf16.mxu0 %v16531_v20 }
 0x439   : > { %11099 = vrot.lane.b32.xlu1 %v11098_v16, %s16384_s2 }
 0x43b   : > { %4165 = vmatpush2.bf16.msra.mxu1 %v10588_v42 }
 0x43c   : > { %4166 = vmatprep.subr.bf16.mxu1 %v11224_v45  ;;  %v13569_v3 = vpop.permute.xlu1 %3337 }
 0x43e   : > { %10598 = vmatmul.mubr.msk.bf16.vlgmr.msra.gmra.mxu0 %vm16532_vm15, %v11227_v57  ;;  %vm16561_vm15 = vmmov %vm16535_vm0 }
 0x43f   : > { %4167 = vmatpush2.bf16.msra.mxu1 %v11226_v26  ;;  %4259 = vmatprep.mubr.bf16.mxu0 %v16531_v20 }
 0x440   : > { %4168 = vmatprep.subr.bf16.mxu1 %v10585_v43  ;;  %v13579_v60 = vpop.permute.xlu1 %3327 }
 0x443   : > { %4169 = vmatpush2.bf16.msra.mxu1 %v10584_v56  ;;  %v13575_v56 = vpop.permute.xlu0 %3342 }
 0x444   : > { %4170 = vmatprep.subr.bf16.mxu1 %v10583_v15  ;;  %v3318_v0 = vpop.permute.xlu1 %3317 }
 0x446   : > { %10599 = vmatmul.mubr.msk.bf16.gmra.mxu0 %vm16533_vm14, %v11234_v36  ;;  %vm16562_vm14 = vcmask 130048  }
 0x447   : > { %4171 = vmatpush2.bf16.msra.mxu1 %v10582_v8  ;;  %4269 = vmatprep.mubr.bf16.mxu0 %v16531_v20  ;;  %v13583_v30 = vpop.permute.xlu0 %3332 }
 0x448   : > { %4172 = vmatprep.subr.bf16.mxu1 %v10581_v11  ;;  %v3308_v10 = vpop.permute.xlu1 %3307 }
 0x44b   : > { %4173 = vmatpush2.bf16.msra.mxu1 %v10580_v23  ;;  %v3323_v59 = vpop.permute.xlu0 %3322 }
 0x44c   : > { %4174 = vmatprep.subr.bf16.mxu1 %v10579_v9 }
 0x44e   : > { %10600 = vmatmul.mubr.msk.bf16.gmra.mxu0 %vm16534_vm12, %v11238_v53  ;;  %vm16563_vm12 = vcmask 916480  }
 0x44f   : > { %4175 = vmatpush2.bf16.msra.mxu1 %v10578_v49  ;;  %4279 = vmatprep.mubr.bf16.mxu0 %v16531_v20 }
 0x452   : > { %4177 = vmatmul.mubr.bf16.vlgmr.msra.gmra.mxu1 %v11228_v44 }
 0x453   : > { %4186 = vmatprep.mubr.bf16.mxu1 %v11231_v55  ;;  %v3313_v55 = vpop.permute.xlu0 %3312 }
 0x456   : > { %10601 = vmatmul.mubr.msk.bf16.gmra.mxu0 %vm16535_vm0, %v11242_v17  ;;  %vm16564_vm0 = vcmask 277504  }
 0x45a   : > { %4187 = vmatmul.mubr.bf16.gmra.mxu1 %v11233_v7 }
 0x45b   : > { %4196 = vmatprep.mubr.bf16.mxu1 %v11235_v52 }
 0x462   : > { %4197 = vmatmul.mubr.bf16.gmra.mxu1 %v11237_v6 }
 0x463   : > { %4206 = vmatprep.mubr.bf16.mxu1 %v11239_v39 }
 0x46a   : > { %4207 = vmatmul.mubr.bf16.gmra.mxu1 %v11241_v28 }
 0x4d2   : > { %v4032_v40 = vpop.f32.mrf.mxu1 }
 0x4d3   : > { %v4033_v23 = vadd.f32 %v4032_v40, %v3308_v10 }
 0x4d4   : > { %v4034_v63 = vpop.f32.mrf.mxu1 }
 0x4d5   : > { %v4035_v49 = vadd.f32 %v4034_v63, %v3308_v10 }
 0x4d6   : > { %v4036_v51 = vpop.f32.mrf.mxu1 }
 0x4d7   : > { %v4037_v7 = vadd.f32 %v4036_v51, %v3313_v55 }
 0x4d8   : > { %v4038_v32 = vpop.f32.mrf.mxu1 }
 0x4d9   : > { %v4039_v29 = vadd.f32 %v4038_v32, %v3313_v55 }
 0x4da   : > { %v4042_v4 = vpop.f32.mrf.mxu1 }
 0x4db   : > { %v4043_v62 = vadd.f32 %v4042_v4, %v3318_v0 }
 0x4dc   : > { %v4044_v33 = vpop.f32.mrf.mxu1 }
 0x4de   : > { %v4105_v38 = vpop.f32.mrf.mxu0  ;;  %v4046_v42 = vpop.f32.mrf.mxu1 }
 0x4df   : > { %v4106_v44 = vadd.f32 %v4105_v38, %v4033_v23 }
 0x4e0   : > { %v4107_v61 = vpop.f32.mrf.mxu0  ;;  %v13551_v57 = vpop.f32.mrf.mxu1 }
 0x4e1   : > { %v4108_v52 = vadd.f32 %v4107_v61, %v4035_v49 }
 0x4e2   : > { %v4109_v18 = vpop.f32.mrf.mxu0  ;;  %v13557_v14 = vpop.f32.mrf.mxu1 }
 0x4e3   : > { %v4110_v24 = vadd.f32 %v4109_v18, %v4037_v7 }
 0x4e4   : > { %v4111_v47 = vpop.f32.mrf.mxu0  ;;  %v13563_v27 = vpop.f32.mrf.mxu1 }
 0x4e5   : > { %v4112_v40 = vadd.f32 %v4111_v47, %v4039_v29  ;;  %v4049_v47 = vadd.f32 %v13551_v57, %v3323_v59 }
 0x4e6   : > { %v4115_v12 = vpop.f32.mrf.mxu0  ;;  %v13571_v22 = vpop.f32.mrf.mxu1 }
 0x4e7   : > { %v4116_v63 = vadd.f32 %v4115_v12, %v4043_v62 }
 0x4e8   : > { %v13543_v46 = vpop.f32.mrf.mxu0  ;;  %v13577_v54 = vpop.f32.mrf.mxu1 }
 0x4ea   : > { %v13545_v1 = vpop.f32.mrf.mxu0  ;;  %v13581_v15 = vpop.f32.mrf.mxu1 }
 0x4ec   : > { %v13547_v34 = vpop.f32.mrf.mxu0  ;;  %v13585_v25 = vpop.f32.mrf.mxu1 }
 0x4ee   : > { %v13549_v45 = vpop.f32.mrf.mxu0  ;;  %v13587_v11 = vpop.f32.mrf.mxu1 }
 0x4f0   : > { %v13553_v48 = vpop.f32.mrf.mxu0  ;;  %v13589_v9 = vpop.f32.mrf.mxu1 }
 0x4f2   : > { %v13555_v19 = vpop.f32.mrf.mxu0 }
 0x4f4   : > { %v13559_v26 = vpop.f32.mrf.mxu0 }
 0x4f6   : > { %v13561_v5 = vpop.f32.mrf.mxu0 }
 0x4f8   : > { %v13565_v21 = vpop.f32.mrf.mxu0 }
 0x4fa   : > { %v13567_v43 = vpop.f32.mrf.mxu0 }
 0x4fb   : > { %16536 = vst [vmem:[#allocation71_spill] sm:$0xff] %v13567_v43  ;;  %v4045_v43 = vadd.f32 %v4044_v33, %v3318_v0 }
 0x4fc   : > { %v13573_v13 = vpop.f32.mrf.mxu0 }
 0x4fd   : > { %16537 = vst [vmem:[#allocation72_spill] sm:$0xff] %v13573_v13  ;;  %v4118_v32 = vadd.f32 %v13543_v46, %v4045_v43  ;;  %v4053_v46 = vadd.f32 %v13557_v14, %v13579_v60 }
 0x4fe   : > { %v4251_v31 = vpop.f32.mrf.mxu0 }
 0x4ff   : > { %v4126_v55 = vadd.f32 %v13549_v45, %v4053_v46 }
 0x500   : > { %v4253_v35 = vpop.f32.mrf.mxu0 }
 0x502   : > { %v4255_v41 = vpop.f32.mrf.mxu0 }
 0x504   : > { %v4257_v36 = vpop.f32.mrf.mxu0 }
 0x506   : > { %v4261_v37 = vpop.f32.mrf.mxu0 }
 0x508   : > { %v4263_v8 = vpop.f32.mrf.mxu0 }
 0x50a   : > { %v4265_v58 = vpop.f32.mrf.mxu0 }
 0x50c   : > { %v13591_v53 = vpop.f32.mrf.mxu0 }
 0x50e   : > { %v13593_v28 = vpop.f32.mrf.mxu0 }
 0x510   : > { %v4273_v10 = vpop.f32.mrf.mxu0 }
 0x512   : > { %v4178_v17 = vpop.f32.mrf.mxu1  ;;  %v4275_v12 = vpop.f32.mrf.mxu0 }
 0x513   : > { %v4179_v6 = vadd.f32 %v4178_v17, %v4106_v44  ;;  %v4047_v44 = vadd.f32 %v4046_v42, %v3323_v59  ;;  %v4055_v59 = vadd.f32 %v13563_v27, %v13579_v60  ;;  %v4059_v60 = vadd.f32 %v13577_v54, %v13583_v30 }
 0x514   : > { %v4180_v39 = vpop.f32.mrf.mxu1 }
 0x515   : > { %v4252_v50 = vadd.f32 %v4251_v31, %v4179_v6  ;;  %v4181_v2 = vadd.f32 %v4180_v39, %v4108_v52  ;;  %v4277_v52 = vpop.f32.mrf.mxu0 }
 0x516   : > { %v4182_v16 = vpop.f32.mrf.mxu1 }
 0x517   : > { %v4254_v20 = vadd.f32 %v4253_v35, %v4181_v2  ;;  %v4183_v13 = vadd.f32 %v4182_v16, %v4110_v24  ;;  %v4290_v23 = vmax.f32 %v4252_v50, 0.0  ;;  %v4120_v35 = vadd.f32 %v13545_v1, %v4047_v44 }
 0x518   : > { %v4184_v38 = vpop.f32.mrf.mxu1 }
 0x519   : > { %v4291_v51 = vmax.f32 %v4254_v20, 0.0  ;;  %v4256_v61 = vadd.f32 %v4255_v41, %v4183_v13  ;;  %v4185_v49 = vadd.f32 %v4184_v38, %v4112_v40 }
 0x51a   : > { %v4188_v17 = vpop.f32.mrf.mxu1 }
 0x51b   : > { %v13596_v18 = vpack.c.bf16 %v4291_v51, %v4290_v23  ;;  %v4258_v31 = vadd.f32 %v4257_v36, %v4185_v49  ;;  %v4189_v4 = vadd.f32 %v4188_v17, %v4116_v63  ;;  %v4292_v20 = vmax.f32 %v4256_v61, 0.0 }
 0x51c   : > { %v4190_v33 = vpop.f32.mrf.mxu1  ;;  %v4122_v36 = vadd.f32 %v13547_v34, %v4049_v47  ;;  %v4057_v34 = vadd.f32 %v13571_v22, %v13583_v30  ;;  %v4132_v30 = vadd.f32 %v13559_v26, %v4059_v60  ;;  %v4065_v51 = vadd.f32 %v13585_v25, %v13569_v3  ;;  %v16538_v47 = vld [vmem:[#allocation35_spill] sm:$0xff] }
 0x51d   : > { %4354 = vst [vmem:[#allocation5 + $0x4] sm:$0xff] %v13596_v18  ;;  %5874 = vst [vmem:[#allocation2 + $0x458] sm:$0xff] %v13596_v18  ;;  %v4293_v13 = vmax.f32 %v4258_v31, 0.0  ;;  %v4191_v42 = vadd.f32 %v4190_v33, %v4118_v32  ;;  %v4262_v41 = vadd.f32 %v4261_v37, %v4189_v4 }
 0x51e   : > { %v4192_v43 = vpop.f32.mrf.mxu1  ;;  %v4130_v50 = vadd.f32 %v13555_v19, %v4057_v34  ;;  %v4063_v19 = vadd.f32 %v13581_v15, %v13569_v3  ;;  %v4067_v3 = vadd.f32 %v13587_v11, %v13575_v56 }
 0x51f   : > { %v13605_v0 = vpack.c.bf16 %v4293_v13, %v4292_v20  ;;  %v4193_v57 = vadd.f32 %v4192_v43, %v4120_v35  ;;  %v4264_v1 = vadd.f32 %v4263_v8, %v4191_v42  ;;  %v4294_v37 = vmax.f32 %v4262_v41, 0.0  ;;  %v16539_v20 = vld [vmem:[#allocation71_spill] sm:$0xff] }
 0x520   : > { %v4194_v7 = vpop.f32.mrf.mxu1  ;;  %v4128_v8 = vadd.f32 %v13553_v48, %v4055_v59  ;;  %v4140_v13 = vadd.f32 %v16539_v20, %v4067_v3  ;;  %v16541_v59 = vld [vmem:[#allocation34_spill] sm:$0xff] }
 0x521   : > { %4355 = vst [vmem:[#allocation5 + $0x14] sm:$0xff] %v13605_v0  ;;  %5875 = vst [vmem:[#allocation2 + $0x498] sm:$0xff] %v13605_v0  ;;  %v4295_v14 = vmax.f32 %v4264_v1, 0.0  ;;  %v4195_v6 = vadd.f32 %v4194_v7, %v4122_v36  ;;  %v4266_v39 = vadd.f32 %v4265_v58, %v4193_v57  ;;  %v4281_v58 = vpop.f32.mrf.mxu0  ;;  %v16540_v36 = vld [vmem:[#allocation72_spill] sm:$0xff] }
 0x522   : > { %v4198_v29 = vpop.f32.mrf.mxu1 }
 0x523   : > { %v13615_v24 = vpack.c.bf16 %v4295_v14, %v4294_v37  ;;  %v4199_v27 = vadd.f32 %v4198_v29, %v4126_v55  ;;  %v4268_v45 = vadd.f32 %v13591_v53, %v4195_v6  ;;  %v4296_v48 = vmax.f32 %v4266_v39, 0.0  ;;  %v4283_v44 = vpop.f32.mrf.mxu0 }
 0x524   : > { %v4200_v2 = vpop.f32.mrf.mxu1  ;;  %v4619_v62 = vld [vmem:[#allocation5 + $0x8] sm:$0xf]  ;;  %v13621_v16 = vld [vmem:[#allocation5] sm:$0xff] }
 0x525   : > { %4356 = vst [vmem:[#allocation5 + $0x24] sm:$0xff] %v13615_v24  ;;  %5876 = vst [vmem:[#allocation2 + $0x400] sm:$0xff] %v13615_v24  ;;  %v4297_v22 = vmax.f32 %v4268_v45, 0.0  ;;  %v4201_v40 = vadd.f32 %v4200_v2, %v4128_v8  ;;  %v4272_v63 = vadd.f32 %v13593_v28, %v4199_v27  ;;  %4652 = vrot.lane.b32.xlu0 %v4619_v62, %s16396_s8  ;;  %4650 = vrot.lane.b32.xlu1 %v13621_v16, %s16396_s8  ;;  %v5243_v49 = vld [vmem:[#allocation5 + $0x8] sm:$0xf]  ;;  %v4285_v41 = vpop.f32.mrf.mxu0  ;;  %v16544_v62 = vld [vmem:[#allocation40_spill] sm:$0xff] }
 0x526   : > { %v4202_v54 = vpop.f32.mrf.mxu1  ;;  %v4136_v28 = vadd.f32 %v13561_v5, %v4063_v19  ;;  %v4138_v5 = vadd.f32 %v13565_v21, %v4065_v51  ;;  %v4378_v35 = vmul.bf16 %v13621_v16, %v16538_v47  ;;  %v4363_v33 = vld [vmem:[#allocation5 + $0x8] sm:$0xf]  ;;  %v16545_v19 = vld [vmem:[#allocation36_spill] sm:$0xff] }
 0x527   : > { %v13632_v53 = vpack.c.bf16 %v4297_v22, %v4296_v48  ;;  %v4203_v38 = vadd.f32 %v4202_v54, %v4130_v50  ;;  %v4274_v23 = vadd.f32 %v4273_v10, %v4201_v40  ;;  %v4298_v15 = vmax.f32 %v4272_v63, 0.0  ;;  %v4287_v6 = vpop.f32.mrf.mxu0  ;;  %v4491_v39 = vld [vmem:[#allocation5 + $0x8] sm:$0xf]  ;;  %v16543_v50 = vld [vmem:[#allocation37_spill] sm:$0xff]  ;;  %v16547_v51 = vld [vmem:[#allocation44_spill] sm:$0xff] }
 0x528   : > { %v4204_v61 = vpop.f32.mrf.mxu1  ;;  %v4379_v55 = vmul.bf16 %v4363_v33, %v16541_v59  ;;  %v4507_v2 = vmul.bf16 %v4491_v39, %v16543_v50  ;;  %v4731_v48 = vld [vmem:[#allocation5 + $0x8] sm:$0xf]  ;;  %v4620_v39 = vld [vmem:[#allocation5 + $0x10] sm:$0xff] }
 0x529   : > { %4357 = vst [vmem:[#allocation5 + $0x34] sm:$0xff] %v13632_v53  ;;  %5877 = vst [vmem:[#allocation2 + $0x5d8] sm:$0xff] %v13632_v53  ;;  %v4299_v17 = vmax.f32 %v4274_v23, 0.0  ;;  %v4205_v32 = vadd.f32 %v4204_v61, %v4132_v30  ;;  %v4276_v26 = vadd.f32 %v4275_v12, %v4203_v38  ;;  %5276 = vrot.lane.b32.xlu0 %v5243_v49, %s16399_s19  ;;  %5274 = vrot.lane.b32.xlu1 %v13621_v16, %s16399_s19  ;;  %v16546_v30 = vld [vmem:[#allocation48_spill] sm:$0xff]  ;;  %v4987_v23 = vld [vmem:[#allocation5 + $0x8] sm:$0xf] }
 0x52a   : > { %v4208_v25 = vpop.f32.mrf.mxu1  ;;  %v4069_v12 = vadd.f32 %v13589_v9, %v13575_v56  ;;  %v4747_v54 = vmul.bf16 %v4731_v48, %v16545_v19  ;;  %v5002_v38 = vmul.bf16 %v13621_v16, %v16546_v30  ;;  %v16548_v61 = vld [vmem:[#allocation52_spill] sm:$0xff]  ;;  %v4859_v3 = vld [vmem:[#allocation5 + $0x8] sm:$0xf] }
 0x52b   : > { %v10938_v10 = vpack.c.bf16 %v4299_v17, %v4298_v15  ;;  %v4209_v31 = vadd.f32 %v4208_v25, %v4136_v28  ;;  %v4278_v4 = vadd.f32 %v4277_v52, %v4205_v32  ;;  %v4300_v46 = vmax.f32 %v4276_v26, 0.0  ;;  %v16542_v52 = vld [vmem:[#allocation38_spill] sm:$0xff]  ;;  %v16550_v32 = vld [vmem:[#allocation55_spill] sm:$0xff] }
 0x52c   : > { %v4210_v42 = vpop.f32.mrf.mxu1  ;;  %v4142_v57 = vadd.f32 %v16540_v36, %v4069_v12  ;;  %v4506_v37 = vmul.bf16 %v13621_v16, %v16542_v52  ;;  %v5003_v28 = vmul.bf16 %v4987_v23, %v16547_v51  ;;  %v5498_v49 = vmul.bf16 %v13621_v16, %v16548_v61  ;;  %v16549_v15 = vld [vmem:[#allocation46_spill] sm:$0xff]  ;;  %v16554_v12 = vld [vmem:[#allocation43_spill] sm:$0xff] }
 0x52d   : > { %4358 = vst [vmem:[#allocation5 + $0x44] sm:$0xff] %v10938_v10  ;;  %v4301_v11 = vmax.f32 %v4278_v4, 0.0  ;;  %v4211_v43 = vadd.f32 %v4210_v42, %v4138_v5  ;;  %v4282_v21 = vadd.f32 %v4281_v58, %v4209_v31  ;;  %6426 = vrot.lane.b32.xlu0 %v13596_v18, %s16384_s2  ;;  %4410 = vrot.lane.b32.xlu1 %v4378_v35, %s16364_s18  ;;  %v16551_v5 = vld [vmem:[#allocation53_spill] sm:$0xff]  ;;  %v16552_v10 = vld [vmem:[#allocation56_spill] sm:$0xff]  ;;  %v5355_v4 = vld [vmem:[#allocation5 + $0x8] sm:$0xf] }
 0x52e   : > { %v4212_v1 = vpop.f32.mrf.mxu1  ;;  %v4746_v58 = vmul.bf16 %v13621_v16, %v16544_v62  ;;  %v4874_v26 = vmul.bf16 %v13621_v16, %v16550_v32  ;;  %v4875_v25 = vmul.bf16 %v4859_v3, %v16551_v5  ;;  %v5370_v31 = vmul.bf16 %v13621_v16, %v16552_v10  ;;  %v16553_v35 = vld [vmem:[#allocation54_spill] sm:$0xff] }
 0x52f   : > { %v10939_v56 = vpack.c.bf16 %v4301_v11, %v4300_v46  ;;  %v4213_v9 = vadd.f32 %v4212_v1, %v4140_v13  ;;  %v4284_v7 = vadd.f32 %v4283_v44, %v4211_v43  ;;  %v4302_v34 = vmax.f32 %v4282_v21, 0.0  ;;  %v5483_v44 = vld [vmem:[#allocation5 + $0x8] sm:$0xf] }
 0x530   : > { %v4214_v14 = vpop.f32.mrf.mxu1  ;;  %v5499_v17 = vmul.bf16 %v5483_v44, %v16549_v15  ;;  %v5371_v33 = vmul.bf16 %v5355_v4, %v16553_v35  ;;  %v5754_v20 = vmul.bf16 %v13621_v16, %v16554_v12  ;;  %v5739_v13 = vld [vmem:[#allocation5 + $0x8] sm:$0xf]  ;;  %v5500_v23 = vmul.bf16 %v4620_v39, %v16548_v61  ;;  %v13752_v4 = vpop.permute.xlu1 %5948 }
 0x531   : > { %4359 = vst [vmem:[#allocation5 + $0x54] sm:$0xff] %v10939_v56  ;;  %v4303_v29 = vmax.f32 %v4284_v7, 0.0  ;;  %v4215_v8 = vadd.f32 %v4214_v14, %v4142_v57  ;;  %v4286_v27 = vadd.f32 %v4285_v41, %v4213_v9  ;;  %4412 = vrot.lane.b32.xlu0 %v4379_v55, %s16364_s18  ;;  %4538 = vrot.lane.b32.xlu1 %v4506_v37, %s16363_s0  ;;  %v16555_v41 = vld [vmem:[#allocation39_spill] sm:$0xff]  ;;  %v16557_v55 = vld [vmem:[#allocation41_spill] sm:$0xff]  ;;  %v16559_v14 = vld [vmem:[#allocation42_spill] sm:$0xff] }
 0x532   : > { %v5755_v46 = vmul.bf16 %v5739_v13, %v16555_v41  ;;  %v16556_v11 = vld [vmem:[#allocation47_spill] sm:$0xff]  ;;  %v4876_v44 = vmul.bf16 %v4620_v39, %v16550_v32  ;;  %v5372_v3 = vmul.bf16 %v4620_v39, %v16552_v10  ;;  %v4861_v13 = vld [vmem:[#allocation5 + $0x18] sm:$0xf] }
 0x533   : > { %v10940_v45 = vpack.c.bf16 %v4303_v29, %v4302_v34  ;;  %v4288_v60 = vadd.f32 %v4287_v6, %v4215_v8  ;;  %v4304_v22 = vmax.f32 %v4286_v27, 0.0  ;;  %v5130_v43 = vmul.bf16 %v13621_v16, %v16556_v11  ;;  %v5115_v21 = vld [vmem:[#allocation5 + $0x8] sm:$0xf]  ;;  %v16560_v34 = vld [vmem:[#allocation64_spill] sm:$0xff] }
 0x534   : > { %v13695_v36 = vld [vmem:[#allocation5 + $0x44] sm:$0xff]  ;;  %v5131_v56 = vmul.bf16 %v5115_v21, %v16557_v55  ;;  %v5898_v29 = vmul.bf16 %v13596_v18, %v16560_v34  ;;  %v4621_v8 = vld [vmem:[#allocation5 + $0x18] sm:$0xf]  ;;  %v4508_v27 = vmul.bf16 %v4620_v39, %v16542_v52  ;;  %v4748_v18 = vmul.bf16 %v4620_v39, %v16544_v62 }
 0x535   : > { %4360 = vst [vmem:[#allocation5 + $0x64] sm:$0xff] %v10940_v45  ;;  %v4305_v40 = vmax.f32 %v4288_v60, 0.0  ;;  %4540 = vrot.lane.b32.xlu0 %v4507_v2, %s16363_s0  ;;  %4778 = vrot.lane.b32.xlu1 %v4746_v58, %s16365_s11  ;;  %5878 = vst [vmem:[#allocation2 + $0x210] sm:$0xff] %v13695_v36  ;;  %v16558_v9 = vld [vmem:[#allocation51_spill] sm:$0xff]  ;;  %v5245_v45 = vld [vmem:[#allocation5 + $0x18] sm:$0xf]  ;;  %v4877_v21 = vmul.bf16 %v4861_v13, %v16551_v5 }
 0x536   : > { %v5626_v7 = vmul.bf16 %v13621_v16, %v16558_v9  ;;  %v5611_v37 = vld [vmem:[#allocation5 + $0x8] sm:$0xf]  ;;  %v4380_v16 = vmul.bf16 %v4620_v39, %v16538_v47  ;;  %v4365_v2 = vld [vmem:[#allocation5 + $0x18] sm:$0xf] }
 0x537   : > { %v10941_v63 = vpack.c.bf16 %v4305_v40, %v4304_v22  ;;  %v5627_v6 = vmul.bf16 %v5611_v37, %v16559_v14  ;;  %v4381_v40 = vmul.bf16 %v4365_v2, %v16541_v59 }
 0x538   : > { %v13697_v57 = vld [vmem:[#allocation5 + $0x54] sm:$0xff] }
 0x539   : > { %4361 = vst [vmem:[#allocation5 + $0x74] sm:$0xff] %v10941_v63  ;;  %4780 = vrot.lane.b32.xlu0 %v4747_v54, %s16365_s11  ;;  %5034 = vrot.lane.b32.xlu1 %v5002_v38, %s16362_s23  ;;  %5879 = vst [vmem:[#allocation2 + $0x160] sm:$0xff] %v13697_v57  ;;  %v10814_v48 = vcombine.low %v13695_v36, %v13697_v57  ;;  %v10815_v22 = vcombine.high %v13695_v36, %v13697_v57  ;;  %v4493_v54 = vld [vmem:[#allocation5 + $0x18] sm:$0xf]  ;;  %v11342_v36 = vld [vmem:[%s16149_s5 + $0x208] ss:$52 sps:$4 sm:$0xff]  }
 0x53a   : > { %v5004_v63 = vmul.bf16 %v4620_v39, %v16546_v30  ;;  %v4509_v38 = vmul.bf16 %v4493_v54, %v16543_v50  ;;  %v11403_v57 = vld [vmem:[%s16149_s5 + $0x1ac] ss:$52 sps:$4 sm:$0xff]  }
 0x53c   : > { %v13699_v1 = vld [vmem:[#allocation5 + $0x64] sm:$0xff] }
 0x53d   : > { %5036 = vrot.lane.b32.xlu0 %v5003_v28, %s16362_s23  ;;  %5530 = vrot.lane.b32.xlu1 %v5498_v49, %s16358_s24  ;;  %5880 = vst [vmem:[#allocation2 + $0x178] sm:$0xff] %v13699_v1  ;;  %v4733_v28 = vld [vmem:[#allocation5 + $0x18] sm:$0xf] }
 0x53e   : > { %v4749_v49 = vmul.bf16 %v4733_v28, %v16545_v19  ;;  %v5900_v28 = vmul.bf16 %v13605_v0, %v16560_v34 }
 0x540   : > { %v13689_v42 = vld [vmem:[#allocation5 + $0x74] sm:$0xff] }
 0x541   : > { %5532 = vrot.lane.b32.xlu0 %v5499_v17, %s16358_s24  ;;  %4906 = vrot.lane.b32.xlu1 %v4874_v26, %s16359_s29  ;;  %5881 = vst [vmem:[#allocation2 + $0x200] sm:$0xff] %v13689_v42  ;;  %v10816_v60 = vcombine.low %v13699_v1, %v13689_v42  ;;  %v10817_v58 = vcombine.high %v13699_v1, %v13689_v42  ;;  %v4989_v17 = vld [vmem:[#allocation5 + $0x18] sm:$0xf] }
 0x542   : > { %v5005_v26 = vmul.bf16 %v4989_v17, %v16547_v51  ;;  %v11340_v1 = vld [vmem:[%s16149_s5 + $0x20c] ss:$52 sps:$4 sm:$0xff]  }
 0x545   : > { %4908 = vrot.lane.b32.xlu0 %v4875_v25, %s16359_s29  ;;  %5402 = vrot.lane.b32.xlu1 %v5370_v31, %s16355_s22  ;;  %v5485_v25 = vld [vmem:[#allocation5 + $0x18] sm:$0xf]  ;;  %v13750_v31 = vpop.permute.xlu0 %5956 }
 0x549   : > { %5404 = vrot.lane.b32.xlu0 %v5371_v33, %s16355_s22  ;;  %5786 = vrot.lane.b32.xlu1 %v5754_v20, %s16360_s28  ;;  %v5501_v33 = vmul.bf16 %v5485_v25, %v16549_v15  ;;  %v5756_v20 = vmul.bf16 %v4620_v39, %v16554_v12 }
 0x54d   : > { %5788 = vrot.lane.b32.xlu0 %v5755_v46, %s16360_s28  ;;  %5162 = vrot.lane.b32.xlu1 %v5130_v43, %s16361_s21  ;;  %v13760_v46 = vpop.permute.xlu0 %5960  ;;  %v13762_v43 = vpop.permute.xlu1 %5952 }
 0x551   : > { %5164 = vrot.lane.b32.xlu0 %v5131_v56, %s16361_s21  ;;  %5658 = vrot.lane.b32.xlu1 %v5626_v7, %s16357_s17  ;;  %v5132_v56 = vmul.bf16 %v4620_v39, %v16556_v11  ;;  %v5357_v7 = vld [vmem:[#allocation5 + $0x18] sm:$0xf] }
 0x552   : > { %v5373_v37 = vmul.bf16 %v5357_v7, %v16553_v35 }
 0x555   : > { %5660 = vrot.lane.b32.xlu0 %v5627_v6, %s16357_s17  ;;  %4654 = vrot.lane.b32.xlu1 %v4620_v39, %s16396_s8  ;;  %v5628_v6 = vmul.bf16 %v4620_v39, %v16558_v9 }
 0x559   : > { %5930 = vrot.lane.b32.xlu0 %v5898_v29, %s16354_s16  ;;  %5278 = vrot.lane.b32.xlu1 %v4620_v39, %s16399_s19  ;;  %v5741_v29 = vld [vmem:[#allocation5 + $0x18] sm:$0xf] }
 0x55d   : > { %4656 = vrot.lane.b32.xlu0 %v4621_v8, %s16396_s8  ;;  %4414 = vrot.lane.b32.xlu1 %v4380_v16, %s16364_s18  ;;  %v13770_v16 = vpop.permute.xlu0 %11084  ;;  %v13772_v8 = vpop.permute.xlu1 %11089 }
 0x561   : > { %5280 = vrot.lane.b32.xlu0 %v5245_v45, %s16399_s19  ;;  %4542 = vrot.lane.b32.xlu1 %v4508_v27, %s16363_s0  ;;  %v5757_v27 = vmul.bf16 %v5741_v29, %v16555_v41  ;;  %v13777_v45 = vld [vmem:[#allocation5 + $0x20] sm:$0xff]  ;;  %v13782_v39 = vpop.permute.xlu0 %5940  ;;  %v13784_v2 = vpop.permute.xlu1 %5932 }
 0x565   : > { %6430 = vrot.lane.b32.xlu0 %v13605_v0, %s16384_s2  ;;  %4782 = vrot.lane.b32.xlu1 %v4748_v18, %s16365_s11  ;;  %v5117_v18 = vld [vmem:[#allocation5 + $0x18] sm:$0xf] }
 0x569   : > { %4416 = vrot.lane.b32.xlu0 %v4381_v40, %s16364_s18  ;;  %5038 = vrot.lane.b32.xlu1 %v5004_v63, %s16362_s23  ;;  %v5133_v40 = vmul.bf16 %v5117_v18, %v16557_v55  ;;  %v5613_v63 = vld [vmem:[#allocation5 + $0x18] sm:$0xf]  ;;  %v5006_v18 = vmul.bf16 %v13777_v45, %v16546_v30 }
 0x56a   : > { %v5629_v54 = vmul.bf16 %v5613_v63, %v16559_v14 }
 0x56d   : > { %4544 = vrot.lane.b32.xlu0 %v4509_v38, %s16363_s0  ;;  %5534 = vrot.lane.b32.xlu1 %v5500_v23, %s16358_s24  ;;  %v13791_v38 = vpop.permute.xlu0 %5944  ;;  %v13793_v23 = vpop.permute.xlu1 %5936 }
 0x571   : > { %4784 = vrot.lane.b32.xlu0 %v4749_v49, %s16365_s11  ;;  %4910 = vrot.lane.b32.xlu1 %v4876_v44, %s16359_s29  ;;  %v4382_v49 = vmul.bf16 %v13777_v45, %v16538_v47  ;;  %v13804_v44 = vpop.permute.xlu0 %11094  ;;  %v13806_v17 = vpop.permute.xlu1 %11099 }
 0x575   : > { %5040 = vrot.lane.b32.xlu0 %v5005_v26, %s16362_s23  ;;  %5406 = vrot.lane.b32.xlu1 %v5372_v3, %s16355_s22  ;;  %v4510_v26 = vmul.bf16 %v13777_v45, %v16542_v52  ;;  %v4623_v3 = vld [vmem:[#allocation5 + $0x28] sm:$0xf] }
 0x579   : > { %5536 = vrot.lane.b32.xlu0 %v5501_v33, %s16358_s24  ;;  %5790 = vrot.lane.b32.xlu1 %v5756_v20, %s16360_s28  ;;  %v4750_v33 = vmul.bf16 %v13777_v45, %v16544_v62 }
 0x57d   : > { %4912 = vrot.lane.b32.xlu0 %v4877_v21, %s16359_s29  ;;  %5166 = vrot.lane.b32.xlu1 %v5132_v56, %s16361_s21  ;;  %v5247_v21 = vld [vmem:[#allocation5 + $0x28] sm:$0xf] }
 0x57e   : > { %v4367_v56 = vld [vmem:[#allocation5 + $0x28] sm:$0xf] }
 0x581   : > { %5408 = vrot.lane.b32.xlu0 %v5373_v37, %s16355_s22  ;;  %5662 = vrot.lane.b32.xlu1 %v5628_v6, %s16357_s17 }
 0x585   : > { %5792 = vrot.lane.b32.xlu0 %v5757_v27, %s16360_s28  ;;  %4658 = vrot.lane.b32.xlu1 %v13777_v45, %s16396_s8  ;;  %v4383_v27 = vmul.bf16 %v4367_v56, %v16541_v59 }
 0x589   : > { %5168 = vrot.lane.b32.xlu0 %v5133_v40, %s16361_s21  ;;  %5282 = vrot.lane.b32.xlu1 %v13777_v45, %s16399_s19  ;;  %v11101_v40 = vunpack.i.l.bf16 %v13806_v17 }
 0x58d   : > { %5664 = vrot.lane.b32.xlu0 %v5629_v54, %s16357_s17  ;;  %6434 = vrot.lane.b32.xlu1 %v13615_v24, %s16384_s2 }
 0x591   : > { %5934 = vrot.lane.b32.xlu0 %v5900_v28, %s16354_s16  ;;  %4418 = vrot.lane.b32.xlu1 %v4382_v49, %s16364_s18  ;;  %v4495_v28 = vld [vmem:[#allocation5 + $0x28] sm:$0xf] }
 0x595   : > { %4660 = vrot.lane.b32.xlu0 %v4623_v3, %s16396_s8  ;;  %4546 = vrot.lane.b32.xlu1 %v4510_v26, %s16363_s0 }
 0x597   : > { %v4653_v0 = vpop.permute.xlu0 %4652  ;;  %v4651_v25 = vpop.permute.xlu1 %4650 }
 0x598   : > { %v4683_v20 = vrot.slane %v4653_v0, 4  ;;  %v4682_v13 = vrot.slane %v4651_v25, 4 }
 0x599   : > { %5284 = vrot.lane.b32.xlu0 %v5247_v21, %s16399_s19  ;;  %4786 = vrot.lane.b32.xlu1 %v4750_v33, %s16365_s11  ;;  %v5502_v33 = vmul.bf16 %v13777_v45, %v16548_v61  ;;  %v4735_v21 = vld [vmem:[#allocation5 + $0x28] sm:$0xf] }
 0x59a   : > { %v4698_v7 = vsel %vm498_vm10, %v4682_v13, %v4683_v20  ;;  %v6459_v20 = vrot.slane %v11101_v40, 4 }
 0x59b   : > { %v4699_v37 = vsel %vm16561_vm15, %v4651_v25, %v4698_v7  ;;  %v5277_v6 = vpop.permute.xlu0 %5276  ;;  %v5275_v29 = vpop.permute.xlu1 %5274  ;;  %v4511_v25 = vmul.bf16 %v4495_v28, %v16543_v50  ;;  %vm16565_vm15 = vcmask 269312  }
 0x59c   : > { %4722 = vst [vmem:[#allocation2 + $0x580] sm:$0xff] %v4699_v37  ;;  %v5307_v63 = vrot.slane %v5277_v6, 4  ;;  %v5306_v54 = vrot.slane %v5275_v29, 4 }
 0x59d   : > { %4420 = vrot.lane.b32.xlu0 %v4383_v27, %s16364_s18  ;;  %5042 = vrot.lane.b32.xlu1 %v5006_v18, %s16362_s23  ;;  %v4878_v27 = vmul.bf16 %v13777_v45, %v16550_v32 }
 0x59e   : > { %v5322_v49 = vsel %vm498_vm10, %v5306_v54, %v5307_v63  ;;  %v4991_v63 = vld [vmem:[#allocation5 + $0x28] sm:$0xf] }
 0x59f   : > { %v5323_v26 = vsel %vm16562_vm14, %v5275_v29, %v5322_v49  ;;  %v6427_v3 = vpop.permute.xlu0 %6426  ;;  %v4411_v0 = vpop.permute.xlu1 %4410  ;;  %v4751_v29 = vmul.bf16 %v4735_v21, %v16545_v19  ;;  %vm16566_vm14 = vcmask 252928  }
 0x5a0   : > { %5346 = vst [vmem:[#allocation2 + $0x308] sm:$0xff] %v5323_v26  ;;  %v6458_v13 = vrot.slane %v6427_v3, 4  ;;  %v4442_v18 = vrot.slane %v4411_v0, 4 }
 0x5a1   : > { %4548 = vrot.lane.b32.xlu0 %v4511_v25, %s16363_s0  ;;  %5538 = vrot.lane.b32.xlu1 %v5502_v33, %s16358_s24  ;;  %v5374_v25 = vmul.bf16 %v13777_v45, %v16552_v10 }
 0x5a2   : > { %v6474_v56 = vsel %vm498_vm10, %v6458_v13, %v6459_v20  ;;  %v5487_v13 = vld [vmem:[#allocation5 + $0x28] sm:$0xf] }
 0x5a3   : > { %v6475_v7 = vsel %vm16563_vm12, %v6427_v3, %v6474_v56  ;;  %v4413_v37 = vpop.permute.xlu0 %4412  ;;  %v4539_v6 = vpop.permute.xlu1 %4538  ;;  %v5007_v3 = vmul.bf16 %v4991_v63, %v16547_v51  ;;  %vm16567_vm12 = vcmask 146432  }
 0x5a4   : > { %6498 = vst [vmem:[#allocation2 + $0x280] sm:$0xff] %v6475_v7  ;;  %v4443_v40 = vrot.slane %v4413_v37, 4  ;;  %v4570_v33 = vrot.slane %v4539_v6, 4  ;;  %v5503_v37 = vmul.bf16 %v5487_v13, %v16549_v15 }
 0x5a5   : > { %4788 = vrot.lane.b32.xlu0 %v4751_v29, %s16365_s11  ;;  %4914 = vrot.lane.b32.xlu1 %v4878_v27, %s16359_s29  ;;  %v5758_v29 = vmul.bf16 %v13777_v45, %v16554_v12 }
 0x5a6   : > { %v4458_v54 = vsel %vm498_vm10, %v4442_v18, %v4443_v40  ;;  %v4863_v40 = vld [vmem:[#allocation5 + $0x28] sm:$0xf] }
 0x5a7   : > { %v4459_v28 = vsel %vm16564_vm0, %v4411_v0, %v4458_v54  ;;  %v4541_v49 = vpop.permute.xlu0 %4540  ;;  %v4779_v26 = vpop.permute.xlu1 %4778  ;;  %vm16568_vm0 = vcmask 244736  }
 0x5a8   : > { %4482 = vst [vmem:[#allocation2 + $0x2b0] sm:$0xff] %v4459_v28  ;;  %v4571_v20 = vrot.slane %v4541_v49, 4  ;;  %v4810_v27 = vrot.slane %v4779_v26, 4  ;;  %v4879_v49 = vmul.bf16 %v4863_v40, %v16551_v5 }
 0x5a9   : > { %5044 = vrot.lane.b32.xlu0 %v5007_v3, %s16362_s23  ;;  %5410 = vrot.lane.b32.xlu1 %v5374_v25, %s16355_s22  ;;  %v5134_v3 = vmul.bf16 %v13777_v45, %v16556_v11 }
 0x5aa   : > { %v4586_v21 = vsel %vm498_vm10, %v4570_v33, %v4571_v20  ;;  %v5359_v20 = vld [vmem:[#allocation5 + $0x28] sm:$0xf] }
 0x5ab   : > { %v4587_v56 = vsel %vm16565_vm15, %v4539_v6, %v4586_v21  ;;  %v4781_v0 = vpop.permute.xlu0 %4780  ;;  %v5035_v7 = vpop.permute.xlu1 %5034  ;;  %vm16569_vm15 = vcmask 121856  }
 0x5ac   : > { %4610 = vst [vmem:[#allocation2 + $0x108] sm:$0xff] %v4587_v56  ;;  %v4811_v18 = vrot.slane %v4781_v0, 4  ;;  %v5066_v25 = vrot.slane %v5035_v7, 4  ;;  %v5375_v0 = vmul.bf16 %v5359_v20, %v16553_v35 }
 0x5ad   : > { %5540 = vrot.lane.b32.xlu0 %v5503_v37, %s16358_s24  ;;  %5794 = vrot.lane.b32.xlu1 %v5758_v29, %s16360_s28  ;;  %v5630_v37 = vmul.bf16 %v13777_v45, %v16558_v9 }
 0x5ae   : > { %v4826_v63 = vsel %vm498_vm10, %v4810_v27, %v4811_v18  ;;  %v5743_v18 = vld [vmem:[#allocation5 + $0x28] sm:$0xf] }
 0x5af   : > { %v4827_v54 = vsel %vm16566_vm14, %v4779_v26, %v4826_v63  ;;  %v5037_v6 = vpop.permute.xlu0 %5036  ;;  %v5531_v28 = vpop.permute.xlu1 %5530  ;;  %vm16570_vm14 = vcmask 7168  }
 0x5b0   : > { %4850 = vst [vmem:[#allocation2 + $0x248] sm:$0xff] %v4827_v54  ;;  %v5067_v33 = vrot.slane %v5037_v6, 4  ;;  %v5562_v29 = vrot.slane %v5531_v28, 4  ;;  %v5759_v6 = vmul.bf16 %v5743_v18, %v16555_v41 }
 0x5b1   : > { %4916 = vrot.lane.b32.xlu0 %v4879_v49, %s16359_s29  ;;  %5170 = vrot.lane.b32.xlu1 %v5134_v3, %s16361_s21  ;;  %v5902_v49 = vmul.bf16 %v13615_v24, %v16560_v34  ;;  %v13876_v24 = vld [vmem:[#allocation5 + $0x30] sm:$0xff] }
 0x5b2   : > { %v5082_v13 = vsel %vm498_vm10, %v5066_v25, %v5067_v33  ;;  %v5119_v25 = vld [vmem:[#allocation5 + $0x28] sm:$0xf] }
 0x5b3   : > { %v5083_v21 = vsel %vm16567_vm12, %v5035_v7, %v5082_v13  ;;  %v5533_v26 = vpop.permute.xlu0 %5532  ;;  %v4907_v56 = vpop.permute.xlu1 %4906  ;;  %vm16571_vm12 = vcmask 138240  }
 0x5b4   : > { %5106 = vst [vmem:[#allocation2 + $0x1f8] sm:$0xff] %v5083_v21  ;;  %v5563_v27 = vrot.slane %v5533_v26, 4  ;;  %v4938_v45 = vrot.slane %v4907_v56, 4  ;;  %v5135_v21 = vmul.bf16 %v5119_v25, %v16557_v55 }
 0x5b5   : > { %5412 = vrot.lane.b32.xlu0 %v5375_v0, %s16355_s22  ;;  %5666 = vrot.lane.b32.xlu1 %v5630_v37, %s16357_s17  ;;  %v5615_v37 = vld [vmem:[#allocation5 + $0x28] sm:$0xf] }
 0x5b6   : > { %v5578_v40 = vsel %vm498_vm10, %v5562_v29, %v5563_v27 }
 0x5b7   : > { %v5579_v63 = vsel %vm831_vm1, %v5531_v28, %v5578_v40  ;;  %v4909_v7 = vpop.permute.xlu0 %4908  ;;  %v5403_v54 = vpop.permute.xlu1 %5402  ;;  %v5631_v40 = vmul.bf16 %v5615_v37, %v16559_v14 }
 0x5b8   : > { %5602 = vst [vmem:[#allocation2 + $0x390] sm:$0xff] %v5579_v63  ;;  %v4939_v3 = vrot.slane %v4909_v7, 4  ;;  %v5434_v26 = vrot.slane %v5403_v54, 4 }
 0x5b9   : > { %5796 = vrot.lane.b32.xlu0 %v5759_v6, %s16360_s28  ;;  %5938 = vrot.lane.b32.xlu1 %v5902_v49, %s16354_s16 }
 0x5ba   : > { %v4954_v33 = vsel %vm498_vm10, %v4938_v45, %v4939_v3 }
 0x5bb   : > { %v4955_v20 = vsel %vm16568_vm0, %v4907_v56, %v4954_v33  ;;  %v5405_v28 = vpop.permute.xlu0 %5404  ;;  %v5787_v13 = vpop.permute.xlu1 %5786  ;;  %v4625_v33 = vld [vmem:[#allocation5 + $0x38] sm:$0xf]  ;;  %vm16572_vm0 = vcmask 15360  }
 0x5bc   : > { %4978 = vst [vmem:[#allocation2 + $0x98] sm:$0xff] %v4955_v20  ;;  %v5435_v0 = vrot.slane %v5405_v28, 4  ;;  %v5818_v63 = vrot.slane %v5787_v13, 4 }
 0x5bd   : > { %5172 = vrot.lane.b32.xlu0 %v5135_v21, %s16361_s21  ;;  %4662 = vrot.lane.b32.xlu1 %v13876_v24, %s16396_s8 }
 0x5be   : > { %v5450_v29 = vsel %vm498_vm10, %v5434_v26, %v5435_v0 }
 0x5bf   : > { %v5451_v27 = vsel %vm16569_vm15, %v5403_v54, %v5450_v29  ;;  %v5789_v56 = vpop.permute.xlu0 %5788  ;;  %v5163_v18 = vpop.permute.xlu1 %5162  ;;  %v5249_v29 = vld [vmem:[#allocation5 + $0x38] sm:$0xf]  ;;  %vm16573_vm15 = vcmask 261120  }
 0x5c0   : > { %5474 = vst [vmem:[#allocation2 + $0x538] sm:$0xff] %v5451_v27  ;;  %v5819_v7 = vrot.slane %v5789_v56, 4  ;;  %v5194_v54 = vrot.slane %v5163_v18, 4  ;;  %v4369_v27 = vld [vmem:[#allocation5 + $0x38] sm:$0xf] }
 0x5c1   : > { %5668 = vrot.lane.b32.xlu0 %v5631_v40, %s16357_s17  ;;  %5286 = vrot.lane.b32.xlu1 %v13876_v24, %s16399_s19 }
 0x5c2   : > { %v5834_v6 = vsel %vm498_vm10, %v5818_v63, %v5819_v7  ;;  %v4385_v7 = vmul.bf16 %v4369_v27, %v16541_v59 }
 0x5c3   : > { %v5835_v49 = vsel %vm16570_vm14, %v5787_v13, %v5834_v6  ;;  %v5165_v45 = vpop.permute.xlu0 %5164  ;;  %v5659_v3 = vpop.permute.xlu1 %5658  ;;  %v4384_v13 = vmul.bf16 %v13876_v24, %v16538_v47  ;;  %v4512_v6 = vmul.bf16 %v13876_v24, %v16542_v52  ;;  %vm16574_vm14 = vcmask 130048  }
 0x5c4   : > { %5858 = vst [vmem:[#allocation2 + $0x2d8] sm:$0xff] %v5835_v49  ;;  %v5195_v25 = vrot.slane %v5165_v45, 4  ;;  %v5690_v0 = vrot.slane %v5659_v3, 4  ;;  %v5963_v49 = vrot.slane %v13784_v2, 4 }
 0x5c5   : > { %4664 = vrot.lane.b32.xlu0 %v4625_v33, %s16396_s8  ;;  %6438 = vrot.lane.b32.xlu1 %v13632_v53, %s16384_s2 }
 0x5c6   : > { %v5210_v20 = vsel %vm498_vm10, %v5194_v54, %v5195_v25  ;;  %v4497_v54 = vld [vmem:[#allocation5 + $0x38] sm:$0xf] }
 0x5c7   : > { %v5211_v28 = vsel %vm16571_vm12, %v5163_v18, %v5210_v20  ;;  %v5661_v21 = vpop.permute.xlu0 %5660  ;;  %v4655_v26 = vpop.permute.xlu1 %4654  ;;  %vm16575_vm12 = vcmask 916480  }
 0x5c8   : > { %5234 = vst [vmem:[#allocation2 + $0x3d8] sm:$0xff] %v5211_v28  ;;  %v5691_v37 = vrot.slane %v5661_v21, 4  ;;  %v4513_v28 = vmul.bf16 %v4497_v54, %v16543_v50  ;;  %v4752_v21 = vmul.bf16 %v13876_v24, %v16544_v62 }
 0x5c9   : > { %5288 = vrot.lane.b32.xlu0 %v5249_v29, %s16399_s19  ;;  %4422 = vrot.lane.b32.xlu1 %v4384_v13, %s16364_s18  ;;  %v4684_v13 = vrot.slane %v4655_v26, 4 }
 0x5ca   : > { %v5706_v56 = vsel %vm498_vm10, %v5690_v0, %v5691_v37  ;;  %v4737_v0 = vld [vmem:[#allocation5 + $0x38] sm:$0xf] }
 0x5cb   : > { %v5707_v40 = vsel %vm16572_vm0, %v5659_v3, %v5706_v56  ;;  %v5931_v63 = vpop.permute.xlu0 %5930  ;;  %v5279_v18 = vpop.permute.xlu1 %5278  ;;  %vm16576_vm0 = vcmask 277504  }
 0x5cc   : > { %5730 = vst [vmem:[#allocation2 + $0x398] sm:$0xff] %v5707_v40  ;;  %v5962_v45 = vrot.slane %v5931_v63, 4  ;;  %v4753_v40 = vmul.bf16 %v4737_v0, %v16545_v19 }
 0x5cd   : > { %4424 = vrot.lane.b32.xlu0 %v4385_v7, %s16364_s18  ;;  %4550 = vrot.lane.b32.xlu1 %v4512_v6, %s16363_s0  ;;  %v11102_v7 = vunpack.i.h.bf16 %v13806_v17  ;;  %v5308_v6 = vrot.slane %v5279_v18, 4 }
 0x5ce   : > { %v5978_v25 = vsel %vm498_vm10, %v5962_v45, %v5963_v49  ;;  %v4993_v45 = vld [vmem:[#allocation5 + $0x38] sm:$0xf] }
 0x5cf   : > { %v5979_v3 = vsel %vm874_vm5, %v5931_v63, %v5978_v25  ;;  %v4657_v33 = vpop.permute.xlu0 %4656  ;;  %v4415_v20 = vpop.permute.xlu1 %4414  ;;  %v5008_v63 = vmul.bf16 %v13876_v24, %v16546_v30  ;;  %v6461_v17 = vrot.slane %v11102_v7, 4  ;;  %v4865_v7 = vld [vmem:[#allocation5 + $0x38] sm:$0xf] }
 0x5d0   : > { %6002 = vst [vmem:[#allocation2 + $0x288] sm:$0xff] %v5979_v3  ;;  %v4685_v2 = vrot.slane %v4657_v33, 4  ;;  %v5009_v33 = vmul.bf16 %v4993_v45, %v16547_v51 }
 0x5d1   : > { %4552 = vrot.lane.b32.xlu0 %v4513_v28, %s16363_s0  ;;  %4790 = vrot.lane.b32.xlu1 %v4752_v21, %s16365_s11  ;;  %v5504_v28 = vmul.bf16 %v13876_v24, %v16548_v61 }
 0x5d2   : > { %v4700_v37 = vsel %vm498_vm10, %v4684_v13, %v4685_v2  ;;  %v5489_v13 = vld [vmem:[#allocation5 + $0x38] sm:$0xf] }
 0x5d3   : > { %v4701_v29 = vsel %vm16573_vm15, %v4655_v26, %v4700_v37  ;;  %v5281_v27 = vpop.permute.xlu0 %5280  ;;  %v4543_v56 = vpop.permute.xlu1 %4542  ;;  %vm16577_vm15 = vcmask 269312  }
 0x5d4   : > { %4723 = vst [vmem:[#allocation2 + $0x590] sm:$0xff] %v4701_v29  ;;  %v5309_v49 = vrot.slane %v5281_v27, 4  ;;  %v5505_v29 = vmul.bf16 %v5489_v13, %v16549_v15  ;;  %v4880_v27 = vmul.bf16 %v13876_v24, %v16550_v32 }
 0x5d5   : > { %4792 = vrot.lane.b32.xlu0 %v4753_v40, %s16365_s11  ;;  %5046 = vrot.lane.b32.xlu1 %v5008_v63, %s16362_s23  ;;  %v4444_v40 = vrot.slane %v4415_v20, 4 }
 0x5d6   : > { %v5324_v54 = vsel %vm498_vm10, %v5308_v6, %v5309_v49 }
 0x5d7   : > { %v5325_v26 = vsel %vm16574_vm14, %v5279_v18, %v5324_v54  ;;  %v6431_v25 = vpop.permute.xlu0 %6430  ;;  %v4783_v3 = vpop.permute.xlu1 %4782  ;;  %vm16578_vm14 = vcmask 252928  }
 0x5d8   : > { %5347 = vst [vmem:[#allocation2 + $0x278] sm:$0xff] %v5325_v26  ;;  %v6460_v21 = vrot.slane %v6431_v25, 4  ;;  %v4881_v26 = vmul.bf16 %v4865_v7, %v16551_v5 }
 0x5d9   : > { %5048 = vrot.lane.b32.xlu0 %v5009_v33, %s16362_s23  ;;  %5542 = vrot.lane.b32.xlu1 %v5504_v28, %s16358_s24  ;;  %v4572_v33 = vrot.slane %v4543_v56, 4 }
 0x5da   : > { %v6476_v2 = vsel %vm498_vm10, %v6460_v21, %v6461_v17  ;;  %v5361_v17 = vld [vmem:[#allocation5 + $0x38] sm:$0xf] }
 0x5db   : > { %v6477_v0 = vsel %vm16575_vm12, %v6431_v25, %v6476_v2  ;;  %v4417_v18 = vpop.permute.xlu0 %4416  ;;  %v5039_v37 = vpop.permute.xlu1 %5038  ;;  %v5376_v25 = vmul.bf16 %v13876_v24, %v16552_v10  ;;  %vm16579_vm12 = vcmask 146432  }
 0x5dc   : > { %6499 = vst [vmem:[#allocation2 + $0x5f0] sm:$0xff] %v6477_v0  ;;  %v4445_v63 = vrot.slane %v4417_v18, 4  ;;  %v5377_v0 = vmul.bf16 %v5361_v17, %v16553_v35  ;;  %v5760_v18 = vmul.bf16 %v13876_v24, %v16554_v12 }
 0x5dd   : > { %5544 = vrot.lane.b32.xlu0 %v5505_v29, %s16358_s24  ;;  %4918 = vrot.lane.b32.xlu1 %v4880_v27, %s16359_s29  ;;  %v4812_v29 = vrot.slane %v4783_v3, 4 }
 0x5de   : > { %v4460_v6 = vsel %vm498_vm10, %v4444_v40, %v4445_v63  ;;  %v5745_v40 = vld [vmem:[#allocation5 + $0x38] sm:$0xf] }
 0x5df   : > { %v4461_v49 = vsel %vm16576_vm0, %v4415_v20, %v4460_v6  ;;  %v4545_v45 = vpop.permute.xlu0 %4544  ;;  %v5535_v54 = vpop.permute.xlu1 %5534  ;;  %vm16580_vm0 = vcmask 244736  }
 0x5e0   : > { %4483 = vst [vmem:[#allocation2 + $0x3b0] sm:$0xff] %v4461_v49  ;;  %v4573_v28 = vrot.slane %v4545_v45, 4  ;;  %v5761_v49 = vmul.bf16 %v5745_v40, %v16555_v41  ;;  %v5136_v45 = vmul.bf16 %v13876_v24, %v16556_v11 }
 0x5e1   : > { %4920 = vrot.lane.b32.xlu0 %v4881_v26, %s16359_s29  ;;  %5414 = vrot.lane.b32.xlu1 %v5376_v25, %s16355_s22  ;;  %v5068_v26 = vrot.slane %v5039_v37, 4 }
 0x5e2   : > { %v4588_v21 = vsel %vm498_vm10, %v4572_v33, %v4573_v28  ;;  %v5121_v33 = vld [vmem:[#allocation5 + $0x38] sm:$0xf] }
 0x5e3   : > { %v4589_v13 = vsel %vm16577_vm15, %v4543_v56, %v4588_v21  ;;  %v4785_v20 = vpop.permute.xlu0 %4784  ;;  %v4911_v2 = vpop.permute.xlu1 %4910  ;;  %vm16581_vm15 = vcmask 121856  }
 0x5e4   : > { %4611 = vst [vmem:[#allocation2 + $0x510] sm:$0xff] %v4589_v13  ;;  %v4813_v27 = vrot.slane %v4785_v20, 4  ;;  %v5137_v13 = vmul.bf16 %v5121_v33, %v16557_v55  ;;  %v5632_v20 = vmul.bf16 %v13876_v24, %v16558_v9  ;;  %v4940_v24 = vrot.slane %v4911_v2, 4 }
 0x5e5   : > { %5416 = vrot.lane.b32.xlu0 %v5377_v0, %s16355_s22  ;;  %5798 = vrot.lane.b32.xlu1 %v5760_v18, %s16360_s28  ;;  %v5564_v0 = vrot.slane %v5535_v54, 4 }
 0x5e6   : > { %v4828_v63 = vsel %vm498_vm10, %v4812_v29, %v4813_v27  ;;  %v5617_v29 = vld [vmem:[#allocation5 + $0x38] sm:$0xf] }
 0x5e7   : > { %v4829_v7 = vsel %vm16578_vm14, %v4783_v3, %v4828_v63  ;;  %v5041_v56 = vpop.permute.xlu0 %5040  ;;  %v5407_v6 = vpop.permute.xlu1 %5406  ;;  %vm16582_vm14 = vcmask 7168  }
 0x5e8   : > { %4851 = vst [vmem:[#allocation2 + $0xc8] sm:$0xff] %v4829_v7  ;;  %v5069_v25 = vrot.slane %v5041_v56, 4  ;;  %v5633_v7 = vmul.bf16 %v5617_v29, %v16559_v14  ;;  %v5904_v56 = vmul.bf16 %v13632_v53, %v16560_v34  ;;  %v5436_v33 = vrot.slane %v5407_v6, 4  ;;  %v5251_v29 = vld [vmem:[#allocation5 + $0x48] sm:$0xf] }
 0x5e9   : > { %5800 = vrot.lane.b32.xlu0 %v5761_v49, %s16360_s28  ;;  %5174 = vrot.lane.b32.xlu1 %v5136_v45, %s16361_s21 }
 0x5ea   : > { %v5084_v28 = vsel %vm498_vm10, %v5068_v26, %v5069_v25 }
 0x5eb   : > { %v5085_v17 = vsel %vm16579_vm12, %v5039_v37, %v5084_v28  ;;  %v5537_v3 = vpop.permute.xlu0 %5536  ;;  %v5791_v21 = vpop.permute.xlu1 %5790  ;;  %vm16583_vm12 = vcmask 138240  }
 0x5ec   : > { %5107 = vst [vmem:[#allocation2 + $0x2f0] sm:$0xff] %v5085_v17  ;;  %v5565_v18 = vrot.slane %v5537_v3, 4  ;;  %v4627_v17 = vld [vmem:[#allocation5 + $0x48] sm:$0xf]  ;;  %v13972_v3 = vld [vmem:[#allocation5 + $0x40] sm:$0xff] }
 0x5ed   : > { %5176 = vrot.lane.b32.xlu0 %v5137_v13, %s16361_s21  ;;  %5670 = vrot.lane.b32.xlu1 %v5632_v20, %s16357_s17 }
 0x5ee   : > { %v5580_v27 = vsel %vm498_vm10, %v5564_v0, %v5565_v18 }
 0x5ef   : > { %v5581_v40 = vsel %vm831_vm1, %v5535_v54, %v5580_v27  ;;  %v4913_v37 = vpop.permute.xlu0 %4912  ;;  %v5167_v63 = vpop.permute.xlu1 %5166 }
 0x5f0   : > { %5603 = vst [vmem:[#allocation2 + $0x4c0] sm:$0xff] %v5581_v40  ;;  %v4941_v49 = vrot.slane %v4913_v37, 4 }
 0x5f1   : > { %5672 = vrot.lane.b32.xlu0 %v5633_v7, %s16357_s17  ;;  %5942 = vrot.lane.b32.xlu1 %v5904_v56, %s16354_s16  ;;  %v11096_v56 = vunpack.i.l.bf16 %v13804_v44 }
 0x5f2   : > { %v4956_v45 = vsel %vm498_vm10, %v4940_v24, %v4941_v49  ;;  %v5196_v24 = vrot.slane %v5167_v63, 4 }
 0x5f3   : > { %v4957_v26 = vsel %vm16580_vm0, %v4911_v2, %v4956_v45  ;;  %v5409_v25 = vpop.permute.xlu0 %5408  ;;  %v5663_v54 = vpop.permute.xlu1 %5662  ;;  %v5820_v2 = vrot.slane %v5791_v21, 4  ;;  %v13991_v45 = vld [vmem:[#allocation5 + $0x44] sm:$0xff]  ;;  %vm16584_vm0 = vcmask 15360  }
 0x5f4   : > { %4979 = vst [vmem:[#allocation2 + $0xb0] sm:$0xff] %v4957_v26  ;;  %v5437_v28 = vrot.slane %v5409_v25, 4  ;;  %v4499_v26 = vld [vmem:[#allocation5 + $0x48] sm:$0xf] }
 0x5f5   : > { %4668 = vrot.lane.b32.xlu0 %v4627_v17, %s16396_s8  ;;  %4666 = vrot.lane.b32.xlu1 %v13972_v3, %s16396_s8  ;;  %v4515_v17 = vmul.bf16 %v4499_v26, %v16543_v50  ;;  %v5965_v26 = vrot.slane %v13793_v23, 4 }
 0x5f6   : > { %v5452_v53 = vsel %vm498_vm10, %v5436_v33, %v5437_v28 }
 0x5f7   : > { %v5453_v13 = vsel %vm16581_vm15, %v5407_v6, %v5452_v53  ;;  %v5793_v20 = vpop.permute.xlu0 %5792  ;;  %v13979_v0 = vpop.permute.xlu1 %4658  ;;  %v4514_v6 = vmul.bf16 %v13972_v3, %v16542_v52  ;;  %v4386_v53 = vmul.bf16 %v13972_v3, %v16538_v47  ;;  %vm16585_vm15 = vcmask 916480  }
 0x5f8   : > { %5475 = vst [vmem:[#allocation2 + $0x1d0] sm:$0xff] %v5453_v13  ;;  %v5821_v18 = vrot.slane %v5793_v20, 4  ;;  %v6463_v13 = vrot.slane %v11096_v56, 4  ;;  %v5692_v20 = vrot.slane %v5663_v54, 4  ;;  %v4686_v23 = vrot.slane %v13979_v0, 4 }
 0x5f9   : > { %5292 = vrot.lane.b32.xlu0 %v5251_v29, %s16399_s19  ;;  %5290 = vrot.lane.b32.xlu1 %v13972_v3, %s16399_s19  ;;  %v4371_v29 = vld [vmem:[#allocation5 + $0x48] sm:$0xf] }
 0x5fa   : > { %v5836_v27 = vsel %vm498_vm10, %v5820_v2, %v5821_v18  ;;  %v4387_v56 = vmul.bf16 %v4371_v29, %v16541_v59 }
 0x5fb   : > { %v5837_v40 = vsel %vm16582_vm14, %v5791_v21, %v5836_v27  ;;  %v5169_v37 = vpop.permute.xlu0 %5168  ;;  %v13986_v7 = vpop.permute.xlu1 %5282  ;;  %vm16586_vm14 = vcmask 261120  }
 0x5fc   : > { %5859 = vst [vmem:[#allocation2 + $0x4e0] sm:$0xff] %v5837_v40  ;;  %v5197_v49 = vrot.slane %v5169_v37, 4 }
 0x5fd   : > { %6442 = vrot.lane.b32.xlu0 %v13991_v45, %s16384_s2  ;;  %4554 = vrot.lane.b32.xlu1 %v4514_v6, %s16363_s0 }
 0x5fe   : > { %v5212_v21 = vsel %vm498_vm10, %v5196_v24, %v5197_v49  ;;  %v4754_v49 = vmul.bf16 %v13972_v3, %v16544_v62 }
 0x5ff   : > { %v5213_v25 = vsel %vm16583_vm12, %v5167_v63, %v5212_v21  ;;  %v5665_v33 = vpop.permute.xlu0 %5664  ;;  %v6435_v28 = vpop.permute.xlu1 %6434  ;;  %vm16587_vm12 = vcmask 130048  }
 0x600   : > { %5235 = vst [vmem:[#allocation2 + $0x4b0] sm:$0xff] %v5213_v25  ;;  %v5693_v2 = vrot.slane %v5665_v33, 4  ;;  %v6462_v18 = vrot.slane %v6435_v28, 4  ;;  %v4739_v25 = vld [vmem:[#allocation5 + $0x48] sm:$0xf] }
 0x601   : > { %4556 = vrot.lane.b32.xlu0 %v4515_v17, %s16363_s0  ;;  %4426 = vrot.lane.b32.xlu1 %v4386_v53, %s16364_s18  ;;  %v4755_v53 = vmul.bf16 %v4739_v25, %v16545_v19 }
 0x602   : > { %v5708_v27 = vsel %vm498_vm10, %v5692_v20, %v5693_v2  ;;  %v6478_v63 = vsel %vm498_vm10, %v6462_v18, %v6463_v13  ;;  %v5010_v13 = vmul.bf16 %v13972_v3, %v16546_v30  ;;  %v4995_v2 = vld [vmem:[#allocation5 + $0x48] sm:$0xf] }
 0x603   : > { %v5709_v40 = vsel %vm16584_vm0, %v5663_v54, %v5708_v27  ;;  %v6479_v37 = vsel %vm16585_vm15, %v6435_v28, %v6478_v63  ;;  %v5935_v6 = vpop.permute.xlu0 %5934  ;;  %v4419_v24 = vpop.permute.xlu1 %4418  ;;  %vm16588_vm0 = vcmask 277504   ;;  %vm16589_vm15 = vcmask 269312  }
 0x604   : > { %5731 = vst [vmem:[#allocation2 + $0x138] sm:$0xff] %v5709_v40  ;;  %6500 = vst [vmem:[#allocation2 + $0x68] sm:$0xff] %v6479_v37  ;;  %v5964_v21 = vrot.slane %v5935_v6, 4  ;;  %v5011_v40 = vmul.bf16 %v4995_v2, %v16547_v51  ;;  %v5506_v37 = vmul.bf16 %v13972_v3, %v16548_v61 }
 0x605   : > { %4428 = vrot.lane.b32.xlu0 %v4387_v56, %s16364_s18  ;;  %4794 = vrot.lane.b32.xlu1 %v4754_v49, %s16365_s11  ;;  %v5491_v49 = vld [vmem:[#allocation5 + $0x48] sm:$0xf] }
 0x606   : > { %v5980_v54 = vsel %vm498_vm10, %v5964_v21, %v5965_v26 }
 0x607   : > { %v5981_v33 = vsel %vm874_vm5, %v5935_v6, %v5980_v54  ;;  %v4661_v28 = vpop.permute.xlu0 %4660  ;;  %v4547_v17 = vpop.permute.xlu1 %4546  ;;  %v5310_v6 = vrot.slane %v13986_v7, 4  ;;  %v5507_v54 = vmul.bf16 %v5491_v49, %v16549_v15 }
 0x608   : > { %6003 = vst [vmem:[#allocation2 + $0x240] sm:$0xff] %v5981_v33  ;;  %v4687_v20 = vrot.slane %v4661_v28, 4  ;;  %v4882_v33 = vmul.bf16 %v13972_v3, %v16550_v32  ;;  %v4446_v28 = vrot.slane %v4419_v24, 4 }
 0x609   : > { %4796 = vrot.lane.b32.xlu0 %v4755_v53, %s16365_s11  ;;  %5050 = vrot.lane.b32.xlu1 %v5010_v13, %s16362_s23  ;;  %v4867_v13 = vld [vmem:[#allocation5 + $0x48] sm:$0xf] }
 0x60a   : > { %v4702_v18 = vsel %vm498_vm10, %v4686_v23, %v4687_v20 }
 0x60b   : > { %v4703_v29 = vsel %vm16586_vm14, %v13979_v0, %v4702_v18  ;;  %v5285_v27 = vpop.permute.xlu0 %5284  ;;  %v4787_v63 = vpop.permute.xlu1 %4786  ;;  %v4883_v18 = vmul.bf16 %v4867_v13, %v16551_v5  ;;  %vm16590_vm14 = vcmask 252928  }
 0x60c   : > { %4724 = vst [vmem:[#allocation2 + $0x540] sm:$0xff] %v4703_v29  ;;  %v5311_v56 = vrot.slane %v5285_v27, 4  ;;  %v5378_v29 = vmul.bf16 %v13972_v3, %v16552_v10  ;;  %v4574_v27 = vrot.slane %v4547_v17, 4 }
 0x60d   : > { %5052 = vrot.lane.b32.xlu0 %v5011_v40, %s16362_s23  ;;  %5546 = vrot.lane.b32.xlu1 %v5506_v37, %s16358_s24  ;;  %v5363_v37 = vld [vmem:[#allocation5 + $0x48] sm:$0xf] }
 0x60e   : > { %v5326_v26 = vsel %vm498_vm10, %v5310_v6, %v5311_v56 }
 0x60f   : > { %v5327_v0 = vsel %vm16587_vm12, %v13986_v7, %v5326_v26  ;;  %v4421_v21 = vpop.permute.xlu0 %4420  ;;  %v5043_v25 = vpop.permute.xlu1 %5042  ;;  %v5379_v26 = vmul.bf16 %v5363_v37, %v16553_v35  ;;  %vm16591_vm12 = vcmask 146432  }
 0x610   : > { %5348 = vst [vmem:[#allocation2 + $0x118] sm:$0xff] %v5327_v0  ;;  %v4447_v53 = vrot.slane %v4421_v21, 4  ;;  %v5762_v0 = vmul.bf16 %v13972_v3, %v16554_v12  ;;  %v4814_v21 = vrot.slane %v4787_v63, 4 }
 0x611   : > { %5548 = vrot.lane.b32.xlu0 %v5507_v54, %s16358_s24  ;;  %4922 = vrot.lane.b32.xlu1 %v4882_v33, %s16359_s29  ;;  %v5747_v33 = vld [vmem:[#allocation5 + $0x48] sm:$0xf] }
 0x612   : > { %v4462_v23 = vsel %vm498_vm10, %v4446_v28, %v4447_v53 }
 0x613   : > { %v4463_v20 = vsel %vm16588_vm0, %v4419_v24, %v4462_v23  ;;  %v4549_v7 = vpop.permute.xlu0 %4548  ;;  %v5539_v2 = vpop.permute.xlu1 %5538  ;;  %v5763_v23 = vmul.bf16 %v5747_v33, %v16555_v41  ;;  %vm16592_vm0 = vcmask 244736  }
 0x614   : > { %4484 = vst [vmem:[#allocation2 + $0x4d8] sm:$0xff] %v4463_v20  ;;  %v4575_v40 = vrot.slane %v4549_v7, 4  ;;  %v5138_v20 = vmul.bf16 %v13972_v3, %v16556_v11  ;;  %v5070_v7 = vrot.slane %v5043_v25, 4 }
 0x615   : > { %4924 = vrot.lane.b32.xlu0 %v4883_v18, %s16359_s29  ;;  %5418 = vrot.lane.b32.xlu1 %v5378_v29, %s16355_s22  ;;  %v5123_v29 = vld [vmem:[#allocation5 + $0x48] sm:$0xf] }
 0x616   : > { %v4590_v6 = vsel %vm498_vm10, %v4574_v27, %v4575_v40 }
 0x617   : > { %v4591_v56 = vsel %vm16589_vm15, %v4547_v17, %v4590_v6  ;;  %v4789_v24 = vpop.permute.xlu0 %4788  ;;  %v4915_v49 = vpop.permute.xlu1 %4914  ;;  %v5139_v6 = vmul.bf16 %v5123_v29, %v16557_v55  ;;  %vm16593_vm15 = vcmask 121856  }
 0x618   : > { %4612 = vst [vmem:[#allocation2 + $0x490] sm:$0xff] %v4591_v56  ;;  %v4815_v54 = vrot.slane %v4789_v24, 4  ;;  %v5634_v56 = vmul.bf16 %v13972_v3, %v16558_v9  ;;  %v5566_v24 = vrot.slane %v5539_v2, 4  ;;  %v14069_v3 = vld [vmem:[#allocation5 + $0x50] sm:$0xff] }
 0x619   : > { %5420 = vrot.lane.b32.xlu0 %v5379_v26, %s16355_s22  ;;  %5802 = vrot.lane.b32.xlu1 %v5762_v0, %s16360_s28  ;;  %v5619_v0 = vld [vmem:[#allocation5 + $0x48] sm:$0xf] }
 0x61a   : > { %v4830_v28 = vsel %vm498_vm10, %v4814_v21, %v4815_v54 }
 0x61b   : > { %v4831_v53 = vsel %vm16590_vm14, %v4787_v63, %v4830_v28  ;;  %v5045_v17 = vpop.permute.xlu0 %5044  ;;  %v5411_v13 = vpop.permute.xlu1 %5410  ;;  %v5635_v28 = vmul.bf16 %v5619_v0, %v16559_v14  ;;  %vm16594_vm14 = vcmask 7168  }
 0x61c   : > { %4852 = vst [vmem:[#allocation2 + $0x388] sm:$0xff] %v4831_v53  ;;  %v5071_v18 = vrot.slane %v5045_v17, 4  ;;  %v4942_v53 = vrot.slane %v4915_v49, 4  ;;  %v5438_v29 = vrot.slane %v5411_v13, 4 }
 0x61d   : > { %5804 = vrot.lane.b32.xlu0 %v5763_v23, %s16360_s28  ;;  %5178 = vrot.lane.b32.xlu1 %v5138_v20, %s16361_s21 }
 0x61e   : > { %v5086_v27 = vsel %vm498_vm10, %v5070_v7, %v5071_v18  ;;  %v5906_v18 = vmul.bf16 %v13991_v45, %v16560_v34 }
 0x61f   : > { %v5087_v40 = vsel %vm16591_vm12, %v5043_v25, %v5086_v27  ;;  %v5541_v63 = vpop.permute.xlu0 %5540  ;;  %v5795_v37 = vpop.permute.xlu1 %5794  ;;  %vm16595_vm12 = vcmask 138240  }
 0x620   : > { %5108 = vst [vmem:[#allocation2 + $0x3c8] sm:$0xff] %v5087_v40  ;;  %v5567_v26 = vrot.slane %v5541_v63, 4  ;;  %v5822_v45 = vrot.slane %v5795_v37, 4 }
 0x621   : > { %5180 = vrot.lane.b32.xlu0 %v5139_v6, %s16361_s21  ;;  %5674 = vrot.lane.b32.xlu1 %v5634_v56, %s16357_s17 }
 0x622   : > { %v5582_v21 = vsel %vm498_vm10, %v5566_v24, %v5567_v26  ;;  %v5967_v24 = vrot.slane %v13782_v39, 4  ;;  %v4388_v39 = vmul.bf16 %v14069_v3, %v16538_v47 }
 0x623   : > { %v5583_v54 = vsel %vm831_vm1, %v5539_v2, %v5582_v21  ;;  %v4917_v25 = vpop.permute.xlu0 %4916  ;;  %v5171_v33 = vpop.permute.xlu1 %5170  ;;  %v4629_v21 = vld [vmem:[#allocation5 + $0x58] sm:$0xf] }
 0x624   : > { %5604 = vst [vmem:[#allocation2 + $0xb8] sm:$0xff] %v5583_v54  ;;  %v4943_v17 = vrot.slane %v4917_v25, 4 }
 0x625   : > { %5676 = vrot.lane.b32.xlu0 %v5635_v28, %s16357_s17  ;;  %4670 = vrot.lane.b32.xlu1 %v14069_v3, %s16396_s8 }
 0x626   : > { %v4958_v23 = vsel %vm498_vm10, %v4942_v53, %v4943_v17 }
 0x627   : > { %v4959_v20 = vsel %vm16592_vm0, %v4915_v49, %v4958_v23  ;;  %v5413_v7 = vpop.permute.xlu0 %5412  ;;  %v5667_v2 = vpop.permute.xlu1 %5666  ;;  %v4516_v49 = vmul.bf16 %v14069_v3, %v16542_v52  ;;  %v5198_v23 = vrot.slane %v5171_v33, 4  ;;  %vm16596_vm0 = vcmask 15360  }
 0x628   : > { %4980 = vst [vmem:[#allocation2 + $0x2a0] sm:$0xff] %v4959_v20  ;;  %v5439_v27 = vrot.slane %v5413_v7, 4  ;;  %v5253_v7 = vld [vmem:[#allocation5 + $0x58] sm:$0xf] }
 0x629   : > { %5946 = vrot.lane.b32.xlu0 %v5906_v18, %s16354_s16  ;;  %5294 = vrot.lane.b32.xlu1 %v14069_v3, %s16399_s19 }
 0x62a   : > { %v5454_v40 = vsel %vm498_vm10, %v5438_v29, %v5439_v27 }
 0x62b   : > { %v5455_v63 = vsel %vm16593_vm15, %v5411_v13, %v5454_v40  ;;  %v5797_v6 = vpop.permute.xlu0 %5796  ;;  %v5939_v56 = vpop.permute.xlu1 %5938  ;;  %v4756_v40 = vmul.bf16 %v14069_v3, %v16544_v62  ;;  %vm16597_vm15 = vcmask 261120  }
 0x62c   : > { %5476 = vst [vmem:[#allocation2 + $0xe8] sm:$0xff] %v5455_v63  ;;  %v5823_v26 = vrot.slane %v5797_v6, 4  ;;  %v5966_v0 = vrot.slane %v5939_v56, 4  ;;  %v11097_v63 = vunpack.i.h.bf16 %v13804_v44  ;;  %v5694_v6 = vrot.slane %v5667_v2, 4 }
 0x62d   : > { %4672 = vrot.lane.b32.xlu0 %v4629_v21, %s16396_s8  ;;  %4558 = vrot.lane.b32.xlu1 %v4516_v49, %s16363_s0  ;;  %v14101_v49 = vld [vmem:[#allocation5 + $0x54] sm:$0xff]  ;;  %v5012_v44 = vmul.bf16 %v14069_v3, %v16546_v30 }
 0x62e   : > { %v5838_v54 = vsel %vm498_vm10, %v5822_v45, %v5823_v26  ;;  %v5982_v13 = vsel %vm498_vm10, %v5966_v0, %v5967_v24  ;;  %v4501_v24 = vld [vmem:[#allocation5 + $0x58] sm:$0xf] }
 0x62f   : > { %v5839_v25 = vsel %vm16594_vm14, %v5795_v37, %v5838_v54  ;;  %v5983_v28 = vsel %vm874_vm5, %v5939_v56, %v5982_v13  ;;  %v5173_v53 = vpop.permute.xlu0 %5172  ;;  %v4663_v17 = vpop.permute.xlu1 %4662  ;;  %v4517_v21 = vmul.bf16 %v4501_v24, %v16543_v50  ;;  %v6465_v54 = vrot.slane %v11097_v63, 4 }
 0x630   : > { %5860 = vst [vmem:[#allocation2 + $0x168] sm:$0xff] %v5839_v25  ;;  %6004 = vst [vmem:[#allocation2 + $0x230] sm:$0xff] %v5983_v28  ;;  %v5199_v20 = vrot.slane %v5173_v53, 4  ;;  %v4688_v13 = vrot.slane %v4663_v17, 4  ;;  %v4373_v53 = vld [vmem:[#allocation5 + $0x58] sm:$0xf] }
 0x631   : > { %5296 = vrot.lane.b32.xlu0 %v5253_v7, %s16399_s19  ;;  %4430 = vrot.lane.b32.xlu1 %v4388_v39, %s16364_s18  ;;  %vm16598_vm14 = vcmask 916480  }
 0x632   : > { %v5214_v18 = vsel %vm498_vm10, %v5198_v23, %v5199_v20 }
 0x633   : > { %v5215_v37 = vsel %vm16595_vm12, %v5171_v33, %v5214_v18  ;;  %v5669_v29 = vpop.permute.xlu0 %5668  ;;  %v5287_v27 = vpop.permute.xlu1 %5286  ;;  %vm16599_vm12 = vcmask 130048  }
 0x634   : > { %5236 = vst [vmem:[#allocation2 + $0x28] sm:$0xff] %v5215_v37  ;;  %v5695_v56 = vrot.slane %v5669_v29, 4  ;;  %v4389_v37 = vmul.bf16 %v4373_v53, %v16541_v59  ;;  %v5508_v29 = vmul.bf16 %v14069_v3, %v16548_v61  ;;  %v5380_v53 = vmul.bf16 %v14069_v3, %v16552_v10 }
 0x635   : > { %6446 = vrot.lane.b32.xlu0 %v14101_v49, %s16384_s2  ;;  %4798 = vrot.lane.b32.xlu1 %v4756_v40, %s16365_s11  ;;  %v5312_v40 = vrot.slane %v5287_v27, 4 }
 0x636   : > { %v5710_v33 = vsel %vm498_vm10, %v5694_v6, %v5695_v56  ;;  %v4741_v6 = vld [vmem:[#allocation5 + $0x58] sm:$0xf] }
 0x637   : > { %v5711_v45 = vsel %vm16596_vm0, %v5667_v2, %v5710_v33  ;;  %v4665_v26 = vpop.permute.xlu0 %4664  ;;  %v6439_v0 = vpop.permute.xlu1 %6438  ;;  %vm16600_vm0 = vcmask 277504  }
 0x638   : > { %5732 = vst [vmem:[#allocation2 + $0x518] sm:$0xff] %v5711_v45  ;;  %v4689_v25 = vrot.slane %v4665_v26, 4  ;;  %v6464_v28 = vrot.slane %v6439_v0, 4  ;;  %v4757_v45 = vmul.bf16 %v4741_v6, %v16545_v19  ;;  %v4884_v26 = vmul.bf16 %v14069_v3, %v16550_v32 }
 0x639   : > { %4560 = vrot.lane.b32.xlu0 %v4517_v21, %s16363_s0  ;;  %5054 = vrot.lane.b32.xlu1 %v5012_v44, %s16362_s23  ;;  %v4997_v44 = vld [vmem:[#allocation5 + $0x58] sm:$0xf] }
 0x63a   : > { %v4704_v39 = vsel %vm498_vm10, %v4688_v13, %v4689_v25  ;;  %v6480_v2 = vsel %vm498_vm10, %v6464_v28, %v6465_v54  ;;  %v5013_v28 = vmul.bf16 %v4997_v44, %v16547_v51 }
 0x63b   : > { %v4705_v23 = vsel %vm16597_vm15, %v4663_v17, %v4704_v39  ;;  %v6481_v20 = vsel %vm16598_vm14, %v6439_v0, %v6480_v2  ;;  %v5289_v7 = vpop.permute.xlu0 %5288  ;;  %v4423_v18 = vpop.permute.xlu1 %4422  ;;  %vm16601_vm15 = vcmask 269312   ;;  %vm16602_vm14 = vcmask 252928  }
 0x63c   : > { %4725 = vst [vmem:[#allocation2 + $0x3c0] sm:$0xff] %v4705_v23  ;;  %6501 = vst [vmem:[#allocation2 + $0x40] sm:$0xff] %v6481_v20  ;;  %v5313_v63 = vrot.slane %v5289_v7, 4  ;;  %v4448_v0 = vrot.slane %v4423_v18, 4  ;;  %v5493_v23 = vld [vmem:[#allocation5 + $0x58] sm:$0xf] }
 0x63d   : > { %4432 = vrot.lane.b32.xlu0 %v4389_v37, %s16364_s18  ;;  %5550 = vrot.lane.b32.xlu1 %v5508_v29, %s16358_s24  ;;  %v5509_v29 = vmul.bf16 %v5493_v23, %v16549_v15 }
 0x63e   : > { %v5328_v17 = vsel %vm498_vm10, %v5312_v40, %v5313_v63  ;;  %v5764_v40 = vmul.bf16 %v14069_v3, %v16554_v12 }
 0x63f   : > { %v5329_v56 = vsel %vm16599_vm12, %v5287_v27, %v5328_v17  ;;  %v4425_v24 = vpop.permute.xlu0 %4424  ;;  %v4551_v33 = vpop.permute.xlu1 %4550  ;;  %v4869_v17 = vld [vmem:[#allocation5 + $0x58] sm:$0xf]  ;;  %vm16603_vm12 = vcmask 146432  }
 0x640   : > { %5349 = vst [vmem:[#allocation2 + $0x508] sm:$0xff] %v5329_v56  ;;  %v4449_v21 = vrot.slane %v4425_v24, 4  ;;  %v4576_v39 = vrot.slane %v4551_v33, 4 }
 0x641   : > { %4800 = vrot.lane.b32.xlu0 %v4757_v45, %s16365_s11  ;;  %4926 = vrot.lane.b32.xlu1 %v4884_v26, %s16359_s29  ;;  %v4885_v26 = vmul.bf16 %v4869_v17, %v16551_v5  ;;  %v5125_v17 = vld [vmem:[#allocation5 + $0x58] sm:$0xf] }
 0x642   : > { %v4464_v54 = vsel %vm498_vm10, %v4448_v0, %v4449_v21  ;;  %v5140_v0 = vmul.bf16 %v14069_v3, %v16556_v11 }
 0x643   : > { %v4465_v13 = vsel %vm16600_vm0, %v4423_v18, %v4464_v54  ;;  %v4553_v27 = vpop.permute.xlu0 %4552  ;;  %v4791_v25 = vpop.permute.xlu1 %4790  ;;  %v5365_v54 = vld [vmem:[#allocation5 + $0x58] sm:$0xf]  ;;  %vm16604_vm0 = vcmask 244736  }
 0x644   : > { %4485 = vst [vmem:[#allocation2 + $0x18] sm:$0xff] %v4465_v13  ;;  %v4577_v2 = vrot.slane %v4553_v27, 4  ;;  %v4816_v63 = vrot.slane %v4791_v25, 4 }
 0x645   : > { %5056 = vrot.lane.b32.xlu0 %v5013_v28, %s16362_s23  ;;  %5422 = vrot.lane.b32.xlu1 %v5380_v53, %s16355_s22  ;;  %v5381_v53 = vmul.bf16 %v5365_v54, %v16553_v35 }
 0x646   : > { %v4592_v20 = vsel %vm498_vm10, %v4576_v39, %v4577_v2  ;;  %v5636_v39 = vmul.bf16 %v14069_v3, %v16558_v9  ;;  %v14160_v3 = vld [vmem:[#allocation5 + $0x60] sm:$0xff] }
 0x647   : > { %v4593_v7 = vsel %vm16601_vm15, %v4551_v33, %v4592_v20  ;;  %v4793_v18 = vpop.permute.xlu0 %4792  ;;  %v5047_v37 = vpop.permute.xlu1 %5046  ;;  %v5749_v20 = vld [vmem:[#allocation5 + $0x58] sm:$0xf]  ;;  %vm16605_vm15 = vcmask 121856  }
 0x648   : > { %4613 = vst [vmem:[#allocation2 + $0x318] sm:$0xff] %v4593_v7  ;;  %v4817_v6 = vrot.slane %v4793_v18, 4  ;;  %v5072_v21 = vrot.slane %v5047_v37, 4 }
 0x649   : > { %5552 = vrot.lane.b32.xlu0 %v5509_v29, %s16358_s24  ;;  %5806 = vrot.lane.b32.xlu1 %v5764_v40, %s16360_s28  ;;  %v5765_v40 = vmul.bf16 %v5749_v20, %v16555_v41 }
 0x64a   : > { %v4832_v56 = vsel %vm498_vm10, %v4816_v63, %v4817_v6 }
 0x64b   : > { %v4833_v24 = vsel %vm16602_vm14, %v4791_v25, %v4832_v56  ;;  %v5049_v33 = vpop.permute.xlu0 %5048  ;;  %v5543_v45 = vpop.permute.xlu1 %5542  ;;  %vm16606_vm14 = vcmask 7168  }
 0x64c   : > { %4853 = vst [vmem:[#allocation2 + $0x520] sm:$0xff] %v4833_v24  ;;  %v5073_v44 = vrot.slane %v5049_v33, 4  ;;  %v5568_v2 = vrot.slane %v5543_v45, 4 }
 0x64d   : > { %4928 = vrot.lane.b32.xlu0 %v4885_v26, %s16359_s29  ;;  %5182 = vrot.lane.b32.xlu1 %v5140_v0, %s16361_s21  ;;  %v5141_v26 = vmul.bf16 %v5125_v17, %v16557_v55 }
 0x64e   : > { %v5088_v13 = vsel %vm498_vm10, %v5072_v21, %v5073_v44  ;;  %v5621_v44 = vld [vmem:[#allocation5 + $0x58] sm:$0xf] }
 0x64f   : > { %v5089_v27 = vsel %vm16603_vm12, %v5047_v37, %v5088_v13  ;;  %v5545_v25 = vpop.permute.xlu0 %5544  ;;  %v4919_v28 = vpop.permute.xlu1 %4918  ;;  %vm16607_vm12 = vcmask 138240  }
 0x650   : > { %5109 = vst [vmem:[#allocation2 + $0x5c0] sm:$0xff] %v5089_v27  ;;  %v5569_v23 = vrot.slane %v5545_v25, 4  ;;  %v4944_v63 = vrot.slane %v4919_v28, 4 }
 0x651   : > { %5424 = vrot.lane.b32.xlu0 %v5381_v53, %s16355_s22  ;;  %5678 = vrot.lane.b32.xlu1 %v5636_v39, %s16357_s17 }
 0x652   : > { %v5584_v7 = vsel %vm498_vm10, %v5568_v2, %v5569_v23  ;;  %v14174_v2 = vld [vmem:[#allocation5 + $0x64] sm:$0xff] }
 0x653   : > { %v5585_v18 = vsel %vm831_vm1, %v5543_v45, %v5584_v7  ;;  %v4921_v37 = vpop.permute.xlu0 %4920  ;;  %v5415_v29 = vpop.permute.xlu1 %5414 }
 0x654   : > { %5605 = vst [vmem:[#allocation2 + $0x530] sm:$0xff] %v5585_v18  ;;  %v4945_v6 = vrot.slane %v4921_v37, 4  ;;  %v5440_v0 = vrot.slane %v5415_v29, 4  ;;  %v5908_v37 = vmul.bf16 %v14101_v49, %v16560_v34 }
 0x655   : > { %5808 = vrot.lane.b32.xlu0 %v5765_v40, %s16360_s28  ;;  %4674 = vrot.lane.b32.xlu1 %v14160_v3, %s16396_s8 }
 0x656   : > { %v4960_v56 = vsel %vm498_vm10, %v4944_v63, %v4945_v6 }
 0x657   : > { %v4961_v24 = vsel %vm16604_vm0, %v4919_v28, %v4960_v56  ;;  %v5417_v33 = vpop.permute.xlu0 %5416  ;;  %v5799_v45 = vpop.permute.xlu1 %5798  ;;  %v5637_v28 = vmul.bf16 %v5621_v44, %v16559_v14  ;;  %v4631_v44 = vld [vmem:[#allocation5 + $0x68] sm:$0xf]  ;;  %vm16608_vm0 = vcmask 15360  }
 0x658   : > { %4981 = vst [vmem:[#allocation2 + $0x570] sm:$0xff] %v4961_v24  ;;  %v5441_v21 = vrot.slane %v5417_v33, 4  ;;  %v5824_v53 = vrot.slane %v5799_v45, 4  ;;  %v4390_v33 = vmul.bf16 %v14160_v3, %v16538_v47 }
 0x659   : > { %5184 = vrot.lane.b32.xlu0 %v5141_v26, %s16361_s21  ;;  %5298 = vrot.lane.b32.xlu1 %v14160_v3, %s16399_s19 }
 0x65a   : > { %v5456_v54 = vsel %vm498_vm10, %v5440_v0, %v5441_v21 }
 0x65b   : > { %v5457_v13 = vsel %vm16605_vm15, %v5415_v29, %v5456_v54  ;;  %v5801_v27 = vpop.permute.xlu0 %5800  ;;  %v5175_v25 = vpop.permute.xlu1 %5174  ;;  %v4518_v29 = vmul.bf16 %v14160_v3, %v16542_v52  ;;  %vm16609_vm15 = vcmask 261120  }
 0x65c   : > { %5477 = vst [vmem:[#allocation2 + $0x270] sm:$0xff] %v5457_v13  ;;  %v5825_v39 = vrot.slane %v5801_v27, 4  ;;  %v5200_v40 = vrot.slane %v5175_v25, 4 }
 0x65d   : > { %5680 = vrot.lane.b32.xlu0 %v5637_v28, %s16357_s17  ;;  %6450 = vrot.lane.b32.xlu1 %v14174_v2, %s16384_s2 }
 0x65e   : > { %v5840_v23 = vsel %vm498_vm10, %v5824_v53, %v5825_v39 }
 0x65f   : > { %v5841_v20 = vsel %vm16606_vm14, %v5799_v45, %v5840_v23  ;;  %v5177_v7 = vpop.permute.xlu0 %5176  ;;  %v5671_v18 = vpop.permute.xlu1 %5670  ;;  %v5969_v45 = vrot.slane %v13791_v38, 4  ;;  %v4758_v38 = vmul.bf16 %v14160_v3, %v16544_v62  ;;  %vm16610_vm14 = vcmask 130048  }
 0x660   : > { %5861 = vst [vmem:[#allocation2 + $0x50] sm:$0xff] %v5841_v20  ;;  %v5201_v63 = vrot.slane %v5177_v7, 4  ;;  %v5696_v26 = vrot.slane %v5671_v18, 4  ;;  %v5255_v20 = vld [vmem:[#allocation5 + $0x68] sm:$0xf] }
 0x661   : > { %5950 = vrot.lane.b32.xlu0 %v5908_v37, %s16354_s16  ;;  %4562 = vrot.lane.b32.xlu1 %v4518_v29, %s16363_s0  ;;  %v4503_v7 = vld [vmem:[#allocation5 + $0x68] sm:$0xf] }
 0x662   : > { %v5216_v6 = vsel %vm498_vm10, %v5200_v40, %v5201_v63  ;;  %v4519_v63 = vmul.bf16 %v4503_v7, %v16543_v50 }
 0x663   : > { %v5217_v17 = vsel %vm16607_vm12, %v5175_v25, %v5216_v6  ;;  %v5673_v56 = vpop.permute.xlu0 %5672  ;;  %v5943_v24 = vpop.permute.xlu1 %5942  ;;  %v5014_v6 = vmul.bf16 %v14160_v3, %v16546_v30  ;;  %vm16611_vm12 = vcmask 916480  }
 0x664   : > { %5237 = vst [vmem:[#allocation2 + $0xf8] sm:$0xff] %v5217_v17  ;;  %v5697_v0 = vrot.slane %v5673_v56, 4  ;;  %v5968_v21 = vrot.slane %v5943_v24, 4  ;;  %v11091_v17 = vunpack.i.l.bf16 %v13772_v8 }
 0x665   : > { %4676 = vrot.lane.b32.xlu0 %v4631_v44, %s16396_s8  ;;  %4434 = vrot.lane.b32.xlu1 %v4390_v33, %s16364_s18  ;;  %v4375_v33 = vld [vmem:[#allocation5 + $0x68] sm:$0xf] }
 0x666   : > { %v5712_v54 = vsel %vm498_vm10, %v5696_v26, %v5697_v0  ;;  %v5984_v13 = vsel %vm498_vm10, %v5968_v21, %v5969_v45  ;;  %v4391_v44 = vmul.bf16 %v4375_v33, %v16541_v59 }
 0x667   : > { %v5713_v27 = vsel %vm16608_vm0, %v5671_v18, %v5712_v54  ;;  %v5985_v25 = vsel %vm874_vm5, %v5943_v24, %v5984_v13  ;;  %v4669_v28 = vpop.permute.xlu0 %4668  ;;  %v4667_v53 = vpop.permute.xlu1 %4666  ;;  %v5510_v54 = vmul.bf16 %v14160_v3, %v16548_v61  ;;  %v6467_v13 = vrot.slane %v11091_v17, 4 }
 0x668   : > { %5733 = vst [vmem:[#allocation2 + $0x48] sm:$0xff] %v5713_v27  ;;  %6005 = vst [vmem:[#allocation2 + $0x5d0] sm:$0xff] %v5985_v25  ;;  %v4691_v39 = vrot.slane %v4669_v28, 4  ;;  %v4690_v23 = vrot.slane %v4667_v53, 4  ;;  %v4743_v25 = vld [vmem:[#allocation5 + $0x68] sm:$0xf] }
 0x669   : > { %5300 = vrot.lane.b32.xlu0 %v5255_v20, %s16399_s19  ;;  %4802 = vrot.lane.b32.xlu1 %v4758_v38, %s16365_s11  ;;  %v4886_v20 = vmul.bf16 %v14160_v3, %v16550_v32  ;;  %vm16612_vm0 = vcmask 269312  }
 0x66a   : > { %v4706_v37 = vsel %vm498_vm10, %v4690_v23, %v4691_v39  ;;  %v4759_v23 = vmul.bf16 %v4743_v25, %v16545_v19 }
 0x66b   : > { %v4707_v18 = vsel %vm16609_vm15, %v4667_v53, %v4706_v37  ;;  %v5293_v29 = vpop.permute.xlu0 %5292  ;;  %v5291_v40 = vpop.permute.xlu1 %5290  ;;  %vm16613_vm15 = vcmask 277504  }
 0x66c   : > { %4726 = vst [vmem:[#allocation2 + $0x330] sm:$0xff] %v4707_v18  ;;  %v5315_v56 = vrot.slane %v5293_v29, 4  ;;  %v5314_v24 = vrot.slane %v5291_v40, 4  ;;  %v4999_v18 = vld [vmem:[#allocation5 + $0x68] sm:$0xf] }
 0x66d   : > { %4564 = vrot.lane.b32.xlu0 %v4519_v63, %s16363_s0  ;;  %5058 = vrot.lane.b32.xlu1 %v5014_v6, %s16362_s23  ;;  %v5015_v17 = vmul.bf16 %v4999_v18, %v16547_v51 }
 0x66e   : > { %v5330_v45 = vsel %vm498_vm10, %v5314_v24, %v5315_v56  ;;  %v5382_v56 = vmul.bf16 %v14160_v3, %v16552_v10 }
 0x66f   : > { %v5331_v26 = vsel %vm16610_vm14, %v5291_v40, %v5330_v45  ;;  %v6443_v0 = vpop.permute.xlu0 %6442  ;;  %v4555_v21 = vpop.permute.xlu1 %4554  ;;  %v5495_v45 = vld [vmem:[#allocation5 + $0x68] sm:$0xf]  ;;  %vm16614_vm14 = vcmask 252928  }
 0x670   : > { %5350 = vst [vmem:[#allocation2 + $0x2f8] sm:$0xff] %v5331_v26  ;;  %v6466_v27 = vrot.slane %v6443_v0, 4  ;;  %v4578_v7 = vrot.slane %v4555_v21, 4 }
 0x671   : > { %4436 = vrot.lane.b32.xlu0 %v4391_v44, %s16364_s18  ;;  %5554 = vrot.lane.b32.xlu1 %v5510_v54, %s16358_s24  ;;  %v5511_v54 = vmul.bf16 %v5495_v45, %v16549_v15 }
 0x672   : > { %v6482_v28 = vsel %vm498_vm10, %v6466_v27, %v6467_v13  ;;  %v5766_v13 = vmul.bf16 %v14160_v3, %v16554_v12 }
 0x673   : > { %v6483_v53 = vsel %vm16611_vm12, %v6443_v0, %v6482_v28  ;;  %v4557_v38 = vpop.permute.xlu0 %4556  ;;  %v4427_v39 = vpop.permute.xlu1 %4426  ;;  %v4871_v28 = vld [vmem:[#allocation5 + $0x68] sm:$0xf]  ;;  %vm16615_vm12 = vcmask 146432  }
 0x674   : > { %6502 = vst [vmem:[#allocation2 + $0x4f8] sm:$0xff] %v6483_v53  ;;  %v4579_v37 = vrot.slane %v4557_v38, 4  ;;  %v4450_v24 = vrot.slane %v4427_v39, 4 }
 0x675   : > { %4804 = vrot.lane.b32.xlu0 %v4759_v23, %s16365_s11  ;;  %4930 = vrot.lane.b32.xlu1 %v4886_v20, %s16359_s29  ;;  %v4887_v20 = vmul.bf16 %v4871_v28, %v16551_v5  ;;  %v5127_v28 = vld [vmem:[#allocation5 + $0x68] sm:$0xf] }
 0x676   : > { %v4594_v29 = vsel %vm498_vm10, %v4578_v7, %v4579_v37  ;;  %v5142_v7 = vmul.bf16 %v14160_v3, %v16556_v11 }
 0x677   : > { %v4595_v40 = vsel %vm16612_vm0, %v4555_v21, %v4594_v29  ;;  %v4429_v63 = vpop.permute.xlu0 %4428  ;;  %v4795_v6 = vpop.permute.xlu1 %4794  ;;  %v5367_v29 = vld [vmem:[#allocation5 + $0x68] sm:$0xf]  ;;  %vm16616_vm0 = vcmask 244736  }
 0x678   : > { %4614 = vst [vmem:[#allocation2 + $0x548] sm:$0xff] %v4595_v40  ;;  %v4451_v33 = vrot.slane %v4429_v63, 4  ;;  %v4818_v27 = vrot.slane %v4795_v6, 4 }
 0x679   : > { %5060 = vrot.lane.b32.xlu0 %v5015_v17, %s16362_s23  ;;  %5426 = vrot.lane.b32.xlu1 %v5382_v56, %s16355_s22  ;;  %v5383_v56 = vmul.bf16 %v5367_v29, %v16553_v35 }
 0x67a   : > { %v4466_v26 = vsel %vm498_vm10, %v4450_v24, %v4451_v33  ;;  %v5638_v24 = vmul.bf16 %v14160_v3, %v16558_v9 }
 0x67b   : > { %v4467_v0 = vsel %vm16613_vm15, %v4427_v39, %v4466_v26  ;;  %v4797_v21 = vpop.permute.xlu0 %4796  ;;  %v5051_v44 = vpop.permute.xlu1 %5050  ;;  %v5751_v26 = vld [vmem:[#allocation5 + $0x68] sm:$0xf]  ;;  %vm16618_vm15 = vcmask 121856  }
 0x67c   : > { %4486 = vst [vmem:[#allocation2 + $0x450] sm:$0xff] %v4467_v0  ;;  %v4819_v25 = vrot.slane %v4797_v21, 4  ;;  %v5074_v37 = vrot.slane %v5051_v44, 4 }
 0x67d   : > { %5556 = vrot.lane.b32.xlu0 %v5511_v54, %s16358_s24  ;;  %5810 = vrot.lane.b32.xlu1 %v5766_v13, %s16360_s28  ;;  %v5767_v13 = vmul.bf16 %v5751_v26, %v16555_v41  ;;  %v14269_v26 = vld [vmem:[#allocation5 + $0x70] sm:$0xff] }
 0x67e   : > { %v4834_v53 = vsel %vm498_vm10, %v4818_v27, %v4819_v25  ;;  %v5910_v27 = vmul.bf16 %v14174_v2, %v16560_v34 }
 0x67f   : > { %v4835_v38 = vsel %vm16614_vm14, %v4795_v6, %v4834_v53  ;;  %v5053_v39 = vpop.permute.xlu0 %5052  ;;  %v5547_v23 = vpop.permute.xlu1 %5546  ;;  %vm16619_vm14 = vcmask 7168  }
 0x680   : > { %4854 = vst [vmem:[#allocation2 + $0x3a8] sm:$0xff] %v4835_v38  ;;  %v5075_v18 = vrot.slane %v5053_v39, 4  ;;  %v5570_v33 = vrot.slane %v5547_v23, 4 }
 0x681   : > { %4932 = vrot.lane.b32.xlu0 %v4887_v20, %s16359_s29  ;;  %5186 = vrot.lane.b32.xlu1 %v5142_v7, %s16361_s21  ;;  %v5143_v20 = vmul.bf16 %v5127_v28, %v16557_v55  ;;  %v16617_v7 = vld [vmem:[#allocation65_spill] sm:$0xff] }
 0x682   : > { %v5090_v40 = vsel %vm498_vm10, %v5074_v37, %v5075_v18  ;;  %v6294_v37 = vmul.bf16 %v14174_v2, %v16617_v7 }
 0x683   : > { %v5091_v63 = vsel %vm16615_vm12, %v5051_v44, %v5090_v40  ;;  %v5549_v6 = vpop.permute.xlu0 %5548  ;;  %v4923_v17 = vpop.permute.xlu1 %4922  ;;  %v5623_v40 = vld [vmem:[#allocation5 + $0x68] sm:$0xf]  ;;  %vm16620_vm12 = vcmask 138240  }
 0x684   : > { %5110 = vst [vmem:[#allocation2 + $0x338] sm:$0xff] %v5091_v63  ;;  %v5571_v45 = vrot.slane %v5549_v6, 4  ;;  %v4946_v3 = vrot.slane %v4923_v17, 4 }
 0x685   : > { %5428 = vrot.lane.b32.xlu0 %v5383_v56, %s16355_s22  ;;  %5682 = vrot.lane.b32.xlu1 %v5638_v24, %s16357_s17  ;;  %v5639_v24 = vmul.bf16 %v5623_v40, %v16559_v14 }
 0x686   : > { %v5586_v0 = vsel %vm498_vm10, %v5570_v33, %v5571_v45 }
 0x687   : > { %v5587_v21 = vsel %vm831_vm1, %v5547_v23, %v5586_v0  ;;  %v4925_v44 = vpop.permute.xlu0 %4924  ;;  %v5419_v54 = vpop.permute.xlu1 %5418 }
 0x688   : > { %5606 = vst [vmem:[#allocation2 + $0x3f8] sm:$0xff] %v5587_v21  ;;  %v4947_v25 = vrot.slane %v4925_v44, 4  ;;  %v5442_v18 = vrot.slane %v5419_v54, 4 }
 0x689   : > { %5812 = vrot.lane.b32.xlu0 %v5767_v13, %s16360_s28  ;;  %5954 = vrot.lane.b32.xlu1 %v5910_v27, %s16354_s16 }
 0x68a   : > { %v4962_v53 = vsel %vm498_vm10, %v4946_v3, %v4947_v25  ;;  %v4633_v3 = vld [vmem:[#allocation5 + $0x78] sm:$0xf] }
 0x68b   : > { %v4963_v38 = vsel %vm16616_vm0, %v4923_v17, %v4962_v53  ;;  %v5421_v39 = vpop.permute.xlu0 %5420  ;;  %v5803_v23 = vpop.permute.xlu1 %5802  ;;  %vm16621_vm0 = vcmask 15360  }
 0x68c   : > { %4982 = vst [vmem:[#allocation2 + $0x598] sm:$0xff] %v4963_v38  ;;  %v5443_v29 = vrot.slane %v5421_v39, 4  ;;  %v5826_v33 = vrot.slane %v5803_v23, 4  ;;  %v5257_v39 = vld [vmem:[#allocation5 + $0x78] sm:$0xf] }
 0x68d   : > { %5188 = vrot.lane.b32.xlu0 %v5143_v20, %s16361_s21  ;;  %6338 = vrot.lane.b32.xlu1 %v6294_v37, %s16370_s9  ;;  %v14281_v37 = vld [vmem:[#allocation5 + $0x74] sm:$0xff] }
 0x68e   : > { %v5458_v63 = vsel %vm498_vm10, %v5442_v18, %v5443_v29  ;;  %v4505_v18 = vld [vmem:[#allocation5 + $0x78] sm:$0xf] }
 0x68f   : > { %v5459_v6 = vsel %vm16618_vm15, %v5419_v54, %v5458_v63  ;;  %v5805_v17 = vpop.permute.xlu0 %5804  ;;  %v5179_v56 = vpop.permute.xlu1 %5178  ;;  %vm16622_vm15 = vcmask 261120  }
 0x690   : > { %5478 = vst [vmem:[#allocation2 + $0x588] sm:$0xff] %v5459_v6  ;;  %v5827_v45 = vrot.slane %v5805_v17, 4  ;;  %v5202_v13 = vrot.slane %v5179_v56, 4  ;;  %v4521_v17 = vmul.bf16 %v4505_v18, %v16543_v50  ;;  %v5001_v18 = vld [vmem:[#allocation5 + $0x78] sm:$0xf] }
 0x691   : > { %5684 = vrot.lane.b32.xlu0 %v5639_v24, %s16357_s17  ;;  %4678 = vrot.lane.b32.xlu1 %v14269_v26, %s16396_s8  ;;  %v5971_v24 = vrot.slane %v13752_v4, 4 }
 0x692   : > { %v5842_v0 = vsel %vm498_vm10, %v5826_v33, %v5827_v45  ;;  %v4377_v45 = vld [vmem:[#allocation5 + $0x78] sm:$0xf] }
 0x693   : > { %v5843_v21 = vsel %vm16619_vm14, %v5803_v23, %v5842_v0  ;;  %v5181_v44 = vpop.permute.xlu0 %5180  ;;  %v5675_v54 = vpop.permute.xlu1 %5674  ;;  %v4393_v50 = vmul.bf16 %v4377_v45, %v16541_v59  ;;  %v4760_v59 = vmul.bf16 %v14269_v26, %v16544_v62  ;;  %vm16623_vm14 = vcmask 130048  }
 0x694   : > { %5862 = vst [vmem:[#allocation2 + $0x610] sm:$0xff] %v5843_v21  ;;  %v5203_v27 = vrot.slane %v5181_v44, 4  ;;  %v5698_v23 = vrot.slane %v5675_v54, 4  ;;  %v5016_v62 = vmul.bf16 %v14269_v26, %v16546_v30 }
 0x695   : > { %4680 = vrot.lane.b32.xlu0 %v4633_v3, %s16396_s8  ;;  %5302 = vrot.lane.b32.xlu1 %v14269_v26, %s16399_s19 }
 0x696   : > { %v5218_v25 = vsel %vm498_vm10, %v5202_v13, %v5203_v27  ;;  %v4745_v27 = vld [vmem:[#allocation5 + $0x78] sm:$0xf] }
 0x697   : > { %v5219_v28 = vsel %vm16620_vm12, %v5179_v56, %v5218_v25  ;;  %v5677_v53 = vpop.permute.xlu0 %5676  ;;  %v4671_v38 = vpop.permute.xlu1 %4670  ;;  %v4520_v56 = vmul.bf16 %v14269_v26, %v16542_v52  ;;  %v4392_v52 = vmul.bf16 %v14269_v26, %v16538_v47  ;;  %v11092_v47 = vunpack.i.h.bf16 %v13772_v8 }
 0x698   : > { %5238 = vst [vmem:[#allocation2 + $0x608] sm:$0xff] %v5219_v28  ;;  %v5699_v20 = vrot.slane %v5677_v53, 4  ;;  %v4692_v13 = vrot.slane %v4671_v38, 4  ;;  %vm16624_vm12 = vcmask 916480  }
 0x699   : > { %5304 = vrot.lane.b32.xlu0 %v5257_v39, %s16399_s19  ;;  %6454 = vrot.lane.b32.xlu1 %v14281_v37, %s16384_s2  ;;  %v4761_v39 = vmul.bf16 %v4745_v27, %v16545_v19  ;;  %v5017_v19 = vmul.bf16 %v5001_v18, %v16547_v51  ;;  %v6469_v8 = vrot.slane %v11092_v47, 4  ;;  %v5512_v51 = vmul.bf16 %v14269_v26, %v16548_v61 }
 0x69a   : > { %v5714_v29 = vsel %vm498_vm10, %v5698_v23, %v5699_v20  ;;  %v4888_v61 = vmul.bf16 %v14269_v26, %v16550_v32  ;;  %v5384_v32 = vmul.bf16 %v14269_v26, %v16552_v10  ;;  %v5768_v10 = vmul.bf16 %v14269_v26, %v16554_v12 }
 0x69b   : > { %v5715_v40 = vsel %vm16621_vm0, %v5675_v54, %v5714_v29  ;;  %v5947_v63 = vpop.permute.xlu0 %5946  ;;  %v5295_v6 = vpop.permute.xlu1 %5294  ;;  %vm16625_vm0 = vcmask 269312   ;;  %v5144_v12 = vmul.bf16 %v14269_v26, %v16556_v11  ;;  %v5640_v11 = vmul.bf16 %v14269_v26, %v16558_v9 }
 0x69c   : > { %5734 = vst [vmem:[#allocation2 + $0xd0] sm:$0xff] %v5715_v40  ;;  %v5970_v33 = vrot.slane %v5947_v63, 4  ;;  %v5316_v23 = vrot.slane %v5295_v6, 4  ;;  %v5912_v9 = vmul.bf16 %v14281_v37, %v16560_v34  ;;  %v6296_v34 = vmul.bf16 %v14281_v37, %v16617_v7 }
 0x69d   : > { %4568 = vrot.lane.b32.xlu0 %v4521_v17, %s16363_s0  ;;  %4566 = vrot.lane.b32.xlu1 %v4520_v56, %s16363_s0  ;;  %v5497_v56 = vld [vmem:[#allocation5 + $0x78] sm:$0xf]  ;;  %s323_s0 = sand.u32 1, %s16877_s7  }
 0x69e   : > { %v5986_v0 = vsel %vm498_vm10, %v5970_v33, %v5971_v24 }
 0x69f   : > { %v5987_v21 = vsel %vm874_vm5, %v5947_v63, %v5986_v0  ;;  %v4673_v44 = vpop.permute.xlu0 %4672  ;;  %v4559_v54 = vpop.permute.xlu1 %4558  ;;  %v5513_v0 = vmul.bf16 %v5497_v56, %v16549_v15 }
 0x6a0   : > { %6006 = vst [vmem:[#allocation2 + $0x5b0] sm:$0xff] %v5987_v21  ;;  %v4693_v4 = vrot.slane %v4673_v44, 4  ;;  %v4580_v30 = vrot.slane %v4559_v54, 4  ;;  %v4873_v44 = vld [vmem:[#allocation5 + $0x78] sm:$0xf] }
 0x6a1   : > { %4440 = vrot.lane.b32.xlu0 %v4393_v50, %s16364_s18  ;;  %4438 = vrot.lane.b32.xlu1 %v4392_v52, %s16364_s18  ;;  %v4889_v15 = vmul.bf16 %v4873_v44, %v16551_v5  ;;  %s10922_s18 = sshll.u32 %s16878_s4, 4 }
 0x6a2   : > { %v4708_v3 = vsel %vm498_vm10, %v4692_v13, %v4693_v4 }
 0x6a3   : > { %v4709_v25 = vsel %vm16622_vm15, %v4671_v38, %v4708_v3  ;;  %v5297_v28 = vpop.permute.xlu0 %5296  ;;  %v4431_v53 = vpop.permute.xlu1 %4430  ;;  %vm16626_vm15 = vcmask 277504  }
 0x6a4   : > { %4727 = vst [vmem:[#allocation2 + $0x100] sm:$0xff] %v4709_v25  ;;  %v5317_v20 = vrot.slane %v5297_v28, 4  ;;  %v4452_v27 = vrot.slane %v4431_v53, 4  ;;  %v5369_v25 = vld [vmem:[#allocation5 + $0x78] sm:$0xf] }
 0x6a5   : > { %4808 = vrot.lane.b32.xlu0 %v4761_v39, %s16365_s11  ;;  %4806 = vrot.lane.b32.xlu1 %v4760_v59, %s16365_s11  ;;  %v5385_v5 = vmul.bf16 %v5369_v25, %v16553_v35  ;;  %v6281_v25 = vld [vmem:[#allocation5 + $0x7c] sm:$0xf] }
 0x6a6   : > { %v5332_v29 = vsel %vm498_vm10, %v5316_v23, %v5317_v20  ;;  %v5753_v20 = vld [vmem:[#allocation5 + $0x78] sm:$0xf] }
 0x6a7   : > { %v5333_v38 = vsel %vm16623_vm14, %v5295_v6, %v5332_v29  ;;  %v6447_v40 = vpop.permute.xlu0 %6446  ;;  %v4799_v63 = vpop.permute.xlu1 %4798  ;;  %vm16627_vm14 = vcmask 252928   ;;  %v5769_v35 = vmul.bf16 %v5753_v20, %v16555_v41  ;;  %v6275_v20 = vld [vmem:[#allocation5 + $0x4c] sm:$0xf] }
 0x6a8   : > { %5351 = vst [vmem:[#allocation2 + $0x380] sm:$0xff] %v5333_v38  ;;  %v6468_v17 = vrot.slane %v6447_v40, 4  ;;  %v4820_v47 = vrot.slane %v4799_v63, 4 }
 0x6a9   : > { %5064 = vrot.lane.b32.xlu0 %v5017_v19, %s16362_s23  ;;  %5062 = vrot.lane.b32.xlu1 %v5016_v62, %s16362_s23  ;;  %v5129_v62 = vld [vmem:[#allocation5 + $0x78] sm:$0xf] }
 0x6aa   : > { %v6484_v24 = vsel %vm498_vm10, %v6468_v17, %v6469_v8  ;;  %v5145_v41 = vmul.bf16 %v5129_v62, %v16557_v55 }
 0x6ab   : > { %v6485_v33 = vsel %vm16624_vm12, %v6447_v40, %v6484_v24  ;;  %v4561_v6 = vpop.permute.xlu0 %4560  ;;  %v5055_v45 = vpop.permute.xlu1 %5054  ;;  %vm16628_vm12 = vcmask 146432  }
 0x6ac   : > { %6503 = vst [vmem:[#allocation2 + $0x408] sm:$0xff] %v6485_v33  ;;  %v4581_v21 = vrot.slane %v4561_v6, 4  ;;  %v5076_v40 = vrot.slane %v5055_v45, 4  ;;  %v5625_v6 = vld [vmem:[#allocation5 + $0x78] sm:$0xf] }
 0x6ad   : > { %5560 = vrot.lane.b32.xlu0 %v5513_v0, %s16358_s24  ;;  %5558 = vrot.lane.b32.xlu1 %v5512_v51, %s16358_s24  ;;  %v5641_v55 = vmul.bf16 %v5625_v6, %v16559_v14  ;;  %v6292_v6 = vmul.bf16 %v14101_v49, %v16617_v7  ;;  %s10355_s24 = scalar_lea.sflag [#allocation7], %s323_s0 }
 0x6ae   : > { %v4596_v50 = vsel %vm498_vm10, %v4580_v30, %v4581_v21 }
 0x6af   : > { %v14325_v52 = vsel %vm16625_vm0, %v4559_v54, %v4596_v50  ;;  %v4433_v13 = vpop.permute.xlu0 %4432  ;;  %v5551_v4 = vpop.permute.xlu1 %5550  ;;  %v6279_v50 = vld [vmem:[#allocation5 + $0x6c] sm:$0xf]  ;;  %vm16629_vm0 = vcmask 244736  }
 0x6b0   : > { %4615 = vst [vmem:[#allocation2 + $0x500] sm:$0xff] %v14325_v52  ;;  %v4453_v3 = vrot.slane %v4433_v13, 4  ;;  %v5572_v24 = vrot.slane %v5551_v4, 4 }
 0x6b1   : > { %4936 = vrot.lane.b32.xlu0 %v4889_v15, %s16359_s29  ;;  %4934 = vrot.lane.b32.xlu1 %v4888_v61, %s16359_s29 }
 0x6b2   : > { %v4468_v28 = vsel %vm498_vm10, %v4452_v27, %v4453_v3  ;;  %v16630_v27 = vld [vmem:[#allocation23_spill] sm:$0xff] }
 0x6b3   : > { %v14335_v54 = vsel %vm16626_vm15, %v4431_v53, %v4468_v28  ;;  %v4801_v39 = vpop.permute.xlu0 %4800  ;;  %v4927_v59 = vpop.permute.xlu1 %4926  ;;  %v6295_v14 = vmul.bf16 %v6279_v50, %v16630_v27  ;;  %vm16631_vm15 = vcmask 121856  }
 0x6b4   : > { %4487 = vst [vmem:[#allocation2 + $0x328] sm:$0xff] %v14335_v54  ;;  %v4821_v23 = vrot.slane %v4801_v39, 4  ;;  %v4948_v21 = vrot.slane %v4927_v59, 4 }
 0x6b5   : > { %5432 = vrot.lane.b32.xlu0 %v5385_v5, %s16355_s22  ;;  %5430 = vrot.lane.b32.xlu1 %v5384_v32, %s16355_s22  ;;  %v6297_v32 = vmul.bf16 %v6281_v25, %v16630_v27  ;;  %v6273_v25 = vld [vmem:[#allocation5 + $0x3c] sm:$0xf]  ;;  %s11609_s22 = smov [#allocation6]  }
 0x6b6   : > { %v4836_v18 = vsel %vm498_vm10, %v4820_v47, %v4821_v23 }
 0x6b7   : > { %v4837_v53 = vsel %vm16627_vm14, %v4799_v63, %v4836_v18  ;;  %v5057_v29 = vpop.permute.xlu0 %5056  ;;  %v5423_v38 = vpop.permute.xlu1 %5422  ;;  %v14384_v18 = vld [vmem:[#allocation5 + $0x44] sm:$0xff]  ;;  %vm16632_vm14 = vcmask 7168  }
 0x6b8   : > { %4855 = vst [vmem:[#allocation2 + $0x5e0] sm:$0xff] %v4837_v53  ;;  %v5077_v19 = vrot.slane %v5057_v29, 4  ;;  %v5444_v26 = vrot.slane %v5423_v38, 4 }
 0x6b9   : > { %5816 = vrot.lane.b32.xlu0 %v5769_v35, %s16360_s28  ;;  %5814 = vrot.lane.b32.xlu1 %v5768_v10, %s16360_s28  ;;  %v6291_v10 = vmul.bf16 %v6275_v20, %v16630_v27  ;;  %v6267_v20 = vld [vmem:[#allocation5 + $0xc] sm:$0xf]  ;;  %s324_s28 = scalar_lea.vmem [#allocation6], %s323_s0 }
 0x6ba   : > { %v5092_v8 = vsel %vm498_vm10, %v5076_v40, %v5077_v19  ;;  %v6290_v40 = vmul.bf16 %v14384_v18, %v16617_v7  ;;  %v11086_v19 = vunpack.i.l.bf16 %v13770_v16 }
 0x6bb   : > { %v14352_v17 = vsel %vm16628_vm12, %v5055_v45, %v5092_v8  ;;  %v5553_v63 = vpop.permute.xlu0 %5552  ;;  %v5807_v56 = vpop.permute.xlu1 %5806  ;;  %vm16633_vm12 = vcmask 138240  }
 0x6bc   : > { %5111 = vst [vmem:[#allocation2 + $0x480] sm:$0xff] %v14352_v17  ;;  %v5573_v33 = vrot.slane %v5553_v63, 4  ;;  %v5828_v47 = vrot.slane %v5807_v56, 4  ;;  %v6277_v63 = vld [vmem:[#allocation5 + $0x5c] sm:$0xf] }
 0x6bd   : > { %5192 = vrot.lane.b32.xlu0 %v5145_v41, %s16361_s21  ;;  %5190 = vrot.lane.b32.xlu1 %v5144_v12, %s16361_s21  ;;  %s16881_s21 = sld [smem:[#allocation117_spill]] }
 0x6be   : > { %v5588_v0 = vsel %vm498_vm10, %v5572_v24, %v5573_v33  ;;  %v6293_v33 = vmul.bf16 %v6277_v63, %v16630_v27 }
 0x6bf   : > { %v5589_v45 = vsel %vm831_vm1, %v5551_v4, %v5588_v0  ;;  %v4929_v51 = vpop.permute.xlu0 %4928  ;;  %v5183_v30 = vpop.permute.xlu1 %5182  ;;  %v6271_v0 = vld [vmem:[#allocation5 + $0x2c] sm:$0xf] }
 0x6c0   : > { %5607 = vst [vmem:[#allocation2 + $0x128] sm:$0xff] %v5589_v45  ;;  %v4949_v44 = vrot.slane %v4929_v51, 4  ;;  %v5204_v62 = vrot.slane %v5183_v30, 4  ;;  %v6471_v45 = vrot.slane %v11086_v19, 4  ;;  %v6283_v19 = vmul.bf16 %v6267_v20, %v16630_v27 }
 0x6c1   : > { %5688 = vrot.lane.b32.xlu0 %v5641_v55, %s16357_s17  ;;  %5686 = vrot.lane.b32.xlu1 %v5640_v11, %s16357_s17 }
 0x6c2   : > { %v4964_v13 = vsel %vm498_vm10, %v4948_v21, %v4949_v44  ;;  %v14403_v21 = vld [vmem:[#allocation5 + $0x24] sm:$0xff] }
 0x6c3   : > { %v14369_v15 = vsel %vm16629_vm0, %v4927_v59, %v4964_v13  ;;  %v5425_v4 = vpop.permute.xlu0 %5424  ;;  %v5679_v61 = vpop.permute.xlu1 %5678  ;;  %vm16634_vm0 = vcmask 15360   ;;  %s10365_s23 = scalar_lea.hbm %s16881_s21, %s10922_s18 }
 0x6c4   : > { %4983 = vst [vmem:[#allocation2 + $0x5a8] sm:$0xff] %v14369_v15  ;;  %v5445_v3 = vrot.slane %v5425_v4, 4  ;;  %v5700_v51 = vrot.slane %v5679_v61, 4 }
 0x6c5   : > { %6340 = vrot.lane.b32.xlu0 %v6295_v14, %s16370_s9  ;;  %5958 = vrot.lane.b32.xlu1 %v5912_v9, %s16354_s16  ;;  %v6287_v14 = vmul.bf16 %v6271_v0, %v16630_v27  ;;  %v6286_v9 = vmul.bf16 %v14403_v21, %v16617_v7  ;;  %s16677_s16 = smov 94  }
 0x6c6   : > { %v5460_v28 = vsel %vm498_vm10, %v5444_v26, %v5445_v3  ;;  %v5973_v26 = vrot.slane %v13762_v43, 4 }
 0x6c7   : > { %v5461_v39 = vsel %vm16631_vm15, %v5423_v38, %v5460_v28  ;;  %v5809_v59 = vpop.permute.xlu0 %5808  ;;  %v14379_v5 = vpop.permute.xlu1 %4674  ;;  %vm16635_vm15 = vcmask 916480   ;;  %v14415_v28 = vld [vmem:[#allocation5 + $0x34] sm:$0xff] }
 0x6c8   : > { %5479 = vst [vmem:[#allocation2 + $0x148] sm:$0xff] %v5461_v39  ;;  %v5829_v23 = vrot.slane %v5809_v59, 4  ;;  %v6288_v43 = vmul.bf16 %v14415_v28, %v16617_v7 }
 0x6c9   : > { %6344 = vrot.lane.b32.xlu0 %v6297_v32, %s16370_s9  ;;  %6342 = vrot.lane.b32.xlu1 %v6296_v34, %s16370_s9  ;;  %v6289_v34 = vmul.bf16 %v6273_v25, %v16630_v27 }
 0x6ca   : > { %v5844_v53 = vsel %vm498_vm10, %v5828_v47, %v5829_v23  ;;  %v4694_v47 = vrot.slane %v14379_v5, 4 }
 0x6cb   : > { %v5845_v29 = vsel %vm16632_vm14, %v5807_v56, %v5844_v53  ;;  %v5185_v38 = vpop.permute.xlu0 %5184  ;;  %v14390_v35 = vpop.permute.xlu1 %5298  ;;  %v14425_v53 = vld [vmem:[#allocation5 + $0x4] sm:$0xff]  ;;  %vm16636_vm14 = vcmask 261120  }
 0x6cc   : > { %5863 = vst [vmem:[#allocation2 + $0x460] sm:$0xff] %v5845_v29  ;;  %v5205_v8 = vrot.slane %v5185_v38, 4 }
 0x6cd   : > { %6332 = vrot.lane.b32.xlu0 %v6291_v10, %s16370_s9  ;;  %6330 = vrot.lane.b32.xlu1 %v6290_v40, %s16370_s9 }
 0x6ce   : > { %v5220_v56 = vsel %vm498_vm10, %v5204_v62, %v5205_v8  ;;  %v6282_v62 = vmul.bf16 %v14425_v53, %v16617_v7  ;;  %v5318_v8 = vrot.slane %v14390_v35, 4 }
 0x6cf   : > { %v5221_v41 = vsel %vm16633_vm12, %v5183_v30, %v5220_v56  ;;  %v5681_v12 = vpop.permute.xlu0 %5680  ;;  %v6451_v24 = vpop.permute.xlu1 %6450  ;;  %v6269_v56 = vld [vmem:[#allocation5 + $0x1c] sm:$0xf]  ;;  %vm16637_vm12 = vcmask 130048  }
 0x6d0   : > { %5239 = vst [vmem:[#allocation2 + $0x4f0] sm:$0xff] %v5221_v41  ;;  %v5701_v55 = vrot.slane %v5681_v12, 4  ;;  %v6470_v11 = vrot.slane %v6451_v24, 4  ;;  %v14436_v41 = vld [vmem:[#allocation5 + $0x14] sm:$0xff] }
 0x6d1   : > { %6336 = vrot.lane.b32.xlu0 %v6293_v33, %s16370_s9  ;;  %6334 = vrot.lane.b32.xlu1 %v6292_v6, %s16370_s9  ;;  %v6285_v6 = vmul.bf16 %v6269_v56, %v16630_v27  ;;  %v6284_v0 = vmul.bf16 %v14436_v41, %v16617_v7  ;;  %v16639_v7 = vld [vmem:[#allocation19_spill] sm:$0xff]  ;;  %v6649_v56 = vld [vmem:[#allocation5 + $0x7c] sm:$0xf] }
 0x6d2   : > { %v5716_v30 = vsel %vm498_vm10, %v5700_v51, %v5701_v55  ;;  %v6486_v44 = vsel %vm498_vm10, %v6470_v11, %v6471_v45  ;;  %v6151_v55 = vld [vmem:[#allocation5 + $0x6c] sm:$0xf]  ;;  %v11287_v11 = vld [vmem:[%s16149_s5 + $0x4] ss:$52 sps:$4 sm:$0xff]  }
 0x6d3   : > { %v5717_v50 = vsel %vm16634_vm0, %v5679_v61, %v5716_v30  ;;  %v6487_v49 = vsel %vm16635_vm15, %v6451_v24, %v6486_v44  ;;  %v5951_v13 = vpop.permute.xlu0 %5950  ;;  %v4563_v4 = vpop.permute.xlu1 %4562  ;;  %9371 = vmatprep.mubr.bf16.mxu0 %v11287_v11  ;;  %vm16638_vm0 = vcmask 269312   ;;  %vm16641_vm15 = vcmask 277504   ;;  %v6147_v11 = vld [vmem:[#allocation5 + $0x4c] sm:$0xf] }
 0x6d4   : > { %5735 = vst [vmem:[#allocation2 + $0x238] sm:$0xff] %v5717_v50  ;;  %6504 = vst [vmem:[#allocation2 + $0x3b8] sm:$0xff] %v6487_v49  ;;  %v5972_v3 = vrot.slane %v5951_v13, 4  ;;  %v4582_v45 = vrot.slane %v4563_v4, 4  ;;  %v6167_v50 = vmul.bf16 %v6151_v55, %v16639_v7  ;;  %v16640_v49 = vld [vmem:[#allocation60_spill] sm:$0xff] }
 0x6d5   : > { %6324 = vrot.lane.b32.xlu0 %v6287_v14, %s16370_s9  ;;  %6322 = vrot.lane.b32.xlu1 %v6286_v9, %s16370_s9  ;;  %v11333_v42 = vld [vmem:[#allocation2 + $0x614] ss:$-432 sps:$4 sm:$0xff]  }
 0x6d6   : > { %v5988_v61 = vsel %vm498_vm10, %v5972_v3, %v5973_v26  ;;  %v6153_v26 = vld [vmem:[#allocation5 + $0x7c] sm:$0xf] }
 0x6d7   : > { %v5989_v39 = vsel %vm874_vm5, %v5951_v13, %v5988_v61  ;;  %v4677_v59 = vpop.permute.xlu0 %4676  ;;  %v4435_v32 = vpop.permute.xlu1 %4434  ;;  %v6166_v13 = vmul.bf16 %v14174_v2, %v16640_v49 }
 0x6d8   : > { %6007 = vst [vmem:[#allocation2 + $0x310] sm:$0xff] %v5989_v39  ;;  %v4695_v23 = vrot.slane %v4677_v59, 4  ;;  %v4454_v14 = vrot.slane %v4435_v32, 4  ;;  %v6169_v39 = vmul.bf16 %v6153_v26, %v16639_v7  ;;  %v6168_v59 = vmul.bf16 %v14281_v37, %v16640_v49 }
 0x6d9   : > { %6328 = vrot.lane.b32.xlu0 %v6289_v34, %s16370_s9  ;;  %6326 = vrot.lane.b32.xlu1 %v6288_v43, %s16370_s9 }
 0x6da   : > { %v4710_v29 = vsel %vm498_vm10, %v4694_v47, %v4695_v23  ;;  %v6647_v47 = vld [vmem:[#allocation5 + $0x6c] sm:$0xf] }
 0x6db   : > { %v4711_v38 = vsel %vm16636_vm14, %v14379_v5, %v4710_v29  ;;  %v5301_v10 = vpop.permute.xlu0 %5300  ;;  %v4803_v40 = vpop.permute.xlu1 %4802  ;;  %vm16642_vm14 = vcmask 252928  }
 0x6dc   : > { %4728 = vst [vmem:[#allocation2 + $0x8] sm:$0xff] %v4711_v38  ;;  %v5319_v63 = vrot.slane %v5301_v10, 4  ;;  %v4822_v34 = vrot.slane %v4803_v40, 4  ;;  %v16643_v38 = vld [vmem:[#allocation18_spill] sm:$0xff] }
 0x6dd   : > { %6316 = vrot.lane.b32.xlu0 %v6283_v19, %s16370_s9  ;;  %6314 = vrot.lane.b32.xlu1 %v6282_v62, %s16370_s9  ;;  %v6663_v10 = vmul.bf16 %v6647_v47, %v16643_v38  ;;  %v16644_v19 = vld [vmem:[#allocation58_spill] sm:$0xff] }
 0x6de   : > { %v5334_v5 = vsel %vm498_vm10, %v5318_v8, %v5319_v63  ;;  %v6662_v62 = vmul.bf16 %v14174_v2, %v16644_v19  ;;  %v6665_v2 = vmul.bf16 %v6649_v56, %v16643_v38 }
 0x6df   : > { %v14443_v12 = vsel %vm16637_vm12, %v14390_v35, %v5334_v5  ;;  %v4565_v24 = vpop.permute.xlu0 %4564  ;;  %v5059_v33 = vpop.permute.xlu1 %5058  ;;  %v11308_v5 = vld [vmem:[%s16149_s5 + $0xc] ss:$52 sps:$4 sm:$0xff]   ;;  %vm16645_vm12 = vcmask 146432  }
 0x6e0   : > { %v4583_v51 = vrot.slane %v4565_v24, 4  ;;  %v5078_v8 = vrot.slane %v5059_v33, 4  ;;  %9484 = vmatprep.mubr.bf16.mxu1 %v11308_v5  ;;  %v6658_v5 = vmul.bf16 %v14384_v18, %v16644_v19 }
 0x6e1   : > { %6320 = vrot.lane.b32.xlu0 %v6285_v6, %s16370_s9  ;;  %6318 = vrot.lane.b32.xlu1 %v6284_v0, %s16370_s9 }
 0x6e2   : > { %v4598_v35 = vsel %vm498_vm10, %v4582_v45, %v4583_v51  ;;  %v6664_v45 = vmul.bf16 %v14281_v37, %v16644_v19 }
 0x6e3   : > { %v14455_v30 = vsel %vm16638_vm0, %v4563_v4, %v4598_v35  ;;  %v4437_v27 = vpop.permute.xlu0 %4436  ;;  %v5555_v44 = vpop.permute.xlu1 %5554  ;;  %vm16646_vm0 = vcmask 244736  }
 0x6e4   : > { %v4455_v9 = vrot.slane %v4437_v27, 4  ;;  %v5574_v51 = vrot.slane %v5555_v44, 4 }
 0x6e5   : > { %6212 = vrot.lane.b32.xlu0 %v6167_v50, %s16356_s25  ;;  %6210 = vrot.lane.b32.xlu1 %v6166_v13, %s16356_s25  ;;  %v6163_v13 = vmul.bf16 %v6147_v11, %v16639_v7 }
 0x6e6   : > { %v4470_v3 = vsel %vm498_vm10, %v4454_v14, %v4455_v9  ;;  %v6162_v14 = vmul.bf16 %v14384_v18, %v16640_v49 }
 0x6e7   : > { %v14464_v25 = vsel %vm16641_vm15, %v4435_v32, %v4470_v3  ;;  %v4805_v4 = vpop.permute.xlu0 %4804  ;;  %v4931_v61 = vpop.permute.xlu1 %4930  ;;  %v6149_v3 = vld [vmem:[#allocation5 + $0x5c] sm:$0xf]  ;;  %vm16647_vm15 = vcmask 121856  }
 0x6e8   : > { %4488 = vst [vmem:[#allocation2 + $0x440] sm:$0xff] %v14464_v25  ;;  %v4823_v43 = vrot.slane %v4805_v4, 4  ;;  %v4950_v9 = vrot.slane %v4931_v61, 4  ;;  %v14498_v4 = vld [vmem:[#allocation5 + $0x54] sm:$0xff] }
 0x6e9   : > { %6216 = vrot.lane.b32.xlu0 %v6169_v39, %s16356_s25  ;;  %6214 = vrot.lane.b32.xlu1 %v6168_v59, %s16356_s25  ;;  %v6164_v47 = vmul.bf16 %v14498_v4, %v16640_v49 }
 0x6ea   : > { %v4838_v23 = vsel %vm498_vm10, %v4822_v34, %v4823_v43  ;;  %v6165_v43 = vmul.bf16 %v6149_v3, %v16639_v7 }
 0x6eb   : > { %v14474_v32 = vsel %vm16642_vm14, %v4803_v40, %v4838_v23  ;;  %v5061_v20 = vpop.permute.xlu0 %5060  ;;  %v5427_v29 = vpop.permute.xlu1 %5426  ;;  %vm16648_vm14 = vcmask 7168  }
 0x6ec   : > { %v5079_v63 = vrot.slane %v5061_v20, 4  ;;  %v5446_v23 = vrot.slane %v5427_v29, 4 }
 0x6ed   : > { %6708 = vrot.lane.b32.xlu0 %v6663_v10, %s16352_s27  ;;  %6706 = vrot.lane.b32.xlu1 %v6662_v62, %s16352_s27  ;;  %v6643_v10 = vld [vmem:[#allocation5 + $0x4c] sm:$0xf] }
 0x6ee   : > { %v5094_v40 = vsel %vm498_vm10, %v5078_v8, %v5079_v63  ;;  %v6659_v56 = vmul.bf16 %v6643_v10, %v16643_v38  ;;  %v6145_v10 = vld [vmem:[#allocation5 + $0x3c] sm:$0xf] }
 0x6ef   : > { %v14486_v24 = vsel %vm16645_vm12, %v5059_v33, %v5094_v40  ;;  %v5557_v6 = vpop.permute.xlu0 %5556  ;;  %v5811_v0 = vpop.permute.xlu1 %5810  ;;  %v5975_v40 = vrot.slane %v13750_v31, 4  ;;  %vm16649_vm12 = vcmask 138240  }
 0x6f0   : > { %v5575_v55 = vrot.slane %v5557_v6, 4  ;;  %v5830_v6 = vrot.slane %v5811_v0, 4 }
 0x6f1   : > { %6712 = vrot.lane.b32.xlu0 %v6665_v2, %s16352_s27  ;;  %6710 = vrot.lane.b32.xlu1 %v6664_v45, %s16352_s27 }
 0x6f2   : > { %v5590_v35 = vsel %vm498_vm10, %v5574_v51, %v5575_v55  ;;  %v6645_v51 = vld [vmem:[#allocation5 + $0x5c] sm:$0xf] }
 0x6f3   : > { %v5591_v27 = vsel %vm831_vm1, %v5555_v44, %v5590_v35  ;;  %v4933_v33 = vpop.permute.xlu0 %4932  ;;  %v5187_v50 = vpop.permute.xlu1 %5186  ;;  %v6661_v31 = vmul.bf16 %v6645_v51, %v16643_v38 }
 0x6f4   : > { %5608 = vst [vmem:[#allocation2 + $0x320] sm:$0xff] %v5591_v27  ;;  %v4951_v26 = vrot.slane %v4933_v33, 4 }
 0x6f5   : > { %6204 = vrot.lane.b32.xlu0 %v6163_v13, %s16356_s25  ;;  %6202 = vrot.lane.b32.xlu1 %v6162_v14, %s16356_s25  ;;  %v6660_v13 = vmul.bf16 %v14498_v4, %v16644_v19  ;;  %v5206_v14 = vrot.slane %v5187_v50, 4 }
 0x6f6   : > { %v4966_v39 = vsel %vm498_vm10, %v4950_v9, %v4951_v26  ;;  %v6143_v26 = vld [vmem:[#allocation5 + $0x2c] sm:$0xf] }
 0x6f7   : > { %v14504_v44 = vsel %vm16646_vm0, %v4931_v61, %v4966_v39  ;;  %v5429_v59 = vpop.permute.xlu0 %5428  ;;  %v5683_v34 = vpop.permute.xlu1 %5682  ;;  %vm16650_vm0 = vcmask 15360  }
 0x6f8   : > { %v5447_v20 = vrot.slane %v5429_v59, 4 }
 0x6f9   : > { %6208 = vrot.lane.b32.xlu0 %v6165_v43, %s16356_s25  ;;  %6206 = vrot.lane.b32.xlu1 %v6164_v47, %s16356_s25  ;;  %v6159_v43 = vmul.bf16 %v6143_v26, %v16639_v7  ;;  %v6158_v47 = vmul.bf16 %v14403_v21, %v16640_v49 }
 0x6fa   : > { %v5462_v62 = vsel %vm498_vm10, %v5446_v23, %v5447_v20  ;;  %v5702_v23 = vrot.slane %v5683_v34, 4 }
 0x6fb   : > { %v5463_v8 = vsel %vm16647_vm15, %v5427_v29, %v5462_v62  ;;  %v5813_v61 = vpop.permute.xlu0 %5812  ;;  %v5955_v63 = vpop.permute.xlu1 %5954  ;;  %vm16651_vm15 = vcmask 261120  }
 0x6fc   : > { %5480 = vst [vmem:[#allocation2 + $0x2e8] sm:$0xff] %v5463_v8  ;;  %v5831_v2 = vrot.slane %v5813_v61, 4  ;;  %v5974_v45 = vrot.slane %v5955_v63, 4 }
 0x6fd   : > { %6700 = vrot.lane.b32.xlu0 %v6659_v56, %s16352_s27  ;;  %6698 = vrot.lane.b32.xlu1 %v6658_v5, %s16352_s27  ;;  %v6160_v56 = vmul.bf16 %v14415_v28, %v16640_v49  ;;  %v11087_v5 = vunpack.i.h.bf16 %v13770_v16  ;;  %v6654_v16 = vmul.bf16 %v14403_v21, %v16644_v19 }
 0x6fe   : > { %v5846_v29 = vsel %vm498_vm10, %v5830_v6, %v5831_v2  ;;  %v5990_v55 = vsel %vm498_vm10, %v5974_v45, %v5975_v40  ;;  %v6639_v2 = vld [vmem:[#allocation5 + $0x2c] sm:$0xf] }
 0x6ff   : > { %v5847_v11 = vsel %vm16648_vm14, %v5811_v0, %v5846_v29  ;;  %v5991_v35 = vsel %vm874_vm5, %v5955_v63, %v5990_v55  ;;  %v5189_v27 = vpop.permute.xlu0 %5188  ;;  %v14523_v33 = vpop.permute.xlu1 %6338  ;;  %v6161_v63 = vmul.bf16 %v6145_v10, %v16639_v7  ;;  %v6655_v55 = vmul.bf16 %v6639_v2, %v16643_v38  ;;  %v6139_v10 = vld [vmem:[#allocation5 + $0xc] sm:$0xf] }
 0x700   : > { %5864 = vst [vmem:[#allocation2 + $0x60] sm:$0xff] %v5847_v11  ;;  %6008 = vst [vmem:[#allocation2 + $0x630] sm:$0xff] %v5991_v35  ;;  %v5207_v9 = vrot.slane %v5189_v27, 4  ;;  %v6473_v11 = vrot.slane %v11087_v5, 4  ;;  %vm16652_vm14 = vcmask 130048  }
 0x701   : > { %6704 = vrot.lane.b32.xlu0 %v6661_v31, %s16352_s27  ;;  %6702 = vrot.lane.b32.xlu1 %v6660_v13, %s16352_s27  ;;  %v6641_v13 = vld [vmem:[#allocation5 + $0x3c] sm:$0xf] }
 0x702   : > { %v5222_v0 = vsel %vm498_vm10, %v5206_v14, %v5207_v9 }
 0x703   : > { %v14532_v3 = vsel %vm16649_vm12, %v5187_v50, %v5222_v0  ;;  %v5685_v39 = vpop.permute.xlu0 %5684  ;;  %v4679_v59 = vpop.permute.xlu1 %4678  ;;  %vm16653_vm12 = vcmask 916480  }
 0x704   : > { %5240 = vst [vmem:[#allocation2 + $0x5a0] sm:$0xff] %v14532_v3  ;;  %v5703_v20 = vrot.slane %v5685_v39, 4  ;;  %v4696_v40 = vrot.slane %v4679_v59, 4 }
 0x705   : > { %6196 = vrot.lane.b32.xlu0 %v6159_v43, %s16356_s25  ;;  %6194 = vrot.lane.b32.xlu1 %v6158_v47, %s16356_s25  ;;  %v6657_v43 = vmul.bf16 %v6641_v13, %v16643_v38  ;;  %v6656_v47 = vmul.bf16 %v14415_v28, %v16644_v19 }
 0x706   : > { %v5718_v62 = vsel %vm498_vm10, %v5702_v23, %v5703_v20 }
 0x707   : > { %v5719_v50 = vsel %vm16650_vm0, %v5683_v34, %v5718_v62  ;;  %v4681_v8 = vpop.permute.xlu0 %4680  ;;  %v5303_v61 = vpop.permute.xlu1 %5302  ;;  %vm16654_vm0 = vcmask 269312  }
 0x708   : > { %5736 = vst [vmem:[#allocation2 + $0x20] sm:$0xff] %v5719_v50  ;;  %v4697_v6 = vrot.slane %v4681_v8, 4  ;;  %v5320_v35 = vrot.slane %v5303_v61, 4 }
 0x709   : > { %6200 = vrot.lane.b32.xlu0 %v6161_v63, %s16356_s25  ;;  %6198 = vrot.lane.b32.xlu1 %v6160_v56, %s16356_s25  ;;  %v6155_v63 = vmul.bf16 %v6139_v10, %v16639_v7  ;;  %v6154_v56 = vmul.bf16 %v14425_v53, %v16640_v49  ;;  %v6637_v10 = vld [vmem:[#allocation5 + $0x1c] sm:$0xf] }
 0x70a   : > { %v4712_v45 = vsel %vm498_vm10, %v4696_v40, %v4697_v6  ;;  %v6141_v6 = vld [vmem:[#allocation5 + $0x1c] sm:$0xf] }
 0x70b   : > { %v14550_v34 = vsel %vm16651_vm15, %v4679_v59, %v4712_v45  ;;  %v5305_v51 = vpop.permute.xlu0 %5304  ;;  %v6455_v29 = vpop.permute.xlu1 %6454  ;;  %vm16655_vm15 = vcmask 277504  }
 0x70c   : > { %v5321_v27 = vrot.slane %v5305_v51, 4  ;;  %v6472_v31 = vrot.slane %v6455_v29, 4  ;;  %v7510_v51 = vld [vmem:[#allocation2 + $0x548] sm:$0xff] }
 0x70d   : > { %6692 = vrot.lane.b32.xlu0 %v6655_v55, %s16352_s27  ;;  %6690 = vrot.lane.b32.xlu1 %v6654_v16, %s16352_s27  ;;  %v10727_v55 = vcombine.high %v7510_v51, %v14325_v52 }
 0x70e   : > { %v5336_v14 = vsel %vm498_vm10, %v5320_v35, %v5321_v27  ;;  %v6488_v9 = vsel %vm498_vm10, %v6472_v31, %v6473_v11  ;;  %v6157_v27 = vmul.bf16 %v6141_v6, %v16639_v7  ;;  %v6023_v6 = vld [vmem:[#allocation5 + $0x6c] sm:$0xf] }
 0x70f   : > { %v14560_v26 = vsel %vm16652_vm14, %v5303_v61, %v5336_v14  ;;  %v6489_v0 = vsel %vm16653_vm12, %v6455_v29, %v6488_v9  ;;  %v4569_v39 = vpop.permute.xlu0 %4568  ;;  %v4567_v59 = vpop.permute.xlu1 %4566  ;;  %v6635_v14 = vld [vmem:[#allocation5 + $0xc] sm:$0xf]  ;;  %v10726_v9 = vcombine.low %v7510_v51, %v14325_v52  ;;  %vm16656_vm14 = vcmask 252928   ;;  %v11243_v52 = vld [vmem:[#allocation2 + $0x490] ss:$-376 sps:$4 sm:$0xff]  }
 0x710   : > { %6505 = vst [vmem:[#allocation2 + $0x430] sm:$0xff] %v6489_v0  ;;  %v4585_v23 = vrot.slane %v4569_v39, 4  ;;  %v4584_v20 = vrot.slane %v4567_v59, 4  ;;  %v11245_v39 = vld [vmem:[#allocation2 + $0x494] ss:$-376 sps:$4 sm:$0xff]   ;;  %vm16657_vm12 = vcmask 146432  }
 0x711   : > { %6696 = vrot.lane.b32.xlu0 %v6657_v43, %s16352_s27  ;;  %6694 = vrot.lane.b32.xlu1 %v6656_v47, %s16352_s27  ;;  %v6651_v43 = vmul.bf16 %v6635_v14, %v16643_v38  ;;  %v6650_v47 = vmul.bf16 %v14425_v53, %v16644_v19  ;;  %v6652_v53 = vmul.bf16 %v14436_v41, %v16644_v19 }
 0x712   : > { %v4600_v62 = vsel %vm498_vm10, %v4584_v20, %v4585_v23 }
 0x713   : > { %v4601_v50 = vsel %vm16654_vm0, %v4567_v59, %v4600_v62  ;;  %v4441_v8 = vpop.permute.xlu0 %4440  ;;  %v4439_v61 = vpop.permute.xlu1 %4438  ;;  %vm16661_vm0 = vcmask 121856  }
 0x714   : > { %v4457_v5 = vrot.slane %v4441_v8, 4  ;;  %v4456_v40 = vrot.slane %v4439_v61, 4  ;;  %v10728_v2 = vcombine.low %v14455_v30, %v4601_v50  ;;  %v10729_v45 = vcombine.high %v14455_v30, %v4601_v50  ;;  %v11248_v50 = vld [vmem:[#allocation2 + $0x10c] ss:$1032 sps:$4 sm:$0xff]  }
 0x715   : > { %6188 = vrot.lane.b32.xlu0 %v6155_v63, %s16356_s25  ;;  %6186 = vrot.lane.b32.xlu1 %v6154_v56, %s16356_s25  ;;  %v6156_v30 = vmul.bf16 %v14436_v41, %v16640_v49  ;;  %v6653_v56 = vmul.bf16 %v6637_v10, %v16643_v38  ;;  %v7542_v38 = vld [vmem:[#allocation2 + $0x338] sm:$0xff] }
 0x716   : > { %v4472_v29 = vsel %vm498_vm10, %v4456_v40, %v4457_v5  ;;  %9339 = vmatprep.subr.bf16.mxu0 %v10729_v45  ;;  %v10759_v19 = vcombine.high %v7542_v38, %v14352_v17 }
 0x717   : > { %v14580_v16 = vsel %vm16655_vm15, %v4439_v61, %v4472_v29  ;;  %v4809_v11 = vpop.permute.xlu0 %4808  ;;  %v4807_v35 = vpop.permute.xlu1 %4806  ;;  %9340 = vmatpush1.bf16.msra.mxu0 %v10728_v2  ;;  %v14603_v2 = vld [vmem:[#allocation5 + $0x64] sm:$0xff]  ;;  %vm16664_vm15 = vcmask 7168  }
 0x718   : > { %4489 = vst [vmem:[#allocation2 + $0x378] sm:$0xff] %v14580_v16  ;;  %v4825_v31 = vrot.slane %v4809_v11, 4  ;;  %v4824_v13 = vrot.slane %v4807_v35, 4  ;;  %9341 = vmatprep.subr.bf16.mxu0 %v10727_v55  ;;  %v11246_v29 = vld [vmem:[#allocation2 + $0x108] ss:$1032 sps:$4 sm:$0xff]   ;;  %v10721_v41 = vcombine.high %v14464_v25, %v14580_v16 }
 0x719   : > { %6192 = vrot.lane.b32.xlu0 %v6157_v27, %s16356_s25  ;;  %6190 = vrot.lane.b32.xlu1 %v6156_v30, %s16356_s25  ;;  %s11523_s25 = sshll.u32 %s11609_s22, 4  ;;  %s11524_s25 = int_to_ptr.vmem [resolvable:$false] %s11523_s25 }
 0x71a   : > { %v4840_v0 = vsel %vm498_vm10, %v4824_v13, %v4825_v31  ;;  %v16659_v31 = vld [vmem:[#allocation63_spill] sm:$0xff]  ;;  %s11525_s2 = scalar_lea.vmem %s11524_s25, 32 }
 0x71b   : > { %v14591_v7 = vsel %vm16656_vm14, %v4807_v35, %v4840_v0  ;;  %v5065_v49 = vpop.permute.xlu0 %5064  ;;  %v5063_v59 = vpop.permute.xlu1 %5062  ;;  %9342 = vmatpush1.bf16.msra.mxu0 %v10726_v9  ;;  %v6038_v13 = vmul.bf16 %v14603_v2, %v16659_v31  ;;  %v6025_v0 = vld [vmem:[#allocation5 + $0x7c] sm:$0xf]  ;;  %vm16665_vm14 = vcmask 138240  }
 0x71c   : > { %v5081_v23 = vrot.slane %v5065_v49, 4  ;;  %v5080_v20 = vrot.slane %v5063_v59, 4  ;;  %9343 = vmatprep.subr.bf16.mxu0 %v11245_v39  ;;  %v10720_v39 = vcombine.low %v14464_v25, %v14580_v16  ;;  %v10758_v49 = vcombine.low %v7542_v38, %v14352_v17  ;;  %v7501_v25 = vld [vmem:[#allocation2 + $0x18] sm:$0xff]  ;;  %v16663_v38 = vld [vmem:[#allocation61_spill] sm:$0xff] }
 0x71d   : > { %6684 = vrot.lane.b32.xlu0 %v6651_v43, %s16352_s27  ;;  %6682 = vrot.lane.b32.xlu1 %v6650_v47, %s16352_s27 }
 0x71e   : > { %v5096_v62 = vsel %vm498_vm10, %v5080_v20, %v5081_v23  ;;  %v11251_v23 = vld [vmem:[#allocation2 + $0x3cc] ss:$504 sps:$4 sm:$0xff]  }
 0x71f   : > { %v5097_v8 = vsel %vm16657_vm12, %v5063_v59, %v5096_v62  ;;  %v5561_v61 = vpop.permute.xlu0 %5560  ;;  %v5559_v63 = vpop.permute.xlu1 %5558  ;;  %9344 = vmatpush1.bf16.msra.mxu0 %v11243_v52  ;;  %v7502_v59 = vld [vmem:[#allocation2 + $0x450] sm:$0xff]  ;;  %vm16666_vm12 = vcmask 15360  }
 0x720   : > { %v5577_v5 = vrot.slane %v5561_v61, 4  ;;  %v5576_v40 = vrot.slane %v5559_v63, 4  ;;  %9345 = vmatprep.subr.bf16.mxu0 %v11248_v50  ;;  %v10760_v45 = vcombine.low %v14486_v24, %v5097_v8  ;;  %v10761_v51 = vcombine.high %v14486_v24, %v5097_v8  ;;  %v16658_v24 = vld [vmem:[#allocation22_spill] sm:$0xff]  ;;  %v6519_v8 = vld [vmem:[#allocation5 + $0x6c] sm:$0xf] }
 0x721   : > { %6688 = vrot.lane.b32.xlu0 %v6653_v56, %s16352_s27  ;;  %6686 = vrot.lane.b32.xlu1 %v6652_v53, %s16352_s27  ;;  %v6039_v30 = vmul.bf16 %v6023_v6, %v16658_v24  ;;  %v10719_v47 = vcombine.high %v7502_v59, %v14335_v54  ;;  %v6041_v62 = vmul.bf16 %v6025_v0, %v16658_v24  ;;  %v7500_v56 = vld [vmem:[#allocation2 + $0x4d8] sm:$0xff] }
 0x722   : > { %v5592_v55 = vsel %vm498_vm10, %v5576_v40, %v5577_v5  ;;  %9452 = vmatprep.subr.bf16.mxu1 %v10761_v51  ;;  %v6040_v50 = vmul.bf16 %v14281_v37, %v16659_v31  ;;  %v10718_v61 = vcombine.low %v7502_v59, %v14335_v54  ;;  %v10717_v5 = vcombine.high %v7500_v56, %v7501_v25  ;;  %v11254_v37 = vld [vmem:[#allocation2 + $0x1fc] ss:$248 sps:$4 sm:$0xff]   ;;  %v16662_v51 = vld [vmem:[#allocation21_spill] sm:$0xff] }
 0x723   : > { %v14614_v11 = vsel %vm831_vm1, %v5559_v63, %v5592_v55  ;;  %v4937_v35 = vpop.permute.xlu0 %4936  ;;  %v4935_v27 = vpop.permute.xlu1 %4934  ;;  %9346 = vmatpush1.bf16.msra.mxu0 %v11246_v29  ;;  %9453 = vmatpush1.bf16.msra.mxu1 %v10760_v45  ;;  %vm16660_vm1 = vcmask 244736   ;;  %v11249_v63 = vld [vmem:[#allocation2 + $0x3c8] ss:$504 sps:$4 sm:$0xff]   ;;  %v6535_v29 = vmul.bf16 %v6519_v8, %v16662_v51  ;;  %v6534_v55 = vmul.bf16 %v14603_v2, %v16663_v38 }
 0x724   : > { %v4953_v14 = vrot.slane %v4937_v35, 4  ;;  %v4952_v9 = vrot.slane %v4935_v27, 4  ;;  %9347 = vmatprep.subr.bf16.mxu0 %v10721_v41  ;;  %9454 = vmatprep.subr.bf16.mxu1 %v10759_v19  ;;  %v7499_v41 = vld [vmem:[#allocation2 + $0x3b0] sm:$0xff]  ;;  %v6521_v35 = vld [vmem:[#allocation5 + $0x7c] sm:$0xf]  ;;  %v10745_v8 = vcombine.high %v14474_v32, %v14591_v7 }
 0x725   : > { %6084 = vrot.lane.b32.xlu0 %v6039_v30, %s16353_s14  ;;  %6082 = vrot.lane.b32.xlu1 %v6038_v13, %s16353_s14  ;;  %v11252_v30 = vld [vmem:[#allocation2 + $0x1f8] ss:$248 sps:$4 sm:$0xff]  }
 0x726   : > { %v4968_v43 = vsel %vm498_vm10, %v4952_v9, %v4953_v14  ;;  %v7498_v13 = vld [vmem:[#allocation2 + $0x2b0] sm:$0xff] }
 0x727   : > { %v14627_v20 = vsel %vm16660_vm1, %v4935_v27, %v4968_v43  ;;  %v5433_v10 = vpop.permute.xlu0 %5432  ;;  %v5431_v52 = vpop.permute.xlu1 %5430  ;;  %9348 = vmatpush1.bf16.msra.mxu0 %v10720_v39  ;;  %9455 = vmatpush1.bf16.msra.mxu1 %v10758_v49  ;;  %v10716_v27 = vcombine.low %v7500_v56, %v7501_v25  ;;  %v10715_v9 = vcombine.high %v7498_v13, %v7499_v41 }
 0x728   : > { %v5449_v17 = vrot.slane %v5433_v10, 4  ;;  %v5448_v16 = vrot.slane %v5431_v52, 4  ;;  %9349 = vmatprep.subr.bf16.mxu0 %v10719_v47  ;;  %9456 = vmatprep.subr.bf16.mxu1 %v11251_v23  ;;  %v10753_v0 = vcombine.high %v14504_v44, %v14627_v20  ;;  %v6537_v43 = vmul.bf16 %v6521_v35, %v16662_v51  ;;  %v14649_v47 = vld [vmem:[#allocation2 + $0x200] sm:$0xff] }
 0x729   : > { %6088 = vrot.lane.b32.xlu0 %v6041_v62, %s16353_s14  ;;  %6086 = vrot.lane.b32.xlu1 %v6040_v50, %s16353_s14  ;;  %v6536_v23 = vmul.bf16 %v14649_v47, %v16663_v38  ;;  %v6019_v62 = vld [vmem:[#allocation5 + $0x4c] sm:$0xf]  ;;  %v10714_v50 = vcombine.low %v7498_v13, %v7499_v41  ;;  %v10752_v25 = vcombine.low %v14504_v44, %v14627_v20  ;;  %v11257_v41 = vld [vmem:[#allocation2 + $0x3ac] ss:$568 sps:$4 sm:$0xff]  }
 0x72a   : > { %v5464_v53 = vsel %vm498_vm10, %v5448_v16, %v5449_v17  ;;  %v7534_v17 = vld [vmem:[#allocation2 + $0x598] sm:$0xff]  ;;  %v6036_v13 = vmul.bf16 %v14498_v4, %v16659_v31 }
 0x72b   : > { %v14637_v40 = vsel %vm16661_vm0, %v5431_v52, %v5464_v53  ;;  %v5817_v6 = vpop.permute.xlu0 %5816  ;;  %v5815_v45 = vpop.permute.xlu1 %5814  ;;  %9350 = vmatpush1.bf16.msra.mxu0 %v10718_v61  ;;  %9457 = vmatpush1.bf16.msra.mxu1 %v11249_v63  ;;  %v10751_v61 = vcombine.high %v7534_v17, %v14369_v15 }
 0x72c   : > { %v5833_v54 = vrot.slane %v5817_v6, 4  ;;  %v5832_v19 = vrot.slane %v5815_v45, 4  ;;  %9351 = vmatprep.subr.bf16.mxu0 %v10717_v5  ;;  %9458 = vmatprep.subr.bf16.mxu1 %v11254_v37  ;;  %v6035_v5 = vmul.bf16 %v6019_v62, %v16658_v24  ;;  %v6034_v37 = vmul.bf16 %v14384_v18, %v16659_v31  ;;  %v6021_v6 = vld [vmem:[#allocation5 + $0x5c] sm:$0xf] }
 0x72d   : > { %6580 = vrot.lane.b32.xlu0 %v6535_v29, %s16351_s26  ;;  %6578 = vrot.lane.b32.xlu1 %v6534_v55, %s16351_s26  ;;  %v10750_v29 = vcombine.low %v7534_v17, %v14369_v15  ;;  %v6358_v15 = vrot.slane %v14523_v33, 4  ;;  %v7523_v17 = vld [vmem:[#allocation2 + $0xc8] sm:$0xff] }
 0x72e   : > { %v5848_v14 = vsel %vm498_vm10, %v5832_v19, %v5833_v54  ;;  %v11260_v54 = vld [vmem:[#allocation2 + $0x2a4] ss:$720 sps:$4 sm:$0xff]  }
 0x72f   : > { %v5849_v39 = vsel %vm16664_vm15, %v5815_v45, %v5848_v14  ;;  %v5193_v49 = vpop.permute.xlu0 %5192  ;;  %v5191_v59 = vpop.permute.xlu1 %5190  ;;  %9352 = vmatpush1.bf16.msra.mxu0 %v10716_v27  ;;  %9459 = vmatpush1.bf16.msra.mxu1 %v11252_v30  ;;  %v10744_v45 = vcombine.low %v14474_v32, %v14591_v7  ;;  %v6037_v30 = vmul.bf16 %v6021_v6, %v16658_v24  ;;  %v6515_v14 = vld [vmem:[#allocation5 + $0x4c] sm:$0xf]  ;;  %v5977_v32 = vrot.slane %v13760_v46, 4  ;;  %v11263_v46 = vld [vmem:[#allocation2 + $0x38c] ss:$408 sps:$4 sm:$0xff]  }
 0x730   : > { %5865 = vst [vmem:[#allocation2 + $0x1a0] sm:$0xff] %v5849_v39  ;;  %v5209_v10 = vrot.slane %v5193_v49, 4  ;;  %v5208_v52 = vrot.slane %v5191_v59, 4  ;;  %9353 = vmatprep.subr.bf16.mxu0 %v10715_v9  ;;  %9460 = vmatprep.subr.bf16.mxu1 %v10753_v0  ;;  %v11255_v0 = vld [vmem:[#allocation2 + $0x3a8] ss:$568 sps:$4 sm:$0xff]  }
 0x731   : > { %6584 = vrot.lane.b32.xlu0 %v6537_v43, %s16351_s26  ;;  %6582 = vrot.lane.b32.xlu1 %v6536_v23, %s16351_s26  ;;  %v11258_v39 = vld [vmem:[#allocation2 + $0x2a0] ss:$720 sps:$4 sm:$0xff]   ;;  %v6531_v43 = vmul.bf16 %v6515_v14, %v16662_v51  ;;  %v11266_v23 = vld [vmem:[#allocation2 + $0x9c] ss:$24 sps:$4 sm:$0xff]  }
 0x732   : > { %v5224_v16 = vsel %vm498_vm10, %v5208_v52, %v5209_v10 }
 0x733   : > { %v14662_v63 = vsel %vm16665_vm14, %v5191_v59, %v5224_v16  ;;  %v5689_v56 = vpop.permute.xlu0 %5688  ;;  %v5687_v53 = vpop.permute.xlu1 %5686  ;;  %9354 = vmatpush1.bf16.msra.mxu0 %v10714_v50  ;;  %9461 = vmatpush1.bf16.msra.mxu1 %v10752_v25  ;;  %v6530_v25 = vmul.bf16 %v14384_v18, %v16663_v38  ;;  %v10777_v18 = vcombine.high %v14443_v12, %v14560_v26 }
 0x734   : > { %v5705_v44 = vrot.slane %v5689_v56, 4  ;;  %v5704_v20 = vrot.slane %v5687_v53, 4  ;;  %9355 = vmatprep.subr.bf16.mxu0 %v10745_v8  ;;  %9462 = vmatprep.subr.bf16.mxu1 %v10751_v61  ;;  %v6517_v61 = vld [vmem:[#allocation5 + $0x5c] sm:$0xf]  ;;  %v11264_v56 = vld [vmem:[#allocation2 + $0x98] ss:$24 sps:$4 sm:$0xff]  }
 0x735   : > { %6076 = vrot.lane.b32.xlu0 %v6035_v5, %s16353_s14  ;;  %6074 = vrot.lane.b32.xlu1 %v6034_v37, %s16353_s14 }
 0x736   : > { %v5720_v55 = vsel %vm498_vm10, %v5704_v20, %v5705_v44 }
 0x737   : > { %v5721_v19 = vsel %vm16666_vm12, %v5687_v53, %v5720_v55  ;;  %v6341_v35 = vpop.permute.xlu0 %6340  ;;  %v5959_v27 = vpop.permute.xlu1 %5958  ;;  %9356 = vmatpush2.bf16.msra.mxu0 %v10744_v45  ;;  %9463 = vmatpush1.bf16.msra.mxu1 %v10750_v29  ;;  %v7522_v53 = vld [vmem:[#allocation2 + $0x248] sm:$0xff]  ;;  %v6533_v45 = vmul.bf16 %v6517_v61, %v16662_v51  ;;  %v6532_v29 = vmul.bf16 %v14498_v4, %v16663_v38  ;;  %v11270_v61 = vld [vmem:[#allocation2 + $0x330] ss:$-560 sps:$4 sm:$0xff]  }
 0x738   : > { %5737 = vst [vmem:[#allocation2 + $0x78] sm:$0xff] %v5721_v19  ;;  %v6359_v7 = vrot.slane %v6341_v35, 4  ;;  %v5976_v9 = vrot.slane %v5959_v27, 4  ;;  %9357 = vmatprep.subr.bf16.mxu0 %v11257_v41  ;;  %9464 = vmatprep.subr.bf16.mxu1 %v11260_v54  ;;  %v10739_v37 = vcombine.high %v7522_v53, %v7523_v17  ;;  %v6015_v54 = vld [vmem:[#allocation5 + $0x2c] sm:$0xf]  ;;  %v10738_v19 = vcombine.low %v7522_v53, %v7523_v17 }
 0x739   : > { %6080 = vrot.lane.b32.xlu0 %v6037_v30, %s16353_s14  ;;  %6078 = vrot.lane.b32.xlu1 %v6036_v13, %s16353_s14  ;;  %v10776_v35 = vcombine.low %v14443_v12, %v14560_v26  ;;  %v11269_v13 = vld [vmem:[#allocation2 + $0x2fc] ss:$136 sps:$4 sm:$0xff]  }
 0x73a   : > { %v6374_v49 = vsel %vm498_vm10, %v6358_v15, %v6359_v7  ;;  %v5992_v59 = vsel %vm498_vm10, %v5976_v9, %v5977_v32  ;;  %v6031_v7 = vmul.bf16 %v6015_v54, %v16658_v24  ;;  %v6030_v9 = vmul.bf16 %v14403_v21, %v16659_v31  ;;  %v6017_v26 = vld [vmem:[#allocation5 + $0x3c] sm:$0xf] }
 0x73b   : > { %v6375_v10 = vsel %vm769_vm2, %v14523_v33, %v6374_v49  ;;  %v14687_v52 = vsel %vm874_vm5, %v5959_v27, %v5992_v59  ;;  %v6345_v62 = vpop.permute.xlu0 %6344  ;;  %v6343_v50 = vpop.permute.xlu1 %6342  ;;  %9358 = vmatpush2.bf16.msra.mxu0 %v11255_v0  ;;  %9465 = vmatpush1.bf16.msra.mxu1 %v11258_v39  ;;  %v11261_v33 = vld [vmem:[#allocation2 + $0x388] ss:$408 sps:$4 sm:$0xff]  }
 0x73c   : > { %6392 = vst [vmem:[#allocation2 + $0x3a0] sm:$0xff] %v6375_v10  ;;  %v6361_v16 = vrot.slane %v6345_v62, 4  ;;  %v6360_v8 = vrot.slane %v6343_v50, 4  ;;  %9359 = vmatprep.subr.bf16.mxu0 %v11263_v46  ;;  %9466 = vmatprep.subr.bf16.mxu1 %v11266_v23  ;;  %v7520_v27 = vld [vmem:[#allocation2 + $0x8] sm:$0xff]  ;;  %v11267_v49 = vld [vmem:[#allocation2 + $0x2f8] ss:$136 sps:$4 sm:$0xff]   ;;  %v6033_v62 = vmul.bf16 %v6017_v26, %v16658_v24 }
 0x73d   : > { %6572 = vrot.lane.b32.xlu0 %v6531_v43, %s16351_s26  ;;  %6570 = vrot.lane.b32.xlu1 %v6530_v25, %s16351_s26  ;;  %v10737_v4 = vcombine.high %v7520_v27, %v14550_v34  ;;  %v10736_v39 = vcombine.low %v7520_v27, %v14550_v34  ;;  %v11272_v43 = vld [vmem:[#allocation2 + $0x334] ss:$-560 sps:$4 sm:$0xff]   ;;  %v11275_v46 = vld [vmem:[#allocation2 + $0x11c] ss:$1008 sps:$4 sm:$0xff]   ;;  %v11279_v26 = vld [vmem:[#allocation2 + $0x580] ss:$16 sps:$4 sm:$0xff]  }
 0x73e   : > { %v6376_v5 = vsel %vm498_vm10, %v6360_v8, %v6361_v16  ;;  %v7517_v25 = vld [vmem:[#allocation2 + $0x3c0] sm:$0xff]  ;;  %v6511_v16 = vld [vmem:[#allocation5 + $0x2c] sm:$0xf]  ;;  %v14718_v8 = vld [vmem:[#allocation5 + $0x24] sm:$0xff] }
 0x73f   : > { %v6377_v44 = vsel %vm769_vm2, %v6343_v50, %v6376_v5  ;;  %v6333_v20 = vpop.permute.xlu0 %6332  ;;  %v6331_v6 = vpop.permute.xlu1 %6330  ;;  %9360 = vmatpush2.bf16.msra.mxu0 %v11261_v33  ;;  %9467 = vmatpush1.bf16.msra.mxu1 %v11264_v56  ;;  %v6032_v50 = vmul.bf16 %v14415_v28, %v16659_v31  ;;  %v11273_v33 = vld [vmem:[#allocation2 + $0x118] ss:$1008 sps:$4 sm:$0xff]   ;;  %v7516_v56 = vld [vmem:[#allocation2 + $0x540] sm:$0xff]  ;;  %v11278_v5 = vld [vmem:[#allocation2 + $0x30c] ss:$-144 sps:$4 sm:$0xff]  }
 0x740   : > { %6393 = vst [vmem:[#allocation2 + $0x38] sm:$0xff] %v6377_v44  ;;  %v6355_v55 = vrot.slane %v6333_v20, 4  ;;  %v6354_v41 = vrot.slane %v6331_v6, 4  ;;  %9361 = vmatprep.subr.bf16.mxu0 %v10739_v37  ;;  %9468 = vmatprep.subr.bf16.mxu1 %v10777_v18  ;;  %v10733_v53 = vcombine.high %v7516_v56, %v7517_v25  ;;  %v6527_v20 = vmul.bf16 %v6511_v16, %v16662_v51  ;;  %v11281_v27 = vld [vmem:[#allocation2 + $0x584] ss:$16 sps:$4 sm:$0xff]  }
 0x741   : > { %6576 = vrot.lane.b32.xlu0 %v6533_v45, %s16351_s26  ;;  %6574 = vrot.lane.b32.xlu1 %v6532_v29, %s16351_s26  ;;  %v10732_v54 = vcombine.low %v7516_v56, %v7517_v25  ;;  %v11282_v16 = vld [vmem:[#allocation2 + $0x608] ss:$-280 sps:$4 sm:$0xff]   ;;  %v11290_v56 = vld [vmem:[#allocation2 + $0x2c] ss:$208 sps:$4 sm:$0xff]  }
 0x742   : > { %v6370_v30 = vsel %vm498_vm10, %v6354_v41, %v6355_v55  ;;  %v6513_v55 = vld [vmem:[#allocation5 + $0x3c] sm:$0xf]  ;;  %v14727_v41 = vld [vmem:[#allocation5 + $0x34] sm:$0xff] }
 0x743   : > { %v6371_v14 = vsel %vm769_vm2, %v6331_v6, %v6370_v30  ;;  %v6337_v32 = vpop.permute.xlu0 %6336  ;;  %v6335_v15 = vpop.permute.xlu1 %6334  ;;  %9362 = vmatpush2.bf16.msra.mxu0 %v10738_v19  ;;  %9469 = vmatpush2.bf16.msra.mxu1 %v10776_v35  ;;  %v6526_v6 = vmul.bf16 %v14718_v8, %v16663_v38  ;;  %v11276_v19 = vld [vmem:[#allocation2 + $0x308] ss:$-144 sps:$4 sm:$0xff]   ;;  %v10769_v30 = vcombine.high %v14532_v3, %v14662_v63 }
 0x744   : > { %6390 = vst [vmem:[#allocation2 + $0x478] sm:$0xff] %v6371_v14  ;;  %v6357_v0 = vrot.slane %v6337_v32, 4  ;;  %v6356_v12 = vrot.slane %v6335_v15, 4  ;;  %9363 = vmatprep.subr.bf16.mxu0 %v10737_v4  ;;  %9470 = vmatprep.subr.bf16.mxu1 %v11269_v13  ;;  %v6529_v32 = vmul.bf16 %v6513_v55, %v16662_v51  ;;  %v11291_v55 = vld [vmem:[#allocation2 + $0x3f8] ss:$-720 sps:$4 sm:$0xff]  }
 0x745   : > { %6068 = vrot.lane.b32.xlu0 %v6031_v7, %s16353_s14  ;;  %6066 = vrot.lane.b32.xlu1 %v6030_v9, %s16353_s14 }
 0x746   : > { %v6372_v59 = vsel %vm498_vm10, %v6356_v12, %v6357_v0  ;;  %v6011_v0 = vld [vmem:[#allocation5 + $0xc] sm:$0xf]  ;;  %v14738_v12 = vld [vmem:[#allocation5 + $0x4] sm:$0xff] }
 0x747   : > { %v6373_v21 = vsel %vm769_vm2, %v6335_v15, %v6372_v59  ;;  %v6325_v23 = vpop.permute.xlu0 %6324  ;;  %v6323_v10 = vpop.permute.xlu1 %6322  ;;  %9364 = vmatpush2.bf16.msra.mxu0 %v10736_v39  ;;  %9471 = vmatpush2.bf16.msra.mxu1 %v11267_v49  ;;  %v6528_v15 = vmul.bf16 %v14727_v41, %v16663_v38  ;;  %v10768_v39 = vcombine.low %v14532_v3, %v14662_v63  ;;  %v7576_v49 = vld [vmem:[#allocation2 + $0x320] sm:$0xff] }
 0x748   : > { %6391 = vst [vmem:[#allocation2 + $0x368] sm:$0xff] %v6373_v21  ;;  %v6351_v17 = vrot.slane %v6325_v23, 4  ;;  %v6350_v34 = vrot.slane %v6323_v10, 4  ;;  %9365 = vmatprep.subr.bf16.mxu0 %v11272_v43  ;;  %9472 = vmatprep.subr.bf16.mxu1 %v11275_v46  ;;  %v11284_v43 = vld [vmem:[#allocation2 + $0x60c] ss:$-280 sps:$4 sm:$0xff]   ;;  %v10793_v46 = vcombine.high %v7576_v49, %v14614_v11  ;;  %v6026_v25 = vmul.bf16 %v14738_v12, %v16659_v31 }
 0x749   : > { %6072 = vrot.lane.b32.xlu0 %v6033_v62, %s16353_s14  ;;  %6070 = vrot.lane.b32.xlu1 %v6032_v50, %s16353_s14  ;;  %v11285_v21 = vld [vmem:[%s16149_s5] ss:$52 sps:$4 sm:$0xff]   ;;  %v6027_v50 = vmul.bf16 %v6011_v0, %v16658_v24 }
 0x74a   : > { %v6366_v28 = vsel %vm498_vm10, %v6350_v34, %v6351_v17  ;;  %v6013_v17 = vld [vmem:[#allocation5 + $0x1c] sm:$0xf]  ;;  %v14753_v34 = vld [vmem:[#allocation5 + $0x14] sm:$0xff]  ;;  %v7608_v0 = vld [vmem:[#allocation2 + $0x630] sm:$0xff] }
 0x74b   : > { %v6367_v37 = vsel %vm769_vm2, %v6323_v10, %v6366_v28  ;;  %v6329_v18 = vpop.permute.xlu0 %6328  ;;  %v6327_v44 = vpop.permute.xlu1 %6326  ;;  %9366 = vmatpush2.bf16.msra.mxu0 %v11270_v61  ;;  %9473 = vmatpush2.bf16.msra.mxu1 %v11273_v33  ;;  %v10792_v61 = vcombine.low %v7576_v49, %v14614_v11  ;;  %v11293_v28 = vld [vmem:[#allocation2 + $0x3fc] ss:$-720 sps:$4 sm:$0xff]   ;;  %v10825_v49 = vcombine.high %v7608_v0, %v14687_v52 }
 0x74c   : > { %6388 = vst [vmem:[#allocation2 + $0x180] sm:$0xff] %v6367_v37  ;;  %v6353_v45 = vrot.slane %v6329_v18, 4  ;;  %v6352_v29 = vrot.slane %v6327_v44, 4  ;;  %9367 = vmatprep.subr.bf16.mxu0 %v10733_v53  ;;  %9474 = vmatprep.subr.bf16.mxu1 %v11278_v5  ;;  %v11300_v53 = vld [vmem:[%s16149_s5 + $0x6c] ss:$52 sps:$4 sm:$0xff]  }
 0x74d   : > { %6564 = vrot.lane.b32.xlu0 %v6527_v20, %s16351_s26  ;;  %6562 = vrot.lane.b32.xlu1 %v6526_v6, %s16351_s26  ;;  %v6028_v20 = vmul.bf16 %v14753_v34, %v16659_v31  ;;  %v11302_v31 = vld [vmem:[%s16149_s5 + $0x68] ss:$52 sps:$4 sm:$0xff]  }
 0x74e   : > { %v6368_v35 = vsel %vm498_vm10, %v6352_v29, %v6353_v45  ;;  %v6507_v45 = vld [vmem:[#allocation5 + $0xc] sm:$0xf]  ;;  %v11288_v29 = vld [vmem:[#allocation2 + $0x28] ss:$208 sps:$4 sm:$0xff]  }
 0x74f   : > { %v6369_v4 = vsel %vm769_vm2, %v6327_v44, %v6368_v35  ;;  %v6317_v13 = vpop.permute.xlu0 %6316  ;;  %v6315_v14 = vpop.permute.xlu1 %6314  ;;  %9368 = vmatpush2.bf16.msra.mxu0 %v10732_v54  ;;  %9475 = vmatpush2.bf16.msra.mxu1 %v11276_v19  ;;  %v6029_v44 = vmul.bf16 %v6013_v17, %v16658_v24  ;;  %v11296_v24 = vld [vmem:[#allocation2 + $0x3dc] ss:$216 sps:$4 sm:$0xff]   ;;  %v11303_v17 = vld [vmem:[#allocation2 + $0x390] ss:$304 sps:$4 sm:$0xff]  }
 0x750   : > { %6389 = vst [vmem:[#allocation2 + $0x550] sm:$0xff] %v6369_v4  ;;  %v6347_v7 = vrot.slane %v6317_v13, 4  ;;  %v6346_v9 = vrot.slane %v6315_v14, 4  ;;  %9369 = vmatprep.subr.bf16.mxu0 %v11281_v27  ;;  %9476 = vmatprep.subr.bf16.mxu1 %v10769_v30  ;;  %v11299_v19 = vld [vmem:[#allocation2 + $0xbc] ss:$1144 sps:$4 sm:$0xff]   ;;  %v6523_v4 = vmul.bf16 %v6507_v45, %v16662_v51  ;;  %v6522_v13 = vmul.bf16 %v14738_v12, %v16663_v38 }
 0x751   : > { %6568 = vrot.lane.b32.xlu0 %v6529_v32, %s16351_s26  ;;  %6566 = vrot.lane.b32.xlu1 %v6528_v15, %s16351_s26  ;;  %v6509_v15 = vld [vmem:[#allocation5 + $0x1c] sm:$0xf]  ;;  %v7605_v45 = vld [vmem:[#allocation2 + $0x5d0] sm:$0xff] }
 0x752   : > { %v6362_v59 = vsel %vm498_vm10, %v6346_v9, %v6347_v7  ;;  %v11294_v7 = vld [vmem:[#allocation2 + $0x3d8] ss:$216 sps:$4 sm:$0xff]  }
 0x753   : > { %v6363_v23 = vsel %vm769_vm2, %v6315_v14, %v6362_v59  ;;  %v6321_v10 = vpop.permute.xlu0 %6320  ;;  %v6319_v62 = vpop.permute.xlu1 %6318  ;;  %9370 = vmatpush2.bf16.msra.mxu0 %v11279_v26  ;;  %9477 = vmatpush2.bf16.msra.mxu1 %v10768_v39  ;;  %v11297_v9 = vld [vmem:[#allocation2 + $0xb8] ss:$1144 sps:$4 sm:$0xff]   ;;  %v11305_v39 = vld [vmem:[#allocation2 + $0x394] ss:$304 sps:$4 sm:$0xff]   ;;  %v11306_v59 = vld [vmem:[%s16149_s5 + $0x8] ss:$52 sps:$4 sm:$0xff]  }
 0x754   : > { %6386 = vst [vmem:[#allocation2 + $0x4a8] sm:$0xff] %v6363_v23  ;;  %v6349_v3 = vrot.slane %v6321_v10, 4  ;;  %v6348_v63 = vrot.slane %v6319_v62, 4  ;;  %9478 = vmatprep.subr.bf16.mxu1 %v11284_v43  ;;  %9565 = vmatprep.subr.bf16.mxu0 %v10793_v46  ;;  %v11309_v43 = vld [vmem:[%s16149_s5 + $0xd4] ss:$52 sps:$4 sm:$0xff]   ;;  %v6525_v10 = vmul.bf16 %v6509_v15, %v16662_v51 }
 0x755   : > { %6060 = vrot.lane.b32.xlu0 %v6027_v50, %s16353_s14  ;;  %6058 = vrot.lane.b32.xlu1 %v6026_v25, %s16353_s14  ;;  %v7607_v50 = vld [vmem:[#allocation2 + $0x310] sm:$0xff] }
 0x756   : > { %v6364_v33 = vsel %vm498_vm10, %v6348_v63, %v6349_v3  ;;  %9372 = vmatmul.mubr.bf16.vlgmr.msra.gmra.mxu0 %v11285_v21  ;;  %v6903_v63 = vld [vmem:[#allocation5 + $0x6c] sm:$0xf] }
 0x757   : > { %v6365_v5 = vsel %vm769_vm2, %v6319_v62, %v6364_v33  ;;  %v6213_v37 = vpop.permute.xlu0 %6212  ;;  %v6211_v18 = vpop.permute.xlu1 %6210  ;;  %9479 = vmatpush2.bf16.msra.mxu1 %v11282_v16  ;;  %9566 = vmatpush1.bf16.msra.mxu0 %v10792_v61  ;;  %v6524_v62 = vmul.bf16 %v14753_v34, %v16663_v38  ;;  %v10824_v16 = vcombine.low %v7608_v0, %v14687_v52  ;;  %v7568_v61 = vld [vmem:[#allocation2 + $0x2e8] sm:$0xff]  ;;  %v7606_v51 = vld [vmem:[#allocation2 + $0x5b0] sm:$0xff] }
 0x758   : > { %6387 = vst [vmem:[#allocation2 + $0x3d0] sm:$0xff] %v6365_v5  ;;  %v6231_v11 = vrot.slane %v6213_v37, 4  ;;  %v6230_v6 = vrot.slane %v6211_v18, 4  ;;  %9480 = vmatprep.subr.bf16.mxu1 %v11290_v56  ;;  %9567 = vmatprep.subr.bf16.mxu0 %v11293_v28  ;;  %v10785_v38 = vcombine.high %v7568_v61, %v14637_v40  ;;  %v10823_v56 = vcombine.high %v7606_v51, %v7607_v50  ;;  %v11311_v28 = vld [vmem:[%s16149_s5 + $0xd0] ss:$52 sps:$4 sm:$0xff]  }
 0x759   : > { %6064 = vrot.lane.b32.xlu0 %v6029_v44, %s16353_s14  ;;  %6062 = vrot.lane.b32.xlu1 %v6028_v20, %s16353_s14  ;;  %v16668_v20 = vld [vmem:[#allocation68_spill] sm:$0xff]  ;;  %s16675_s14 = smov 96  }
 0x75a   : > { %v6246_v54 = vsel %vm498_vm10, %v6230_v6, %v6231_v11  ;;  %9381 = vmatprep.mubr.bf16.mxu0 %v11300_v53  ;;  %v11367_v53 = vld [vmem:[%s16149_s5 + $0x74] ss:$52 sps:$4 sm:$0xff]   ;;  %v6918_v11 = vmul.bf16 %v14603_v2, %v16668_v20 }
 0x75b   : > { %v14773_v35 = vsel %vm804_vm3, %v6211_v18, %v6246_v54  ;;  %v6217_v27 = vpop.permute.xlu0 %6216  ;;  %v6215_v30 = vpop.permute.xlu1 %6214  ;;  %9481 = vmatpush2.bf16.msra.mxu1 %v11288_v29  ;;  %9568 = vmatpush1.bf16.msra.mxu0 %v11291_v55  ;;  %v16667_v18 = vld [vmem:[#allocation25_spill] sm:$0xff] }
 0x75c   : > { %v6233_v14 = vrot.slane %v6217_v27, 4  ;;  %v6232_v32 = vrot.slane %v6215_v30, 4  ;;  %9482 = vmatprep.subr.bf16.mxu1 %v11296_v24  ;;  %9569 = vmatprep.subr.bf16.mxu0 %v11299_v19  ;;  %v6919_v44 = vmul.bf16 %v6903_v63, %v16667_v18  ;;  %v7567_v6 = vld [vmem:[#allocation2 + $0x148] sm:$0xff]  ;;  %v6905_v54 = vld [vmem:[#allocation5 + $0x7c] sm:$0xf]  ;;  %v10784_v24 = vcombine.low %v7568_v61, %v14637_v40  ;;  %v7604_v27 = vld [vmem:[#allocation2 + $0x230] sm:$0xff] }
 0x75d   : > { %6556 = vrot.lane.b32.xlu0 %v6523_v4, %s16351_s26  ;;  %6554 = vrot.lane.b32.xlu1 %v6522_v13, %s16351_s26  ;;  %v10822_v19 = vcombine.low %v7606_v51, %v7607_v50  ;;  %v10821_v4 = vcombine.high %v7604_v27, %v7605_v45  ;;  %v11318_v13 = vld [vmem:[%s16149_s5 + $0x13c] ss:$52 sps:$4 sm:$0xff]   ;;  %v6901_v51 = vld [vmem:[#allocation5 + $0x5c] sm:$0xf] }
 0x75e   : > { %v6248_v26 = vsel %vm498_vm10, %v6232_v32, %v6233_v14  ;;  %9382 = vmatmul.mubr.bf16.gmra.mxu0 %v11302_v31  ;;  %v7566_v31 = vld [vmem:[#allocation2 + $0x588] sm:$0xff]  ;;  %v11369_v14 = vld [vmem:[%s16149_s5 + $0x70] ss:$52 sps:$4 sm:$0xff]  }
 0x75f   : > { %v14789_v46 = vsel %vm804_vm3, %v6215_v30, %v6248_v26  ;;  %v6709_v21 = vpop.permute.xlu0 %6708  ;;  %v6707_v23 = vpop.permute.xlu1 %6706  ;;  %9483 = vmatpush2.bf16.msra.mxu1 %v11294_v7  ;;  %9570 = vmatpush1.bf16.msra.mxu0 %v11297_v9  ;;  %v10783_v30 = vcombine.high %v7566_v31, %v7567_v6  ;;  %v6921_v7 = vmul.bf16 %v6905_v54, %v16667_v18  ;;  %v14836_v63 = vld [vmem:[#allocation2 + $0x210] sm:$0xff] }
 0x760   : > { %v6727_v25 = vrot.slane %v6709_v21, 4  ;;  %v6726_v3 = vrot.slane %v6707_v23, 4  ;;  %9571 = vmatprep.subr.bf16.mxu0 %v11305_v39  ;;  %9678 = vmatprep.subr.bf16.mxu1 %v10825_v49  ;;  %v6920_v9 = vmul.bf16 %v14649_v47, %v16668_v20  ;;  %v6899_v39 = vld [vmem:[#allocation5 + $0x4c] sm:$0xf]  ;;  %v10782_v49 = vcombine.low %v7566_v31, %v7567_v6  ;;  %v11320_v47 = vld [vmem:[%s16149_s5 + $0x138] ss:$52 sps:$4 sm:$0xff]  }
 0x761   : > { %6560 = vrot.lane.b32.xlu0 %v6525_v10, %s16351_s26  ;;  %6558 = vrot.lane.b32.xlu1 %v6524_v62, %s16351_s26  ;;  %v11379_v10 = vld [vmem:[%s16149_s5 + $0xdc] ss:$52 sps:$4 sm:$0xff]   ;;  %v14853_v6 = vld [vmem:[#allocation2 + $0x160] sm:$0xff] }
 0x762   : > { %v6742_v33 = vsel %vm498_vm10, %v6726_v3, %v6727_v25  ;;  %9485 = vmatmul.mubr.bf16.vlgmr.msra.gmra.mxu1 %v11306_v59  ;;  %9391 = vmatprep.mubr.bf16.mxu0 %v11309_v43  ;;  %v10820_v59 = vcombine.low %v7604_v27, %v7605_v45  ;;  %v11317_v43 = vld [vmem:[#allocation2 + $0x28c] ss:$-72 sps:$4 sm:$0xff]   ;;  %v6915_v3 = vmul.bf16 %v6899_v39, %v16667_v18 }
 0x763   : > { %v6743_v5 = vsel %vm671_vm7, %v6707_v23, %v6742_v33  ;;  %v6713_v52 = vpop.permute.xlu0 %6712  ;;  %v6711_v37 = vpop.permute.xlu1 %6710  ;;  %9572 = vmatpush1.bf16.msra.mxu0 %v11303_v17  ;;  %9679 = vmatpush1.bf16.msra.mxu1 %v10824_v16  ;;  %v11314_v23 = vld [vmem:[#allocation2 + $0xec] ss:$392 sps:$4 sm:$0xff]   ;;  %v6914_v17 = vmul.bf16 %v14836_v63, %v16668_v20  ;;  %v11312_v33 = vld [vmem:[#allocation2 + $0xe8] ss:$392 sps:$4 sm:$0xff]   ;;  %v6916_v45 = vmul.bf16 %v14853_v6, %v16668_v20  ;;  %v7592_v31 = vld [vmem:[#allocation2 + $0x60] sm:$0xff] }
 0x764   : > { %6760 = vst [vmem:[#allocation2 + $0x110] sm:$0xff] %v6743_v5  ;;  %v6729_v29 = vrot.slane %v6713_v52, 4  ;;  %v6728_v55 = vrot.slane %v6711_v37, 4  ;;  %9573 = vmatprep.subr.bf16.mxu0 %v10785_v38  ;;  %9680 = vmatprep.subr.bf16.mxu1 %v10823_v56  ;;  %v11315_v38 = vld [vmem:[#allocation2 + $0x288] ss:$-72 sps:$4 sm:$0xff]  }
 0x765   : > { %6964 = vrot.lane.b32.xlu0 %v6919_v44, %s16366_s15  ;;  %6962 = vrot.lane.b32.xlu1 %v6918_v11, %s16366_s15  ;;  %v11381_v5 = vld [vmem:[%s16149_s5 + $0xd8] ss:$52 sps:$4 sm:$0xff]   ;;  %v6917_v11 = vmul.bf16 %v6901_v51, %v16667_v18 }
 0x766   : > { %v6744_v2 = vsel %vm498_vm10, %v6728_v55, %v6729_v29  ;;  %9392 = vmatmul.mubr.bf16.gmra.mxu0 %v11311_v28  ;;  %9494 = vmatprep.mubr.bf16.mxu1 %v11367_v53  ;;  %v11323_v28 = vld [vmem:[#allocation2 + $0x53c] ss:$-872 sps:$4 sm:$0xff]   ;;  %v11328_v53 = vld [vmem:[%s16149_s5 + $0x1a4] ss:$52 sps:$4 sm:$0xff]  }
 0x767   : > { %v6745_v32 = vsel %vm671_vm7, %v6711_v37, %v6744_v2  ;;  %v6205_v40 = vpop.permute.xlu0 %6204  ;;  %v6203_v15 = vpop.permute.xlu1 %6202  ;;  %9574 = vmatpush1.bf16.msra.mxu0 %v10784_v24  ;;  %9681 = vmatpush1.bf16.msra.mxu1 %v10822_v19  ;;  %v7593_v29 = vld [vmem:[#allocation2 + $0x1a0] sm:$0xff]  ;;  %v6895_v24 = vld [vmem:[#allocation5 + $0x2c] sm:$0xf]  ;;  %v11321_v19 = vld [vmem:[#allocation2 + $0x538] ss:$-872 sps:$4 sm:$0xff]  }
 0x768   : > { %6761 = vst [vmem:[#allocation2 + $0x1a8] sm:$0xff] %v6745_v32  ;;  %v6227_v0 = vrot.slane %v6205_v40, 4  ;;  %v6226_v26 = vrot.slane %v6203_v15, 4  ;;  %9575 = vmatprep.subr.bf16.mxu0 %v10783_v30  ;;  %9682 = vmatprep.subr.bf16.mxu1 %v10821_v4  ;;  %v10809_v2 = vcombine.high %v7592_v31, %v7593_v29  ;;  %v11330_v30 = vld [vmem:[%s16149_s5 + $0x1a0] ss:$52 sps:$4 sm:$0xff]   ;;  %v6911_v32 = vmul.bf16 %v6895_v24, %v16667_v18 }
 0x769   : > { %6968 = vrot.lane.b32.xlu0 %v6921_v7, %s16366_s15  ;;  %6966 = vrot.lane.b32.xlu1 %v6920_v9, %s16366_s15  ;;  %v11391_v4 = vld [vmem:[%s16149_s5 + $0x144] ss:$52 sps:$4 sm:$0xff]   ;;  %v6910_v40 = vmul.bf16 %v14718_v8, %v16668_v20  ;;  %v11405_v24 = vld [vmem:[%s16149_s5 + $0x1a8] ss:$52 sps:$4 sm:$0xff]  }
 0x76a   : > { %v6242_v21 = vsel %vm498_vm10, %v6226_v26, %v6227_v0  ;;  %9401 = vmatprep.mubr.bf16.mxu0 %v11318_v13  ;;  %9495 = vmatmul.mubr.bf16.gmra.mxu1 %v11369_v14  ;;  %v6897_v9 = vld [vmem:[#allocation5 + $0x3c] sm:$0xf]  ;;  %v10808_v0 = vcombine.low %v7592_v31, %v7593_v29 }
 0x76b   : > { %v14833_v62 = vsel %vm804_vm3, %v6203_v15, %v6242_v21  ;;  %v6209_v50 = vpop.permute.xlu0 %6208  ;;  %v6207_v25 = vpop.permute.xlu1 %6206  ;;  %9576 = vmatpush1.bf16.msra.mxu0 %v10782_v49  ;;  %9683 = vmatpush1.bf16.msra.mxu1 %v10820_v59  ;;  %v11336_v26 = vld [vmem:[#allocation2 + $0x404] ss:$472 sps:$4 sm:$0xff]   ;;  %v6912_v21 = vmul.bf16 %v14727_v41, %v16668_v20 }
 0x76c   : > { %v6229_v16 = vrot.slane %v6209_v50, 4  ;;  %v6228_v61 = vrot.slane %v6207_v25, 4  ;;  %9577 = vmatprep.subr.bf16.mxu0 %v11314_v23  ;;  %9684 = vmatprep.subr.bf16.mxu1 %v11317_v43  ;;  %v6913_v43 = vmul.bf16 %v6897_v9, %v16667_v18  ;;  %v7595_v23 = vld [vmem:[#allocation2 + $0x498] sm:$0xff]  ;;  %v6891_v50 = vld [vmem:[#allocation5 + $0xc] sm:$0xf] }
 0x76d   : > { %6956 = vrot.lane.b32.xlu0 %v6915_v3, %s16366_s15  ;;  %6954 = vrot.lane.b32.xlu1 %v6914_v17, %s16366_s15  ;;  %v11334_v3 = vld [vmem:[#allocation2 + $0x400] ss:$472 sps:$4 sm:$0xff]   ;;  %v11345_v29 = vld [vmem:[#allocation2 + $0x2dc] ss:$520 sps:$4 sm:$0xff]  }
 0x76e   : > { %v6244_v56 = vsel %vm498_vm10, %v6228_v61, %v6229_v16  ;;  %9402 = vmatmul.mubr.bf16.gmra.mxu0 %v11320_v47  ;;  %9504 = vmatprep.mubr.bf16.mxu1 %v11379_v10  ;;  %v7594_v17 = vld [vmem:[#allocation2 + $0x458] sm:$0xff]  ;;  %v11339_v61 = vld [vmem:[#allocation2 + $0x16c] ss:$-280 sps:$4 sm:$0xff]  }
 0x76f   : > { %v14850_v52 = vsel %vm804_vm3, %v6207_v25, %v6244_v56  ;;  %v6701_v37 = vpop.permute.xlu0 %6700  ;;  %v6699_v44 = vpop.permute.xlu1 %6698  ;;  %9578 = vmatpush1.bf16.msra.mxu0 %v11312_v33  ;;  %9685 = vmatpush1.bf16.msra.mxu1 %v11315_v38  ;;  %v11331_v25 = vld [vmem:[#allocation2 + $0x610] ss:$-432 sps:$4 sm:$0xff]   ;;  %v10811_v51 = vcombine.high %v7594_v17, %v7595_v23  ;;  %v6907_v56 = vmul.bf16 %v6891_v50, %v16667_v18 }
 0x770   : > { %v6723_v55 = vrot.slane %v6701_v37, 4  ;;  %v6722_v54 = vrot.slane %v6699_v44, 4  ;;  %9579 = vmatprep.subr.bf16.mxu0 %v11323_v28  ;;  %9686 = vmatprep.subr.bf16.mxu1 %v10817_v58  ;;  %v6906_v28 = vmul.bf16 %v14738_v12, %v16668_v20  ;;  %v6893_v37 = vld [vmem:[#allocation5 + $0x1c] sm:$0xf]  ;;  %v11358_v50 = vld [vmem:[%s16149_s5 + $0x2dc] ss:$52 sps:$4 sm:$0xff]  }
 0x771   : > { %6960 = vrot.lane.b32.xlu0 %v6917_v11, %s16366_s15  ;;  %6958 = vrot.lane.b32.xlu1 %v6916_v45, %s16366_s15  ;;  %v10810_v11 = vcombine.low %v7594_v17, %v7595_v23 }
 0x772   : > { %v6738_v27 = vsel %vm498_vm10, %v6722_v54, %v6723_v55  ;;  %9411 = vmatprep.mubr.bf16.mxu0 %v11328_v53  ;;  %9505 = vmatmul.mubr.bf16.gmra.mxu1 %v11381_v5  ;;  %v10841_v55 = vcombine.high %v14773_v35, %v14789_v46  ;;  %v11349_v54 = vld [vmem:[%s16149_s5 + $0x274] ss:$52 sps:$4 sm:$0xff]  }
 0x773   : > { %v6739_v58 = vsel %vm671_vm7, %v6699_v44, %v6738_v27  ;;  %v6705_v13 = vpop.permute.xlu0 %6704  ;;  %v6703_v14 = vpop.permute.xlu1 %6702  ;;  %9580 = vmatpush1.bf16.msra.mxu0 %v11321_v19  ;;  %9687 = vmatpush1.bf16.msra.mxu1 %v10816_v60  ;;  %v11393_v60 = vld [vmem:[%s16149_s5 + $0x140] ss:$52 sps:$4 sm:$0xff]   ;;  %v11337_v44 = vld [vmem:[#allocation2 + $0x168] ss:$-280 sps:$4 sm:$0xff]  }
 0x774   : > { %6758 = vst [vmem:[#allocation2 + $0x140] sm:$0xff] %v6739_v58  ;;  %v6725_v15 = vrot.slane %v6705_v13, 4  ;;  %v6724_v7 = vrot.slane %v6703_v14, 4  ;;  %9581 = vmatprep.subr.bf16.mxu0 %v10809_v2  ;;  %9688 = vmatprep.subr.bf16.mxu1 %v10815_v22  ;;  %v6909_v2 = vmul.bf16 %v6893_v37, %v16667_v18  ;;  %v6775_v13 = vld [vmem:[#allocation5 + $0x6c] sm:$0xf] }
 0x775   : > { %6948 = vrot.lane.b32.xlu0 %v6911_v32, %s16366_s15  ;;  %6946 = vrot.lane.b32.xlu1 %v6910_v40, %s16366_s15  ;;  %v10840_v32 = vcombine.low %v14773_v35, %v14789_v46  ;;  %v11348_v40 = vld [vmem:[#allocation2 + $0x24] ss:$88 sps:$4 sm:$0xff]  }
 0x776   : > { %v6740_v39 = vsel %vm498_vm10, %v6724_v7, %v6725_v15  ;;  %9412 = vmatmul.mubr.bf16.gmra.mxu0 %v11330_v30  ;;  %9514 = vmatprep.mubr.bf16.mxu1 %v11391_v4  ;;  %v6908_v30 = vmul.bf16 %v14753_v34, %v16668_v20  ;;  %v10839_v20 = vcombine.high %v14833_v62, %v14850_v52  ;;  %v11351_v15 = vld [vmem:[%s16149_s5 + $0x270] ss:$52 sps:$4 sm:$0xff]   ;;  %v11415_v7 = vld [vmem:[%s16149_s5 + $0x214] ss:$52 sps:$4 sm:$0xff]  }
 0x777   : > { %v6741_v22 = vsel %vm671_vm7, %v6703_v14, %v6740_v39  ;;  %v6197_v49 = vpop.permute.xlu0 %6196  ;;  %v6195_v59 = vpop.permute.xlu1 %6194  ;;  %9582 = vmatpush2.bf16.msra.mxu0 %v10808_v0  ;;  %9689 = vmatpush1.bf16.msra.mxu1 %v10814_v48  ;;  %v11343_v14 = vld [vmem:[#allocation2 + $0x2d8] ss:$520 sps:$4 sm:$0xff]  }
 0x778   : > { %6759 = vst [vmem:[#allocation2 + $0x420] sm:$0xff] %v6741_v22  ;;  %v6223_v47 = vrot.slane %v6197_v49, 4  ;;  %v6222_v10 = vrot.slane %v6195_v59, 4  ;;  %9583 = vmatprep.subr.bf16.mxu0 %v11333_v42  ;;  %9690 = vmatprep.subr.bf16.mxu1 %v11336_v26  ;;  %v16669_v0 = vld [vmem:[#allocation77_spill] sm:$0xff]  ;;  %v14944_v39 = vld [vmem:[#allocation2 + $0x178] sm:$0xff] }
 0x779   : > { %6952 = vrot.lane.b32.xlu0 %v6913_v43, %s16366_s15  ;;  %6950 = vrot.lane.b32.xlu1 %v6912_v21, %s16366_s15  ;;  %v6791_v26 = vmul.bf16 %v6775_v13, %v16669_v0  ;;  %v16670_v42 = vld [vmem:[#allocation57_spill] sm:$0xff]  ;;  %v10838_v21 = vcombine.low %v14833_v62, %v14850_v52 }
 0x77a   : > { %v6238_v16 = vsel %vm498_vm10, %v6222_v10, %v6223_v47  ;;  %9421 = vmatprep.mubr.bf16.mxu0 %v11340_v1  ;;  %9515 = vmatmul.mubr.bf16.gmra.mxu1 %v11393_v60  ;;  %v6790_v1 = vmul.bf16 %v14944_v39, %v16670_v42  ;;  %v6777_v49 = vld [vmem:[#allocation5 + $0x7c] sm:$0xf]  ;;  %v11346_v43 = vld [vmem:[#allocation2 + $0x20] ss:$88 sps:$4 sm:$0xff]   ;;  %v11354_v47 = vld [vmem:[#allocation2 + $0xd4] ss:$360 sps:$4 sm:$0xff]  }
 0x77b   : > { %v14905_v48 = vsel %vm804_vm3, %v6195_v59, %v6238_v16  ;;  %v6201_v33 = vpop.permute.xlu0 %6200  ;;  %v6199_v38 = vpop.permute.xlu1 %6198  ;;  %9584 = vmatpush2.bf16.msra.mxu0 %v11331_v25  ;;  %9691 = vmatpush1.bf16.msra.mxu1 %v11334_v3  ;;  %v14948_v59 = vld [vmem:[#allocation5 + $0x74] sm:$0xff]  ;;  %v11417_v25 = vld [vmem:[%s16149_s5 + $0x210] ss:$52 sps:$4 sm:$0xff]   ;;  %v6793_v17 = vmul.bf16 %v6777_v49, %v16669_v0 }
 0x77c   : > { %v6225_v53 = vrot.slane %v6201_v33, 4  ;;  %v6224_v5 = vrot.slane %v6199_v38, 4  ;;  %9585 = vmatprep.subr.bf16.mxu0 %v11339_v61  ;;  %9692 = vmatprep.subr.bf16.mxu1 %v10811_v51  ;;  %v6792_v16 = vmul.bf16 %v14948_v59, %v16670_v42  ;;  %v11352_v33 = vld [vmem:[#allocation2 + $0xd0] ss:$360 sps:$4 sm:$0xff]  }
 0x77d   : > { %6940 = vrot.lane.b32.xlu0 %v6907_v56, %s16366_s15  ;;  %6938 = vrot.lane.b32.xlu1 %v6906_v28, %s16366_s15  ;;  %v11357_v28 = vld [vmem:[#allocation2 + $0x51c] ss:$-1232 sps:$4 sm:$0xff]  }
 0x77e   : > { %v6240_v45 = vsel %vm498_vm10, %v6224_v5, %v6225_v53  ;;  %9422 = vmatmul.mubr.bf16.gmra.mxu0 %v11342_v36  ;;  %9524 = vmatprep.mubr.bf16.mxu1 %v11403_v57  ;;  %v6771_v36 = vld [vmem:[#allocation5 + $0x4c] sm:$0xf]  ;;  %v11421_v57 = vld [vmem:[%s16149_s5 + $0x27c] ss:$52 sps:$4 sm:$0xff]   ;;  %v11360_v53 = vld [vmem:[%s16149_s5 + $0x2d8] ss:$52 sps:$4 sm:$0xff]  }
 0x77f   : > { %v14922_v19 = vsel %vm804_vm3, %v6199_v38, %v6240_v45  ;;  %v6693_v31 = vpop.permute.xlu0 %6692  ;;  %v6691_v27 = vpop.permute.xlu1 %6690  ;;  %9586 = vmatpush2.bf16.msra.mxu0 %v11337_v44  ;;  %9693 = vmatpush1.bf16.msra.mxu1 %v10810_v11  ;;  %v6787_v11 = vmul.bf16 %v6771_v36, %v16669_v0  ;;  %v6786_v45 = vmul.bf16 %v14836_v63, %v16670_v42 }
 0x780   : > { %v6719_v4 = vrot.slane %v6693_v31, 4  ;;  %v6718_v58 = vrot.slane %v6691_v27, 4  ;;  %9587 = vmatprep.subr.bf16.mxu0 %v11345_v29  ;;  %9694 = vmatprep.subr.bf16.mxu1 %v10841_v55  ;;  %v10837_v10 = vcombine.high %v14905_v48, %v14922_v19  ;;  %v10836_v38 = vcombine.low %v14905_v48, %v14922_v19  ;;  %v7579_v48 = vld [vmem:[#allocation2 + $0x138] sm:$0xff]  ;;  %v11366_v29 = vld [vmem:[%s16149_s5 + $0x14] ss:$52 sps:$4 sm:$0xff]  }
 0x781   : > { %6944 = vrot.lane.b32.xlu0 %v6909_v2, %s16366_s15  ;;  %6942 = vrot.lane.b32.xlu1 %v6908_v30, %s16366_s15  ;;  %s16671_s15 = smov 98   ;;  %v11355_v19 = vld [vmem:[#allocation2 + $0x518] ss:$-1232 sps:$4 sm:$0xff]  }
 0x782   : > { %v6734_v18 = vsel %vm498_vm10, %v6718_v58, %v6719_v4  ;;  %9431 = vmatprep.mubr.bf16.mxu0 %v11349_v54  ;;  %9525 = vmatmul.mubr.bf16.gmra.mxu1 %v11405_v24  ;;  %v6773_v24 = vld [vmem:[#allocation5 + $0x5c] sm:$0xf]  ;;  %v7578_v31 = vld [vmem:[#allocation2 + $0x398] sm:$0xff] }
 0x783   : > { %v14941_v9 = vsel %vm671_vm7, %v6691_v27, %v6734_v18  ;;  %v6697_v35 = vpop.permute.xlu0 %6696  ;;  %v6695_v46 = vpop.permute.xlu1 %6694  ;;  %9588 = vmatpush2.bf16.msra.mxu0 %v11343_v14  ;;  %9695 = vmatpush2.bf16.msra.mxu1 %v10840_v32  ;;  %v10795_v2 = vcombine.high %v7578_v31, %v7579_v48  ;;  %v11423_v30 = vld [vmem:[%s16149_s5 + $0x278] ss:$52 sps:$4 sm:$0xff]   ;;  %v6789_v14 = vmul.bf16 %v6773_v24, %v16669_v0 }
 0x784   : > { %v6721_v60 = vrot.slane %v6697_v35, 4  ;;  %v6720_v22 = vrot.slane %v6695_v46, 4  ;;  %9589 = vmatprep.subr.bf16.mxu0 %v11348_v40  ;;  %9696 = vmatprep.subr.bf16.mxu1 %v10839_v20  ;;  %v6788_v32 = vmul.bf16 %v14853_v6, %v16670_v42  ;;  %v6767_v20 = vld [vmem:[#allocation5 + $0x2c] sm:$0xf]  ;;  %v11427_v35 = vld [vmem:[%s16149_s5 + $0x2e4] ss:$52 sps:$4 sm:$0xff]  }
 0x785   : > { %6836 = vrot.lane.b32.xlu0 %v6791_v26, %s16671_s15  ;;  %6834 = vrot.lane.b32.xlu1 %v6790_v1, %s16671_s15  ;;  %v11363_v1 = vld [vmem:[#allocation2 + $0x3bc] ss:$120 sps:$4 sm:$0xff]  }
 0x786   : > { %v6736_v23 = vsel %vm498_vm10, %v6720_v22, %v6721_v60  ;;  %9432 = vmatmul.mubr.bf16.gmra.mxu0 %v11351_v15  ;;  %9534 = vmatprep.mubr.bf16.mxu1 %v11415_v7  ;;  %v11364_v60 = vld [vmem:[%s16149_s5 + $0x10] ss:$52 sps:$4 sm:$0xff]  }
 0x787   : > { %v14964_v3 = vsel %vm671_vm7, %v6695_v46, %v6736_v23  ;;  %v6189_v62 = vpop.permute.xlu0 %6188  ;;  %v6187_v52 = vpop.permute.xlu1 %6186  ;;  %9590 = vmatpush2.bf16.msra.mxu0 %v11346_v43  ;;  %9697 = vmatpush2.bf16.msra.mxu1 %v10838_v21  ;;  %v10794_v46 = vcombine.low %v7578_v31, %v7579_v48  ;;  %v6783_v21 = vmul.bf16 %v6767_v20, %v16669_v0  ;;  %v11373_v31 = vld [vmem:[#allocation2 + $0x68] ss:$-40 sps:$4 sm:$0xff]  }
 0x788   : > { %v6219_v61 = vrot.slane %v6189_v62, 4  ;;  %v6218_v51 = vrot.slane %v6187_v52, 4  ;;  %9591 = vmatprep.subr.bf16.mxu0 %v11354_v47  ;;  %9698 = vmatprep.subr.bf16.mxu1 %v10837_v10  ;;  %v6782_v23 = vmul.bf16 %v14718_v8, %v16670_v42  ;;  %v11376_v47 = vld [vmem:[%s16149_s5 + $0x7c] ss:$52 sps:$4 sm:$0xff]  }
 0x789   : > { %6840 = vrot.lane.b32.xlu0 %v6793_v17, %s16671_s15  ;;  %6838 = vrot.lane.b32.xlu1 %v6792_v16, %s16671_s15  ;;  %v11361_v62 = vld [vmem:[#allocation2 + $0x3b8] ss:$120 sps:$4 sm:$0xff]   ;;  %v11372_v8 = vld [vmem:[#allocation2 + $0x4fc] ss:$-240 sps:$4 sm:$0xff]   ;;  %v11429_v17 = vld [vmem:[%s16149_s5 + $0x2e0] ss:$52 sps:$4 sm:$0xff]  }
 0x78a   : > { %v6234_v56 = vsel %vm498_vm10, %v6218_v51, %v6219_v61  ;;  %9441 = vmatprep.mubr.bf16.mxu0 %v11358_v50  ;;  %9535 = vmatmul.mubr.bf16.gmra.mxu1 %v11417_v25  ;;  %v6769_v25 = vld [vmem:[#allocation5 + $0x3c] sm:$0xf] }
 0x78b   : > { %v6235_v5 = vsel %vm804_vm3, %v6187_v52, %v6234_v56  ;;  %v6193_v37 = vpop.permute.xlu0 %6192  ;;  %v6191_v44 = vpop.permute.xlu1 %6190  ;;  %9592 = vmatpush2.bf16.msra.mxu0 %v11352_v33  ;;  %9699 = vmatpush2.bf16.msra.mxu1 %v10836_v38  ;;  %v6785_v36 = vmul.bf16 %v6769_v25, %v16669_v0  ;;  %v11435_v33 = vld [vmem:[%s16149_s5 + $0x1c] ss:$52 sps:$4 sm:$0xff]  }
 0x78c   : > { %v6221_v55 = vrot.slane %v6193_v37, 4  ;;  %v6220_v54 = vrot.slane %v6191_v44, 4  ;;  %9593 = vmatprep.subr.bf16.mxu0 %v11357_v28  ;;  %9544 = vmatprep.mubr.bf16.mxu1 %v11421_v57  ;;  %v6784_v57 = vmul.bf16 %v14727_v41, %v16670_v42  ;;  %v6763_v28 = vld [vmem:[#allocation5 + $0xc] sm:$0xf]  ;;  %v11375_v37 = vld [vmem:[#allocation2 + $0x6c] ss:$-40 sps:$4 sm:$0xff]  }
 0x78d   : > { %6828 = vrot.lane.b32.xlu0 %v6787_v11, %s16671_s15  ;;  %6826 = vrot.lane.b32.xlu1 %v6786_v45, %s16671_s15  ;;  %v11378_v41 = vld [vmem:[%s16149_s5 + $0x78] ss:$52 sps:$4 sm:$0xff]   ;;  %v6779_v48 = vmul.bf16 %v6763_v28, %v16669_v0 }
 0x78e   : > { %v6236_v27 = vsel %vm498_vm10, %v6220_v54, %v6221_v55  ;;  %9442 = vmatmul.mubr.bf16.gmra.mxu0 %v11360_v53  ;;  %v11370_v53 = vld [vmem:[#allocation2 + $0x4f8] ss:$-240 sps:$4 sm:$0xff]   ;;  %v11396_v25 = vld [vmem:[#allocation2 + $0x47c] ss:$-272 sps:$4 sm:$0xff]  }
 0x78f   : > { %v6237_v4 = vsel %vm804_vm3, %v6191_v44, %v6236_v27  ;;  %v6685_v58 = vpop.permute.xlu0 %6684  ;;  %v6683_v13 = vpop.permute.xlu1 %6682  ;;  %9594 = vmatpush2.bf16.msra.mxu0 %v11355_v19  ;;  %9597 = vmatprep.mubr.bf16.mxu0 %v11366_v29  ;;  %v6778_v29 = vmul.bf16 %v14738_v12, %v16670_v42  ;;  %v11388_v55 = vld [vmem:[%s16149_s5 + $0xe4] ss:$52 sps:$4 sm:$0xff]  }
 0x790   : > { %v6715_v18 = vrot.slane %v6685_v58, 4  ;;  %v6714_v40 = vrot.slane %v6683_v13, 4  ;;  %9595 = vmatprep.subr.bf16.mxu0 %v10795_v2  ;;  %v10834_v15 = vcombine.low %v6235_v5, %v6237_v4  ;;  %v10835_v7 = vcombine.high %v6235_v5, %v6237_v4  ;;  %v6765_v19 = vld [vmem:[#allocation5 + $0x1c] sm:$0xf] }
 0x791   : > { %6832 = vrot.lane.b32.xlu0 %v6789_v14, %s16671_s15  ;;  %6830 = vrot.lane.b32.xlu1 %v6788_v32, %s16671_s15  ;;  %v11384_v2 = vld [vmem:[#allocation2 + $0x284] ss:$880 sps:$4 sm:$0xff]   ;;  %v6781_v58 = vmul.bf16 %v6765_v19, %v16669_v0 }
 0x792   : > { %v6730_v26 = vsel %vm498_vm10, %v6714_v40, %v6715_v18  ;;  %9700 = vmatprep.subr.bf16.mxu1 %v10835_v7  ;;  %9545 = vmatmul.mubr.bf16.gmra.mxu1 %v11423_v30  ;;  %v7143_v18 = vld [vmem:[#allocation5 + $0x6c] sm:$0xf]  ;;  %v11387_v0 = vld [vmem:[#allocation2 + $0x3a4] ss:$-872 sps:$4 sm:$0xff]  }
 0x793   : > { %v15007_v22 = vsel %vm671_vm7, %v6683_v13, %v6730_v26  ;;  %v6689_v49 = vpop.permute.xlu0 %6688  ;;  %v6687_v43 = vpop.permute.xlu1 %6686  ;;  %9596 = vmatpush2.bf16.msra.mxu0 %v10794_v46  ;;  %9701 = vmatpush2.bf16.msra.mxu1 %v10834_v15  ;;  %v6780_v13 = vmul.bf16 %v14753_v34, %v16670_v42  ;;  %v11382_v15 = vld [vmem:[#allocation2 + $0x280] ss:$880 sps:$4 sm:$0xff]  }
 0x794   : > { %v6717_v10 = vrot.slane %v6689_v49, 4  ;;  %v6716_v50 = vrot.slane %v6687_v43, 4  ;;  %9791 = vmatprep.subr.bf16.mxu0 %v11363_v1  ;;  %9554 = vmatprep.mubr.bf16.mxu1 %v11427_v35  ;;  %v11390_v34 = vld [vmem:[%s16149_s5 + $0xe0] ss:$52 sps:$4 sm:$0xff]  }
 0x795   : > { %6820 = vrot.lane.b32.xlu0 %v6783_v21, %s16671_s15  ;;  %6818 = vrot.lane.b32.xlu1 %v6782_v23, %s16671_s15  ;;  %v16672_v26 = vld [vmem:[#allocation24_spill] sm:$0xff] }
 0x796   : > { %v6732_v52 = vsel %vm498_vm10, %v6716_v50, %v6717_v10  ;;  %9598 = vmatmul.mubr.bf16.vlgmr.msra.gmra.mxu0 %v11364_v60  ;;  %v7159_v1 = vmul.bf16 %v7143_v18, %v16672_v26  ;;  %v16673_v60 = vld [vmem:[#allocation67_spill] sm:$0xff] }
 0x797   : > { %v15022_v16 = vsel %vm671_vm7, %v6687_v43, %v6732_v52  ;;  %v6085_v61 = vpop.permute.xlu0 %6084  ;;  %v6083_v51 = vpop.permute.xlu1 %6082  ;;  %9792 = vmatpush1.bf16.msra.mxu0 %v11361_v62  ;;  %9607 = vmatprep.mubr.bf16.mxu0 %v11376_v47  ;;  %v7158_v49 = vmul.bf16 %v14944_v39, %v16673_v60  ;;  %v11400_v43 = vld [vmem:[%s16149_s5 + $0x14c] ss:$52 sps:$4 sm:$0xff]   ;;  %v7145_v47 = vld [vmem:[#allocation5 + $0x7c] sm:$0xf] }
 0x798   : > { %v6103_v38 = vrot.slane %v6085_v61, 4  ;;  %v6102_v56 = vrot.slane %v6083_v51, 4  ;;  %9793 = vmatprep.subr.bf16.mxu0 %v11372_v8  ;;  %v11385_v10 = vld [vmem:[#allocation2 + $0x3a0] ss:$-872 sps:$4 sm:$0xff]   ;;  %v7161_v8 = vmul.bf16 %v7145_v47, %v16672_v26  ;;  %v11411_v18 = vld [vmem:[#allocation2 + $0x114] ss:$152 sps:$4 sm:$0xff]  }
 0x799   : > { %6824 = vrot.lane.b32.xlu0 %v6785_v36, %s16671_s15  ;;  %6822 = vrot.lane.b32.xlu1 %v6784_v57, %s16671_s15  ;;  %v7139_v36 = vld [vmem:[#allocation5 + $0x4c] sm:$0xf]  ;;  %v11394_v57 = vld [vmem:[#allocation2 + $0x478] ss:$-272 sps:$4 sm:$0xff]  }
 0x79a   : > { %v6118_v5 = vsel %vm498_vm10, %v6102_v56, %v6103_v38  ;;  %9555 = vmatmul.mubr.bf16.gmra.mxu1 %v11429_v17  ;;  %v7160_v17 = vmul.bf16 %v14948_v59, %v16673_v60  ;;  %v11399_v38 = vld [vmem:[#allocation2 + $0x184] ss:$976 sps:$4 sm:$0xff]   ;;  %v11402_v56 = vld [vmem:[%s16149_s5 + $0x148] ss:$52 sps:$4 sm:$0xff]  }
 0x79b   : > { %v6119_v44 = vsel %vm839_vm4, %v6083_v51, %v6118_v5  ;;  %v6089_v11 = vpop.permute.xlu0 %6088  ;;  %v6087_v45 = vpop.permute.xlu1 %6086  ;;  %9794 = vmatpush1.bf16.msra.mxu0 %v11370_v53  ;;  %9710 = vmatprep.mubr.bf16.mxu1 %v11435_v33 }
 0x79c   : > { %v6105_v54 = vrot.slane %v6089_v11, 4  ;;  %v6104_v24 = vrot.slane %v6087_v45, 4  ;;  %9795 = vmatprep.subr.bf16.mxu0 %v11375_v37  ;;  %v7155_v37 = vmul.bf16 %v7139_v36, %v16672_v26  ;;  %v15122_v36 = vld [vmem:[#allocation5 + $0x4] sm:$0xff] }
 0x79d   : > { %6812 = vrot.lane.b32.xlu0 %v6779_v48, %s16671_s15  ;;  %6810 = vrot.lane.b32.xlu1 %v6778_v29, %s16671_s15  ;;  %v7141_v48 = vld [vmem:[#allocation5 + $0x5c] sm:$0xf]  ;;  %v11397_v29 = vld [vmem:[#allocation2 + $0x180] ss:$976 sps:$4 sm:$0xff]  }
 0x79e   : > { %v6120_v27 = vsel %vm498_vm10, %v6104_v24, %v6105_v54  ;;  %9608 = vmatmul.mubr.bf16.gmra.mxu0 %v11378_v41  ;;  %v7154_v41 = vmul.bf16 %v14836_v63, %v16673_v60  ;;  %v11408_v54 = vld [vmem:[#allocation2 + $0x4ac] ss:$-216 sps:$4 sm:$0xff]  }
 0x79f   : > { %v6121_v12 = vsel %vm839_vm4, %v6087_v45, %v6120_v27  ;;  %v6581_v30 = vpop.permute.xlu0 %6580  ;;  %v6579_v4 = vpop.permute.xlu1 %6578  ;;  %9796 = vmatpush1.bf16.msra.mxu0 %v11373_v31  ;;  %9617 = vmatprep.mubr.bf16.mxu0 %v11388_v55  ;;  %v7157_v31 = vmul.bf16 %v7141_v48, %v16672_v26  ;;  %v7156_v27 = vmul.bf16 %v14853_v6, %v16673_v60  ;;  %v11414_v6 = vld [vmem:[%s16149_s5 + $0x1b0] ss:$52 sps:$4 sm:$0xff]  }
 0x7a0   : > { %v6599_v14 = vrot.slane %v6581_v30, 4  ;;  %v6598_v32 = vrot.slane %v6579_v4, 4  ;;  %9797 = vmatprep.subr.bf16.mxu0 %v11384_v2  ;;  %v10832_v40 = vcombine.low %v6119_v44, %v6121_v12  ;;  %v10833_v20 = vcombine.high %v6119_v44, %v6121_v12  ;;  %v11412_v44 = vld [vmem:[%s16149_s5 + $0x1b4] ss:$52 sps:$4 sm:$0xff]   ;;  %v7133_v48 = vld [vmem:[#allocation5 + $0x1c] sm:$0xf] }
 0x7a1   : > { %6816 = vrot.lane.b32.xlu0 %v6781_v58, %s16671_s15  ;;  %6814 = vrot.lane.b32.xlu1 %v6780_v13, %s16671_s15  ;;  %v7135_v30 = vld [vmem:[#allocation5 + $0x2c] sm:$0xf]  ;;  %s16875_s15 = smov %s16874_s30 }
 0x7a2   : > { %v6614_v7 = vsel %vm498_vm10, %v6598_v32, %v6599_v14  ;;  %9702 = vmatprep.subr.bf16.mxu1 %v10833_v20  ;;  %v11406_v14 = vld [vmem:[#allocation2 + $0x4a8] ss:$-216 sps:$4 sm:$0xff]  }
 0x7a3   : > { %v15057_v42 = vsel %vm706_vm8, %v6579_v4, %v6614_v7  ;;  %v6585_v35 = vpop.permute.xlu0 %6584  ;;  %v6583_v46 = vpop.permute.xlu1 %6582  ;;  %9703 = vmatpush2.bf16.msra.mxu1 %v10832_v40  ;;  %9798 = vmatpush1.bf16.msra.mxu0 %v11382_v15  ;;  %v15094_v4 = vld [vmem:[#allocation5 + $0x24] sm:$0xff]  ;;  %v7151_v7 = vmul.bf16 %v7135_v30, %v16672_v26 }
 0x7a4   : > { %v6601_v21 = vrot.slane %v6585_v35, 4  ;;  %v6600_v23 = vrot.slane %v6583_v46, 4  ;;  %9799 = vmatprep.subr.bf16.mxu0 %v11387_v0  ;;  %v7150_v0 = vmul.bf16 %v15094_v4, %v16673_v60  ;;  %v11418_v35 = vld [vmem:[%s16149_s5 + $0x21c] ss:$52 sps:$4 sm:$0xff]  }
 0x7a5   : > { %7204 = vrot.lane.b32.xlu0 %v7159_v1, %s16674_s6  ;;  %7202 = vrot.lane.b32.xlu1 %v7158_v49, %s16674_s6  ;;  %v7137_v49 = vld [vmem:[#allocation5 + $0x3c] sm:$0xf] }
 0x7a6   : > { %v6616_v50 = vsel %vm498_vm10, %v6600_v23, %v6601_v21  ;;  %9618 = vmatmul.mubr.bf16.gmra.mxu0 %v11390_v34  ;;  %v7655_v34 = vld [vmem:[#allocation2 + $0x420] sm:$0xff]  ;;  %v11409_v21 = vld [vmem:[#allocation2 + $0x110] ss:$152 sps:$4 sm:$0xff]  }
 0x7a7   : > { %v15069_v39 = vsel %vm706_vm8, %v6583_v46, %v6616_v50  ;;  %v6077_v62 = vpop.permute.xlu0 %6076  ;;  %v6075_v52 = vpop.permute.xlu1 %6074  ;;  %9800 = vmatpush1.bf16.msra.mxu0 %v11385_v10  ;;  %9627 = vmatprep.mubr.bf16.mxu0 %v11400_v43  ;;  %v15111_v43 = vld [vmem:[#allocation5 + $0x34] sm:$0xff] }
 0x7a8   : > { %v6099_v61 = vrot.slane %v6077_v62, 4  ;;  %v6098_v51 = vrot.slane %v6075_v52, 4  ;;  %9801 = vmatprep.subr.bf16.mxu0 %v11396_v25  ;;  %v7654_v23 = vld [vmem:[#allocation2 + $0x140] sm:$0xff] }
 0x7a9   : > { %7208 = vrot.lane.b32.xlu0 %v7161_v8, %s16674_s6  ;;  %7206 = vrot.lane.b32.xlu1 %v7160_v17, %s16674_s6  ;;  %v10871_v10 = vcombine.high %v7654_v23, %v7655_v34  ;;  %v7152_v8 = vmul.bf16 %v15111_v43, %v16673_v60 }
 0x7aa   : > { %v6114_v33 = vsel %vm498_vm10, %v6098_v51, %v6099_v61  ;;  %v7131_v51 = vld [vmem:[#allocation5 + $0xc] sm:$0xf] }
 0x7ab   : > { %v6115_v28 = vsel %vm839_vm4, %v6075_v52, %v6114_v33  ;;  %v6081_v53 = vpop.permute.xlu0 %6080  ;;  %v6079_v5 = vpop.permute.xlu1 %6078  ;;  %9802 = vmatpush1.bf16.msra.mxu0 %v11394_v57  ;;  %v7153_v52 = vmul.bf16 %v7137_v49, %v16672_v26  ;;  %v10870_v57 = vcombine.low %v7654_v23, %v7655_v34  ;;  %v10864_v34 = vcombine.low %v15057_v42, %v15069_v39  ;;  %v16676_v23 = vld [vmem:[#allocation66_spill] sm:$0xff] }
 0x7ac   : > { %v6101_v11 = vrot.slane %v6081_v53, 4  ;;  %v6100_v45 = vrot.slane %v6079_v5, 4  ;;  %9803 = vmatprep.subr.bf16.mxu0 %v11399_v38  ;;  %v10869_v38 = vcombine.high %v14941_v9, %v14964_v3 }
 0x7ad   : > { %7196 = vrot.lane.b32.xlu0 %v7155_v37, %s16674_s6  ;;  %7194 = vrot.lane.b32.xlu1 %v7154_v41, %s16674_s6  ;;  %v7147_v37 = vmul.bf16 %v7131_v51, %v16672_v26  ;;  %v7146_v41 = vmul.bf16 %v15122_v36, %v16673_v60 }
 0x7ae   : > { %v6116_v55 = vsel %vm498_vm10, %v6100_v45, %v6101_v11  ;;  %9628 = vmatmul.mubr.bf16.gmra.mxu0 %v11402_v56  ;;  %v11420_v56 = vld [vmem:[%s16149_s5 + $0x218] ss:$52 sps:$4 sm:$0xff]  }
 0x7af   : > { %v6117_v63 = vsel %vm839_vm4, %v6079_v5, %v6116_v55  ;;  %v6573_v24 = vpop.permute.xlu0 %6572  ;;  %v6571_v19 = vpop.permute.xlu1 %6570  ;;  %9804 = vmatpush1.bf16.msra.mxu0 %v11397_v29  ;;  %9637 = vmatprep.mubr.bf16.mxu0 %v11412_v44  ;;  %v11424_v44 = vld [vmem:[%s16149_s5 + $0x284] ss:$52 sps:$4 sm:$0xff]   ;;  %v15139_v29 = vld [vmem:[#allocation5 + $0x14] sm:$0xff]  ;;  %v10868_v55 = vcombine.low %v14941_v9, %v14964_v3 }
 0x7b0   : > { %v6595_v2 = vrot.slane %v6573_v24, 4  ;;  %v6594_v12 = vrot.slane %v6571_v19, 4  ;;  %9805 = vmatprep.subr.bf16.mxu0 %v11408_v54  ;;  %v10830_v58 = vcombine.low %v6115_v28, %v6117_v63  ;;  %v10831_v13 = vcombine.high %v6115_v28, %v6117_v63  ;;  %v7031_v63 = vld [vmem:[#allocation5 + $0x6c] sm:$0xf]  ;;  %v7033_v24 = vld [vmem:[#allocation5 + $0x7c] sm:$0xf] }
 0x7b1   : > { %7200 = vrot.lane.b32.xlu0 %v7157_v31, %s16674_s6  ;;  %7198 = vrot.lane.b32.xlu1 %v7156_v27, %s16674_s6  ;;  %v7148_v30 = vmul.bf16 %v15139_v29, %v16673_v60  ;;  %v10865_v60 = vcombine.high %v15057_v42, %v15069_v39 }
 0x7b2   : > { %v6610_v32 = vsel %vm498_vm10, %v6594_v12, %v6595_v2  ;;  %9704 = vmatprep.subr.bf16.mxu1 %v10831_v13  ;;  %v7149_v12 = vmul.bf16 %v7133_v48, %v16672_v26 }
 0x7b3   : > { %v15103_v40 = vsel %vm706_vm8, %v6571_v19, %v6610_v32  ;;  %v6577_v20 = vpop.permute.xlu0 %6576  ;;  %v6575_v15 = vpop.permute.xlu1 %6574  ;;  %9705 = vmatpush2.bf16.msra.mxu1 %v10830_v58  ;;  %9806 = vmatpush1.bf16.msra.mxu0 %v11406_v14  ;;  %v10867_v19 = vcombine.high %v15007_v22, %v15022_v16  ;;  %v11103_v14 = vpack.i.bf16 %v7033_v24, %v7031_v63 }
 0x7b4   : > { %v6597_v46 = vrot.slane %v6577_v20, 4  ;;  %v6596_v1 = vrot.slane %v6575_v15, 4  ;;  %9807 = vmatprep.subr.bf16.mxu0 %v11411_v18  ;;  %v10866_v32 = vcombine.low %v15007_v22, %v15022_v16  ;;  %v11426_v18 = vld [vmem:[%s16149_s5 + $0x280] ss:$52 sps:$4 sm:$0xff]  }
 0x7b5   : > { %7188 = vrot.lane.b32.xlu0 %v7151_v7, %s16674_s6  ;;  %7186 = vrot.lane.b32.xlu1 %v7150_v0, %s16674_s6  ;;  %v11430_v22 = vld [vmem:[%s16149_s5 + $0x2ec] ss:$52 sps:$4 sm:$0xff]  }
 0x7b6   : > { %v6612_v47 = vsel %vm498_vm10, %v6596_v1, %v6597_v46  ;;  %9638 = vmatmul.mubr.bf16.gmra.mxu0 %v11414_v6  ;;  %v7030_v0 = vld [vmem:[#allocation5 + $0x64] sm:$0xff] }
 0x7b7   : > { %v15117_v50 = vsel %vm706_vm8, %v6575_v15, %v6612_v47  ;;  %v6069_v25 = vpop.permute.xlu0 %6068  ;;  %v6067_v62 = vpop.permute.xlu1 %6066  ;;  %9808 = vmatpush2.bf16.msra.mxu0 %v11409_v21  ;;  %9647 = vmatprep.mubr.bf16.mxu0 %v11418_v35  ;;  %v7286_v47 = vmul.bf16 %v7030_v0, %v16676_v23 }
 0x7b8   : > { %v6095_v17 = vrot.slane %v6069_v25, 4  ;;  %v6094_v61 = vrot.slane %v6067_v62, 4  ;;  %9809 = vmatprep.subr.bf16.mxu0 %v10871_v10  ;;  %v10863_v46 = vcombine.high %v15103_v40, %v15117_v50  ;;  %v10862_v42 = vcombine.low %v15103_v40, %v15117_v50  ;;  %v11438_v40 = vld [vmem:[%s16149_s5 + $0x24] ss:$52 sps:$4 sm:$0xff]  }
 0x7b9   : > { %7192 = vrot.lane.b32.xlu0 %v7153_v52, %s16674_s6  ;;  %7190 = vrot.lane.b32.xlu1 %v7152_v8, %s16674_s6  ;;  %v11432_v8 = vld [vmem:[%s16149_s5 + $0x2e8] ss:$52 sps:$4 sm:$0xff]  }
 0x7ba   : > { %v6110_v33 = vsel %vm498_vm10, %v6094_v61, %v6095_v17 }
 0x7bb   : > { %v6111_v28 = vsel %vm839_vm4, %v6067_v62, %v6110_v33  ;;  %v6073_v53 = vpop.permute.xlu0 %6072  ;;  %v6071_v5 = vpop.permute.xlu1 %6070  ;;  %9810 = vmatpush2.bf16.msra.mxu0 %v10870_v57  ;;  %v7271_v62 = vld [vmem:[#allocation5 + $0x6c] sm:$0xf]  ;;  %v7288_v57 = vmul.bf16 %v14948_v59, %v16676_v23  ;;  %v16678_v33 = vld [vmem:[#allocation78_spill] sm:$0xff] }
 0x7bc   : > { %v6097_v11 = vrot.slane %v6073_v53, 4  ;;  %v6096_v45 = vrot.slane %v6071_v5, 4  ;;  %9811 = vmatprep.subr.bf16.mxu0 %v10869_v38  ;;  %v7287_v38 = vmul.bf16 %v7271_v62, %v16678_v33 }
 0x7bd   : > { %7180 = vrot.lane.b32.xlu0 %v7147_v37, %s16674_s6  ;;  %7178 = vrot.lane.b32.xlu1 %v7146_v41, %s16674_s6  ;;  %v7027_v37 = vld [vmem:[#allocation5 + $0x4c] sm:$0xf] }
 0x7be   : > { %v6112_v54 = vsel %vm498_vm10, %v6096_v45, %v6097_v11  ;;  %9648 = vmatmul.mubr.bf16.gmra.mxu0 %v11420_v56 }
 0x7bf   : > { %v6113_v31 = vsel %vm839_vm4, %v6071_v5, %v6112_v54  ;;  %v6565_v27 = vpop.permute.xlu0 %6564  ;;  %v6563_v2 = vpop.permute.xlu1 %6562  ;;  %9812 = vmatpush2.bf16.msra.mxu0 %v10868_v55  ;;  %9657 = vmatprep.mubr.bf16.mxu0 %v11424_v44  ;;  %v7026_v54 = vld [vmem:[#allocation5 + $0x44] sm:$0xff] }
 0x7c0   : > { %v6591_v9 = vrot.slane %v6565_v27, 4  ;;  %v6590_v3 = vrot.slane %v6563_v2, 4  ;;  %9813 = vmatprep.subr.bf16.mxu0 %v10867_v19  ;;  %v10828_v58 = vcombine.low %v6111_v28, %v6113_v31  ;;  %v10829_v13 = vcombine.high %v6111_v28, %v6113_v31  ;;  %v7273_v28 = vld [vmem:[#allocation5 + $0x7c] sm:$0xf]  ;;  %v11433_v27 = vld [vmem:[%s16149_s5 + $0x18] ss:$52 sps:$4 sm:$0xff]  }
 0x7c1   : > { %7184 = vrot.lane.b32.xlu0 %v7149_v12, %s16674_s6  ;;  %7182 = vrot.lane.b32.xlu1 %v7148_v30, %s16674_s6  ;;  %v7289_v45 = vmul.bf16 %v7273_v28, %v16678_v33 }
 0x7c2   : > { %v6606_v26 = vsel %vm498_vm10, %v6590_v3, %v6591_v9  ;;  %9706 = vmatprep.subr.bf16.mxu1 %v10829_v13  ;;  %v11439_v9 = vld [vmem:[%s16149_s5 + $0x84] ss:$52 sps:$4 sm:$0xff]   ;;  %v7028_v13 = vld [vmem:[#allocation5 + $0x54] sm:$0xff] }
 0x7c3   : > { %v6607_v6 = vsel %vm706_vm8, %v6563_v2, %v6606_v26  ;;  %v6569_v20 = vpop.permute.xlu0 %6568  ;;  %v6567_v15 = vpop.permute.xlu1 %6566  ;;  %9707 = vmatpush2.bf16.msra.mxu1 %v10828_v58  ;;  %9814 = vmatpush2.bf16.msra.mxu0 %v10866_v32  ;;  %v7284_v62 = vmul.bf16 %v7028_v13, %v16676_v23 }
 0x7c4   : > { %v6593_v16 = vrot.slane %v6569_v20, 4  ;;  %v6592_v7 = vrot.slane %v6567_v15, 4  ;;  %9815 = vmatprep.subr.bf16.mxu0 %v10865_v60  ;;  %v7282_v20 = vmul.bf16 %v7026_v54, %v16676_v23 }
 0x7c5   : > { %11104 = vrot.lane.b32.xlu0 %v11103_v14, %s16675_s14  ;;  %7074 = vrot.lane.b32.xlu1 %v7030_v0, %s16675_s14  ;;  %v7267_v14 = vld [vmem:[#allocation5 + $0x4c] sm:$0xf] }
 0x7c6   : > { %v6608_v35 = vsel %vm498_vm10, %v6592_v7, %v6593_v16  ;;  %9658 = vmatmul.mubr.bf16.gmra.mxu0 %v11426_v18  ;;  %v7269_v16 = vld [vmem:[#allocation5 + $0x5c] sm:$0xf] }
 0x7c7   : > { %v6609_v1 = vsel %vm706_vm8, %v6567_v15, %v6608_v35  ;;  %v6061_v49 = vpop.permute.xlu0 %6060  ;;  %v6059_v21 = vpop.permute.xlu1 %6058  ;;  %9816 = vmatpush2.bf16.msra.mxu0 %v10864_v34  ;;  %9667 = vmatprep.mubr.bf16.mxu0 %v11430_v22  ;;  %v7023_v34 = vld [vmem:[#allocation5 + $0x2c] sm:$0xf] }
 0x7c8   : > { %v6091_v10 = vrot.slane %v6061_v49, 4  ;;  %v6090_v25 = vrot.slane %v6059_v21, 4  ;;  %9817 = vmatprep.subr.bf16.mxu0 %v10863_v46  ;;  %v10861_v52 = vcombine.high %v6607_v6, %v6609_v1  ;;  %v10860_v53 = vcombine.low %v6607_v6, %v6609_v1  ;;  %v7025_v46 = vld [vmem:[#allocation5 + $0x3c] sm:$0xf]  ;;  %v11436_v1 = vld [vmem:[%s16149_s5 + $0x20] ss:$52 sps:$4 sm:$0xff]  }
 0x7c9   : > { %7330 = vrot.lane.b32.xlu0 %v7286_v47, %s16677_s16  ;;  %7078 = vrot.lane.b32.xlu1 %v14948_v59, %s16675_s14  ;;  %v7029_v59 = vld [vmem:[#allocation5 + $0x5c] sm:$0xf]  ;;  %v7283_v6 = vmul.bf16 %v7267_v14, %v16678_v33  ;;  %v11441_v49 = vld [vmem:[%s16149_s5 + $0x80] ss:$52 sps:$4 sm:$0xff]  }
 0x7ca   : > { %v6106_v39 = vsel %vm498_vm10, %v6090_v25, %v6091_v10  ;;  %v11108_v19 = vpack.i.bf16 %v7029_v59, %v7027_v37  ;;  %v7285_v25 = vmul.bf16 %v7269_v16, %v16678_v33  ;;  %v11447_v37 = vld [vmem:[%s16149_s5 + $0x88] ss:$52 sps:$4 sm:$0xff]  }
 0x7cb   : > { %v6107_v17 = vsel %vm839_vm4, %v6059_v21, %v6106_v39  ;;  %v6065_v61 = vpop.permute.xlu0 %6064  ;;  %v6063_v51 = vpop.permute.xlu1 %6062  ;;  %9818 = vmatpush2.bf16.msra.mxu0 %v10862_v42  ;;  %v11442_v42 = vld [vmem:[%s16149_s5 + $0xec] ss:$52 sps:$4 sm:$0xff]  }
 0x7cc   : > { %v6093_v50 = vrot.slane %v6065_v61, 4  ;;  %v6092_v56 = vrot.slane %v6063_v51, 4  ;;  %9819 = vmatprep.subr.bf16.mxu0 %v10861_v52  ;;  %v11444_v39 = vld [vmem:[%s16149_s5 + $0x8c] ss:$52 sps:$4 sm:$0xff]  }
 0x7cd   : > { %7334 = vrot.lane.b32.xlu0 %v7288_v57, %s16677_s16  ;;  %7332 = vrot.lane.b32.xlu1 %v7287_v38, %s16677_s16 }
 0x7ce   : > { %v6108_v5 = vsel %vm498_vm10, %v6092_v56, %v6093_v50  ;;  %9668 = vmatmul.mubr.bf16.gmra.mxu0 %v11432_v8 }
 0x7cf   : > { %v6109_v41 = vsel %vm839_vm4, %v6063_v51, %v6108_v5  ;;  %v6557_v44 = vpop.permute.xlu0 %6556  ;;  %v6555_v11 = vpop.permute.xlu1 %6554  ;;  %9820 = vmatpush2.bf16.msra.mxu0 %v10860_v53  ;;  %9823 = vmatprep.mubr.bf16.mxu0 %v11438_v40  ;;  %v11446_v5 = vld [vmem:[%s16149_s5 + $0xe8] ss:$52 sps:$4 sm:$0xff]  }
 0x7d0   : > { %v6587_v48 = vrot.slane %v6557_v44, 4  ;;  %v6586_v55 = vrot.slane %v6555_v11, 4  ;;  %v10826_v63 = vcombine.low %v6107_v17, %v6109_v41  ;;  %v10827_v24 = vcombine.high %v6107_v17, %v6109_v41 }
 0x7d1   : > { %7066 = vrot.lane.b32.xlu0 %v7026_v54, %s16675_s14  ;;  %7336 = vrot.lane.b32.xlu1 %v7289_v45, %s16677_s16  ;;  %v11113_v17 = vpack.i.bf16 %v7025_v46, %v7023_v34  ;;  %v11448_v45 = vld [vmem:[%s16149_s5 + $0x154] ss:$52 sps:$4 sm:$0xff]  }
 0x7d2   : > { %v6602_v31 = vsel %vm498_vm10, %v6586_v55, %v6587_v48  ;;  %9708 = vmatprep.subr.bf16.mxu1 %v10827_v24  ;;  %v11450_v48 = vld [vmem:[%s16149_s5 + $0xf4] ss:$52 sps:$4 sm:$0xff]  }
 0x7d3   : > { %v6603_v2 = vsel %vm706_vm8, %v6555_v11, %v6602_v31  ;;  %v6561_v12 = vpop.permute.xlu0 %6560  ;;  %v6559_v30 = vpop.permute.xlu1 %6558  ;;  %9709 = vmatpush2.bf16.msra.mxu1 %v10826_v63  ;;  %v7278_v11 = vmul.bf16 %v15094_v4, %v16676_v23  ;;  %v7263_v63 = vld [vmem:[#allocation5 + $0x2c] sm:$0xf] }
 0x7d4   : > { %v6589_v3 = vrot.slane %v6561_v12, 4  ;;  %v6588_v58 = vrot.slane %v6559_v30, 4 }
 0x7d5   : > { %7070 = vrot.lane.b32.xlu0 %v7028_v13, %s16675_s14  ;;  %11109 = vrot.lane.b32.xlu1 %v11108_v19, %s16675_s14  ;;  %v7019_v13 = vld [vmem:[#allocation5 + $0xc] sm:$0xf] }
 0x7d6   : > { %v6604_v32 = vsel %vm498_vm10, %v6588_v58, %v6589_v3  ;;  %9711 = vmatmul.mubr.bf16.vlgmr.msra.gmra.mxu1 %v11433_v27  ;;  %v7280_v27 = vmul.bf16 %v15111_v43, %v16676_v23 }
 0x7d7   : > { %v6605_v26 = vsel %vm706_vm8, %v6559_v30, %v6604_v32  ;;  %v6965_v60 = vpop.permute.xlu0 %6964  ;;  %v6963_v18 = vpop.permute.xlu1 %6962  ;;  %9720 = vmatprep.mubr.bf16.mxu1 %v11439_v9  ;;  %v7265_v9 = vld [vmem:[#allocation5 + $0x3c] sm:$0xf]  ;;  %vm16694_vm8 = vcmask 785408  }
 0x7d8   : > { %v6983_v15 = vrot.slane %v6965_v60, 4  ;;  %v6982_v22 = vrot.slane %v6963_v18, 4  ;;  %v10858_v7 = vcombine.low %v6603_v2, %v6605_v26  ;;  %v10859_v0 = vcombine.high %v6603_v2, %v6605_v26  ;;  %v7021_v32 = vld [vmem:[#allocation5 + $0x1c] sm:$0xf]  ;;  %vm16703_vm2 = vmmov %vm16694_vm8 }
 0x7d9   : > { %7324 = vrot.lane.b32.xlu0 %v7283_v6, %s16677_s16  ;;  %7322 = vrot.lane.b32.xlu1 %v7282_v20, %s16677_s16  ;;  %v7279_v2 = vmul.bf16 %v7263_v63, %v16678_v33  ;;  %v11453_v26 = vld [vmem:[%s16149_s5 + $0xf0] ss:$52 sps:$4 sm:$0xff]   ;;  %v7281_v20 = vmul.bf16 %v7265_v9, %v16678_v33  ;;  %vm16707_vm3 = vmmov %vm16703_vm2 }
 0x7da   : > { %v6998_v35 = vsel %vm498_vm10, %v6982_v22, %v6983_v15  ;;  %9821 = vmatprep.subr.bf16.mxu0 %v10859_v0  ;;  %v11454_v15 = vld [vmem:[%s16149_s5 + $0x1bc] ss:$52 sps:$4 sm:$0xff]   ;;  %v11118_v0 = vpack.i.bf16 %v7021_v32, %v7019_v13  ;;  %vm16709_vm4 = vmmov %vm16703_vm2 }
 0x7db   : > { %v6999_v21 = vsel %vm591_vm11, %v6963_v18, %v6998_v35  ;;  %v6969_v47 = vpop.permute.xlu0 %6968  ;;  %v6967_v10 = vpop.permute.xlu1 %6966  ;;  %9822 = vmatpush2.bf16.msra.mxu0 %v10858_v7  ;;  %v11456_v22 = vld [vmem:[%s16149_s5 + $0x15c] ss:$52 sps:$4 sm:$0xff]   ;;  %vm16718_vm5 = vmmov %vm16703_vm2 }
 0x7dc   : > { %v6985_v52 = vrot.slane %v6969_v47, 4  ;;  %v6984_v8 = vrot.slane %v6967_v10, 4  ;;  %v7259_v47 = vld [vmem:[#allocation5 + $0xc] sm:$0xf] }
 0x7dd   : > { %7328 = vrot.lane.b32.xlu0 %v7285_v25, %s16677_s16  ;;  %7326 = vrot.lane.b32.xlu1 %v7284_v62, %s16677_s16 }
 0x7de   : > { %v7000_v61 = vsel %vm498_vm10, %v6984_v8, %v6985_v52  ;;  %9721 = vmatmul.mubr.bf16.gmra.mxu1 %v11441_v49  ;;  %9824 = vmatmul.mubr.bf16.vlgmr.msra.gmra.mxu0 %v11436_v1 }
 0x7df   : > { %v7001_v51 = vsel %vm591_vm11, %v6967_v10, %v7000_v61  ;;  %v6957_v57 = vpop.permute.xlu0 %6956  ;;  %v6955_v38 = vpop.permute.xlu1 %6954  ;;  %9730 = vmatprep.mubr.bf16.mxu1 %v11442_v42  ;;  %9833 = vmatprep.mubr.bf16.mxu0 %v11444_v39  ;;  %v11458_v42 = vld [vmem:[%s16149_s5 + $0x1b8] ss:$52 sps:$4 sm:$0xff]   ;;  %v7275_v61 = vmul.bf16 %v7259_v47, %v16678_v33 }
 0x7e0   : > { %v6979_v40 = vrot.slane %v6957_v57, 4  ;;  %v6978_v50 = vrot.slane %v6955_v38, 4  ;;  %v10888_v56 = vcombine.low %v6999_v21, %v7001_v51  ;;  %v10889_v28 = vcombine.high %v6999_v21, %v7001_v51  ;;  %v11459_v39 = vld [vmem:[%s16149_s5 + $0x158] ss:$52 sps:$4 sm:$0xff]  }
 0x7e1   : > { %11114 = vrot.lane.b32.xlu0 %v11113_v17, %s16675_s14  ;;  %7058 = vrot.lane.b32.xlu1 %v15094_v4, %s16675_s14  ;;  %v7274_v51 = vmul.bf16 %v15122_v36, %v16676_v23  ;;  %v11460_v57 = vld [vmem:[%s16149_s5 + $0x224] ss:$52 sps:$4 sm:$0xff]  }
 0x7e2   : > { %v6994_v53 = vsel %vm498_vm10, %v6978_v50, %v6979_v40  ;;  %9904 = vmatprep.subr.bf16.mxu1 %v10889_v28 }
 0x7e3   : > { %v6995_v59 = vsel %vm591_vm11, %v6955_v38, %v6994_v53  ;;  %v6961_v41 = vpop.permute.xlu0 %6960  ;;  %v6959_v44 = vpop.permute.xlu1 %6958  ;;  %9905 = vmatpush1.bf16.msra.mxu1 %v10888_v56  ;;  %v11464_v38 = vld [vmem:[%s16149_s5 + $0x1c4] ss:$52 sps:$4 sm:$0xff]  }
 0x7e4   : > { %v6981_v55 = vrot.slane %v6961_v41, 4  ;;  %v6980_v54 = vrot.slane %v6959_v44, 4  ;;  %v7261_v56 = vld [vmem:[#allocation5 + $0x1c] sm:$0xf] }
 0x7e5   : > { %7314 = vrot.lane.b32.xlu0 %v7278_v11, %s16677_s16  ;;  %7062 = vrot.lane.b32.xlu1 %v15111_v43, %s16675_s14  ;;  %v11452_v43 = vld [vmem:[%s16149_s5 + $0x150] ss:$52 sps:$4 sm:$0xff]  }
 0x7e6   : > { %v6996_v24 = vsel %vm498_vm10, %v6980_v54, %v6981_v55  ;;  %9731 = vmatmul.mubr.bf16.gmra.mxu1 %v11446_v5  ;;  %9834 = vmatmul.mubr.bf16.gmra.mxu0 %v11447_v37  ;;  %v7277_v37 = vmul.bf16 %v7261_v56, %v16678_v33  ;;  %v11465_v33 = vld [vmem:[%s16149_s5 + $0x220] ss:$52 sps:$4 sm:$0xff]  }
 0x7e7   : > { %v6997_v4 = vsel %vm591_vm11, %v6959_v44, %v6996_v24  ;;  %v6949_v19 = vpop.permute.xlu0 %6948  ;;  %v6947_v31 = vpop.permute.xlu1 %6946  ;;  %9740 = vmatprep.mubr.bf16.mxu1 %v11448_v45  ;;  %9843 = vmatprep.mubr.bf16.mxu0 %v11450_v48  ;;  %v7699_v48 = vld [vmem:[%s16679_s1 + $0x8] sm:$0xff] }
 0x7e8   : > { %v6975_v12 = vrot.slane %v6949_v19, 4  ;;  %v6974_v30 = vrot.slane %v6947_v31, 4  ;;  %v10886_v3 = vcombine.low %v6995_v59, %v6997_v4  ;;  %v10887_v58 = vcombine.high %v6995_v59, %v6997_v4  ;;  %v11466_v4 = vld [vmem:[%s16149_s5 + $0x28c] ss:$52 sps:$4 sm:$0xff]  }
 0x7e9   : > { %7318 = vrot.lane.b32.xlu0 %v7280_v27, %s16677_s16  ;;  %7316 = vrot.lane.b32.xlu1 %v7279_v2, %s16677_s16  ;;  %v7276_v59 = vmul.bf16 %v15139_v29, %v16676_v23  ;;  %v11462_v23 = vld [vmem:[%s16149_s5 + $0x1c0] ss:$52 sps:$4 sm:$0xff]  }
 0x7ea   : > { %v6990_v14 = vsel %vm498_vm10, %v6974_v30, %v6975_v12  ;;  %9906 = vmatprep.subr.bf16.mxu1 %v10887_v58  ;;  %v11470_v19 = vld [vmem:[%s16149_s5 + $0x22c] ss:$52 sps:$4 sm:$0xff]   ;;  %v7701_v12 = vld [vmem:[%s16679_s1 + $0x18] sm:$0xff]  ;;  %v7700_v30 = vld [vmem:[%s16679_s1 + $0x10] sm:$0xff] }
 0x7eb   : > { %v6991_v60 = vsel %vm591_vm11, %v6947_v31, %v6990_v14  ;;  %v6953_v18 = vpop.permute.xlu0 %6952  ;;  %v6951_v6 = vpop.permute.xlu1 %6950  ;;  %9907 = vmatpush1.bf16.msra.mxu1 %v10886_v3  ;;  %v11483_v56 = vld [vmem:[%s16149_s5 + $0x2c] ss:$52 sps:$4 sm:$0xff]  }
 0x7ec   : > { %v6977_v16 = vrot.slane %v6953_v18, 4  ;;  %v6976_v7 = vrot.slane %v6951_v6, 4  ;;  %v7702_v18 = vld [vmem:[%s16679_s1 + $0x20] sm:$0xff] }
 0x7ed   : > { %7050 = vrot.lane.b32.xlu0 %v15122_v36, %s16675_s14  ;;  %7320 = vrot.lane.b32.xlu1 %v7281_v20, %s16677_s16  ;;  %v11471_v20 = vld [vmem:[%s16149_s5 + $0x288] ss:$52 sps:$4 sm:$0xff]  }
 0x7ee   : > { %v6992_v34 = vsel %vm498_vm10, %v6976_v7, %v6977_v16  ;;  %9741 = vmatmul.mubr.bf16.gmra.mxu1 %v11452_v43  ;;  %9844 = vmatmul.mubr.bf16.gmra.mxu0 %v11453_v26  ;;  %v7703_v26 = vld [vmem:[%s16679_s1 + $0x28] sm:$0xff] }
 0x7ef   : > { %v6993_v35 = vsel %vm591_vm11, %v6951_v6, %v6992_v34  ;;  %v6941_v46 = vpop.permute.xlu0 %6940  ;;  %v6939_v1 = vpop.permute.xlu1 %6938  ;;  %9750 = vmatprep.mubr.bf16.mxu1 %v11454_v15  ;;  %9853 = vmatprep.mubr.bf16.mxu0 %v11456_v22  ;;  %v11468_v6 = vld [vmem:[%s16149_s5 + $0x228] ss:$52 sps:$4 sm:$0xff]  }
 0x7f0   : > { %v6971_v49 = vrot.slane %v6941_v46, 4  ;;  %v6970_v21 = vrot.slane %v6939_v1, 4  ;;  %v10884_v10 = vcombine.low %v6991_v60, %v6993_v35  ;;  %v10885_v25 = vcombine.high %v6991_v60, %v6993_v35  ;;  %v11472_v7 = vld [vmem:[%s16149_s5 + $0x2f4] ss:$52 sps:$4 sm:$0xff]  }
 0x7f1   : > { %7054 = vrot.lane.b32.xlu0 %v15139_v29, %s16675_s14  ;;  %11119 = vrot.lane.b32.xlu1 %v11118_v0, %s16675_s14  ;;  %v7698_v29 = vld [vmem:[%s16679_s1] sm:$0xff]  ;;  %v11476_v0 = vld [vmem:[%s16149_s5 + $0x294] ss:$52 sps:$4 sm:$0xff]  }
 0x7f2   : > { %v6986_v62 = vsel %vm498_vm10, %v6970_v21, %v6971_v49  ;;  %9908 = vmatprep.subr.bf16.mxu1 %v10885_v25  ;;  %v7704_v49 = vld [vmem:[%s16679_s1 + $0x30] sm:$0xff] }
 0x7f3   : > { %v6987_v52 = vsel %vm591_vm11, %v6939_v1, %v6986_v62  ;;  %v6945_v8 = vpop.permute.xlu0 %6944  ;;  %v6943_v17 = vpop.permute.xlu1 %6942  ;;  %9909 = vmatpush1.bf16.msra.mxu1 %v10884_v10  ;;  %v7705_v1 = vld [vmem:[%s16679_s1 + $0x38] sm:$0xff] }
 0x7f4   : > { %v6973_v40 = vrot.slane %v6945_v8, 4  ;;  %v6972_v50 = vrot.slane %v6943_v17, 4 }
 0x7f5   : > { %7308 = vrot.lane.b32.xlu0 %v7275_v61, %s16677_s16  ;;  %7306 = vrot.lane.b32.xlu1 %v7274_v51, %s16677_s16  ;;  %v11474_v61 = vld [vmem:[%s16149_s5 + $0x290] ss:$52 sps:$4 sm:$0xff]  }
 0x7f6   : > { %v6988_v28 = vsel %vm498_vm10, %v6972_v50, %v6973_v40  ;;  %9751 = vmatmul.mubr.bf16.gmra.mxu1 %v11458_v42  ;;  %9854 = vmatmul.mubr.bf16.gmra.mxu0 %v11459_v39  ;;  %v11477_v51 = vld [vmem:[%s16149_s5 + $0x2f0] ss:$52 sps:$4 sm:$0xff]  }
 0x7f7   : > { %v6989_v36 = vsel %vm591_vm11, %v6943_v17, %v6988_v28  ;;  %v6837_v53 = vpop.permute.xlu0 %6836  ;;  %v6835_v5 = vpop.permute.xlu1 %6834  ;;  %9760 = vmatprep.mubr.bf16.mxu1 %v11460_v57  ;;  %9863 = vmatprep.mubr.bf16.mxu0 %v11464_v38  ;;  %v7706_v17 = vld [vmem:[%s16679_s1 + $0x40] sm:$0xff]  ;;  %v11480_v50 = vld [vmem:[%s16149_s5 + $0x2fc] ss:$52 sps:$4 sm:$0xff]   ;;  %vm16697_vm11 = vmmov %vm16694_vm8 }
 0x7f8   : > { %v6855_v41 = vrot.slane %v6837_v53, 4  ;;  %v6854_v44 = vrot.slane %v6835_v5, 4  ;;  %v10882_v11 = vcombine.low %v6987_v52, %v6989_v36  ;;  %v10883_v45 = vcombine.high %v6987_v52, %v6989_v36  ;;  %v7707_v52 = vld [vmem:[%s16679_s1 + $0x48] sm:$0xff] }
 0x7f9   : > { %7312 = vrot.lane.b32.xlu0 %v7277_v37, %s16677_s16  ;;  %7310 = vrot.lane.b32.xlu1 %v7276_v59, %s16677_s16  ;;  %v7708_v37 = vld [vmem:[%s16679_s1 + $0x50] sm:$0xff]  ;;  %s10367_s16 = sshll.u32 %s324_s28, 4  ;;  %s10368_s16 = int_to_ptr.vmem [resolvable:$true] %s10367_s16 }
 0x7fa   : > { %v6870_v55 = vsel %vm498_vm10, %v6854_v44, %v6855_v41  ;;  %9910 = vmatprep.subr.bf16.mxu1 %v10883_v45  ;;  %s11519_s27 = scalar_lea.vmem %s10368_s16, 16  ;;  %p11526_p0 = scmp.lt.s32.totalorder %s10368_s16, %s11524_s25 }
 0x7fb   : > { %v6871_v54 = vsel %vm636_vm6, %v6835_v5, %v6870_v55  ;;  %v6841_v63 = vpop.permute.xlu0 %6840  ;;  %v6839_v24 = vpop.permute.xlu1 %6838  ;;  %9911 = vmatpush1.bf16.msra.mxu1 %v10882_v11  ;;  %v7709_v5 = vld [vmem:[%s16679_s1 + $0x58] sm:$0xff]  ;;  %p11520_p11 = scmp.ne.s32.totalorder %s10368_s16, %s11519_s27  ;;  %p11527_p1 = scmp.lt.s32.totalorder %s11525_s2, %s11519_s27 }
 0x7fc   : > { %v6857_v31 = vrot.slane %v6841_v63, 4  ;;  %v6856_v27 = vrot.slane %v6839_v24, 4 }
 0x7fd   : > { %7721 = vperm.xlu0 %11061, %v7699_v48   ;;  %7716 = vperm.xlu1 %11062, %v7698_v29   ;;  %p11521_p12 = pnand %p11520_p11, %p11698_p5  ;;  %p11528_p2 = por %p11527_p1, %p11526_p0 }
 0x7fe   : > { %v6872_v2 = vsel %vm498_vm10, %v6856_v27, %v6857_v31  ;;  %9761 = vmatmul.mubr.bf16.gmra.mxu1 %v11465_v33  ;;  %9864 = vmatmul.mubr.bf16.gmra.mxu0 %v11462_v23  ;;  %v7711_v23 = vld [vmem:[%s16679_s1 + $0x68] sm:$0xff]  ;;  %v7710_v33 = vld [vmem:[%s16679_s1 + $0x60] sm:$0xff] }
 0x7ff   : > { %v6873_v9 = vsel %vm636_vm6, %v6839_v24, %v6872_v2  ;;  %v6829_v3 = vpop.permute.xlu0 %6828  ;;  %v6827_v58 = vpop.permute.xlu1 %6826  ;;  %9770 = vmatprep.mubr.bf16.mxu1 %v11466_v4  ;;  %9873 = vmatprep.mubr.bf16.mxu0 %v11470_v19  ;;  %v7713_v2 = vld [vmem:[%s16679_s1 + $0x78] sm:$0xff]  ;;  %p11522_p13 = pneg %p11521_p12 }
 0x800   : > { %v6851_v13 = vrot.slane %v6829_v3, 4  ;;  %v6850_v14 = vrot.slane %v6827_v58, 4  ;;  %v10880_v32 = vcombine.low %v6871_v54, %v6873_v9  ;;  %v10881_v43 = vcombine.high %v6871_v54, %v6873_v9  ;;  %v11478_v54 = vld [vmem:[%s16149_s5 + $0x2f8] ss:$52 sps:$4 sm:$0xff]  }
 0x801   : > { %7731 = vperm.xlu0 %11061, %v7701_v12   ;;  %7726 = vperm.xlu1 %11062, %v7700_v30   ;;  %v7712_v12 = vld [vmem:[%s16679_s1 + $0x70] sm:$0xff]  ;;  %p11529_p3 = pnand %p11528_p2, %p11522_p13 }
 0x802   : > { %v6866_v60 = vsel %vm498_vm10, %v6850_v14, %v6851_v13  ;;  %9912 = vmatprep.subr.bf16.mxu1 %v10881_v43  ;;  %v16680_v13 = vmov 0  }
 0x803   : > { %v6867_v15 = vsel %vm636_vm6, %v6827_v58, %v6866_v60  ;;  %v6833_v22 = vpop.permute.xlu0 %6832  ;;  %v6831_v16 = vpop.permute.xlu1 %6830  ;;  %9913 = vmatpush1.bf16.msra.mxu1 %v10880_v32 }
 0x804   : > { %v6853_v34 = vrot.slane %v6833_v22, 4  ;;  %v6852_v35 = vrot.slane %v6831_v16, 4 }
 0x805   : > { %7741 = vperm.xlu0 %11061, %v7703_v26   ;;  %7736 = vperm.xlu1 %11062, %v7702_v18  }
 0x806   : > { %v6868_v46 = vsel %vm498_vm10, %v6852_v35, %v6853_v34  ;;  %9771 = vmatmul.mubr.bf16.gmra.mxu1 %v11471_v20  ;;  %9874 = vmatmul.mubr.bf16.gmra.mxu0 %v11468_v6 }
 0x807   : > { %v6869_v21 = vsel %vm636_vm6, %v6831_v16, %v6868_v46  ;;  %v6821_v47 = vpop.permute.xlu0 %6820  ;;  %v6819_v10 = vpop.permute.xlu1 %6818  ;;  %9780 = vmatprep.mubr.bf16.mxu1 %v11472_v7  ;;  %9883 = vmatprep.mubr.bf16.mxu0 %v11476_v0 }
 0x808   : > { %v6847_v25 = vrot.slane %v6821_v47, 4  ;;  %v6846_v62 = vrot.slane %v6819_v10, 4  ;;  %v10878_v42 = vcombine.low %v6867_v15, %v6869_v21  ;;  %v10879_v39 = vcombine.high %v6867_v15, %v6869_v21 }
 0x809   : > { %7751 = vperm.xlu0 %11061, %v7705_v1   ;;  %7746 = vperm.xlu1 %11062, %v7704_v49  }
 0x80a   : > { %v6862_v8 = vsel %vm498_vm10, %v6846_v62, %v6847_v25  ;;  %9914 = vmatprep.subr.bf16.mxu1 %v10879_v39 }
 0x80b   : > { %v6863_v57 = vsel %vm636_vm6, %v6819_v10, %v6862_v8  ;;  %v6825_v38 = vpop.permute.xlu0 %6824  ;;  %v6823_v40 = vpop.permute.xlu1 %6822  ;;  %9915 = vmatpush1.bf16.msra.mxu1 %v10878_v42 }
 0x80c   : > { %v6849_v28 = vrot.slane %v6825_v38, 4  ;;  %v6848_v36 = vrot.slane %v6823_v40, 4 }
 0x80d   : > { %7761 = vperm.xlu0 %11061, %v7707_v52   ;;  %7756 = vperm.xlu1 %11062, %v7706_v17  }
 0x80e   : > { %v6864_v53 = vsel %vm498_vm10, %v6848_v36, %v6849_v28  ;;  %9781 = vmatmul.mubr.bf16.gmra.mxu1 %v11477_v51  ;;  %9884 = vmatmul.mubr.bf16.gmra.mxu0 %v11474_v61 }
 0x80f   : > { %v6865_v59 = vsel %vm636_vm6, %v6823_v40, %v6864_v53  ;;  %v6813_v41 = vpop.permute.xlu0 %6812  ;;  %v6811_v44 = vpop.permute.xlu1 %6810  ;;  %9893 = vmatprep.mubr.bf16.mxu0 %v11480_v50  ;;  %9936 = vmatprep.mubr.bf16.mxu1 %v11483_v56 }
 0x810   : > { %v6843_v11 = vrot.slane %v6813_v41, 4  ;;  %v6842_v45 = vrot.slane %v6811_v44, 4  ;;  %v10876_v48 = vcombine.low %v6863_v57, %v6865_v59  ;;  %v10877_v55 = vcombine.high %v6863_v57, %v6865_v59 }
 0x811   : > { %7771 = vperm.xlu0 %11061, %v7709_v5   ;;  %7766 = vperm.xlu1 %11062, %v7708_v37  }
 0x812   : > { %v6858_v29 = vsel %vm498_vm10, %v6842_v45, %v6843_v11  ;;  %9916 = vmatprep.subr.bf16.mxu1 %v10877_v55 }
 0x813   : > { %v6859_v63 = vsel %vm636_vm6, %v6811_v44, %v6858_v29  ;;  %v6817_v24 = vpop.permute.xlu0 %6816  ;;  %v6815_v4 = vpop.permute.xlu1 %6814  ;;  %9917 = vmatpush1.bf16.msra.mxu1 %v10876_v48 }
 0x814   : > { %v6845_v19 = vrot.slane %v6817_v24, 4  ;;  %v6844_v31 = vrot.slane %v6815_v4, 4 }
 0x815   : > { %7781 = vperm.xlu0 %11061, %v7711_v23   ;;  %7776 = vperm.xlu1 %11062, %v7710_v33  }
 0x816   : > { %v6860_v27 = vsel %vm498_vm10, %v6844_v31, %v6845_v19  ;;  %v15414_v30 = vpop.f32.mrf.mxu0  ;;  %9894 = vmatmul.mubr.bf16.gmra.mxu0 %v11478_v54 }
 0x817   : > { %v6861_v9 = vsel %vm636_vm6, %v6815_v4, %v6860_v27  ;;  %v7205_v3 = vpop.permute.xlu0 %7204  ;;  %v7203_v58 = vpop.permute.xlu1 %7202  ;;  %10049 = vmatprep.mubr.bf16.mxu0 %v16680_v13  ;;  %vm16719_vm6 = vmmov %vm16703_vm2 }
 0x818   : > { %v7223_v14 = vrot.slane %v7205_v3, 4  ;;  %v7222_v32 = vrot.slane %v7203_v58, 4  ;;  %v15418_v43 = vpop.f32.mrf.mxu0  ;;  %v10874_v26 = vcombine.low %v6859_v63, %v6861_v9  ;;  %v10875_v60 = vcombine.high %v6859_v63, %v6861_v9 }
 0x819   : > { %7791 = vperm.xlu0 %11061, %v7713_v2   ;;  %7786 = vperm.xlu1 %11062, %v7712_v12  }
 0x81a   : > { %v7238_v18 = vsel %vm498_vm10, %v7222_v32, %v7223_v14  ;;  %v15421_v6 = vpop.f32.mrf.mxu0  ;;  %9918 = vmatprep.subr.bf16.mxu1 %v10875_v60 }
 0x81b   : > { %v7239_v20 = vsel %vm518_vm13, %v7203_v58, %v7238_v18  ;;  %v7209_v15 = vpop.permute.xlu0 %7208  ;;  %v7207_v22 = vpop.permute.xlu1 %7206  ;;  %9919 = vmatpush1.bf16.msra.mxu1 %v10874_v26 }
 0x81c   : > { %v7225_v16 = vrot.slane %v7209_v15, 4  ;;  %v7224_v7 = vrot.slane %v7207_v22, 4  ;;  %v15424_v0 = vpop.f32.mrf.mxu0 }
 0x81e   : > { %v7240_v34 = vsel %vm498_vm10, %v7224_v7, %v7225_v16  ;;  %v15427_v35 = vpop.f32.mrf.mxu0 }
 0x81f   : > { %v7241_v46 = vsel %vm518_vm13, %v7207_v22, %v7240_v34  ;;  %v7197_v1 = vpop.permute.xlu0 %7196  ;;  %v7195_v49 = vpop.permute.xlu1 %7194 }
 0x820   : > { %v7219_v21 = vrot.slane %v7197_v1, 4  ;;  %v7218_v47 = vrot.slane %v7195_v49, 4  ;;  %v15430_v10 = vpop.f32.mrf.mxu0  ;;  %v10904_v25 = vcombine.low %v7239_v20, %v7241_v46  ;;  %v10905_v62 = vcombine.high %v7239_v20, %v7241_v46 }
 0x822   : > { %v7234_v42 = vsel %vm498_vm10, %v7218_v47, %v7219_v21  ;;  %v15433_v39 = vpop.f32.mrf.mxu0  ;;  %9920 = vmatprep.subr.bf16.mxu1 %v10905_v62  ;;  %v15435_v52 = vpop.f32.mrf.mxu1 }
 0x823   : > { %v7235_v8 = vsel %vm518_vm13, %v7195_v49, %v7234_v42  ;;  %v7201_v17 = vpop.permute.xlu0 %7200  ;;  %v7199_v61 = vpop.permute.xlu1 %7198  ;;  %9921 = vmatpush2.bf16.msra.mxu1 %v10904_v25 }
 0x824   : > { %v7221_v51 = vrot.slane %v7201_v17, 4  ;;  %v7220_v57 = vrot.slane %v7199_v61, 4  ;;  %v15438_v38 = vpop.f32.mrf.mxu0  ;;  %v15440_v40 = vpop.f32.mrf.mxu1 }
 0x826   : > { %v7236_v50 = vsel %vm498_vm10, %v7220_v57, %v7221_v51  ;;  %v15443_v56 = vpop.f32.mrf.mxu0  ;;  %v15445_v28 = vpop.f32.mrf.mxu1 }
 0x827   : > { %v7237_v36 = vsel %vm518_vm13, %v7199_v61, %v7236_v50  ;;  %v7189_v53 = vpop.permute.xlu0 %7188  ;;  %v7187_v5 = vpop.permute.xlu1 %7186 }
 0x828   : > { %v7215_v37 = vrot.slane %v7189_v53, 4  ;;  %v7214_v59 = vrot.slane %v7187_v5, 4  ;;  %v15448_v41 = vpop.f32.mrf.mxu0  ;;  %v10902_v44 = vcombine.low %v7235_v8, %v7237_v36  ;;  %v10903_v11 = vcombine.high %v7235_v8, %v7237_v36  ;;  %v15450_v45 = vpop.f32.mrf.mxu1 }
 0x829   : > { %16681 = vst [vmem:[#allocation50_spill] sm:$0xff] %v15448_v41 }
 0x82a   : > { %v7230_v48 = vsel %vm498_vm10, %v7214_v59, %v7215_v37  ;;  %v15453_v55 = vpop.f32.mrf.mxu0  ;;  %9922 = vmatprep.subr.bf16.mxu1 %v10903_v11  ;;  %v15455_v29 = vpop.f32.mrf.mxu1 }
 0x82b   : > { %16682 = vst [vmem:[#allocation73_spill] sm:$0xff] %v15453_v55  ;;  %v7231_v23 = vsel %vm518_vm13, %v7187_v5, %v7230_v48  ;;  %v7193_v33 = vpop.permute.xlu0 %7192  ;;  %v7191_v54 = vpop.permute.xlu1 %7190  ;;  %9923 = vmatpush2.bf16.msra.mxu1 %v10902_v44 }
 0x82c   : > { %v7217_v63 = vrot.slane %v7193_v33, 4  ;;  %v7216_v24 = vrot.slane %v7191_v54, 4  ;;  %v15458_v4 = vpop.f32.mrf.mxu0  ;;  %v15463_v27 = vpop.f32.mrf.mxu1 }
 0x82d   : > { %16683 = vst [vmem:[#allocation75_spill] sm:$0xff] %v15458_v4 }
 0x82e   : > { %v7232_v19 = vsel %vm498_vm10, %v7216_v24, %v7217_v63  ;;  %v15461_v31 = vpop.f32.mrf.mxu0  ;;  %v15471_v20 = vpop.f32.mrf.mxu1 }
 0x82f   : > { %16684 = vst [vmem:[#allocation28_spill] sm:$0xff] %v15461_v31  ;;  %v7233_v2 = vsel %vm518_vm13, %v7191_v54, %v7232_v19  ;;  %v7181_v12 = vpop.permute.xlu0 %7180  ;;  %v7179_v9 = vpop.permute.xlu1 %7178 }
 0x830   : > { %v7211_v3 = vrot.slane %v7181_v12, 4  ;;  %v7210_v58 = vrot.slane %v7179_v9, 4  ;;  %v15466_v14 = vpop.f32.mrf.mxu0  ;;  %v10900_v32 = vcombine.low %v7231_v23, %v7233_v2  ;;  %v10901_v26 = vcombine.high %v7231_v23, %v7233_v2  ;;  %v15479_v21 = vpop.f32.mrf.mxu1 }
 0x831   : > { %16685 = vst [vmem:[#allocation29_spill] sm:$0xff] %v15466_v14  ;;  %16689 = vst [vmem:[#allocation27_spill] sm:$0xff] %v15479_v21 }
 0x832   : > { %v7226_v60 = vsel %vm498_vm10, %v7210_v58, %v7211_v3  ;;  %v15469_v18 = vpop.f32.mrf.mxu0  ;;  %9924 = vmatprep.subr.bf16.mxu1 %v10901_v26  ;;  %v15486_v53 = vpop.f32.mrf.mxu1 }
 0x833   : > { %16686 = vst [vmem:[#allocation32_spill] sm:$0xff] %v15469_v18  ;;  %v7227_v15 = vsel %vm518_vm13, %v7179_v9, %v7226_v60  ;;  %v7185_v22 = vpop.permute.xlu0 %7184  ;;  %v7183_v16 = vpop.permute.xlu1 %7182  ;;  %9925 = vmatpush2.bf16.msra.mxu1 %v10900_v32  ;;  %16692 = vst [vmem:[#allocation30_spill] sm:$0xff] %v15486_v53 }
 0x834   : > { %v7213_v7 = vrot.slane %v7185_v22, 4  ;;  %v7212_v34 = vrot.slane %v7183_v16, 4  ;;  %v15474_v46 = vpop.f32.mrf.mxu0  ;;  %v15495_v63 = vpop.f32.mrf.mxu1 }
 0x835   : > { %16687 = vst [vmem:[#allocation33_spill] sm:$0xff] %v15474_v46  ;;  %16696 = vst [vmem:[#allocation62_spill] sm:$0xff] %v15495_v63 }
 0x836   : > { %v7228_v1 = vsel %vm498_vm10, %v7212_v34, %v7213_v7  ;;  %v15477_v49 = vpop.f32.mrf.mxu0 }
 0x837   : > { %16688 = vst [vmem:[#allocation74_spill] sm:$0xff] %v15477_v49  ;;  %v7229_v47 = vsel %vm518_vm13, %v7183_v16, %v7228_v1  ;;  %v11105_v25 = vpop.permute.xlu0 %11104  ;;  %v7075_v62 = vpop.permute.xlu1 %7074  ;;  %vm16702_vm13 = vmmov %vm16694_vm8 }
 0x838   : > { %v11107_v42 = vunpack.i.h.bf16 %v11105_v25  ;;  %v11106_v8 = vunpack.i.l.bf16 %v11105_v25  ;;  %v15482_v17 = vpop.f32.mrf.mxu0  ;;  %v10898_v61 = vcombine.low %v7227_v15, %v7229_v47  ;;  %v10899_v51 = vcombine.high %v7227_v15, %v7229_v47  ;;  %v15503_v15 = vpop.f32.mrf.mxu1 }
 0x839   : > { %16690 = vst [vmem:[#allocation26_spill] sm:$0xff] %v15482_v17  ;;  %v7094_v50 = vrot.slane %v7075_v62, 4  ;;  %16699 = vst [vmem:[#allocation70_spill] sm:$0xff] %v15503_v15  ;;  %v11496_v15 = vld [vmem:[%s16149_s5 + $0x168] ss:$52 sps:$4 sm:$0xff]  }
 0x83a   : > { %v7095_v57 = vrot.slane %v11106_v8, 4  ;;  %v15484_v36 = vpop.f32.mrf.mxu0  ;;  %9926 = vmatprep.subr.bf16.mxu1 %v10899_v51  ;;  %v7097_v59 = vrot.slane %v11107_v42, 4  ;;  %v15511_v42 = vpop.f32.mrf.mxu1 }
 0x83b   : > { %16691 = vst [vmem:[#allocation31_spill] sm:$0xff] %v15484_v36  ;;  %v7331_v5 = vpop.permute.xlu0 %7330  ;;  %v7079_v37 = vpop.permute.xlu1 %7078  ;;  %9927 = vmatpush2.bf16.msra.mxu1 %v10898_v61  ;;  %16700 = vst [vmem:[#allocation69_spill] sm:$0xff] %v15511_v42 }
 0x83c   : > { %v7110_v44 = vsel %vm498_vm10, %v7094_v50, %v7095_v57  ;;  %v7096_v11 = vrot.slane %v7079_v37, 4  ;;  %v15489_v48 = vpop.f32.mrf.mxu0  ;;  %v7350_v12 = vrot.slane %v7331_v5, 4 }
 0x83d   : > { %16693 = vst [vmem:[#allocation49_spill] sm:$0xff] %v15489_v48  ;;  %v7111_v23 = vsel %vm16694_vm8, %v7075_v62, %v7110_v44 }
 0x83e   : > { %v7112_v33 = vsel %vm498_vm10, %v7096_v11, %v7097_v59  ;;  %v15493_v54 = vpop.f32.mrf.mxu0 }
 0x83f   : > { %16695 = vst [vmem:[#allocation45_spill] sm:$0xff] %v15493_v54  ;;  %v7113_v24 = vsel %vm16697_vm11, %v7079_v37, %v7112_v33  ;;  %v7335_v19 = vpop.permute.xlu0 %7334  ;;  %v7333_v2 = vpop.permute.xlu1 %7332 }
 0x840   : > { %v7351_v9 = vrot.slane %v7333_v2, 4  ;;  %v15498_v3 = vpop.f32.mrf.mxu0  ;;  %v10896_v58 = vcombine.low %v7111_v23, %v7113_v24  ;;  %v10897_v32 = vcombine.high %v7111_v23, %v7113_v24  ;;  %v7352_v34 = vrot.slane %v7335_v19, 4  ;;  %v15518_v2 = vpop.f32.mrf.mxu1 }
 0x841   : > { %16698 = vst [vmem:[#allocation59_spill] sm:$0xff] %v15498_v3  ;;  %16701 = vst [vmem:[#allocation20_spill] sm:$0xff] %v15518_v2 }
 0x842   : > { %v7366_v26 = vsel %vm498_vm10, %v7350_v12, %v7351_v9  ;;  %v15501_v60 = vpop.f32.mrf.mxu0  ;;  %9928 = vmatprep.subr.bf16.mxu1 %v10897_v32 }
 0x843   : > { %v7367_v22 = vsel %vm472_vm9, %v7331_v5, %v7366_v26  ;;  %v7067_v16 = vpop.permute.xlu0 %7066  ;;  %v7337_v7 = vpop.permute.xlu1 %7336  ;;  %9929 = vmatpush2.bf16.msra.mxu1 %v10896_v58 }
 0x844   : > { %v7353_v1 = vrot.slane %v7337_v7, 4  ;;  %v15506_v47 = vpop.f32.mrf.mxu0  ;;  %v7090_v44 = vrot.slane %v7067_v16, 4 }
 0x846   : > { %v7368_v25 = vsel %vm498_vm10, %v7352_v34, %v7353_v1  ;;  %v15509_v62 = vpop.f32.mrf.mxu0 }
 0x847   : > { %v7369_v8 = vsel %vm472_vm9, %v7335_v19, %v7368_v25  ;;  %v7071_v61 = vpop.permute.xlu0 %7070  ;;  %v11110_v51 = vpop.permute.xlu1 %11109 }
 0x848   : > { %v11112_v57 = vunpack.i.h.bf16 %v11110_v51  ;;  %v11111_v50 = vunpack.i.l.bf16 %v11110_v51  ;;  %v15514_v5 = vpop.f32.mrf.mxu0  ;;  %v10912_v37 = vcombine.low %v7367_v22, %v7369_v8  ;;  %v10913_v59 = vcombine.high %v7367_v22, %v7369_v8 }
 0x849   : > { %v7092_v11 = vrot.slane %v7071_v61, 4 }
 0x84a   : > { %v7093_v23 = vrot.slane %v11112_v57, 4  ;;  %v7091_v33 = vrot.slane %v11111_v50, 4  ;;  %v15516_v24 = vpop.f32.mrf.mxu0  ;;  %10025 = vmatprep.subr.bf16.mxu0 %v10913_v59  ;;  %v15529_v57 = vpop.f32.mrf.mxu1 }
 0x84b   : > { %v7325_v12 = vpop.permute.xlu0 %7324  ;;  %v7323_v9 = vpop.permute.xlu1 %7322  ;;  %10026 = vmatpush1.bf16.msra.mxu0 %v10912_v37  ;;  %16704 = vst [vmem:[#allocation76_spill] sm:$0xff] %v15529_v57 }
 0x84c   : > { %v7108_v19 = vsel %vm498_vm10, %v7092_v11, %v7093_v23  ;;  %v7106_v58 = vsel %vm498_vm10, %v7090_v44, %v7091_v33  ;;  %v7347_v32 = vrot.slane %v7325_v12, 4  ;;  %v7346_v26 = vrot.slane %v7323_v9, 4  ;;  %v15522_v7 = vpop.f32.mrf.mxu0  ;;  %v15537_v33 = vpop.f32.mrf.mxu1 }
 0x84d   : > { %v7109_v22 = vsel %vm16702_vm13, %v7071_v61, %v7108_v19  ;;  %v7107_v34 = vsel %vm16703_vm2, %v7067_v16, %v7106_v58  ;;  %16705 = vst [vmem:[#allocation35_spill] sm:$0xff] %v15537_v33 }
 0x84e   : > { %v7362_v1 = vsel %vm498_vm10, %v7346_v26, %v7347_v32  ;;  %v15527_v25 = vpop.f32.mrf.mxu0  ;;  %v10894_v8 = vcombine.low %v7107_v34, %v7109_v22  ;;  %v10895_v51 = vcombine.high %v7107_v34, %v7109_v22 }
 0x84f   : > { %v7363_v50 = vsel %vm472_vm9, %v7323_v9, %v7362_v1  ;;  %v7329_v59 = vpop.permute.xlu0 %7328  ;;  %v7327_v44 = vpop.permute.xlu1 %7326 }
 0x850   : > { %v7349_v11 = vrot.slane %v7329_v59, 4  ;;  %v7348_v37 = vrot.slane %v7327_v44, 4  ;;  %v15532_v23 = vpop.f32.mrf.mxu0  ;;  %9930 = vmatprep.subr.bf16.mxu1 %v10895_v51 }
 0x851   : > { %9931 = vmatpush2.bf16.msra.mxu1 %v10894_v8  ;;  %v15544_v8 = vpop.f32.mrf.mxu1 }
 0x852   : > { %v7364_v16 = vsel %vm498_vm10, %v7348_v37, %v7349_v11  ;;  %v15535_v61 = vpop.f32.mrf.mxu0  ;;  %16706 = vst [vmem:[#allocation71_spill] sm:$0xff] %v15544_v8 }
 0x853   : > { %v7365_v12 = vsel %vm472_vm9, %v7327_v44, %v7364_v16  ;;  %v11115_v19 = vpop.permute.xlu0 %11114  ;;  %v7059_v58 = vpop.permute.xlu1 %7058 }
 0x854   : > { %v11117_v32 = vunpack.i.h.bf16 %v11115_v19  ;;  %v11116_v9 = vunpack.i.l.bf16 %v11115_v19  ;;  %v15540_v26 = vpop.f32.mrf.mxu0  ;;  %v10910_v22 = vcombine.low %v7363_v50, %v7365_v12  ;;  %v10911_v34 = vcombine.high %v7363_v50, %v7365_v12 }
 0x855   : > { %v7086_v59 = vrot.slane %v7059_v58, 4 }
 0x856   : > { %v7087_v1 = vrot.slane %v11116_v9, 4  ;;  %v15542_v51 = vpop.f32.mrf.mxu0  ;;  %10027 = vmatprep.subr.bf16.mxu0 %v10911_v34  ;;  %v7089_v3 = vrot.slane %v11117_v32, 4  ;;  %v15553_v9 = vpop.f32.mrf.mxu1 }
 0x857   : > { %v7315_v11 = vpop.permute.xlu0 %7314  ;;  %v7063_v37 = vpop.permute.xlu1 %7062  ;;  %10028 = vmatpush1.bf16.msra.mxu0 %v10910_v22  ;;  %16708 = vst [vmem:[#allocation72_spill] sm:$0xff] %v15553_v9 }
 0x858   : > { %v7102_v44 = vsel %vm498_vm10, %v7086_v59, %v7087_v1  ;;  %v7088_v16 = vrot.slane %v7063_v37, 4  ;;  %v15547_v54 = vpop.f32.mrf.mxu0  ;;  %v7342_v34 = vrot.slane %v7315_v11, 4 }
 0x859   : > { %v7103_v19 = vsel %vm16707_vm3, %v7059_v58, %v7102_v44 }
 0x85a   : > { %v7104_v50 = vsel %vm498_vm10, %v7088_v16, %v7089_v3  ;;  %v15551_v12 = vpop.f32.mrf.mxu0  ;;  %v15561_v3 = vpop.f32.mrf.mxu1 }
 0x85b   : > { %v7105_v48 = vsel %vm16709_vm4, %v7063_v37, %v7104_v50  ;;  %v7319_v36 = vpop.permute.xlu0 %7318  ;;  %v7317_v17 = vpop.permute.xlu1 %7316  ;;  %16710 = vst [vmem:[#allocation34_spill] sm:$0xff] %v15561_v3 }
 0x85c   : > { %v7343_v32 = vrot.slane %v7317_v17, 4  ;;  %v15556_v8 = vpop.f32.mrf.mxu0  ;;  %v10892_v1 = vcombine.low %v7103_v19, %v7105_v48  ;;  %v10893_v22 = vcombine.high %v7103_v19, %v7105_v48  ;;  %v7344_v37 = vrot.slane %v7319_v36, 4  ;;  %v15569_v48 = vpop.f32.mrf.mxu1 }
 0x85d   : > { %16713 = vst [vmem:[#allocation40_spill] sm:$0xff] %v15569_v48 }
 0x85e   : > { %v7358_v59 = vsel %vm498_vm10, %v7342_v34, %v7343_v32  ;;  %v15559_v49 = vpop.f32.mrf.mxu0  ;;  %9932 = vmatprep.subr.bf16.mxu1 %v10893_v22 }
 0x85f   : > { %v7359_v58 = vsel %vm472_vm9, %v7315_v11, %v7358_v59  ;;  %v7051_v44 = vpop.permute.xlu0 %7050  ;;  %v7321_v16 = vpop.permute.xlu1 %7320  ;;  %9933 = vmatpush2.bf16.msra.mxu1 %v10892_v1 }
 0x860   : > { %v7345_v50 = vrot.slane %v7321_v16, 4  ;;  %v15564_v9 = vpop.f32.mrf.mxu0  ;;  %v7082_v57 = vrot.slane %v7051_v44, 4 }
 0x861   : > { %16711 = vst [vmem:[#allocation38_spill] sm:$0xff] %v15564_v9 }
 0x862   : > { %v7360_v17 = vsel %vm498_vm10, %v7344_v37, %v7345_v50  ;;  %v15567_v33 = vpop.f32.mrf.mxu0  ;;  %v15576_v37 = vpop.f32.mrf.mxu1 }
 0x863   : > { %16712 = vst [vmem:[#allocation37_spill] sm:$0xff] %v15567_v33  ;;  %v7361_v19 = vsel %vm472_vm9, %v7319_v36, %v7360_v17  ;;  %v7055_v34 = vpop.permute.xlu0 %7054  ;;  %v11120_v32 = vpop.permute.xlu1 %11119  ;;  %16716 = vst [vmem:[#allocation44_spill] sm:$0xff] %v15576_v37 }
 0x864   : > { %v11122_v22 = vunpack.i.h.bf16 %v11120_v32  ;;  %v11121_v3 = vunpack.i.l.bf16 %v11120_v32  ;;  %v15572_v11 = vpop.f32.mrf.mxu0  ;;  %v10908_v59 = vcombine.low %v7359_v58, %v7361_v19  ;;  %v10909_v1 = vcombine.high %v7359_v58, %v7361_v19 }
 0x865   : > { %16714 = vst [vmem:[#allocation36_spill] sm:$0xff] %v15572_v11  ;;  %v7084_v16 = vrot.slane %v7055_v34, 4 }
 0x866   : > { %v7085_v46 = vrot.slane %v11122_v22, 4  ;;  %v7083_v2 = vrot.slane %v11121_v3, 4  ;;  %v15574_v18 = vpop.f32.mrf.mxu0  ;;  %10029 = vmatprep.subr.bf16.mxu0 %v10909_v1  ;;  %v15587_v1 = vpop.f32.mrf.mxu1 }
 0x867   : > { %16715 = vst [vmem:[#allocation48_spill] sm:$0xff] %v15574_v18  ;;  %v7309_v50 = vpop.permute.xlu0 %7308  ;;  %v7307_v48 = vpop.permute.xlu1 %7306  ;;  %10030 = vmatpush1.bf16.msra.mxu0 %v10908_v59  ;;  %16721 = vst [vmem:[#allocation55_spill] sm:$0xff] %v15587_v1  ;;  %v11489_v1 = vld [vmem:[%s16149_s5 + $0xf8] ss:$52 sps:$4 sm:$0xff]  }
 0x868   : > { %v7100_v36 = vsel %vm498_vm10, %v7084_v16, %v7085_v46  ;;  %v7098_v17 = vsel %vm498_vm10, %v7082_v57, %v7083_v2  ;;  %v7339_v32 = vrot.slane %v7309_v50, 4  ;;  %v7338_v14 = vrot.slane %v7307_v48, 4  ;;  %v15580_v42 = vpop.f32.mrf.mxu0 }
 0x869   : > { %16717 = vst [vmem:[#allocation52_spill] sm:$0xff] %v15580_v42  ;;  %v7101_v58 = vsel %vm16718_vm5, %v7055_v34, %v7100_v36  ;;  %v7099_v3 = vsel %vm16719_vm6, %v7051_v44, %v7098_v17  ;;  %v11481_v44 = vld [vmem:[%s16149_s5 + $0x28] ss:$52 sps:$4 sm:$0xff]   ;;  %v16725_v17 = vmov 0.0  }
 0x86a   : > { %v7354_v19 = vsel %vm498_vm10, %v7338_v14, %v7339_v32  ;;  %v15585_v22 = vpop.f32.mrf.mxu0  ;;  %v10890_v37 = vcombine.low %v7099_v3, %v7101_v58  ;;  %v10891_v18 = vcombine.high %v7099_v3, %v7101_v58  ;;  %v11485_v14 = vld [vmem:[%s16149_s5 + $0x94] ss:$52 sps:$4 sm:$0xff]  }
 0x86b   : > { %16720 = vst [vmem:[#allocation46_spill] sm:$0xff] %v15585_v22  ;;  %v7355_v46 = vsel %vm472_vm9, %v7307_v48, %v7354_v19  ;;  %v7313_v2 = vpop.permute.xlu0 %7312  ;;  %v7311_v57 = vpop.permute.xlu1 %7310  ;;  %v11484_v19 = vld [vmem:[%s16149_s5 + $0x30] ss:$52 sps:$4 sm:$0xff]  }
 0x86c   : > { %v7341_v16 = vrot.slane %v7313_v2, 4  ;;  %v7340_v59 = vrot.slane %v7311_v57, 4  ;;  %v15590_v50 = vpop.f32.mrf.mxu0  ;;  %9934 = vmatprep.subr.bf16.mxu1 %v10891_v18  ;;  %v15601_v48 = vpop.f32.mrf.mxu1 }
 0x86d   : > { %16722 = vst [vmem:[#allocation53_spill] sm:$0xff] %v15590_v50  ;;  %9935 = vmatpush2.bf16.msra.mxu1 %v10890_v37  ;;  %16724 = vst [vmem:[#allocation54_spill] sm:$0xff] %v15601_v48 }
 0x86e   : > { %v7356_v34 = vsel %vm498_vm10, %v7340_v59, %v7341_v16  ;;  %v15599_v36 = vpop.f32.mrf.mxu0  ;;  %10959 = vmatprep.subr.mxu1 %v16725_v17  ;;  %v9540_v2 = vpop.f32.mrf.mxu1  ;;  %vm9314_vm10 = vcmask 523264  }
 0x86f   : > { %16723 = vst [vmem:[#allocation56_spill] sm:$0xff] %v15599_v36  ;;  %v7357_v32 = vsel %vm472_vm9, %v7311_v57, %v7356_v34  ;;  %v11487_v57 = vld [vmem:[%s16149_s5 + $0x90] ss:$52 sps:$4 sm:$0xff]   ;;  %vm11608_vm9 = vmmov 0  }
 0x870   : > { %v15605_v18 = vpop.f32.mrf.mxu0  ;;  %9937 = vmatmul.mubr.bf16.vlgmr.msra.gmra.mxu1 %v11481_v44  ;;  %v10906_v58 = vcombine.low %v7355_v46, %v7357_v32  ;;  %v10907_v3 = vcombine.high %v7355_v46, %v7357_v32  ;;  %v11491_v46 = vld [vmem:[%s16149_s5 + $0xfc] ss:$52 sps:$4 sm:$0xff]   ;;  %v9542_v44 = vpop.f32.mrf.mxu1 }
 0x871   : > { %16726 = vst [vmem:[#allocation43_spill] sm:$0xff] %v15605_v18  ;;  %9946 = vmatprep.mubr.bf16.mxu1 %v11485_v14  ;;  %v11492_v18 = vld [vmem:[%s16149_s5 + $0x100] ss:$52 sps:$4 sm:$0xff]  }
 0x872   : > { %v15607_v37 = vpop.f32.mrf.mxu0  ;;  %10031 = vmatprep.subr.bf16.mxu0 %v10907_v3  ;;  %v9546_v3 = vpop.f32.mrf.mxu1 }
 0x873   : > { %16727 = vst [vmem:[#allocation39_spill] sm:$0xff] %v15607_v37  ;;  %10032 = vmatpush1.bf16.msra.mxu0 %v10906_v58  ;;  %v11488_v58 = vld [vmem:[%s16149_s5 + $0x98] ss:$52 sps:$4 sm:$0xff]  }
 0x874   : > { %v15612_v16 = vpop.f32.mrf.mxu0 }
 0x875   : > { %16728 = vst [vmem:[#allocation47_spill] sm:$0xff] %v15612_v16 }
 0x876   : > { %v15620_v59 = vpop.f32.mrf.mxu0  ;;  %10914 = vmatmul.mubr.msk.bf16.vlgmr.msra.gmra.mxu0 %vm9314_vm10, %v11484_v19 }
 0x877   : > { %16729 = vst [vmem:[#allocation41_spill] sm:$0xff] %v15620_v59  ;;  %10059 = vmatprep.mubr.bf16.mxu0 %v16680_v13 }
 0x878   : > { %v15624_v14 = vpop.permute.xlu0 %7721  ;;  %v15626_v34 = vpop.permute.xlu1 %7716  ;;  %9947 = vmatmul.mubr.bf16.gmra.mxu1 %v11487_v57  ;;  %v11495_v57 = vld [vmem:[%s16149_s5 + $0x164] ss:$52 sps:$4 sm:$0xff]  }
 0x879   : > { %v15628_v32 = vpop.f32.mrf.mxu0  ;;  %9956 = vmatprep.mubr.bf16.mxu1 %v11491_v46  ;;  %v9548_v46 = vpop.f32.mrf.mxu1 }
 0x87a   : > { %16730 = vst [vmem:[#allocation51_spill] sm:$0xff] %v15628_v32 }
 0x87b   : > { %v15633_v17 = vpop.f32.mrf.mxu0 }
 0x87c   : > { %16731 = vst [vmem:[#allocation42_spill] sm:$0xff] %v15633_v17  ;;  %v15635_v48 = vpop.permute.xlu0 %7731  ;;  %v15637_v19 = vpop.permute.xlu1 %7726 }
 0x87d   : > { %v15642_v59 = vpop.f32.mrf.mxu0 }
 0x87e   : > { %16732 = vst [vmem:[#allocation64_spill] sm:$0xff] %v15642_v59  ;;  %10915 = vmatmul.mubr.msk.bf16.gmra.mxu0 %vm9314_vm10, %v11488_v58  ;;  %v9550_v59 = vpop.f32.mrf.mxu1 }
 0x87f   : > { %v15648_v32 = vpop.f32.mrf.mxu0  ;;  %10069 = vmatprep.mubr.bf16.mxu0 %v16680_v13 }
 0x880   : > { %16733 = vst [vmem:[#allocation65_spill] sm:$0xff] %v15648_v32  ;;  %v15651_v17 = vpop.permute.xlu0 %7741  ;;  %v15653_v16 = vpop.permute.xlu1 %7736  ;;  %9957 = vmatmul.mubr.bf16.gmra.mxu1 %v11489_v1  ;;  %v11493_v32 = vld [vmem:[%s16149_s5 + $0x160] ss:$52 sps:$4 sm:$0xff]  }
 0x881   : > { %16734 = vst [vmem:[#allocation23_spill] sm:$0xff] %v15651_v17  ;;  %v15655_v37 = vpop.f32.mrf.mxu0  ;;  %9966 = vmatprep.mubr.bf16.mxu1 %v11495_v57  ;;  %v11499_v1 = vld [vmem:[%s16149_s5 + $0x1cc] ss:$52 sps:$4 sm:$0xff]   ;;  %v9552_v57 = vpop.f32.mrf.mxu1 }
 0x882   : > { %16735 = vst [vmem:[#allocation19_spill] sm:$0xff] %v15655_v37 }
 0x883   : > { %v9653_v36 = vpop.f32.mrf.mxu0 }
 0x884   : > { %v15660_v58 = vpop.permute.xlu0 %7751  ;;  %v15662_v50 = vpop.permute.xlu1 %7746 }
 0x885   : > { %16736 = vst [vmem:[#allocation60_spill] sm:$0xff] %v15660_v58  ;;  %16737 = vst [vmem:[#allocation18_spill] sm:$0xff] %v15662_v50  ;;  %v9655_v22 = vpop.f32.mrf.mxu0  ;;  %v9556_v50 = vpop.f32.mrf.mxu1 }
 0x886   : > { %10916 = vmatmul.mubr.msk.bf16.gmra.mxu0 %vm9314_vm10, %v11492_v18  ;;  %v11497_v18 = vld [vmem:[%s16149_s5 + $0x1c8] ss:$52 sps:$4 sm:$0xff]  }
 0x887   : > { %v9659_v37 = vpop.f32.mrf.mxu0  ;;  %10079 = vmatprep.mubr.bf16.mxu0 %v16680_v13  ;;  %v9558_v33 = vpop.f32.mrf.mxu1 }
 0x888   : > { %v15672_v42 = vpop.permute.xlu0 %7761  ;;  %v15674_v58 = vpop.permute.xlu1 %7756  ;;  %9967 = vmatmul.mubr.bf16.gmra.mxu1 %v11493_v32 }
 0x889   : > { %16738 = vst [vmem:[#allocation58_spill] sm:$0xff] %v15672_v42  ;;  %16739 = vst [vmem:[#allocation22_spill] sm:$0xff] %v15674_v58  ;;  %v9661_v31 = vpop.f32.mrf.mxu0  ;;  %9976 = vmatprep.mubr.bf16.mxu1 %v11499_v1  ;;  %v11503_v1 = vld [vmem:[%s16149_s5 + $0x234] ss:$52 sps:$4 sm:$0xff]  }
 0x88b   : > { %v9663_v11 = vpop.f32.mrf.mxu0 }
 0x88c   : > { %v7772_v63 = vpop.permute.xlu0 %7771  ;;  %v15679_v4 = vpop.permute.xlu1 %7766 }
 0x88d   : > { %16740 = vst [vmem:[#allocation63_spill] sm:$0xff] %v15679_v4  ;;  %v9428_v42 = vadd.f32 %v15501_v60, %v7772_v63  ;;  %v9430_v58 = vadd.f32 %v15506_v47, %v7772_v63  ;;  %v9665_v32 = vpop.f32.mrf.mxu0 }
 0x88e   : > { %10917 = vmatmul.mubr.msk.bf16.gmra.mxu0 %vm9314_vm10, %v11496_v15 }
 0x88f   : > { %v9541_v53 = vadd.f32 %v9540_v2, %v9428_v42  ;;  %v9543_v55 = vadd.f32 %v9542_v44, %v9430_v58  ;;  %v9669_v17 = vpop.f32.mrf.mxu0  ;;  %10089 = vmatprep.mubr.bf16.mxu0 %v16680_v13  ;;  %v9560_v42 = vpop.f32.mrf.mxu1  ;;  %v11500_v2 = vld [vmem:[%s16149_s5 + $0x1d0] ss:$52 sps:$4 sm:$0xff]  }
 0x890   : > { %v7782_v4 = vpop.permute.xlu0 %7781  ;;  %v7777_v9 = vpop.permute.xlu1 %7776  ;;  %9977 = vmatmul.mubr.bf16.gmra.mxu1 %v11497_v18 }
 0x891   : > { %v15691_v41 = vadd.f32 %v9655_v22, %v9543_v55  ;;  %v9438_v63 = vadd.f32 %v15516_v24, %v7782_v4  ;;  %v9440_v60 = vadd.f32 %v15522_v7, %v7782_v4  ;;  %v9434_v47 = vadd.f32 %v15509_v62, %v7777_v9  ;;  %v9671_v21 = vpop.f32.mrf.mxu0  ;;  %9986 = vmatprep.mubr.bf16.mxu1 %v11503_v1  ;;  %v11501_v62 = vld [vmem:[%s16149_s5 + $0x230] ss:$52 sps:$4 sm:$0xff]  }
 0x892   : > { %v9436_v15 = vadd.f32 %v15514_v5, %v7777_v9  ;;  %v15700_v44 = vadd.f32 %v9653_v36, %v9541_v53  ;;  %v11507_v53 = vld [vmem:[%s16149_s5 + $0x29c] ss:$52 sps:$4 sm:$0xff]  }
 0x893   : > { %16741 = vst [vmem:[#allocation21_spill] sm:$0xff] %v15691_v41  ;;  %v9547_v58 = vadd.f32 %v9546_v3, %v9434_v47  ;;  %v9551_v55 = vadd.f32 %v9550_v59, %v9438_v63  ;;  %v9553_v22 = vadd.f32 %v9552_v57, %v9440_v60  ;;  %v9673_v18 = vpop.f32.mrf.mxu0  ;;  %v9562_v3 = vpop.f32.mrf.mxu1 }
 0x894   : > { %16742 = vst [vmem:[#allocation61_spill] sm:$0xff] %v15700_v44  ;;  %v9549_v24 = vadd.f32 %v9548_v46, %v9436_v15  ;;  %v7792_v41 = vpop.permute.xlu0 %7791  ;;  %v7787_v4 = vpop.permute.xlu1 %7786 }
 0x895   : > { %v15705_v7 = vadd.f32 %v9663_v11, %v9551_v55  ;;  %v9448_v5 = vadd.f32 %v15535_v61, %v7792_v41  ;;  %v9450_v9 = vadd.f32 %v15540_v26, %v7792_v41  ;;  %v15709_v1 = vadd.f32 %v9665_v32, %v9553_v22  ;;  %v9675_v46 = vpop.f32.mrf.mxu0 }
 0x896   : > { %v9444_v36 = vadd.f32 %v15527_v25, %v7787_v4  ;;  %v9446_v59 = vadd.f32 %v15532_v23, %v7787_v4  ;;  %10918 = vmatmul.mubr.msk.bf16.gmra.mxu0 %vm9314_vm10, %v11500_v2  ;;  %v15717_v11 = vadd.f32 %v9659_v37, %v9547_v58  ;;  %v15719_v57 = vadd.f32 %v9661_v31, %v9549_v24  ;;  %v11504_v31 = vld [vmem:[%s16149_s5 + $0x238] ss:$52 sps:$4 sm:$0xff]   ;;  %v15753_v47 = vpop.f32.mrf.mxu1 }
 0x897   : > { %16743 = vst [vmem:[#allocation25_spill] sm:$0xff] %v15705_v7  ;;  %16744 = vst [vmem:[#allocation68_spill] sm:$0xff] %v15709_v1  ;;  %v9561_v61 = vadd.f32 %v9560_v42, %v9448_v5  ;;  %v9563_v41 = vadd.f32 %v9562_v3, %v9450_v9  ;;  %10099 = vmatprep.mubr.bf16.mxu0 %v16680_v13  ;;  %v11505_v37 = vld [vmem:[%s16149_s5 + $0x298] ss:$52 sps:$4 sm:$0xff]  }
 0x898   : > { %16745 = vst [vmem:[#allocation77_spill] sm:$0xff] %v15717_v11  ;;  %16746 = vst [vmem:[#allocation57_spill] sm:$0xff] %v15719_v57  ;;  %v9557_v26 = vadd.f32 %v9556_v50, %v9444_v36  ;;  %v9559_v32 = vadd.f32 %v9558_v33, %v9446_v59  ;;  %9987 = vmatmul.mubr.bf16.gmra.mxu1 %v11501_v62  ;;  %v11511_v33 = vld [vmem:[%s16149_s5 + $0x304] ss:$52 sps:$4 sm:$0xff]   ;;  %v11509_v50 = vld [vmem:[%s16149_s5 + $0x300] ss:$52 sps:$4 sm:$0xff]   ;;  %v15755_v15 = vpop.f32.mrf.mxu1 }
 0x899   : > { %v15722_v63 = vadd.f32 %v9673_v18, %v9561_v61  ;;  %v15724_v25 = vadd.f32 %v9675_v46, %v9563_v41  ;;  %9996 = vmatprep.mubr.bf16.mxu1 %v11507_v53 }
 0x89a   : > { %v15726_v23 = vadd.f32 %v9669_v17, %v9557_v26  ;;  %v15728_v60 = vadd.f32 %v9671_v21, %v9559_v32  ;;  %v11508_v21 = vld [vmem:[%s16149_s5 + $0x2a0] ss:$52 sps:$4 sm:$0xff]   ;;  %v11512_v17 = vld [vmem:[%s16149_s5 + $0x308] ss:$52 sps:$4 sm:$0xff]   ;;  %v15759_v2 = vpop.f32.mrf.mxu1 }
 0x89b   : > { %16747 = vst [vmem:[#allocation24_spill] sm:$0xff] %v15722_v63  ;;  %16748 = vst [vmem:[#allocation67_spill] sm:$0xff] %v15724_v25 }
 0x89c   : > { %16749 = vst [vmem:[#allocation66_spill] sm:$0xff] %v15726_v23  ;;  %16750 = vst [vmem:[#allocation78_spill] sm:$0xff] %v15728_v60  ;;  %v15763_v55 = vpop.f32.mrf.mxu1 }
 0x89e   : > { %10919 = vmatmul.mubr.msk.bf16.gmra.mxu0 %vm9314_vm10, %v11504_v31  ;;  %v15757_v42 = vpop.f32.mrf.mxu0  ;;  %v15767_v22 = vpop.f32.mrf.mxu1 }
 0x89f   : > { %10109 = vmatprep.mubr.bf16.mxu0 %v16680_v13 }
 0x8a0   : > { %9997 = vmatmul.mubr.bf16.gmra.mxu1 %v11505_v37  ;;  %v15761_v58 = vpop.f32.mrf.mxu0  ;;  %v15771_v24 = vpop.f32.mrf.mxu1 }
 0x8a1   : > { %10006 = vmatprep.mubr.bf16.mxu1 %v11511_v33 }
 0x8a2   : > { %v15775_v62 = vpop.f32.mrf.mxu1 }
 0x8a4   : > { %v15779_v9 = vpop.f32.mrf.mxu1 }
 0x8a6   : > { %10920 = vmatmul.mubr.msk.bf16.gmra.mxu0 %vm9314_vm10, %v11508_v21  ;;  %v15783_v36 = vpop.f32.mrf.mxu1 }
 0x8a7   : > { %10119 = vmatprep.mubr.bf16.mxu0 %v16680_v13  ;;  %v15765_v13 = vpop.f32.mrf.mxu0 }
 0x8a8   : > { %10007 = vmatmul.mubr.bf16.gmra.mxu1 %v11509_v50  ;;  %v15787_v3 = vpop.f32.mrf.mxu1 }
 0x8a9   : > { %v15769_v18 = vpop.f32.mrf.mxu0 }
 0x8aa   : > { %v15791_v61 = vpop.f32.mrf.mxu1 }
 0x8ab   : > { %v15773_v4 = vpop.f32.mrf.mxu0 }
 0x8ac   : > { %v15795_v26 = vpop.f32.mrf.mxu1 }
 0x8ad   : > { %v15777_v5 = vpop.f32.mrf.mxu0 }
 0x8ae   : > { %10921 = vmatmul.mubr.msk.bf16.gmra.mxu0 %vm9314_vm10, %v11512_v17  ;;  %v15799_v31 = vpop.f32.mrf.mxu1 }
 0x8af   : > { %v15781_v53 = vpop.f32.mrf.mxu0 }
 0x8b0   : > { %v15803_v33 = vpop.f32.mrf.mxu1 }
 0x8b1   : > { %v15785_v59 = vpop.f32.mrf.mxu0 }
 0x8b2   : > { %v15807_v50 = vpop.f32.mrf.mxu1 }
 0x8b3   : > { %v15789_v46 = vpop.f32.mrf.mxu0  ;;  %16751 = vst [vmem:[#allocation79_spill] sm:$0xff] %v15807_v50 }
 0x8b4   : > { %v15811_v25 = vpop.f32.mrf.mxu1 }
 0x8b5   : > { %v15793_v41 = vpop.f32.mrf.mxu0  ;;  %16753 = vst [vmem:[#allocation81_spill] sm:$0xff] %v15811_v25 }
 0x8b6   : > { %v15815_v60 = vpop.f32.mrf.mxu1 }
 0x8b7   : > { %v15797_v32 = vpop.f32.mrf.mxu0  ;;  %16755 = vst [vmem:[#allocation83_spill] sm:$0xff] %v15815_v60 }
 0x8b8   : > { %v15819_v1 = vpop.f32.mrf.mxu1 }
 0x8b9   : > { %v15801_v37 = vpop.f32.mrf.mxu0  ;;  %16757 = vst [vmem:[#allocation85_spill] sm:$0xff] %v15819_v1 }
 0x8ba   : > { %v15823_v57 = vpop.f32.mrf.mxu1 }
 0x8bb   : > { %v15805_v21 = vpop.f32.mrf.mxu0  ;;  %16759 = vst [vmem:[#allocation87_spill] sm:$0xff] %v15823_v57 }
 0x8bc   : > { %v15827_v44 = vpop.f32.mrf.mxu1 }
 0x8bd   : > { %v15809_v17 = vpop.f32.mrf.mxu0  ;;  %16761 = vst [vmem:[#allocation89_spill] sm:$0xff] %v15827_v44 }
 0x8be   : > { %16752 = vst [vmem:[#allocation80_spill] sm:$0xff] %v15809_v17  ;;  %v15831_v17 = vpop.f32.mrf.mxu1 }
 0x8bf   : > { %v15813_v63 = vpop.f32.mrf.mxu0  ;;  %16763 = vst [vmem:[#allocation91_spill] sm:$0xff] %v15831_v17 }
 0x8c0   : > { %16754 = vst [vmem:[#allocation82_spill] sm:$0xff] %v15813_v63  ;;  %v15835_v63 = vpop.f32.mrf.mxu1 }
 0x8c1   : > { %v15817_v23 = vpop.f32.mrf.mxu0  ;;  %16765 = vst [vmem:[#allocation93_spill] sm:$0xff] %v15835_v63 }
 0x8c2   : > { %16756 = vst [vmem:[#allocation84_spill] sm:$0xff] %v15817_v23  ;;  %v15839_v23 = vpop.f32.mrf.mxu1 }
 0x8c3   : > { %v15821_v7 = vpop.f32.mrf.mxu0  ;;  %16767 = vst [vmem:[#allocation95_spill] sm:$0xff] %v15839_v23 }
 0x8c4   : > { %16758 = vst [vmem:[#allocation86_spill] sm:$0xff] %v15821_v7  ;;  %v15843_v7 = vpop.f32.mrf.mxu1 }
 0x8c5   : > { %v15825_v11 = vpop.f32.mrf.mxu0  ;;  %16769 = vst [vmem:[#allocation97_spill] sm:$0xff] %v15843_v7 }
 0x8c6   : > { %16760 = vst [vmem:[#allocation88_spill] sm:$0xff] %v15825_v11  ;;  %v15847_v11 = vpop.f32.mrf.mxu1 }
 0x8c7   : > { %v15829_v50 = vpop.f32.mrf.mxu0 }
 0x8c8   : > { %16762 = vst [vmem:[#allocation90_spill] sm:$0xff] %v15829_v50  ;;  %v15851_v50 = vpop.f32.mrf.mxu1 }
 0x8c9   : > { %v15833_v25 = vpop.f32.mrf.mxu0  ;;  %16772 = vst [vmem:[#allocation100_spill] sm:$0xff] %v15851_v50 }
 0x8ca   : > { %16764 = vst [vmem:[#allocation92_spill] sm:$0xff] %v15833_v25  ;;  %v15855_v25 = vpop.f32.mrf.mxu1 }
 0x8cb   : > { %v15837_v60 = vpop.f32.mrf.mxu0  ;;  %16774 = vst [vmem:[#allocation102_spill] sm:$0xff] %v15855_v25  ;;  %v9376_v25 = vadd.f32 %v15418_v43, %v15626_v34 }
 0x8cc   : > { %16766 = vst [vmem:[#allocation94_spill] sm:$0xff] %v15837_v60  ;;  %v15859_v60 = vpop.f32.mrf.mxu1 }
 0x8cd   : > { %v15841_v1 = vpop.f32.mrf.mxu0  ;;  %16775 = vst [vmem:[#allocation103_spill] sm:$0xff] %v15859_v60  ;;  %v9378_v60 = vadd.f32 %v15421_v6, %v15624_v14  ;;  %v9386_v6 = vadd.f32 %v15430_v10, %v15637_v19 }
 0x8ce   : > { %16768 = vst [vmem:[#allocation96_spill] sm:$0xff] %v15841_v1  ;;  %v15863_v1 = vpop.f32.mrf.mxu1 }
 0x8cf   : > { %v15845_v57 = vpop.f32.mrf.mxu0  ;;  %16777 = vst [vmem:[#allocation105_spill] sm:$0xff] %v15863_v1  ;;  %v9491_v43 = vadd.f32 %v15445_v28, %v9378_v60 }
 0x8d0   : > { %16770 = vst [vmem:[#allocation98_spill] sm:$0xff] %v15845_v57  ;;  %v15867_v57 = vpop.f32.mrf.mxu1 }
 0x8d1   : > { %v15849_v44 = vpop.f32.mrf.mxu0  ;;  %16779 = vst [vmem:[#allocation107_spill] sm:$0xff] %v15867_v57  ;;  %v9380_v57 = vadd.f32 %v15424_v0, %v15624_v14 }
 0x8d2   : > { %16771 = vst [vmem:[#allocation99_spill] sm:$0xff] %v15849_v44  ;;  %v9374_v44 = vadd.f32 %v15414_v30, %v15626_v34  ;;  %v9384_v30 = vadd.f32 %v15427_v35, %v15637_v19  ;;  %v9388_v35 = vadd.f32 %v15433_v39, %v15635_v48  ;;  %v9390_v19 = vadd.f32 %v15438_v38, %v15635_v48 }
 0x8d3   : > { %v15853_v17 = vpop.f32.mrf.mxu0 }
 0x8d4   : > { %16773 = vst [vmem:[#allocation101_spill] sm:$0xff] %v15853_v17  ;;  %v15875_v17 = vpop.f32.mrf.mxu1  ;;  %v9497_v14 = vadd.f32 %v15455_v29, %v9384_v30  ;;  %v9501_v60 = vadd.f32 %v15471_v20, %v9388_v35  ;;  %v16782_v30 = vld [vmem:[#allocation27_spill] sm:$0xff] }
 0x8d5   : > { %v15857_v63 = vpop.f32.mrf.mxu0 }
 0x8d7   : > { %v15861_v23 = vpop.f32.mrf.mxu0 }
 0x8d8   : > { %16776 = vst [vmem:[#allocation104_spill] sm:$0xff] %v15861_v23  ;;  %v9487_v23 = vadd.f32 %v15435_v52, %v9374_v44 }
 0x8d9   : > { %v15865_v7 = vpop.f32.mrf.mxu0 }
 0x8da   : > { %16778 = vst [vmem:[#allocation106_spill] sm:$0xff] %v15865_v7  ;;  %v9489_v7 = vadd.f32 %v15440_v40, %v9376_v25  ;;  %v9600_v34 = vadd.f32 %v15542_v51, %v9487_v23  ;;  %v9604_v25 = vadd.f32 %v15551_v12, %v9491_v43  ;;  %v9394_v12 = vadd.f32 %v15443_v56, %v15653_v16  ;;  %v16784_v43 = vld [vmem:[#allocation38_spill] sm:$0xff] }
 0x8db   : > { %v15871_v50 = vpop.f32.mrf.mxu0 }
 0x8dc   : > { %16780 = vst [vmem:[#allocation108_spill] sm:$0xff] %v15871_v50  ;;  %v15887_v50 = vpop.f32.mrf.mxu1  ;;  %v9713_v0 = vadd.f32 %v15753_v47, %v9600_v34  ;;  %v9602_v40 = vadd.f32 %v15547_v54, %v9489_v7  ;;  %v9717_v7 = vadd.f32 %v15759_v2, %v9604_v25  ;;  %v9610_v47 = vadd.f32 %v15559_v49, %v9497_v14  ;;  %v16787_v14 = vld [vmem:[#allocation30_spill] sm:$0xff]  ;;  %v16788_v25 = vld [vmem:[#allocation37_spill] sm:$0xff] }
 0x8dd   : > { %v15880_v1 = vpop.f32.mrf.mxu0 }
 0x8de   : > { %16781 = vst [vmem:[#allocation109_spill] sm:$0xff] %v15880_v1  ;;  %v9493_v1 = vadd.f32 %v15450_v45, %v9380_v57  ;;  %v9715_v51 = vadd.f32 %v15755_v15, %v9602_v40  ;;  %v9826_v10 = vadd.f32 %v15757_v42, %v9713_v0  ;;  %v9499_v45 = vadd.f32 %v15463_v27, %v9386_v6  ;;  %v16785_v40 = vld [vmem:[#allocation23_spill] sm:$0xff] }
 0x8df   : > { %v15893_v52 = vpop.f32.mrf.mxu0  ;;  %v9830_v15 = vadd.f32 %v15765_v13, %v9717_v7  ;;  %v9723_v20 = vadd.f32 %v15767_v22, %v9610_v47  ;;  %v16786_v13 = vld [vmem:[#allocation73_spill] sm:$0xff] }
 0x8e0   : > { %v9606_v39 = vadd.f32 %v15556_v8, %v9493_v1  ;;  %v9828_v29 = vadd.f32 %v15761_v58, %v9715_v51  ;;  %v9503_v8 = vadd.f32 %v16782_v30, %v9390_v19  ;;  %v16783_v1 = vld [vmem:[#allocation50_spill] sm:$0xff]  ;;  %v9612_v34 = vadd.f32 %v16784_v43, %v9499_v45 }
 0x8e1   : > { %v15907_v57 = vpop.f32.mrf.mxu0  ;;  %v9396_v58 = vadd.f32 %v16783_v1, %v15653_v16  ;;  %v9398_v35 = vadd.f32 %v16786_v13, %v16785_v40  ;;  %v9614_v16 = vadd.f32 %v16788_v25, %v9501_v60  ;;  %v9836_v19 = vadd.f32 %v15773_v4, %v9723_v20  ;;  %v16793_v30 = vld [vmem:[#allocation18_spill] sm:$0xff]  ;;  %v16794_v1 = vld [vmem:[#allocation28_spill] sm:$0xff] }
 0x8e2   : > { %v9719_v27 = vadd.f32 %v15763_v55, %v9606_v39  ;;  %v9725_v51 = vadd.f32 %v15771_v24, %v9612_v34  ;;  %v9404_v20 = vadd.f32 %v16794_v1, %v16793_v30 }
 0x8e3   : > { %v9727_v47 = vadd.f32 %v15775_v62, %v9614_v16 }
 0x8e4   : > { %v9832_v49 = vadd.f32 %v15769_v18, %v9719_v27  ;;  %v16789_v18 = vld [vmem:[#allocation75_spill] sm:$0xff]  ;;  %v9838_v60 = vadd.f32 %v15777_v5, %v9725_v51 }
 0x930   : > { %v9938_v44 = vpop.f32.mrf.mxu1 }
 0x931   : > { %v9939_v23 = vadd.f32 %v9938_v44, %v9826_v10 }
 0x932   : > { %v9940_v28 = vpop.f32.mrf.mxu1 }
 0x933   : > { %v9941_v42 = vadd.f32 %v9940_v28, %v9828_v29  ;;  %v9507_v28 = vadd.f32 %v16787_v14, %v9394_v12  ;;  %v16790_v29 = vld [vmem:[#allocation62_spill] sm:$0xff]  ;;  %v16791_v12 = vld [vmem:[#allocation36_spill] sm:$0xff] }
 0x934   : > { %v9942_v54 = vpop.f32.mrf.mxu1 }
 0x935   : > { %v9943_v44 = vadd.f32 %v9942_v54, %v9830_v15  ;;  %v9400_v54 = vadd.f32 %v16789_v18, %v16785_v40  ;;  %v16802_v18 = vld [vmem:[#allocation46_spill] sm:$0xff] }
 0x936   : > { %v9944_v38 = vpop.f32.mrf.mxu1  ;;  %v10051_v48 = vpop.f32.mrf.mxu0 }
 0x937   : > { %v10052_v2 = vadd.f32 %v10051_v48, %v9939_v23  ;;  %v9945_v45 = vadd.f32 %v9944_v38, %v9832_v49  ;;  %v9509_v23 = vadd.f32 %v16790_v29, %v9396_v58  ;;  %v9616_v48 = vadd.f32 %v16791_v12, %v9503_v8  ;;  %v16792_v38 = vld [vmem:[#allocation70_spill] sm:$0xff]  ;;  %v16795_v58 = vld [vmem:[#allocation48_spill] sm:$0xff] }
 0x938   : > { %v9948_v56 = vpop.f32.mrf.mxu1  ;;  %v10053_v6 = vpop.f32.mrf.mxu0  ;;  %v9620_v34 = vadd.f32 %v16795_v58, %v9507_v28  ;;  %v9840_v8 = vadd.f32 %v15781_v53, %v9727_v47  ;;  %v16807_v58 = vld [vmem:[#allocation22_spill] sm:$0xff] }
 0x939   : > { %v10130_v0 = vmax.f32 %v10052_v2, 0.0  ;;  %v10054_v55 = vadd.f32 %v10053_v6, %v9941_v42  ;;  %v9949_v15 = vadd.f32 %v9948_v56, %v9836_v19  ;;  %v9511_v2 = vadd.f32 %v16792_v38, %v9398_v35  ;;  %v16796_v56 = vld [vmem:[#allocation69_spill] sm:$0xff]  ;;  %v16798_v35 = vld [vmem:[#allocation52_spill] sm:$0xff] }
 0x93a   : > { %v9950_v10 = vpop.f32.mrf.mxu1  ;;  %v10055_v22 = vpop.f32.mrf.mxu0  ;;  %v9729_v43 = vadd.f32 %v15779_v9, %v9616_v48  ;;  %v9733_v13 = vadd.f32 %v15783_v36, %v9620_v34  ;;  %v9622_v14 = vadd.f32 %v16798_v35, %v9509_v23  ;;  %v16803_v48 = vld [vmem:[#allocation33_spill] sm:$0xff]  ;;  %v16808_v34 = vld [vmem:[#allocation74_spill] sm:$0xff] }
 0x93b   : > { %v10131_v7 = vmax.f32 %v10054_v55, 0.0  ;;  %v10056_v39 = vadd.f32 %v10055_v22, %v9943_v44  ;;  %10162 = vxpose.xlu1.b32.start [1/16] %v10130_v0, 128  ;;  %v9951_v49 = vadd.f32 %v9950_v10, %v9838_v60  ;;  %v9513_v0 = vadd.f32 %v16796_v56, %v9400_v54  ;;  %v16797_v55 = vld [vmem:[#allocation29_spill] sm:$0xff]  ;;  %v16799_v10 = vld [vmem:[#allocation60_spill] sm:$0xff] }
 0x93c   : > { %v9952_v24 = vpop.f32.mrf.mxu1  ;;  %v10057_v27 = vpop.f32.mrf.mxu0  ;;  %v9406_v40 = vadd.f32 %v16797_v55, %v16793_v30  ;;  %v9842_v28 = vadd.f32 %v15785_v59, %v9729_v43  ;;  %v16800_v22 = vld [vmem:[#allocation32_spill] sm:$0xff]  ;;  %v9624_v54 = vadd.f32 %v16802_v18, %v9511_v2  ;;  %v9846_v23 = vadd.f32 %v15789_v46, %v9733_v13  ;;  %v16810_v55 = vld [vmem:[#allocation71_spill] sm:$0xff]  ;;  %v16811_v13 = vld [vmem:[#allocation26_spill] sm:$0xff] }
 0x93d   : > { %v10132_v42 = vmax.f32 %v10056_v39, 0.0  ;;  %v10058_v4 = vadd.f32 %v10057_v27, %v9945_v45  ;;  %10194 = vxpose.xlu0.b32.start [1/16] %v10131_v7, 128  ;;  %v9953_v25 = vadd.f32 %v9952_v24, %v9840_v8  ;;  %v9408_v19 = vadd.f32 %v16800_v22, %v16799_v10  ;;  %v16801_v45 = vld [vmem:[#allocation20_spill] sm:$0xff]  ;;  %v16814_v22 = vld [vmem:[#allocation31_spill] sm:$0xff] }
 0x93e   : > { %v9954_v62 = vpop.f32.mrf.mxu1  ;;  %v10061_v6 = vpop.f32.mrf.mxu0  ;;  %v9517_v7 = vadd.f32 %v16801_v45, %v9404_v20  ;;  %v9735_v39 = vadd.f32 %v15787_v3, %v9622_v14  ;;  %v9410_v24 = vadd.f32 %v16803_v48, %v16799_v10  ;;  %v16804_v27 = vld [vmem:[#allocation76_spill] sm:$0xff]  ;;  %v16806_v20 = vld [vmem:[#allocation35_spill] sm:$0xff]  ;;  %v9416_v35 = vadd.f32 %v16811_v13, %v16807_v58  ;;  %v16813_v10 = vld [vmem:[#allocation58_spill] sm:$0xff] }
 0x93f   : > { %v10133_v44 = vmax.f32 %v10058_v4, 0.0  ;;  %v10062_v5 = vadd.f32 %v10061_v6, %v9949_v15  ;;  %10163 = vxpose.xlu1.b32.cont [2/16] %v10132_v42, 128  ;;  %v9955_v47 = vadd.f32 %v9954_v62, %v9842_v28  ;;  %v9519_v60 = vadd.f32 %v16804_v27, %v9406_v40  ;;  %v16805_v42 = vld [vmem:[#allocation53_spill] sm:$0xff]  ;;  %v16809_v8 = vld [vmem:[#allocation56_spill] sm:$0xff]  ;;  %v16816_v18 = vld [vmem:[#allocation39_spill] sm:$0xff] }
 0x940   : > { %v9958_v9 = vpop.f32.mrf.mxu1  ;;  %v10063_v51 = vpop.f32.mrf.mxu0  ;;  %v9737_v15 = vadd.f32 %v15791_v61, %v9624_v54  ;;  %v9626_v4 = vadd.f32 %v16805_v42, %v9513_v0  ;;  %v9848_v2 = vadd.f32 %v15793_v41, %v9735_v39  ;;  %v9521_v43 = vadd.f32 %v16806_v20, %v9408_v19  ;;  %v16815_v45 = vld [vmem:[#allocation72_spill] sm:$0xff]  ;;  %v16818_v48 = vld [vmem:[#allocation34_spill] sm:$0xff]  ;;  %v16819_v27 = vld [vmem:[#allocation79_spill] sm:$0xff] }
 0x941   : > { %v10134_v16 = vmax.f32 %v10062_v5, 0.0  ;;  %v10064_v53 = vadd.f32 %v10063_v51, %v9951_v49  ;;  %10195 = vxpose.xlu0.b32.cont [2/16] %v10133_v44, 128  ;;  %v9959_v30 = vadd.f32 %v9958_v9, %v9846_v23  ;;  %v9414_v62 = vadd.f32 %v16808_v34, %v16807_v58  ;;  %v16812_v9 = vld [vmem:[#allocation43_spill] sm:$0xff]  ;;  %v16825_v34 = vld [vmem:[#allocation81_spill] sm:$0xff] }
 0x942   : > { %v9960_v36 = vpop.f32.mrf.mxu1  ;;  %v10065_v29 = vpop.f32.mrf.mxu0  ;;  %v9739_v6 = vadd.f32 %v15795_v26, %v9626_v4  ;;  %v9630_v49 = vadd.f32 %v16809_v8, %v9517_v7  ;;  %v9850_v5 = vadd.f32 %v15797_v32, %v9737_v15  ;;  %v9523_v40 = vadd.f32 %v16810_v55, %v9410_v24  ;;  %v16820_v15 = vld [vmem:[#allocation47_spill] sm:$0xff]  ;;  %v16828_v55 = vld [vmem:[#allocation44_spill] sm:$0xff] }
 0x943   : > { %v10135_v12 = vmax.f32 %v10064_v53, 0.0  ;;  %v10066_v59 = vadd.f32 %v10065_v29, %v9953_v25  ;;  %10164 = vxpose.xlu1.b32.cont [3/16] %v10134_v16, 128  ;;  %v9961_v56 = vadd.f32 %v9960_v36, %v9848_v2  ;;  %v9632_v51 = vadd.f32 %v16812_v9, %v9519_v60  ;;  %v16823_v20 = vld [vmem:[#allocation63_spill] sm:$0xff] }
 0x944   : > { %v9962_v3 = vpop.f32.mrf.mxu1  ;;  %v10067_v38 = vpop.f32.mrf.mxu0  ;;  %v9743_v14 = vadd.f32 %v15799_v31, %v9630_v49  ;;  %v9852_v25 = vadd.f32 %v15801_v37, %v9739_v6  ;;  %v9418_v19 = vadd.f32 %v16814_v22, %v16813_v10  ;;  %v9527_v7 = vadd.f32 %v16815_v45, %v9414_v62  ;;  %v16826_v6 = vld [vmem:[#allocation41_spill] sm:$0xff]  ;;  %v16829_v13 = vld [vmem:[#allocation59_spill] sm:$0xff] }
 0x945   : > { %v10136_v1 = vmax.f32 %v10066_v59, 0.0  ;;  %v10068_v46 = vadd.f32 %v10067_v38, %v9955_v47  ;;  %10196 = vxpose.xlu0.b32.cont [3/16] %v10135_v12, 128  ;;  %v9963_v16 = vadd.f32 %v9962_v3, %v9850_v5  ;;  %v9745_v39 = vadd.f32 %v15803_v33, %v9632_v51  ;;  %v16817_v12 = vld [vmem:[#allocation49_spill] sm:$0xff]  ;;  %v16821_v3 = vld [vmem:[#allocation80_spill] sm:$0xff]  ;;  %v16831_v51 = vld [vmem:[#allocation51_spill] sm:$0xff] }
 0x946   : > { %v9964_v61 = vpop.f32.mrf.mxu1  ;;  %v10071_v44 = vpop.f32.mrf.mxu0  ;;  %v9634_v54 = vadd.f32 %v16816_v18, %v9521_v43  ;;  %v9856_v29 = vadd.f32 %v15805_v21, %v9743_v14  ;;  %v9420_v59 = vadd.f32 %v16817_v12, %v16813_v10  ;;  %v9529_v24 = vadd.f32 %v16818_v48, %v9416_v35  ;;  %v16824_v43 = vld [vmem:[#allocation45_spill] sm:$0xff]  ;;  %v16830_v14 = vld [vmem:[#allocation83_spill] sm:$0xff]  ;;  %v16835_v18 = vld [vmem:[#allocation42_spill] sm:$0xff] }
 0x947   : > { %v10137_v0 = vmax.f32 %v10068_v46, 0.0  ;;  %v10072_v41 = vadd.f32 %v10071_v44, %v9959_v30  ;;  %10165 = vxpose.xlu1.b32.cont [4/16] %v10136_v1, 128  ;;  %v9965_v23 = vadd.f32 %v9964_v61, %v9852_v25  ;;  %v9636_v42 = vadd.f32 %v16820_v15, %v9523_v40  ;;  %v16822_v1 = vld [vmem:[#allocation40_spill] sm:$0xff]  ;;  %v16827_v44 = vld [vmem:[#allocation82_spill] sm:$0xff] }
 0x948   : > { %v9968_v26 = vpop.f32.mrf.mxu1  ;;  %v10073_v28 = vpop.f32.mrf.mxu0  ;;  %v9747_v60 = vadd.f32 %v16819_v27, %v9634_v54  ;;  %v9858_v38 = vadd.f32 %v16821_v3, %v9745_v39  ;;  %v9531_v46 = vadd.f32 %v16822_v1, %v9418_v19  ;;  %v9424_v58 = vadd.f32 %v16824_v43, %v16823_v20  ;;  %v16833_v19 = vld [vmem:[#allocation55_spill] sm:$0xff] }
 0x949   : > { %v10138_v53 = vmax.f32 %v10072_v41, 0.0  ;;  %v10074_v32 = vadd.f32 %v10073_v28, %v9961_v56  ;;  %10197 = vxpose.xlu0.b32.cont [4/16] %v10137_v0, 128  ;;  %v9969_v2 = vadd.f32 %v9968_v26, %v9856_v29  ;;  %v9749_v62 = vadd.f32 %v16825_v34, %v9636_v42  ;;  %v16836_v29 = vld [vmem:[#allocation86_spill] sm:$0xff] }
 0x94a   : > { %v9970_v31 = vpop.f32.mrf.mxu1  ;;  %v10075_v36 = vpop.f32.mrf.mxu0  ;;  %v9640_v8 = vadd.f32 %v16826_v6, %v9527_v7  ;;  %v9860_v5 = vadd.f32 %v16827_v44, %v9747_v60  ;;  %v9533_v40 = vadd.f32 %v16828_v55, %v9420_v59  ;;  %v9426_v35 = vadd.f32 %v16829_v13, %v16823_v20  ;;  %v16834_v7 = vld [vmem:[#allocation85_spill] sm:$0xff]  ;;  %v16837_v59 = vld [vmem:[#allocation54_spill] sm:$0xff]  ;;  %v16839_v60 = vld [vmem:[#allocation64_spill] sm:$0xff] }
 0x94b   : > { %v10139_v47 = vmax.f32 %v10074_v32, 0.0  ;;  %v10076_v37 = vadd.f32 %v10075_v36, %v9963_v16  ;;  %10166 = vxpose.xlu1.b32.cont [5/16] %v10138_v53, 128  ;;  %v9971_v56 = vadd.f32 %v9970_v31, %v9858_v38  ;;  %v9642_v26 = vadd.f32 %v16831_v51, %v9529_v24  ;;  %v16832_v16 = vld [vmem:[#allocation84_spill] sm:$0xff]  ;;  %v16838_v24 = vld [vmem:[#allocation87_spill] sm:$0xff]  ;;  %v16843_v34 = vld [vmem:[#allocation90_spill] sm:$0xff] }
 0x94c   : > { %v9972_v33 = vpop.f32.mrf.mxu1  ;;  %v10077_v4 = vpop.f32.mrf.mxu0  ;;  %v9753_v9 = vadd.f32 %v16830_v14, %v9640_v8  ;;  %v9862_v53 = vadd.f32 %v16832_v16, %v9749_v62  ;;  %v9537_v45 = vadd.f32 %v16833_v19, %v9424_v58  ;;  %v9644_v54 = vadd.f32 %v16835_v18, %v9531_v46  ;;  %v16842_v46 = vld [vmem:[#allocation65_spill] sm:$0xff]  ;;  %v16846_v55 = vld [vmem:[#allocation92_spill] sm:$0xff]  ;;  %v16850_v19 = vld [vmem:[#allocation95_spill] sm:$0xff] }
 0x94d   : > { %v10140_v30 = vmax.f32 %v10076_v37, 0.0  ;;  %v10078_v21 = vadd.f32 %v10077_v4, %v9965_v23  ;;  %10198 = vxpose.xlu0.b32.cont [5/16] %v10139_v47, 128  ;;  %v9973_v32 = vadd.f32 %v9972_v33, %v9860_v5  ;;  %v9755_v39 = vadd.f32 %v16834_v7, %v9642_v26  ;;  %v16840_v4 = vld [vmem:[#allocation88_spill] sm:$0xff]  ;;  %v16845_v5 = vld [vmem:[#allocation19_spill] sm:$0xff] }
 0x94e   : > { %v9974_v49 = vpop.f32.mrf.mxu1  ;;  %v10081_v61 = vpop.f32.mrf.mxu0  ;;  %v9866_v23 = vadd.f32 %v16836_v29, %v9753_v9  ;;  %v9539_v48 = vadd.f32 %v16837_v59, %v9426_v35  ;;  %v9757_v27 = vadd.f32 %v16838_v24, %v9644_v54  ;;  %v9646_v15 = vadd.f32 %v16839_v60, %v9533_v40  ;;  %v16847_v9 = vld [vmem:[#allocation93_spill] sm:$0xff]  ;;  %v16851_v18 = vld [vmem:[#allocation96_spill] sm:$0xff] }
 0x94f   : > { %v10141_v0 = vmax.f32 %v10078_v21, 0.0  ;;  %v10082_v41 = vadd.f32 %v10081_v61, %v9969_v2  ;;  %10167 = vxpose.xlu1.b32.cont [6/16] %v10140_v30, 128  ;;  %v9975_v47 = vadd.f32 %v9974_v49, %v9862_v53  ;;  %v9868_v3 = vadd.f32 %v16840_v4, %v9755_v39  ;;  %v16841_v21 = vld [vmem:[#allocation89_spill] sm:$0xff]  ;;  %v16844_v61 = vld [vmem:[#allocation91_spill] sm:$0xff] }
 0x950   : > { %v9978_v28 = vpop.f32.mrf.mxu1  ;;  %v10083_v25 = vpop.f32.mrf.mxu0  ;;  %v9759_v1 = vadd.f32 %v16841_v21, %v9646_v15  ;;  %v9650_v20 = vadd.f32 %v16842_v46, %v9537_v45  ;;  %v9870_v62 = vadd.f32 %v16843_v34, %v9757_v27  ;;  %v16857_v46 = vld [vmem:[#allocation57_spill] sm:$0xff] }
 0x951   : > { %v10142_v10 = vmax.f32 %v10082_v41, 0.0  ;;  %v10084_v22 = vadd.f32 %v10083_v25, %v9971_v56  ;;  %10199 = vxpose.xlu0.b32.cont [6/16] %v10141_v0, 128  ;;  %v9979_v38 = vadd.f32 %v9978_v28, %v9866_v23  ;;  %v9652_v56 = vadd.f32 %v16845_v5, %v9539_v48  ;;  %v16848_v25 = vld [vmem:[#allocation94_spill] sm:$0xff]  ;;  %v16852_v23 = vld [vmem:[#allocation21_spill] sm:$0xff] }
 0x952   : > { %v9980_v31 = vpop.f32.mrf.mxu1  ;;  %v10085_v36 = vpop.f32.mrf.mxu0  ;;  %v9763_v44 = vadd.f32 %v16844_v61, %v9650_v20  ;;  %v9872_v40 = vadd.f32 %v16846_v55, %v9759_v1  ;;  %v16854_v48 = vld [vmem:[#allocation98_spill] sm:$0xff]  ;;  %v16858_v20 = vld [vmem:[#allocation100_spill] sm:$0xff] }
 0x953   : > { %v10143_v37 = vmax.f32 %v10084_v22, 0.0  ;;  %v10086_v12 = vadd.f32 %v10085_v36, %v9973_v32  ;;  %10168 = vxpose.xlu1.b32.cont [7/16] %v10142_v10, 128  ;;  %v9981_v6 = vadd.f32 %v9980_v31, %v9868_v3  ;;  %v9765_v51 = vadd.f32 %v16847_v9, %v9652_v56  ;;  %v16849_v22 = vld [vmem:[#allocation61_spill] sm:$0xff] }
 0x954   : > { %v9982_v42 = vpop.f32.mrf.mxu1  ;;  %v10087_v33 = vpop.f32.mrf.mxu0  ;;  %v9876_v16 = vadd.f32 %v16848_v25, %v9763_v44  ;;  %v9767_v45 = vadd.f32 %v16850_v19, %v16849_v22  ;;  %v16861_v44 = vld [vmem:[#allocation102_spill] sm:$0xff]  ;;  %v16866_v22 = vld [vmem:[#allocation105_spill] sm:$0xff] }
 0x955   : > { %v10144_v2 = vmax.f32 %v10086_v12, 0.0  ;;  %v10088_v30 = vadd.f32 %v10087_v33, %v9975_v47  ;;  %10200 = vxpose.xlu0.b32.cont [7/16] %v10143_v37, 128  ;;  %v9983_v13 = vadd.f32 %v9982_v42, %v9870_v62  ;;  %v9878_v54 = vadd.f32 %v16851_v18, %v9765_v51  ;;  %v16853_v47 = vld [vmem:[#allocation97_spill] sm:$0xff] }
 0x956   : > { %v9984_v43 = vpop.f32.mrf.mxu1  ;;  %v10091_v58 = vpop.f32.mrf.mxu0  ;;  %v9769_v37 = vadd.f32 %v16853_v47, %v16852_v23  ;;  %v9880_v24 = vadd.f32 %v16854_v48, %v9767_v45  ;;  %v16855_v42 = vld [vmem:[#allocation77_spill] sm:$0xff] }
 0x957   : > { %v10145_v8 = vmax.f32 %v10088_v30, 0.0  ;;  %v10092_v49 = vadd.f32 %v10091_v58, %v9979_v38  ;;  %10169 = vxpose.xlu1.b32.cont [8/16] %v10144_v2, 128  ;;  %v9985_v53 = vadd.f32 %v9984_v43, %v9872_v40  ;;  %v9773_v33 = vadd.f32 %v15847_v11, %v16855_v42  ;;  %v16856_v38 = vld [vmem:[#allocation99_spill] sm:$0xff]  ;;  %v16859_v62 = vld [vmem:[#allocation101_spill] sm:$0xff] }
 0x958   : > { %v9988_v0 = vpop.f32.mrf.mxu1  ;;  %v10093_v41 = vpop.f32.mrf.mxu0  ;;  %v9882_v2 = vadd.f32 %v16856_v38, %v9769_v37  ;;  %v9775_v43 = vadd.f32 %v16858_v20, %v16857_v46  ;;  %v16860_v11 = vld [vmem:[#allocation25_spill] sm:$0xff] }
 0x959   : > { %v10146_v35 = vmax.f32 %v10092_v49, 0.0  ;;  %v10094_v14 = vadd.f32 %v10093_v41, %v9981_v6  ;;  %10201 = vxpose.xlu0.b32.cont [8/16] %v10145_v8, 128  ;;  %v9989_v31 = vadd.f32 %v9988_v0, %v9876_v16  ;;  %v9886_v6 = vadd.f32 %v16859_v62, %v9773_v33 }
 0x95a   : > { %v9990_v26 = vpop.f32.mrf.mxu1  ;;  %v10095_v28 = vpop.f32.mrf.mxu0  ;;  %v9777_v5 = vadd.f32 %v16861_v44, %v16860_v11  ;;  %v9888_v41 = vadd.f32 %v15857_v63, %v9775_v43 }
 0x95b   : > { %v10147_v32 = vmax.f32 %v10094_v14, 0.0  ;;  %v10096_v10 = vadd.f32 %v10095_v28, %v9983_v13  ;;  %10170 = vxpose.xlu1.b32.cont [9/16] %v10146_v35, 128  ;;  %v9991_v27 = vadd.f32 %v9990_v26, %v9878_v54  ;;  %v16862_v35 = vld [vmem:[#allocation68_spill] sm:$0xff]  ;;  %v16863_v14 = vld [vmem:[#allocation103_spill] sm:$0xff] }
 0x95c   : > { %v9992_v7 = vpop.f32.mrf.mxu1  ;;  %v10097_v39 = vpop.f32.mrf.mxu0  ;;  %v9779_v9 = vadd.f32 %v16863_v14, %v16862_v35  ;;  %v16864_v28 = vld [vmem:[#allocation104_spill] sm:$0xff] }
 0x95d   : > { %v10148_v36 = vmax.f32 %v10096_v10, 0.0  ;;  %v10098_v29 = vadd.f32 %v10097_v39, %v9985_v53  ;;  %10202 = vxpose.xlu0.b32.cont [9/16] %v10147_v32, 128  ;;  %v9993_v30 = vadd.f32 %v9992_v7, %v9880_v24  ;;  %v9890_v25 = vadd.f32 %v16864_v28, %v9777_v5  ;;  %v16865_v10 = vld [vmem:[#allocation66_spill] sm:$0xff]  ;;  %v10277_v35 = vld [vmem:[%s16875_s15 + $0x60] sm:$0xff]  ;;  %v10276_v14 = vld [vmem:[%s16875_s15 + $0x58] sm:$0xff] }
 0x95e   : > { %v9994_v12 = vpop.f32.mrf.mxu1  ;;  %v10101_v59 = vpop.f32.mrf.mxu0  ;;  %v9783_v19 = vadd.f32 %v16866_v22, %v16865_v10  ;;  %v16867_v7 = vld [vmem:[#allocation106_spill] sm:$0xff]  ;;  %v10272_v28 = vld [vmem:[%s16875_s15 + $0x38] sm:$0xff] }
 0x95f   : > { %v10149_v60 = vmax.f32 %v10098_v29, 0.0  ;;  %v10102_v15 = vadd.f32 %v10101_v59, %v9989_v31  ;;  %10171 = vxpose.xlu1.b32.cont [10/16] %v10148_v36, 128  ;;  %v9995_v8 = vadd.f32 %v9994_v12, %v9882_v2  ;;  %v9892_v39 = vadd.f32 %v16867_v7, %v9779_v9  ;;  %v16868_v36 = vld [vmem:[#allocation78_spill] sm:$0xff]  ;;  %v16869_v29 = vld [vmem:[#allocation107_spill] sm:$0xff]  ;;  %v16870_v12 = vld [vmem:[#allocation108_spill] sm:$0xff] }
 0x960   : > { %v9998_v4 = vpop.f32.mrf.mxu1  ;;  %v10103_v3 = vpop.f32.mrf.mxu0  ;;  %v9785_v23 = vadd.f32 %v16869_v29, %v16868_v36  ;;  %v9896_v59 = vadd.f32 %v16870_v12, %v9783_v19  ;;  %v10275_v9 = vld [vmem:[%s16875_s15 + $0x50] sm:$0xff]  ;;  %v10266_v22 = vld [vmem:[%s16875_s15 + $0x8] sm:$0xff]  ;;  %v10265_v19 = vld [vmem:[%s16875_s15] sm:$0xff] }
 0x961   : > { %v10150_v21 = vmax.f32 %v10102_v15, 0.0  ;;  %v10104_v1 = vadd.f32 %v10103_v3, %v9991_v27  ;;  %10203 = vxpose.xlu0.b32.cont [10/16] %v10149_v60, 128  ;;  %v9999_v55 = vadd.f32 %v9998_v4, %v9886_v6  ;;  %v16871_v60 = vld [vmem:[#allocation24_spill] sm:$0xff]  ;;  %v16872_v4 = vld [vmem:[#allocation109_spill] sm:$0xff]  ;;  %v10267_v10 = vld [vmem:[%s16875_s15 + $0x10] sm:$0xff] }
 0x962   : > { %v10000_v58 = vpop.f32.mrf.mxu1  ;;  %v10105_v34 = vpop.f32.mrf.mxu0  ;;  %v9787_v15 = vadd.f32 %v15875_v17, %v16871_v60  ;;  %v9898_v3 = vadd.f32 %v16872_v4, %v9785_v23 }
 0x963   : > { %v10151_v49 = vmax.f32 %v10104_v1, 0.0  ;;  %v10106_v61 = vadd.f32 %v10105_v34, %v9993_v30  ;;  %10172 = vxpose.xlu1.b32.cont [11/16] %v10150_v21, 128  ;;  %v10001_v16 = vadd.f32 %v10000_v58, %v9888_v41  ;;  %v16873_v21 = vld [vmem:[#allocation67_spill] sm:$0xff] }
 0x964   : > { %v10002_v56 = vpop.f32.mrf.mxu1  ;;  %v10107_v0 = vpop.f32.mrf.mxu0  ;;  %v9789_v1 = vadd.f32 %v15887_v50, %v16873_v21  ;;  %v9900_v20 = vadd.f32 %v15893_v52, %v9787_v15 }
 0x965   : > { %v10152_v40 = vmax.f32 %v10106_v61, 0.0  ;;  %v10108_v13 = vadd.f32 %v10107_v0, %v9995_v8  ;;  %10204 = vxpose.xlu0.b32.cont [11/16] %v10151_v49, 128  ;;  %v10003_v18 = vadd.f32 %v10002_v56, %v9890_v25  ;;  %v10271_v25 = vld [vmem:[%s16875_s15 + $0x30] sm:$0xff] }
 0x966   : > { %v10004_v51 = vpop.f32.mrf.mxu1  ;;  %v10111_v26 = vpop.f32.mrf.mxu0  ;;  %v9902_v6 = vadd.f32 %v15907_v57, %v9789_v1  ;;  %v10280_v57 = vld [vmem:[%s16874_s30 + $0x78] sm:$0xff] }
 0x967   : > { %v10153_v53 = vmax.f32 %v10108_v13, 0.0  ;;  %v10112_v32 = vadd.f32 %v10111_v26, %v9999_v55  ;;  %10173 = vxpose.xlu1.b32.cont [12/16] %v10152_v40, 128  ;;  %v10005_v48 = vadd.f32 %v10004_v51, %v9892_v39  ;;  %10960 = vmatpush3.msra.mxu1 %v10280_v57  ;;  %v16876_v55 = vmov 0.0   ;;  %v10279_v40 = vld [vmem:[%s16875_s15 + $0x70] sm:$0xff]  ;;  %v10278_v13 = vld [vmem:[%s16875_s15 + $0x68] sm:$0xff]  ;;  %v10273_v26 = vld [vmem:[%s16875_s15 + $0x40] sm:$0xff] }
 0x968   : > { %v10008_v45 = vpop.f32.mrf.mxu1  ;;  %v10113_v63 = vpop.f32.mrf.mxu0  ;;  %10961 = vmatprep.subr.mxu1 %v16876_v55  ;;  %v10274_v51 = vld [vmem:[%s16875_s15 + $0x48] sm:$0xff]  ;;  %10991 = vmatprep.mubr.msk.f32.mxu1 %vm11608_vm9, %v16876_v55 }
 0x969   : > { %v10154_v54 = vmax.f32 %v10112_v32, 0.0  ;;  %v10114_v31 = vadd.f32 %v10113_v63, %v10001_v16  ;;  %10205 = vxpose.xlu0.b32.cont [12/16] %v10153_v53, 128  ;;  %v10009_v38 = vadd.f32 %v10008_v45, %v9896_v59  ;;  %10962 = vmatpush3.msra.mxu1 %v10279_v40  ;;  %v10270_v16 = vld [vmem:[%s16875_s15 + $0x28] sm:$0xff]  ;;  %v10269_v53 = vld [vmem:[%s16875_s15 + $0x20] sm:$0xff]  ;;  %v10268_v32 = vld [vmem:[%s16875_s15 + $0x18] sm:$0xff] }
 0x96a   : > { %v10010_v47 = vpop.f32.mrf.mxu1  ;;  %v10115_v37 = vpop.f32.mrf.mxu0  ;;  %10963 = vmatprep.subr.mxu1 %v16876_v55 }
 0x96b   : > { %v10155_v24 = vmax.f32 %v10114_v31, 0.0  ;;  %v10116_v27 = vadd.f32 %v10115_v37, %v10003_v18  ;;  %10174 = vxpose.xlu1.b32.cont [13/16] %v10154_v54, 128  ;;  %v10011_v43 = vadd.f32 %v10010_v47, %v9898_v3  ;;  %10964 = vmatpush3.msra.mxu1 %v10278_v13 }
 0x96c   : > { %v10012_v42 = vpop.f32.mrf.mxu1  ;;  %v10117_v33 = vpop.f32.mrf.mxu0  ;;  %10965 = vmatprep.subr.mxu1 %v16876_v55 }
 0x96d   : > { %v10156_v2 = vmax.f32 %v10116_v27, 0.0  ;;  %v10118_v30 = vadd.f32 %v10117_v33, %v10005_v48  ;;  %10206 = vxpose.xlu0.b32.cont [13/16] %v10155_v24, 128  ;;  %v10013_v8 = vadd.f32 %v10012_v42, %v9900_v20  ;;  %10966 = vmatpush3.msra.mxu1 %v10277_v35 }
 0x96e   : > { %v10121_v46 = vpop.f32.mrf.mxu0  ;;  %v10014_v62 = vpop.f32.mrf.mxu1  ;;  %10967 = vmatprep.subr.mxu1 %v16876_v55 }
 0x96f   : > { %v10157_v58 = vmax.f32 %v10118_v30, 0.0  ;;  %v10122_v34 = vadd.f32 %v10121_v46, %v10009_v38  ;;  %10175 = vxpose.xlu1.b32.cont [14/16] %v10156_v2, 128  ;;  %v10015_v44 = vadd.f32 %v10014_v62, %v9902_v6  ;;  %10968 = vmatpush3.msra.mxu1 %v10276_v14 }
 0x970   : > { %v10123_v17 = vpop.f32.mrf.mxu0  ;;  %10969 = vmatprep.subr.mxu1 %v16876_v55 }
 0x971   : > { %v10158_v49 = vmax.f32 %v10122_v34, 0.0  ;;  %v10124_v61 = vadd.f32 %v10123_v17, %v10011_v43  ;;  %10207 = vxpose.xlu0.b32.cont [14/16] %v10157_v58, 128  ;;  %10970 = vmatpush3.msra.mxu1 %v10275_v9 }
 0x972   : > { %v10125_v11 = vpop.f32.mrf.mxu0  ;;  %10971 = vmatprep.subr.mxu1 %v16876_v55 }
 0x973   : > { %v10159_v5 = vmax.f32 %v10124_v61, 0.0  ;;  %v10126_v56 = vadd.f32 %v10125_v11, %v10013_v8  ;;  %10176 = vxpose.xlu1.b32.cont [15/16] %v10158_v49, 128  ;;  %10972 = vmatpush3.msra.mxu1 %v10274_v51 }
 0x974   : > { %v10127_v50 = vpop.f32.mrf.mxu0  ;;  %10973 = vmatprep.subr.mxu1 %v16876_v55 }
 0x975   : > { %v10160_v0 = vmax.f32 %v10126_v56, 0.0  ;;  %v10128_v52 = vadd.f32 %v10127_v50, %v10015_v44  ;;  %10208 = vxpose.xlu0.b32.cont [15/16] %v10159_v5, 128  ;;  %10974 = vmatpush3.msra.mxu1 %v10273_v26 }
 0x976   : > { %10975 = vmatprep.subr.mxu1 %v16876_v55 }
 0x977   : > { %v10161_v41 = vmax.f32 %v10128_v52, 0.0  ;;  %10177 = vxpose.xlu1.b32.end [16/16] %v10160_v0, 128  ;;  %10976 = vmatpush3.msra.mxu1 %v10272_v28 }
 0x978   : > { %10977 = vmatprep.subr.mxu1 %v16876_v55 }
 0x979   : > { %10209 = vxpose.xlu0.b32.end [16/16] %v10161_v41, 128  ;;  %10978 = vmatpush3.msra.mxu1 %v10271_v25 }
 0x97a   : > { %10979 = vmatprep.subr.mxu1 %v16876_v55 }
 0x97b   : > { %10980 = vmatpush3.msra.mxu1 %v10270_v16 }
 0x97c   : > { %10981 = vmatprep.subr.mxu1 %v16876_v55 }
 0x97d   : > { %10982 = vmatpush3.msra.mxu1 %v10269_v53 }
 0x97e   : > { %10983 = vmatprep.subr.mxu1 %v16876_v55 }
 0x97f   : > { %10984 = vmatpush3.msra.mxu1 %v10268_v32 }
 0x980   : > { %10985 = vmatprep.subr.mxu1 %v16876_v55 }
 0x981   : > { %10986 = vmatpush3.msra.mxu1 %v10267_v10 }
 0x982   : > { %10987 = vmatprep.subr.mxu1 %v16876_v55 }
 0x983   : > { %10988 = vmatpush3.msra.mxu1 %v10266_v22 }
 0x984   : > { %10989 = vmatprep.subr.mxu1 %v16876_v55 }
 0x985   : > { %10990 = vmatpush3.msra.mxu1 %v10265_v19 }
 0x9b7   : > { %v10178_v45 = vpop.trf.xlu1 }
 0x9b9   : > { %v10210_v63 = vpop.trf.xlu0 }
 0x9bb   : > { %v10179_v7 = vpop.trf.xlu1 }
 0x9bc   : > { %v10226_v24 = vadd.f32 %v10179_v7, %v10178_v45 }
 0x9bd   : > { %v10211_v39 = vpop.trf.xlu0 }
 0x9bf   : > { %v10180_v18 = vpop.trf.xlu1 }
 0x9c0   : > { %v10227_v27 = vadd.f32 %v10226_v24, %v10180_v18 }
 0x9c1   : > { %v10212_v31 = vpop.trf.xlu0 }
 0x9c3   : > { %v10181_v54 = vpop.trf.xlu1 }
 0x9c4   : > { %v10228_v42 = vadd.f32 %v10227_v27, %v10181_v54 }
 0x9c5   : > { %v10213_v29 = vpop.trf.xlu0 }
 0x9c7   : > { %v10182_v36 = vpop.trf.xlu1 }
 0x9c8   : > { %v10229_v33 = vadd.f32 %v10228_v42, %v10182_v36 }
 0x9c9   : > { %v10214_v37 = vpop.trf.xlu0 }
 0x9cb   : > { %v10183_v23 = vpop.trf.xlu1 }
 0x9cc   : > { %v10230_v3 = vadd.f32 %v10229_v33, %v10183_v23 }
 0x9cd   : > { %v10215_v59 = vpop.trf.xlu0 }
 0x9cf   : > { %v10184_v47 = vpop.trf.xlu1 }
 0x9d0   : > { %v10231_v2 = vadd.f32 %v10230_v3, %v10184_v47 }
 0x9d1   : > { %v10216_v15 = vpop.trf.xlu0 }
 0x9d3   : > { %v10185_v12 = vpop.trf.xlu1 }
 0x9d4   : > { %v10232_v21 = vadd.f32 %v10231_v2, %v10185_v12 }
 0x9d5   : > { %v10217_v38 = vpop.trf.xlu0 }
 0x9d7   : > { %v10186_v48 = vpop.trf.xlu1 }
 0x9d8   : > { %v10233_v1 = vadd.f32 %v10232_v21, %v10186_v48 }
 0x9d9   : > { %v10218_v20 = vpop.trf.xlu0 }
 0x9db   : > { %v10187_v60 = vpop.trf.xlu1 }
 0x9dc   : > { %v10234_v43 = vadd.f32 %v10233_v1, %v10187_v60 }
 0x9dd   : > { %v10219_v17 = vpop.trf.xlu0 }
 0x9df   : > { %v10188_v4 = vpop.trf.xlu1 }
 0x9e0   : > { %v10235_v58 = vadd.f32 %v10234_v43, %v10188_v4 }
 0x9e1   : > { %v10220_v44 = vpop.trf.xlu0 }
 0x9e3   : > { %v10189_v30 = vpop.trf.xlu1 }
 0x9e4   : > { %v10236_v62 = vadd.f32 %v10235_v58, %v10189_v30 }
 0x9e5   : > { %v10221_v0 = vpop.trf.xlu0 }
 0x9e7   : > { %v10190_v46 = vpop.trf.xlu1 }
 0x9e8   : > { %v10237_v6 = vadd.f32 %v10236_v62, %v10190_v46 }
 0x9e9   : > { %v10222_v55 = vpop.trf.xlu0 }
 0x9eb   : > { %v10191_v34 = vpop.trf.xlu1 }
 0x9ec   : > { %v10238_v49 = vadd.f32 %v10237_v6, %v10191_v34 }
 0x9ed   : > { %v10223_v14 = vpop.trf.xlu0 }
 0x9ef   : > { %v10192_v8 = vpop.trf.xlu1 }
 0x9f0   : > { %v10239_v61 = vadd.f32 %v10238_v49, %v10192_v8 }
 0x9f1   : > { %v10224_v28 = vpop.trf.xlu0 }
 0x9f3   : > { %v10193_v11 = vpop.trf.xlu1 }
 0x9f4   : > { %v10240_v5 = vadd.f32 %v10239_v61, %v10193_v11 }
 0x9f5   : > { %v10225_v32 = vpop.trf.xlu0 }
 0x9f6   : > { %v10241_v56 = vadd.f32 %v10240_v5, %v10210_v63 }
 0x9f8   : > { %v10242_v50 = vadd.f32 %v10241_v56, %v10211_v39 }
 0x9fa   : > { %v10243_v52 = vadd.f32 %v10242_v50, %v10212_v31  ;;  %v10281_v31 = vld [vmem:[%s16880_s12] sm:$0x1] }
 0x9fc   : > { %v10244_v41 = vadd.f32 %v10243_v52, %v10213_v29 }
 0x9fe   : > { %v10245_v57 = vadd.f32 %v10244_v41, %v10214_v37 }
 0xa00   : > { %v10246_v40 = vadd.f32 %v10245_v57, %v10215_v59 }
 0xa02   : > { %v10247_v13 = vadd.f32 %v10246_v40, %v10216_v15 }
 0xa04   : > { %v10248_v35 = vadd.f32 %v10247_v13, %v10217_v38 }
 0xa06   : > { %v10249_v9 = vadd.f32 %v10248_v35, %v10218_v20 }
 0xa08   : > { %v10250_v51 = vadd.f32 %v10249_v9, %v10219_v17 }
 0xa0a   : > { %v10251_v26 = vadd.f32 %v10250_v51, %v10220_v44 }
 0xa0c   : > { %v10252_v25 = vadd.f32 %v10251_v26, %v10221_v0 }
 0xa0e   : > { %v10253_v16 = vadd.f32 %v10252_v25, %v10222_v55 }
 0xa10   : > { %v10254_v53 = vadd.f32 %v10253_v16, %v10223_v14 }
 0xa12   : > { %v10255_v10 = vadd.f32 %v10254_v53, %v10224_v28 }
 0xa14   : > { %v10256_v22 = vadd.f32 %v10255_v10, %v10225_v32 }
 0xa16   : > { %v10257_v19 = vrot.slane %v10256_v22, 4 }
 0xa18   : > { %v10258_v45 = vadd.f32 %v10257_v19, %v10256_v22 }
 0xa1a   : > { %v10259_v63 = vrot.slane %v10258_v45, 2 }
 0xa1c   : > { %v10260_v7 = vadd.f32 %v10259_v63, %v10258_v45 }
 0xa1e   : > { %v10261_v39 = vrot.slane %v10260_v7, 1 }
 0xa20   : > { %v10262_v18 = vadd.f32 %v10261_v39, %v10260_v7 }
 0xa22   : > { %v10264_v54 = vmul.f32 0.00390625, %v10262_v18 }
 0xa24   : > { %10992 = vmatmul.mubr.f32.vlgmr.msra.gmra.mxu1 %v10264_v54 }
 0xae4   : > { %v10348_v36 = vpop.f32.mrf.mxu1 }
 0xae5   : > { %v10349_v29 = vadd.f32 %v10348_v36, %v10281_v31 }
 0xae6   : > { %v10993_v23 = vpop.f32.mrf.mxu1 }
 0xae7   : > { %v10352_v47 = vmax.f32 %v10349_v29, 0.0 }
 0xae9   : > { %10353 = vst [vmem:[%s324_s28] sm:$0x1] %v10352_v47 }
 0xaea   : > { %11532 = shalt.err (!%p11529_p3)
}
 0xaeb   : > { %s11533_s8 = scalar_lea.hbm %s10365_s23, 16  ;;  %s11537_s10 = scalar_lea.hbm %s16881_s21, 32 }
 0xaec   : > { %p11534_p4 = scmp.ne.s32.totalorder %s10365_s23, %s11533_s8  ;;  %p11538_p9 = scmp.lt.s32.totalorder %s10365_s23, %s16881_s21 }
 0xaed   : > { %p11539_p10 = scmp.lt.s32.totalorder %s11537_s10, %s11533_s8 }
 0xaee   : > { %p11535_p7 = pnand %p11534_p4, %p11698_p5 }
 0xaef   : > { %p11540_p11 = por %p11539_p10, %p11538_p9 }
 0xaf0   : > { %p11536_p8 = pneg %p11535_p7 }
 0xaf2   : > { %p11541_p12 = pnand %p11540_p11, %p11536_p8 }
 0xaf4   : > { %11544 = shalt.err (!%p11541_p12)
}
 0xaf5   : > { %10994 = dma.vmem_to_hbm [thread:$0]  (%p11698_p5), %s10368_s16, 16, %s10365_s23, %s10355_s24  }
 0xaf6 PF: > { %s16882_s13 = sld [smem:[#allocation12_spill]] }
 0xaf7   : > { %s16883_s6 = sld [smem:[#allocation9_spill]] }
 0xafc   : > { %p11000_p13 = scmp.ge.s32.totalorder %s16882_s13, 2 }
 0xafd   : > { %s10379_s4 = sand.u32 1, %s16883_s6  }
 0xafe   : > { %p10997_p0 = pnand %p11000_p13, %p11702_p6  ;;  %s10380_s0 = scalar_lea.sflag [#allocation7], %s10379_s4 }
 0xb00   : > { %p10998_p1 = pneg %p10997_p0 }
 0xb02   : > { %11562 = dma.done.wait (%p10998_p1), %s10380_s0, 16  }
 0xb03   : > { %11564 = vsyncadd (%p10998_p1), %s10380_s0, 4294967280  ;;  %s16885_s12 = sld [smem:[#allocation14_spill]] }
 0xb04   : > { %s16886_s30 = sld [smem:[#allocation10_spill]] }
 0xb05   : > { %s16887_s10 = sld [smem:[#allocation11_spill]] }
 0xb06   : > { %s16888_s11 = sld [smem:[#allocation15_spill]] }
 0xb09   : > { %p19_p2 = scmp.ge.s32.totalorder %s16885_s12, 4  }
 0xb0b   :  { %21 = sbr.rel (!%p19_p2) target bundleno = 12 (0xc), region = 91 }
 0xb10   :  { %10384 = vsyncpa [#allocation7], 1 }
 0xb11   :  { %10386 = vsyncpa [#allocation7 + $0x1], 1 }

</bundles_post_ra>
